<compile_context>
chip_gen: v7x
topology: tpu7x:2x2x1
jax: 0.10.0
libtpu: 0.0.40
codegen_flags: <defaults>
</compile_context>

<pallas_src>
import functools

import jax
import jax.numpy as jnp
from jax import lax
from jax.experimental import pallas as pl
from jax.experimental.pallas import tpu as pltpu


# -----------------------------------------------------------------------------
# bilinear interpolation matrix, F.interpolate(mode='bilinear', align_corners=True)
# -----------------------------------------------------------------------------
def _bilinear_matrix(in_size, out_size):
    """(out, in) interpolation matrix (rows have <= 2 non-zeros, each row sums to 1)."""
    if in_size == out_size:
        return jnp.eye(out_size, dtype=jnp.float32)
    if out_size == 1 or in_size == 1:
        pos = jnp.zeros((out_size,), jnp.float32)
    else:
        pos = jnp.arange(out_size, dtype=jnp.float32) * ((in_size - 1) / (out_size - 1))
    i0 = jnp.clip(jnp.floor(pos).astype(jnp.int32), 0, in_size - 1)
    i1 = jnp.minimum(i0 + 1, in_size - 1)
    frac = pos - i0.astype(jnp.float32)
    return (jax.nn.one_hot(i0, in_size, dtype=jnp.float32) * (1.0 - frac)[:, None]
            + jax.nn.one_hot(i1, in_size, dtype=jnp.float32) * frac[:, None])


def resize_bilinear_align_corners(x, out_h, out_w, *, compute_dtype=jnp.bfloat16):
    """NCHW bilinear resize (align_corners=True) via MXU matmuls.

    bf16 operands, f32 accumulation; the two contractions are ordered so the
    smaller intermediate is produced first (used only for the downsample path —
    the recolor *up*sample is fused into the Pallas kernel)."""
    B, C, H, W = x.shape
    y = x.astype(compute_dtype)

    def interp_h(y):
        if out_h == y.shape[2]:
            return y
        m = _bilinear_matrix(y.shape[2], out_h).astype(compute_dtype)
        return jnp.einsum('oh,bchw->bcow', m, y,
                          preferred_element_type=jnp.float32).astype(compute_dtype)

    def interp_w(y):
        if out_w == y.shape[3]:
            return y
        m = _bilinear_matrix(y.shape[3], out_w).astype(compute_dtype)
        return jnp.einsum('pw,bchw->bchp', m, y,
                          preferred_element_type=jnp.float32).astype(compute_dtype)

    if out_h * W <= H * out_w:          # smaller intermediate first
        y = interp_w(interp_h(y))
    else:
        y = interp_h(interp_w(y))
    return y.astype(jnp.float32)


# -----------------------------------------------------------------------------
# Pallas kernel: fused  bilinear-upsample (MXU)  ->  (2x-1).clamp  ->  Sobel edge
#                ->  no_edge_mask  ->  alpha blend  ->  clip(-1, 1)
#
# Sobel weights (per the module): [[-1,-1,-1],[-1,8,-1],[-1,-1,-1]] / 3, repeated
# over the 3 input channels, 1 output channel, padding=1, no bias.  Summed over
# channels:  edge = 3*s - box3x3(s)/3,  s = sum_c r_c, with zero padding at the
# image border.  The 3x3 box sum is computed separably with XLU rolls; the
# 1-row halo at a row-tile boundary is interpolated in-kernel from the small
# recolor (zero at the true image border, selected via program_id).
# -----------------------------------------------------------------------------
def _fused_upsample_sobel_blend_kernel(a_ref, rs_ref, wh_ref, ww_ref, whb_ref,
                                       m_ref, out_ref, mask_ref):
    # a_ref    (1, 3, TH, W)   tensor_a tile, bf16, in [-1, 1]
    # rs_ref   (1, 3, nr, nr)  small recolor, bf16, in [0, 1]    (b-only block)
    # wh_ref   (TH, nr)        row-interp matrix tile, bf16      (h-only block)
    # ww_ref   (nr, W)         col-interp matrix, bf16           (constant block)
    # whb_ref  (1, 8, nr)      halo row-interp rows (rows 0/1), bf16
    # m_ref    (1, 1, TH, W)   mask_blending tile, bf16, in [0, 1]
    # out_ref  (1, 3, TH, W)   bf16 blended output, clipped to [-1, 1]
    # mask_ref (1, 1, TH, W)   bf16 no_edge_mask
    TH, W = a_ref.shape[2], a_ref.shape[3]

    rs = rs_ref[0]                       # (3, nr, nr) bf16
    wh = wh_ref[...]                     # (TH, nr)    bf16
    ww = ww_ref[...]                     # (nr, W)     bf16
    whb = whb_ref[0]                     # (8, nr)     bf16

    # --- bilinear upsample on the (otherwise idle) MXU: rows first (h-dependent,
    # so no work is recomputed across the inner h axis), then columns.
    # bf16 operands, f32 accumulation; bilinear rows/cols have <= 2 non-zeros so
    # the bf16 products accumulate exactly.
    def upsample(row_w, c):                         # (rows, nr) @ (nr, nr) @ (nr, W)
        rh = jnp.dot(row_w, rs[c], preferred_element_type=jnp.float32)
        return jnp.dot(rh.astype(jnp.bfloat16), ww,
                       preferred_element_type=jnp.float32)

    # full-res recolor tile mapped to [-1, 1]; the module's (x*2-1).clamp(-1,1)
    # is kept (only bites on bf16 weight rounding / non-[0,1] generator outputs).
    r0 = jnp.clip(2.0 * upsample(wh, 0) - 1.0, -1.0, 1.0)      # (TH, W) f32
    r1 = jnp.clip(2.0 * upsample(wh, 1) - 1.0, -1.0, 1.0)
    r2 = jnp.clip(2.0 * upsample(wh, 2) - 1.0, -1.0, 1.0)
    s = r0 + r1 + r2                                            # channel sum

    # halo rows: the full-res rows just above / below this tile, interpolated the
    # same way; forced to zero at the true image border (Sobel zero padding).
    hal = (jnp.clip(2.0 * upsample(whb, 0) - 1.0, -1.0, 1.0)
           + jnp.clip(2.0 * upsample(whb, 1) - 1.0, -1.0, 1.0)
           + jnp.clip(2.0 * upsample(whb, 2) - 1.0, -1.0, 1.0))  # (8, W)
    h_id = pl.program_id(1)
    top = jnp.where(h_id == 0, 0.0, hal[0:1, :])                 # (1, W)
    bot = jnp.where(h_id == pl.num_programs(1) - 1, 0.0, hal[1:2, :])

    # --- separable zero-padded 3x3 box sum via XLU rolls -----------------------
    row = lax.broadcasted_iota(jnp.int32, (TH, 1), 0)
    col = lax.broadcasted_iota(jnp.int32, (1, W), 1)

    s_up = jnp.where(row == 0, top, pltpu.roll(s, shift=1, axis=0))
    s_dn = jnp.where(row == TH - 1, bot, pltpu.roll(s, shift=TH - 1, axis=0))
    t = s_up + s + s_dn
    t_l = jnp.where(col >= 1, pltpu.roll(t, shift=1, axis=1), 0.0)
    t_r = jnp.where(col <= W - 2, pltpu.roll(t, shift=W - 1, axis=1), 0.0)
    box = t_l + t + t_r

    # conv2d(recolor, sobel): center 8/3, 8 neighbours -1/3, summed over channels
    edge = 3.0 * s - box * (1.0 / 3.0)

    m = m_ref[0, 0].astype(jnp.float32)
    no_edge = jnp.clip(m - edge, 0.0, 1.0)
    alpha = 0.95 * no_edge

    # per-channel blend: only (TH, W) temporaries live (no full (3,TH,W) f32 copy
    # of tensor_a);  a + alpha*(r - a) == a*(1-alpha) + r*alpha.
    for c, r_c in enumerate((r0, r1, r2)):
        a_c = a_ref[0, c].astype(jnp.float32)
        out_ref[0, c] = jnp.clip(a_c + alpha * (r_c - a_c), -1.0, 1.0
                                 ).astype(out_ref.dtype)
    mask_ref[0, 0] = no_edge.astype(mask_ref.dtype)


def _choose_tile_h(H, W, B, *, elem_budget=128 * 1024):
    """Largest row tile TH (multiple of 8, dividing H) with TH*W within the
    element budget; for B == 1 keep >= 2 row tiles so both v7x TensorCores get
    parallel grid steps (on v5e/v6e the extra step is negligible overhead)."""
    assert H % 8 == 0
    cap = min(H, max(8, (elem_budget // max(W, 1)) // 8 * 8))
    if B == 1 and H >= 16:
        cap = min(cap, max(8, (H // 2) // 8 * 8))
    th = 8
    for cand in range(8, cap + 1, 8):
        if H % cand == 0:
            th = cand
    return th


def fused_recolor_blend_pallas(tensor_a, recolor_small, mask_blending, *,
                               force_tile_h=None):
    """tensor_a: (B,3,H,W) bf16 in [-1,1]; recolor_small: (B,3,nr,nr) bf16 in [0,1];
    mask_blending: (1 or B, 1, H, W) bf16 in [0,1].

    Fuses: bilinear upsample (align_corners=True) of recolor to (H,W) on the MXU,
    (x*2-1).clamp(-1,1), Sobel edge, no_edge_mask, alpha blend, clip(-1,1).
    Returns (blended bf16 (B,3,H,W), no_edge_mask bf16 (B,1,H,W))."""
    B, C, H, W = tensor_a.shape
    assert C == 3
    nr = recolor_small.shape[2]
    assert recolor_small.shape == (B, 3, nr, nr)
    # TODO(synk): pad H/W in the caller if the input is not (8,128)-aligned.
    assert H % 8 == 0 and W % 128 == 0, "H must be /8 and W /128 (pad upstream)"
    Bm = mask_blending.shape[0]

    TH = force_tile_h if force_tile_h is not None else _choose_tile_h(H, W, B)
    assert H % TH == 0 and TH % 8 == 0
    nH = H // TH

    # interpolation matrices (bf16 -> MXU path; exact f32 accumulation since
    # bilinear rows have <= 2 non-zeros)
    wh32 = _bilinear_matrix(nr, H)                       # (H, nr) f32
    wh = wh32.astype(jnp.bfloat16)                       # (H, nr)
    ww = _bilinear_matrix(nr, W).T.astype(jnp.bfloat16)  # (nr, W)

    # per-tile halo interp rows: the full-res row just above / below each tile
    # (zero rows at the image border; the kernel masks those via program_id too)
    whb = jnp.zeros((nH, 8, nr), jnp.float32)
    if nH > 1:
        whb = whb.at[1:, 0, :].set(wh32[TH - 1::TH][: nH - 1])
        whb = whb.at[:-1, 1, :].set(wh32[TH::TH][: nH - 1])
    whb = whb.astype(jnp.bfloat16)

    img_spec = pl.BlockSpec((1, 3, TH, W), lambda b, h: (b, 0, h, 0))
    rs_spec = pl.BlockSpec((1, 3, nr, nr), lambda b, h: (b, 0, 0, 0))  # b-only
    wh_spec = pl.BlockSpec((TH, nr), lambda b, h: (h, 0))
    ww_spec = pl.BlockSpec((nr, W), lambda b, h: (0, 0))
    whb_spec = pl.BlockSpec((1, 8, nr), lambda b, h: (h, 0, 0))
    if Bm == B:
        m_spec = pl.BlockSpec((1, 1, TH, W), lambda b, h: (b, 0, h, 0))
    else:  # batch-shared mask stored once -> never materialized per batch
        m_spec = pl.BlockSpec((1, 1, TH, W), lambda b, h: (0, 0, h, 0))
    out_img_spec = pl.BlockSpec((1, 3, TH, W), lambda b, h: (b, 0, h, 0))
    out_msk_spec = pl.BlockSpec((1, 1, TH, W), lambda b, h: (b, 0, h, 0))

    # VMEM budget: double-buffered blocks + f32 intermediates, generation-aware cap
    block_bytes = (8 * TH * W + 3 * nr * nr + TH * nr + nr * W + 8 * nr) * 2
    want = 2 * block_bytes + 18 * TH * W * 4 + (2 << 20)
    try:
        vmem_cap = int(getattr(pltpu.get_tpu_info(), "vmem_capacity_bytes", 64 << 20))
    except Exception:
        vmem_cap = 64 << 20                      # conservative: v7x per-TC VMEM
    vmem_limit = int(max(16 << 20, min(want, int(0.45 * vmem_cap))))

    steps = B * nH
    matmul_flops = 2 * steps * 3 * ((TH + 8) * nr * nr + (TH + 8) * nr * W)
    vpu_flops = 60 * steps * TH * W
    bytes_accessed = (2 * B * 3 * H * W + 2 * Bm * H * W + 2 * B * 3 * nr * nr
                      + 2 * (H * nr + nr * W + nH * 8 * nr) + 2 * B * 4 * H * W)
    cost = pl.CostEstimate(flops=int(matmul_flops + vpu_flops),
                           transcendentals=0,
                           bytes_accessed=int(bytes_accessed))

    return pl.pallas_call(
        _fused_upsample_sobel_blend_kernel,
        out_shape=(jax.ShapeDtypeStruct((B, 3, H, W), jnp.bfloat16),
                   jax.ShapeDtypeStruct((B, 1, H, W), jnp.bfloat16)),
        grid_spec=pl.GridSpec(
            grid=(B, nH),
            in_specs=[img_spec, rs_spec, wh_spec, ww_spec, whb_spec, m_spec],
            out_specs=[out_img_spec, out_msk_spec],
        ),
        compiler_params=pltpu.CompilerParams(
            dimension_semantics=("parallel", "parallel"),
            vmem_limit_bytes=vmem_limit),
        cost_estimate=cost,
    )(tensor_a, recolor_small, wh, ww, whb, mask_blending)


# -----------------------------------------------------------------------------
# BlenderForTrain.forward equivalent
# -----------------------------------------------------------------------------
def blender_for_train_forward(tensor_a, tensor_t):
    """tensor_a, tensor_t: (B, 3, H, W) float in [-1, 1] (NCHW).
    Returns (recolor_blended, no_edge_mask), both bf16."""
    B, C, H, W = tensor_a.shape

    # TODO(synk): parsing_model / mask_softer_model / faceParsing_demo /
    # get_facial_mask_from_seg19 are external pretrained networks; replaced with
    # a deterministic synthetic soft facial mask in [0,1], stored once as a
    # (1,1,H,W) batch-shared plane so it is never materialized per batch element.
    yy = jnp.linspace(-1.0, 1.0, H)
    xx = jnp.linspace(-1.0, 1.0, W)
    rr = jnp.sqrt(yy[:, None] ** 2 + xx[None, :] ** 2)
    mask_blending = jnp.clip(1.2 - rr, 0.0, 1.0).astype(jnp.bfloat16)[None, None]

    # downscale to the generator resolution (256 in the original, scaled for
    # small demo inputs); bf16 einsum operands, f32 accumulation.
    net_res = max(8, min(256, H // 2))
    a_small = resize_bilinear_align_corners(tensor_a, net_res, net_res)
    t_small = resize_bilinear_align_corners(tensor_t, net_res, net_res)

    # TODO(synk): netG (Blender generator) is an external pretrained module
    # loaded from a checkpoint; replaced with a deterministic recoloring stub
    # in [0, 1] (matches the module's recolor.clamp(0, 1) at 256x256).
    recolor_small = jnp.clip(0.25 * (a_small + t_small) + 0.5, 0.0, 1.0
                             ).astype(jnp.bfloat16)

    # TODO(synk): enhance_model (super-resolution) is external; identity stub.

    # Fused Pallas hot path: recolor upsample on the MXU, (x*2-1).clamp,
    # Sobel edge, no_edge_mask, alpha blend, clip.  No full-res recolor plane
    # ever round-trips through HBM.
    out, no_edge_mask = fused_recolor_blend_pallas(
        tensor_a.astype(jnp.bfloat16), recolor_small, mask_blending)
    return out, no_edge_mask


# -----------------------------------------------------------------------------
# Pure-JAX reference of the fused hot path for validation (mirrors the kernel's
# bf16 operand/staging rounding; box sum in f32 via explicit zero padding).
# -----------------------------------------------------------------------------
def _reference_fused(a_bf, rs_bf, m_bf, out_h, out_w):
    B, C, nr, _ = rs_bf.shape
    wh = _bilinear_matrix(nr, out_h).astype(jnp.bfloat16).astype(jnp.float32)
    ww = _bilinear_matrix(nr, out_w).T.astype(jnp.bfloat16).astype(jnp.float32)

    rh = jnp.einsum('hn,bcnk->bchk', wh, rs_bf.astype(jnp.float32))
    rh = rh.astype(jnp.bfloat16).astype(jnp.float32)        # kernel's bf16 staging
    r = jnp.einsum('bchk,kw->bchw', rh, ww)
    r = jnp.clip(2.0 * r - 1.0, -1.0, 1.0)

    s = r.sum(axis=1)                                        # (B, H, W)
    sp = jnp.pad(s, ((0, 0), (1, 1), (1, 1)))
    box = sum(sp[:, i:i + out_h, j:j + out_w] for i in range(3) for j in range(3))
    edge = (3.0 * s - box / 3.0)[:, None]                    # (B, 1, H, W)

    no_edge = jnp.clip(m_bf.astype(jnp.float32) - edge, 0.0, 1.0)
    alpha = 0.95 * no_edge
    a = a_bf.astype(jnp.float32)
    out = jnp.clip(a * (1.0 - alpha) + r * alpha, -1.0, 1.0)
    return out, no_edge


if __name__ == "__main__":
    key = jax.random.PRNGKey(0)
    k_a, k_t = jax.random.split(key)
    B, C, H, W = 2, 3, 256, 256
    tensor_a = jax.random.uniform(k_a, (B, C, H, W), jnp.float32, -1.0, 1.0)
    tensor_t = jax.random.uniform(k_t, (B, C, H, W), jnp.float32, -1.0, 1.0)

    out, no_edge_mask = jax.jit(blender_for_train_forward)(tensor_a, tensor_t)
    jax.block_until_ready((out, no_edge_mask))

    assert out.shape == (B, 3, H, W) and out.dtype == jnp.bfloat16
    assert no_edge_mask.shape == (B, 1, H, W)
    assert bool(jnp.all(out >= -1.0)) and bool(jnp.all(out <= 1.0))
    assert bool(jnp.all(no_edge_mask >= 0.0)) and bool(jnp.all(no_edge_mask <= 1.0))

    # cross-check the fused kernel (MXU upsample + Sobel + blend) against a
    # plain-JAX reference, both with the default single full-image tile and a
    # forced multi-tile split that exercises the in-kernel halo interpolation.
    nr = 128
    k_r, k_m = jax.random.split(jax.random.PRNGKey(1))
    a_bf = tensor_a.astype(jnp.bfloat16)
    rs_bf = jax.random.uniform(k_r, (B, C, nr, nr), jnp.float32, 0.0, 1.0
                               ).astype(jnp.bfloat16)
    m_bf = jax.random.uniform(k_m, (1, 1, H, W), jnp.float32, 0.0, 1.0
                              ).astype(jnp.bfloat16)

    ref_out, ref_msk = _reference_fused(a_bf, rs_bf, m_bf, H, W)
    for tile in (None, 64):
        fn = jax.jit(functools.partial(fused_recolor_blend_pallas, force_tile_h=tile))
        got_out, got_msk = fn(a_bf, rs_bf, m_bf)
        jax.block_until_ready((got_out, got_msk))
        err_o = float(jnp.max(jnp.abs(got_out.astype(jnp.float32) - ref_out)))
        err_m = float(jnp.max(jnp.abs(got_msk.astype(jnp.float32) - ref_msk)))
        assert err_o < 2e-2, f"out mismatch (tile={tile}): {err_o}"
        assert err_m < 2e-2, f"mask mismatch (tile={tile}): {err_m}"

    print("KERNEL_OK")
</pallas_src>

<mosaic_0001>
module attributes {stable_mosaic.version = 11 : i64} {
  func.func @_fused_upsample_sobel_blend_kernel(%arg0: i32, %arg1: i32, %arg2: memref<1x3x256x256xbf16, #tpu.memory_space<vmem>>, %arg3: memref<1x3x128x128xbf16, #tpu.memory_space<vmem>>, %arg4: memref<256x128xbf16, #tpu.memory_space<vmem>>, %arg5: memref<128x256xbf16, #tpu.memory_space<vmem>>, %arg6: memref<1x8x128xbf16, #tpu.memory_space<vmem>>, %arg7: memref<1x1x256x256xbf16, #tpu.memory_space<vmem>>, %arg8: memref<1x3x256x256xbf16, #tpu.memory_space<vmem>>, %arg9: memref<1x1x256x256xbf16, #tpu.memory_space<vmem>>) attributes {dimension_semantics = [#tpu.dimension_semantics<parallel>, #tpu.dimension_semantics<parallel>], iteration_bounds = array<i64: 2, 1>, scalar_prefetch = 0 : i64, scratch_operands = 0 : i64, tpu.core_type = #tpu.core_type<tc>, window_params = [{transform_indices = @transform_0, window_bounds = array<i64: 1, 3, 256, 256>}, {transform_indices = @transform_1, window_bounds = array<i64: 1, 3, 128, 128>}, {transform_indices = @transform_2, window_bounds = array<i64: 256, 128>}, {pipeline_mode = #tpu.pipeline_mode<synchronous>, transform_indices = @transform_3, window_bounds = array<i64: 128, 256>}, {transform_indices = @transform_4, window_bounds = array<i64: 1, 8, 128>}, {transform_indices = @transform_5, window_bounds = array<i64: 1, 1, 256, 256>}, {transform_indices = @transform_6, window_bounds = array<i64: 1, 3, 256, 256>}, {transform_indices = @transform_7, window_bounds = array<i64: 1, 1, 256, 256>}]} {
    %c0 = arith.constant 0 : index
    %c0_0 = arith.constant 0 : index
    %c0_1 = arith.constant 0 : index
    %c0_2 = arith.constant 0 : index
    %0 = vector.load %arg3[%c0, %c0_0, %c0_1, %c0_2] : memref<1x3x128x128xbf16, #tpu.memory_space<vmem>>, vector<1x3x128x128xbf16>
    %1 = vector.shape_cast %0 : vector<1x3x128x128xbf16> to vector<3x128x128xbf16>
    %c0_3 = arith.constant 0 : index
    %c0_4 = arith.constant 0 : index
    %2 = vector.load %arg4[%c0_3, %c0_4] : memref<256x128xbf16, #tpu.memory_space<vmem>>, vector<256x128xbf16>
    %c0_5 = arith.constant 0 : index
    %c0_6 = arith.constant 0 : index
    %3 = vector.load %arg5[%c0_5, %c0_6] : memref<128x256xbf16, #tpu.memory_space<vmem>>, vector<128x256xbf16>
    %c0_7 = arith.constant 0 : index
    %c0_8 = arith.constant 0 : index
    %c0_9 = arith.constant 0 : index
    %4 = vector.load %arg6[%c0_7, %c0_8, %c0_9] : memref<1x8x128xbf16, #tpu.memory_space<vmem>>, vector<1x8x128xbf16>
    %5 = vector.shape_cast %4 : vector<1x8x128xbf16> to vector<8x128xbf16>
    %6 = vector.extract_strided_slice %1 {offsets = [0, 0, 0], sizes = [1, 128, 128], strides = [1, 1, 1]} : vector<3x128x128xbf16> to vector<1x128x128xbf16>
    %7 = vector.shape_cast %6 : vector<1x128x128xbf16> to vector<128x128xbf16>
    %cst = arith.constant dense<0.000000e+00> : vector<256x128xf32>
    %8 = tpu.matmul %2, %7, %cst {dimension_numbers = #tpu.dot_dimension_numbers<[1], [0], [0], [1], [0, 0, 1, 1], [], []>} : vector<256x128xbf16>, vector<128x128xbf16>, vector<256x128xf32> -> vector<256x128xf32>
    %9 = arith.truncf %8 : vector<256x128xf32> to vector<256x128xbf16>
    %cst_10 = arith.constant dense<0.000000e+00> : vector<256x256xf32>
    %10 = tpu.matmul %9, %3, %cst_10 {dimension_numbers = #tpu.dot_dimension_numbers<[1], [0], [0], [1], [0, 0, 1, 1], [], []>} : vector<256x128xbf16>, vector<128x256xbf16>, vector<256x256xf32> -> vector<256x256xf32>
    %cst_11 = arith.constant 2.000000e+00 : f32
    %11 = vector.broadcast %cst_11 : f32 to vector<256x256xf32>
    %12 = arith.mulf %11, %10 : vector<256x256xf32>
    %cst_12 = arith.constant 1.000000e+00 : f32
    %13 = vector.broadcast %cst_12 : f32 to vector<256x256xf32>
    %14 = arith.subf %12, %13 : vector<256x256xf32>
    %cst_13 = arith.constant -1.000000e+00 : f32
    %cst_14 = arith.constant 1.000000e+00 : f32
    %15 = vector.broadcast %cst_13 : f32 to vector<256x256xf32>
    %16 = arith.maximumf %15, %14 : vector<256x256xf32>
    %17 = vector.broadcast %cst_14 : f32 to vector<256x256xf32>
    %18 = arith.minimumf %17, %16 : vector<256x256xf32>
    %19 = vector.extract_strided_slice %1 {offsets = [1, 0, 0], sizes = [1, 128, 128], strides = [1, 1, 1]} : vector<3x128x128xbf16> to vector<1x128x128xbf16>
    %20 = vector.shape_cast %19 : vector<1x128x128xbf16> to vector<128x128xbf16>
    %cst_15 = arith.constant dense<0.000000e+00> : vector<256x128xf32>
    %21 = tpu.matmul %2, %20, %cst_15 {dimension_numbers = #tpu.dot_dimension_numbers<[1], [0], [0], [1], [0, 0, 1, 1], [], []>} : vector<256x128xbf16>, vector<128x128xbf16>, vector<256x128xf32> -> vector<256x128xf32>
    %22 = arith.truncf %21 : vector<256x128xf32> to vector<256x128xbf16>
    %cst_16 = arith.constant dense<0.000000e+00> : vector<256x256xf32>
    %23 = tpu.matmul %22, %3, %cst_16 {dimension_numbers = #tpu.dot_dimension_numbers<[1], [0], [0], [1], [0, 0, 1, 1], [], []>} : vector<256x128xbf16>, vector<128x256xbf16>, vector<256x256xf32> -> vector<256x256xf32>
    %cst_17 = arith.constant 2.000000e+00 : f32
    %24 = vector.broadcast %cst_17 : f32 to vector<256x256xf32>
    %25 = arith.mulf %24, %23 : vector<256x256xf32>
    %cst_18 = arith.constant 1.000000e+00 : f32
    %26 = vector.broadcast %cst_18 : f32 to vector<256x256xf32>
    %27 = arith.subf %25, %26 : vector<256x256xf32>
    %cst_19 = arith.constant -1.000000e+00 : f32
    %cst_20 = arith.constant 1.000000e+00 : f32
    %28 = vector.broadcast %cst_19 : f32 to vector<256x256xf32>
    %29 = arith.maximumf %28, %27 : vector<256x256xf32>
    %30 = vector.broadcast %cst_20 : f32 to vector<256x256xf32>
    %31 = arith.minimumf %30, %29 : vector<256x256xf32>
    %32 = vector.extract_strided_slice %1 {offsets = [2, 0, 0], sizes = [1, 128, 128], strides = [1, 1, 1]} : vector<3x128x128xbf16> to vector<1x128x128xbf16>
    %33 = vector.shape_cast %32 : vector<1x128x128xbf16> to vector<128x128xbf16>
    %cst_21 = arith.constant dense<0.000000e+00> : vector<256x128xf32>
    %34 = tpu.matmul %2, %33, %cst_21 {dimension_numbers = #tpu.dot_dimension_numbers<[1], [0], [0], [1], [0, 0, 1, 1], [], []>} : vector<256x128xbf16>, vector<128x128xbf16>, vector<256x128xf32> -> vector<256x128xf32>
    %35 = arith.truncf %34 : vector<256x128xf32> to vector<256x128xbf16>
    %cst_22 = arith.constant dense<0.000000e+00> : vector<256x256xf32>
    %36 = tpu.matmul %35, %3, %cst_22 {dimension_numbers = #tpu.dot_dimension_numbers<[1], [0], [0], [1], [0, 0, 1, 1], [], []>} : vector<256x128xbf16>, vector<128x256xbf16>, vector<256x256xf32> -> vector<256x256xf32>
    %cst_23 = arith.constant 2.000000e+00 : f32
    %37 = vector.broadcast %cst_23 : f32 to vector<256x256xf32>
    %38 = arith.mulf %37, %36 : vector<256x256xf32>
    %cst_24 = arith.constant 1.000000e+00 : f32
    %39 = vector.broadcast %cst_24 : f32 to vector<256x256xf32>
    %40 = arith.subf %38, %39 : vector<256x256xf32>
    %cst_25 = arith.constant -1.000000e+00 : f32
    %cst_26 = arith.constant 1.000000e+00 : f32
    %41 = vector.broadcast %cst_25 : f32 to vector<256x256xf32>
    %42 = arith.maximumf %41, %40 : vector<256x256xf32>
    %43 = vector.broadcast %cst_26 : f32 to vector<256x256xf32>
    %44 = arith.minimumf %43, %42 : vector<256x256xf32>
    %45 = arith.addf %18, %31 : vector<256x256xf32>
    %46 = arith.addf %45, %44 : vector<256x256xf32>
    %47 = vector.extract_strided_slice %1 {offsets = [0, 0, 0], sizes = [1, 128, 128], strides = [1, 1, 1]} : vector<3x128x128xbf16> to vector<1x128x128xbf16>
    %48 = vector.shape_cast %47 : vector<1x128x128xbf16> to vector<128x128xbf16>
    %cst_27 = arith.constant dense<0.000000e+00> : vector<8x128xf32>
    %49 = tpu.matmul %5, %48, %cst_27 {dimension_numbers = #tpu.dot_dimension_numbers<[1], [0], [0], [1], [0, 0, 1, 1], [], []>} : vector<8x128xbf16>, vector<128x128xbf16>, vector<8x128xf32> -> vector<8x128xf32>
    %50 = arith.truncf %49 : vector<8x128xf32> to vector<8x128xbf16>
    %cst_28 = arith.constant dense<0.000000e+00> : vector<8x256xf32>
    %51 = tpu.matmul %50, %3, %cst_28 {dimension_numbers = #tpu.dot_dimension_numbers<[1], [0], [0], [1], [0, 0, 1, 1], [], []>} : vector<8x128xbf16>, vector<128x256xbf16>, vector<8x256xf32> -> vector<8x256xf32>
    %cst_29 = arith.constant 2.000000e+00 : f32
    %52 = vector.broadcast %cst_29 : f32 to vector<8x256xf32>
    %53 = arith.mulf %52, %51 : vector<8x256xf32>
    %cst_30 = arith.constant 1.000000e+00 : f32
    %54 = vector.broadcast %cst_30 : f32 to vector<8x256xf32>
    %55 = arith.subf %53, %54 : vector<8x256xf32>
    %cst_31 = arith.constant -1.000000e+00 : f32
    %cst_32 = arith.constant 1.000000e+00 : f32
    %56 = vector.broadcast %cst_31 : f32 to vector<8x256xf32>
    %57 = arith.maximumf %56, %55 : vector<8x256xf32>
    %58 = vector.broadcast %cst_32 : f32 to vector<8x256xf32>
    %59 = arith.minimumf %58, %57 : vector<8x256xf32>
    %60 = vector.extract_strided_slice %1 {offsets = [1, 0, 0], sizes = [1, 128, 128], strides = [1, 1, 1]} : vector<3x128x128xbf16> to vector<1x128x128xbf16>
    %61 = vector.shape_cast %60 : vector<1x128x128xbf16> to vector<128x128xbf16>
    %cst_33 = arith.constant dense<0.000000e+00> : vector<8x128xf32>
    %62 = tpu.matmul %5, %61, %cst_33 {dimension_numbers = #tpu.dot_dimension_numbers<[1], [0], [0], [1], [0, 0, 1, 1], [], []>} : vector<8x128xbf16>, vector<128x128xbf16>, vector<8x128xf32> -> vector<8x128xf32>
    %63 = arith.truncf %62 : vector<8x128xf32> to vector<8x128xbf16>
    %cst_34 = arith.constant dense<0.000000e+00> : vector<8x256xf32>
    %64 = tpu.matmul %63, %3, %cst_34 {dimension_numbers = #tpu.dot_dimension_numbers<[1], [0], [0], [1], [0, 0, 1, 1], [], []>} : vector<8x128xbf16>, vector<128x256xbf16>, vector<8x256xf32> -> vector<8x256xf32>
    %cst_35 = arith.constant 2.000000e+00 : f32
    %65 = vector.broadcast %cst_35 : f32 to vector<8x256xf32>
    %66 = arith.mulf %65, %64 : vector<8x256xf32>
    %cst_36 = arith.constant 1.000000e+00 : f32
    %67 = vector.broadcast %cst_36 : f32 to vector<8x256xf32>
    %68 = arith.subf %66, %67 : vector<8x256xf32>
    %cst_37 = arith.constant -1.000000e+00 : f32
    %cst_38 = arith.constant 1.000000e+00 : f32
    %69 = vector.broadcast %cst_37 : f32 to vector<8x256xf32>
    %70 = arith.maximumf %69, %68 : vector<8x256xf32>
    %71 = vector.broadcast %cst_38 : f32 to vector<8x256xf32>
    %72 = arith.minimumf %71, %70 : vector<8x256xf32>
    %73 = arith.addf %59, %72 : vector<8x256xf32>
    %74 = vector.extract_strided_slice %1 {offsets = [2, 0, 0], sizes = [1, 128, 128], strides = [1, 1, 1]} : vector<3x128x128xbf16> to vector<1x128x128xbf16>
    %75 = vector.shape_cast %74 : vector<1x128x128xbf16> to vector<128x128xbf16>
    %cst_39 = arith.constant dense<0.000000e+00> : vector<8x128xf32>
    %76 = tpu.matmul %5, %75, %cst_39 {dimension_numbers = #tpu.dot_dimension_numbers<[1], [0], [0], [1], [0, 0, 1, 1], [], []>} : vector<8x128xbf16>, vector<128x128xbf16>, vector<8x128xf32> -> vector<8x128xf32>
    %77 = arith.truncf %76 : vector<8x128xf32> to vector<8x128xbf16>
    %cst_40 = arith.constant dense<0.000000e+00> : vector<8x256xf32>
    %78 = tpu.matmul %77, %3, %cst_40 {dimension_numbers = #tpu.dot_dimension_numbers<[1], [0], [0], [1], [0, 0, 1, 1], [], []>} : vector<8x128xbf16>, vector<128x256xbf16>, vector<8x256xf32> -> vector<8x256xf32>
    %cst_41 = arith.constant 2.000000e+00 : f32
    %79 = vector.broadcast %cst_41 : f32 to vector<8x256xf32>
    %80 = arith.mulf %79, %78 : vector<8x256xf32>
    %cst_42 = arith.constant 1.000000e+00 : f32
    %81 = vector.broadcast %cst_42 : f32 to vector<8x256xf32>
    %82 = arith.subf %80, %81 : vector<8x256xf32>
    %cst_43 = arith.constant -1.000000e+00 : f32
    %cst_44 = arith.constant 1.000000e+00 : f32
    %83 = vector.broadcast %cst_43 : f32 to vector<8x256xf32>
    %84 = arith.maximumf %83, %82 : vector<8x256xf32>
    %85 = vector.broadcast %cst_44 : f32 to vector<8x256xf32>
    %86 = arith.minimumf %85, %84 : vector<8x256xf32>
    %87 = arith.addf %73, %86 : vector<8x256xf32>
    %c0_i32 = arith.constant 0 : i32
    %88 = arith.cmpi eq, %arg1, %c0_i32 : i32
    %89 = vector.extract_strided_slice %87 {offsets = [0, 0], sizes = [1, 256], strides = [1, 1]} : vector<8x256xf32> to vector<1x256xf32>
    %cst_45 = arith.constant 0.000000e+00 : f32
    %90 = vector.broadcast %cst_45 : f32 to vector<1x256xf32>
    %91 = arith.select %88, %90, %89 : vector<1x256xf32>
    %c0_i32_46 = arith.constant 0 : i32
    %92 = arith.cmpi eq, %arg1, %c0_i32_46 : i32
    %93 = vector.extract_strided_slice %87 {offsets = [1, 0], sizes = [1, 256], strides = [1, 1]} : vector<8x256xf32> to vector<1x256xf32>
    %cst_47 = arith.constant 0.000000e+00 : f32
    %94 = vector.broadcast %cst_47 : f32 to vector<1x256xf32>
    %95 = arith.select %92, %94, %93 : vector<1x256xf32>
    %96 = tpu.iota {dimensions = array<i32: 0>} : vector<256x1xi32>
    %97 = tpu.iota {dimensions = array<i32: 1>} : vector<1x256xi32>
    %c0_i32_48 = arith.constant 0 : i32
    %98 = vector.broadcast %c0_i32_48 : i32 to vector<256x1xi32>
    %99 = arith.cmpi eq, %96, %98 : vector<256x1xi32>
    %c1_i32 = arith.constant 1 : i32
    %100 = tpu.dynamic_rotate %46 by %c1_i32 dim 0 : vector<256x256xf32>, i32 -> vector<256x256xf32>
    %101 = vector.shape_cast %99 : vector<256x1xi1> to vector<256x1xi1>
    %102 = vector.broadcast %101 : vector<256x1xi1> to vector<256x256xi1>
    %103 = vector.shape_cast %91 : vector<1x256xf32> to vector<1x256xf32>
    %104 = vector.broadcast %103 : vector<1x256xf32> to vector<256x256xf32>
    %105 = arith.select %102, %104, %100 : vector<256x256xi1>, vector<256x256xf32>
    %c255_i32 = arith.constant 255 : i32
    %106 = vector.broadcast %c255_i32 : i32 to vector<256x1xi32>
    %107 = arith.cmpi eq, %96, %106 : vector<256x1xi32>
    %c255_i32_49 = arith.constant 255 : i32
    %108 = tpu.dynamic_rotate %46 by %c255_i32_49 dim 0 : vector<256x256xf32>, i32 -> vector<256x256xf32>
    %109 = vector.shape_cast %107 : vector<256x1xi1> to vector<256x1xi1>
    %110 = vector.broadcast %109 : vector<256x1xi1> to vector<256x256xi1>
    %111 = vector.shape_cast %95 : vector<1x256xf32> to vector<1x256xf32>
    %112 = vector.broadcast %111 : vector<1x256xf32> to vector<256x256xf32>
    %113 = arith.select %110, %112, %108 : vector<256x256xi1>, vector<256x256xf32>
    %114 = arith.addf %105, %46 : vector<256x256xf32>
    %115 = arith.addf %114, %113 : vector<256x256xf32>
    %c1_i32_50 = arith.constant 1 : i32
    %116 = vector.broadcast %c1_i32_50 : i32 to vector<1x256xi32>
    %117 = arith.cmpi sge, %97, %116 : vector<1x256xi32>
    %c1_i32_51 = arith.constant 1 : i32
    %118 = tpu.dynamic_rotate %115 by %c1_i32_51 dim 1 : vector<256x256xf32>, i32 -> vector<256x256xf32>
    %cst_52 = arith.constant 0.000000e+00 : f32
    %119 = vector.shape_cast %117 : vector<1x256xi1> to vector<1x256xi1>
    %120 = vector.broadcast %119 : vector<1x256xi1> to vector<256x256xi1>
    %121 = vector.broadcast %cst_52 : f32 to vector<256x256xf32>
    %122 = arith.select %120, %118, %121 : vector<256x256xi1>, vector<256x256xf32>
    %c254_i32 = arith.constant 254 : i32
    %123 = vector.broadcast %c254_i32 : i32 to vector<1x256xi32>
    %124 = arith.cmpi sle, %97, %123 : vector<1x256xi32>
    %c255_i32_53 = arith.constant 255 : i32
    %125 = tpu.dynamic_rotate %115 by %c255_i32_53 dim 1 : vector<256x256xf32>, i32 -> vector<256x256xf32>
    %cst_54 = arith.constant 0.000000e+00 : f32
    %126 = vector.shape_cast %124 : vector<1x256xi1> to vector<1x256xi1>
    %127 = vector.broadcast %126 : vector<1x256xi1> to vector<256x256xi1>
    %128 = vector.broadcast %cst_54 : f32 to vector<256x256xf32>
    %129 = arith.select %127, %125, %128 : vector<256x256xi1>, vector<256x256xf32>
    %130 = arith.addf %122, %115 : vector<256x256xf32>
    %131 = arith.addf %130, %129 : vector<256x256xf32>
    %cst_55 = arith.constant 3.000000e+00 : f32
    %132 = vector.broadcast %cst_55 : f32 to vector<256x256xf32>
    %133 = arith.mulf %132, %46 : vector<256x256xf32>
    %cst_56 = arith.constant 0.333333343 : f32
    %134 = vector.broadcast %cst_56 : f32 to vector<256x256xf32>
    %135 = arith.mulf %131, %134 : vector<256x256xf32>
    %136 = arith.subf %133, %135 : vector<256x256xf32>
    %c0_57 = arith.constant 0 : index
    %c0_58 = arith.constant 0 : index
    %c0_59 = arith.constant 0 : index
    %c0_60 = arith.constant 0 : index
    %137 = vector.load %arg7[%c0_57, %c0_58, %c0_59, %c0_60] : memref<1x1x256x256xbf16, #tpu.memory_space<vmem>>, vector<1x1x256x256xbf16>
    %138 = vector.shape_cast %137 : vector<1x1x256x256xbf16> to vector<256x256xbf16>
    %139 = arith.extf %138 : vector<256x256xbf16> to vector<256x256xf32>
    %140 = arith.subf %139, %136 : vector<256x256xf32>
    %cst_61 = arith.constant 0.000000e+00 : f32
    %cst_62 = arith.constant 1.000000e+00 : f32
    %141 = vector.broadcast %cst_61 : f32 to vector<256x256xf32>
    %142 = arith.maximumf %141, %140 : vector<256x256xf32>
    %143 = vector.broadcast %cst_62 : f32 to vector<256x256xf32>
    %144 = arith.minimumf %143, %142 : vector<256x256xf32>
    %cst_63 = arith.constant 0.949999988 : f32
    %145 = vector.broadcast %cst_63 : f32 to vector<256x256xf32>
    %146 = arith.mulf %145, %144 : vector<256x256xf32>
    %c0_64 = arith.constant 0 : index
    %c0_65 = arith.constant 0 : index
    %c0_66 = arith.constant 0 : index
    %c0_67 = arith.constant 0 : index
    %147 = vector.load %arg2[%c0_64, %c0_65, %c0_66, %c0_67] : memref<1x3x256x256xbf16, #tpu.memory_space<vmem>>, vector<1x1x256x256xbf16>
    %148 = vector.shape_cast %147 : vector<1x1x256x256xbf16> to vector<256x256xbf16>
    %149 = arith.extf %148 : vector<256x256xbf16> to vector<256x256xf32>
    %150 = arith.subf %18, %149 : vector<256x256xf32>
    %151 = arith.mulf %146, %150 : vector<256x256xf32>
    %152 = arith.addf %149, %151 : vector<256x256xf32>
    %cst_68 = arith.constant -1.000000e+00 : f32
    %cst_69 = arith.constant 1.000000e+00 : f32
    %153 = vector.broadcast %cst_68 : f32 to vector<256x256xf32>
    %154 = arith.maximumf %153, %152 : vector<256x256xf32>
    %155 = vector.broadcast %cst_69 : f32 to vector<256x256xf32>
    %156 = arith.minimumf %155, %154 : vector<256x256xf32>
    %157 = arith.truncf %156 : vector<256x256xf32> to vector<256x256xbf16>
    %c0_70 = arith.constant 0 : index
    %c0_71 = arith.constant 0 : index
    %c0_72 = arith.constant 0 : index
    %c0_73 = arith.constant 0 : index
    %158 = vector.load %arg8[%c0_70, %c0_71, %c0_72, %c0_73] : memref<1x3x256x256xbf16, #tpu.memory_space<vmem>>, vector<1x1x256x256xbf16>
    %159 = vector.shape_cast %158 : vector<1x1x256x256xbf16> to vector<256x256xbf16>
    %160 = vector.shape_cast %157 : vector<256x256xbf16> to vector<1x1x256x256xbf16>
    tpu.vector_store %arg8[%c0_70, %c0_71, %c0_72, %c0_73], %160 {strides = array<i32>} : memref<1x3x256x256xbf16, #tpu.memory_space<vmem>>, vector<1x1x256x256xbf16>,
    %c0_74 = arith.constant 0 : index
    %c1 = arith.constant 1 : index
    %c0_75 = arith.constant 0 : index
    %c0_76 = arith.constant 0 : index
    %161 = vector.load %arg2[%c0_74, %c1, %c0_75, %c0_76] : memref<1x3x256x256xbf16, #tpu.memory_space<vmem>>, vector<1x1x256x256xbf16>
    %162 = vector.shape_cast %161 : vector<1x1x256x256xbf16> to vector<256x256xbf16>
    %163 = arith.extf %162 : vector<256x256xbf16> to vector<256x256xf32>
    %164 = arith.subf %31, %163 : vector<256x256xf32>
    %165 = arith.mulf %146, %164 : vector<256x256xf32>
    %166 = arith.addf %163, %165 : vector<256x256xf32>
    %cst_77 = arith.constant -1.000000e+00 : f32
    %cst_78 = arith.constant 1.000000e+00 : f32
    %167 = vector.broadcast %cst_77 : f32 to vector<256x256xf32>
    %168 = arith.maximumf %167, %166 : vector<256x256xf32>
    %169 = vector.broadcast %cst_78 : f32 to vector<256x256xf32>
    %170 = arith.minimumf %169, %168 : vector<256x256xf32>
    %171 = arith.truncf %170 : vector<256x256xf32> to vector<256x256xbf16>
    %c0_79 = arith.constant 0 : index
    %c1_80 = arith.constant 1 : index
    %c0_81 = arith.constant 0 : index
    %c0_82 = arith.constant 0 : index
    %172 = vector.load %arg8[%c0_79, %c1_80, %c0_81, %c0_82] : memref<1x3x256x256xbf16, #tpu.memory_space<vmem>>, vector<1x1x256x256xbf16>
    %173 = vector.shape_cast %172 : vector<1x1x256x256xbf16> to vector<256x256xbf16>
    %174 = vector.shape_cast %171 : vector<256x256xbf16> to vector<1x1x256x256xbf16>
    tpu.vector_store %arg8[%c0_79, %c1_80, %c0_81, %c0_82], %174 {strides = array<i32>} : memref<1x3x256x256xbf16, #tpu.memory_space<vmem>>, vector<1x1x256x256xbf16>,
    %c0_83 = arith.constant 0 : index
    %c2 = arith.constant 2 : index
    %c0_84 = arith.constant 0 : index
    %c0_85 = arith.constant 0 : index
    %175 = vector.load %arg2[%c0_83, %c2, %c0_84, %c0_85] : memref<1x3x256x256xbf16, #tpu.memory_space<vmem>>, vector<1x1x256x256xbf16>
    %176 = vector.shape_cast %175 : vector<1x1x256x256xbf16> to vector<256x256xbf16>
    %177 = arith.extf %176 : vector<256x256xbf16> to vector<256x256xf32>
    %178 = arith.subf %44, %177 : vector<256x256xf32>
    %179 = arith.mulf %146, %178 : vector<256x256xf32>
    %180 = arith.addf %177, %179 : vector<256x256xf32>
    %cst_86 = arith.constant -1.000000e+00 : f32
    %cst_87 = arith.constant 1.000000e+00 : f32
    %181 = vector.broadcast %cst_86 : f32 to vector<256x256xf32>
    %182 = arith.maximumf %181, %180 : vector<256x256xf32>
    %183 = vector.broadcast %cst_87 : f32 to vector<256x256xf32>
    %184 = arith.minimumf %183, %182 : vector<256x256xf32>
    %185 = arith.truncf %184 : vector<256x256xf32> to vector<256x256xbf16>
    %c0_88 = arith.constant 0 : index
    %c2_89 = arith.constant 2 : index
    %c0_90 = arith.constant 0 : index
    %c0_91 = arith.constant 0 : index
    %186 = vector.load %arg8[%c0_88, %c2_89, %c0_90, %c0_91] : memref<1x3x256x256xbf16, #tpu.memory_space<vmem>>, vector<1x1x256x256xbf16>
    %187 = vector.shape_cast %186 : vector<1x1x256x256xbf16> to vector<256x256xbf16>
    %188 = vector.shape_cast %185 : vector<256x256xbf16> to vector<1x1x256x256xbf16>
    tpu.vector_store %arg8[%c0_88, %c2_89, %c0_90, %c0_91], %188 {strides = array<i32>} : memref<1x3x256x256xbf16, #tpu.memory_space<vmem>>, vector<1x1x256x256xbf16>,
    %189 = arith.truncf %144 : vector<256x256xf32> to vector<256x256xbf16>
    %c0_92 = arith.constant 0 : index
    %c0_93 = arith.constant 0 : index
    %c0_94 = arith.constant 0 : index
    %c0_95 = arith.constant 0 : index
    %190 = vector.load %arg9[%c0_92, %c0_93, %c0_94, %c0_95] : memref<1x1x256x256xbf16, #tpu.memory_space<vmem>>, vector<1x1x256x256xbf16>
    %191 = vector.shape_cast %190 : vector<1x1x256x256xbf16> to vector<256x256xbf16>
    %192 = vector.shape_cast %189 : vector<256x256xbf16> to vector<1x1x256x256xbf16>
    tpu.vector_store %arg9[%c0_92, %c0_93, %c0_94, %c0_95], %192 {strides = array<i32>} : memref<1x1x256x256xbf16, #tpu.memory_space<vmem>>, vector<1x1x256x256xbf16>,
    return
  }
  func.func @transform_0(%arg0: i32, %arg1: i32) -> (i32, i32, i32, i32) {
    %c0_i32 = arith.constant 0 : i32
    %c0_i32_0 = arith.constant 0 : i32
    %c0_i32_1 = arith.constant 0 : i32
    return %arg0, %c0_i32, %arg1, %c0_i32_0 : i32, i32, i32, i32
  }
  func.func @transform_1(%arg0: i32, %arg1: i32) -> (i32, i32, i32, i32) {
    %c0_i32 = arith.constant 0 : i32
    %c0_i32_0 = arith.constant 0 : i32
    %c0_i32_1 = arith.constant 0 : i32
    %c0_i32_2 = arith.constant 0 : i32
    return %arg0, %c0_i32, %c0_i32_0, %c0_i32_1 : i32, i32, i32, i32
  }
  func.func @transform_2(%arg0: i32, %arg1: i32) -> (i32, i32) {
    %c0_i32 = arith.constant 0 : i32
    %c0_i32_0 = arith.constant 0 : i32
    return %arg1, %c0_i32 : i32, i32
  }
  func.func @transform_3(%arg0: i32, %arg1: i32) -> (i32, i32) {
    %c0_i32 = arith.constant 0 : i32
    %c0_i32_0 = arith.constant 0 : i32
    %c0_i32_1 = arith.constant 0 : i32
    return %c0_i32, %c0_i32_0 : i32, i32
  }
  func.func @transform_4(%arg0: i32, %arg1: i32) -> (i32, i32, i32) {
    %c0_i32 = arith.constant 0 : i32
    %c0_i32_0 = arith.constant 0 : i32
    %c0_i32_1 = arith.constant 0 : i32
    return %arg1, %c0_i32, %c0_i32_0 : i32, i32, i32
  }
  func.func @transform_5(%arg0: i32, %arg1: i32) -> (i32, i32, i32, i32) {
    %c0_i32 = arith.constant 0 : i32
    %c0_i32_0 = arith.constant 0 : i32
    %c0_i32_1 = arith.constant 0 : i32
    %c0_i32_2 = arith.constant 0 : i32
    return %c0_i32, %c0_i32_0, %arg1, %c0_i32_1 : i32, i32, i32, i32
  }
  func.func @transform_6(%arg0: i32, %arg1: i32) -> (i32, i32, i32, i32) {
    %c0_i32 = arith.constant 0 : i32
    %c0_i32_0 = arith.constant 0 : i32
    %c0_i32_1 = arith.constant 0 : i32
    return %arg0, %c0_i32, %arg1, %c0_i32_0 : i32, i32, i32, i32
  }
  func.func @transform_7(%arg0: i32, %arg1: i32) -> (i32, i32, i32, i32) {
    %c0_i32 = arith.constant 0 : i32
    %c0_i32_0 = arith.constant 0 : i32
    %c0_i32_1 = arith.constant 0 : i32
    return %arg0, %c0_i32, %arg1, %c0_i32_0 : i32, i32, i32, i32
  }
}

</mosaic_0001>

<bundles_post_ra>
// kernel: blender_for_train_forward.1
= control target key start
LH: loop header
LB: loop body
LE: loop exit
PB: predicated region body
PF: predicated region fallthrough
CT: control target
= control target key end

     0   :  { %13 = vsyncpa [#allocation3], 0  ;;  %s15744_s0 = inlined_call_operand.vmem [shape: bf16[2,3,256,256], index: 0, kind: input, shape index: {}]   ;;  %s15745_s1 = inlined_call_operand.vmem [shape: bf16[2,3,128,128], index: 1, kind: input, shape index: {}]   ;;  %s15746_s2 = inlined_call_operand.vmem [shape: bf16[256,128], index: 2, kind: input, shape index: {}]   ;;  %s15747_s3 = inlined_call_operand.vmem [shape: bf16[128,256], index: 3, kind: input, shape index: {}]   ;;  %s15748_s4 = inlined_call_operand.vmem [shape: bf16[1,8,128], index: 4, kind: input, shape index: {}]   ;;  %s15749_s5 = inlined_call_operand.vmem [shape: bf16[1,1,256,256], index: 5, kind: input, shape index: {}]   ;;  %s15750_s6 = inlined_call_operand.hbm [shape: bf16[2,3,256,256], index: 6, kind: output, shape index: {0}]   ;;  %s15751_s7 = inlined_call_operand.hbm [shape: bf16[2,1,256,256], index: 7, kind: output, shape index: {1}]  }
   0x1   :  { %15 = vsyncpa [#allocation3 + $0x1], 0 }
   0x2   :  { %16 = vsyncpa [#allocation5], 0 }
   0x3   :  { %18 = vsyncpa [#allocation5 + $0x1], 0  ;;  %s9125_s24 = smov 0   ;;  %s9127_s25 = smov 0  }
   0x4   :  { %s9129_s26 = smov 0   ;;  %s9131_s27 = smov 0  }
   0x5   :  { %s9133_s28 = smov 0   ;;  %s9135_s29 = smov 0  }
   0x6 LB: > { %s7432_s30 = sadd.s32 4294967295, %s9074_s29   ;;  %s7433_s8 = sadd.s32 4294967294, %s9074_s29   ;;  %s9074_s29 = sphi %s9135_s29, %s24_s29   ;;  %s9070_s28 = sphi %s9133_s28, %s18130_s28   ;;  %s9066_s27 = sphi %s9131_s27, %s18129_s27   ;;  %s9062_s26 = sphi %s9129_s26, %s18128_s26   ;;  %s9058_s25 = sphi %s9127_s25, %s18127_s25   ;;  %s9054_s24 = sphi %s9125_s24, %s18126_s24  }
   0x7   : > { %s36_s9 = sadd.s32 1, %s9070_s28  ;;  %s198_s10 = sadd.s32 1, %s9062_s26 }
   0x8   : > { %p38_p0 = scmp.ge.s32.totalorder %s36_s9, 2  ;;  %p208_p1 = scmp.ne.s32.totalorder %s9062_s26, %s9058_s25 }
   0x9   : > { %p209_p2 = scmp.eq.s32.totalorder %s7432_s30, 1  ;;  %p214_p3 = scmp.ne.s32.totalorder %s9058_s25, %s9054_s24 }
   0xa   : > { %s18132_s9 = smov (%p38_p0, %s36_s9), 0  ;;  %p215_p5 = scmp.eq.s32.totalorder %s7433_s8, 1 }
   0xb   : > { %p9165_p4 = por %p209_p2, %p208_p1  ;;  %s193_s12 = ssub.s32 %s9070_s28, %s18132_s9 }
   0xc   : > { %p7439_p6 = scmp.ge.s32.totalorder %s9074_s29, 1  ;;  %p196_p7 = scmp.eq.s32.totalorder %s193_s12, 0 }
   0xd   : > { %p9172_p8 = por %p215_p5, %p214_p3  ;;  %p312_p9 = scmp.lt.s32.totalorder %s9074_s29, 3 }
   0xe   : > { %s9178_s14 = scalar_select %p196_p7, %s9062_s26, %s198_s10  }
   0xf   : > { %p313_p10 = pnand %p7439_p6, %p312_p9 }
  0x11   : > { %316 = sbr.rel (%p313_p10) target bundleno = 1589 (0x635), region = 44 }
  0x18   : > { %p375_p11 = scmp.lt.s32.totalorder %s9066_s27, 1  ;;  %v9184_v0 = vld [vmem:[%s15746_s2] sm:$0xff]   ;;  %v9246_v11 = vld [vmem:[%s15747_s3 + $0x14] ss:$8 sps:$4 sm:$0xff]   ;;  %v9256_v13 = vld [vmem:[%s15747_s3 + $0x10] ss:$8 sps:$4 sm:$0xff]  }
  0x19   : > { %8593 = vmatprep.mubr.bf16.mxu0 %v9184_v0  ;;  %v9236_v9 = vld [vmem:[%s15747_s3 + $0x4] ss:$8 sps:$4 sm:$0xff]   ;;  %v9241_v10 = vld [vmem:[%s15747_s3] ss:$8 sps:$4 sm:$0xff]   ;;  %v9273_v16 = vld [vmem:[%s15746_s2 + $0x10] sm:$0xff]   ;;  %v15761_v49 = vmov 0  }
  0x1a   : > { %s9187_s17 = scalar_select %p375_p11, %s9066_s27, 1  ;;  %908 = vmatprep.subr.bf16.mxu1 %v9236_v9  ;;  %v9261_v14 = vld [vmem:[%s15746_s2 + $0x8] sm:$0xff]   ;;  %v9285_v19 = vld [vmem:[%s15747_s3 + $0x34] ss:$8 sps:$4 sm:$0xff]   ;;  %v9294_v21 = vld [vmem:[%s15747_s3 + $0x30] ss:$8 sps:$4 sm:$0xff]   ;;  %940 = vmatprep.mubr.bf16.mxu1 %v15761_v49 }
  0x1b   : > { %909 = vmatpush1.bf16.msra.mxu1 %v9241_v10  ;;  %v9267_v15 = vld [vmem:[%s15747_s3 + $0x24] ss:$8 sps:$4 sm:$0xff]   ;;  %v9279_v18 = vld [vmem:[%s15747_s3 + $0x20] ss:$8 sps:$4 sm:$0xff]   ;;  %v9299_v22 = vld [vmem:[%s15746_s2 + $0x18] sm:$0xff]   ;;  %vm9078_vm0 = vmmov 0  }
  0x1c   : > { %s8783_s18 = smul.u32 192, %s9187_s17  ;;  %910 = vmatprep.subr.bf16.mxu1 %v9246_v11  ;;  %v9304_v23 = vld [vmem:[%s15747_s3 + $0x44] ss:$8 sps:$4 sm:$0xff]   ;;  %v9318_v26 = vld [vmem:[%s15747_s3 + $0x40] ss:$8 sps:$4 sm:$0xff]   ;;  %v9349_v32 = vld [vmem:[%s15746_s2 + $0x30] sm:$0xff]  }
  0x1d   : > { %v9311_v24 = vld [vmem:[%s15746_s2 + $0x20] sm:$0xff]   ;;  %v9325_v27 = vld [vmem:[%s15747_s3 + $0x54] ss:$8 sps:$4 sm:$0xff]   ;;  %v9333_v29 = vld [vmem:[%s15747_s3 + $0x50] ss:$8 sps:$4 sm:$0xff]   ;;  %s9080_s30 = smov 1  }
  0x1e   : > { %s9194_s21 = scalar_lea.vmem %s15745_s1, %s8783_s18  ;;  %v9338_v30 = vld [vmem:[%s15746_s2 + $0x28] sm:$0xff]   ;;  %v9366_v36 = vld [vmem:[%s15746_s2 + $0x38] sm:$0xff]   ;;  %v9371_v37 = vld [vmem:[%s15746_s2 + $0x40] sm:$0xff]   ;;  %s8782_s18 = smul.u32 768, %s9187_s17 }
  0x1f   : > { %v9197_v1 = vld [vmem:[%s9194_s21] sm:$0xff]   ;;  %v9200_v2 = vld [vmem:[%s9194_s21 + $0x8] sm:$0xff]   ;;  %v9206_v3 = vld [vmem:[%s9194_s21 + $0x10] sm:$0xff]   ;;  %911 = vmatpush1.bf16.msra.mxu1 %v9256_v13  ;;  %s13190_s16 = sand.u32 1, %s9058_s25   ;;  %s8477_s8 = sshll.u32 %s9066_s27, 12 }
  0x20   : > { %8577 = vmatprep.subr.bf16.mxu0 %v9197_v1  ;;  %v9211_v4 = vld [vmem:[%s9194_s21 + $0x18] sm:$0xff]   ;;  %v9216_v5 = vld [vmem:[%s9194_s21 + $0x20] sm:$0xff]   ;;  %v9221_v6 = vld [vmem:[%s9194_s21 + $0x28] sm:$0xff]   ;;  %912 = vmatprep.subr.bf16.mxu1 %v9267_v15  ;;  %s10302_s22 = scalar_lea.vmem %s15744_s0, %s8782_s18  ;;  %s7440_s18 = sshll.u32 %s13190_s16, 8 }
  0x21   : > { %8578 = vmatpush3.bf16.msra.mxu0 %v9197_v1  ;;  %v9226_v7 = vld [vmem:[%s9194_s21 + $0x30] sm:$0xff]   ;;  %v9230_v8 = vld [vmem:[%s9194_s21 + $0x38] sm:$0xff]   ;;  %v8870_v12 = vld [vmem:[%s9194_s21 + $0x40] sm:$0xff]   ;;  %s13269_s12 = scalar_lea.vmem [#allocation4], %s7440_s18  ;;  %s8781_s15 = smul.u32 768, %s13190_s16 }
  0x22   : > { %8579 = vmatprep.subr.bf16.mxu0 %v9200_v2  ;;  %v8871_v17 = vld [vmem:[%s9194_s21 + $0x48] sm:$0xff]   ;;  %v8874_v20 = vld [vmem:[%s9194_s21 + $0x50] sm:$0xff]   ;;  %v8875_v25 = vld [vmem:[%s9194_s21 + $0x58] sm:$0xff]   ;;  %s7258_s19 = sshll.u32 %s13269_s12, 4  ;;  %s15626_s18 = scalar_lea.hbm %s15751_s7, %s8477_s8  ;;  %s15628_s19 = int_to_ptr.vmem [resolvable:$true] %s7258_s19 }
  0x23   : > { %913 = vmatpush1.bf16.msra.mxu1 %v9279_v18  ;;  %v8878_v28 = vld [vmem:[%s9194_s21 + $0x60] sm:$0xff]   ;;  %v8879_v33 = vld [vmem:[%s9194_s21 + $0x68] sm:$0xff]   ;;  %v8882_v35 = vld [vmem:[%s9194_s21 + $0x70] sm:$0xff]   ;;  %s13318_s10 = scalar_lea.vmem [#allocation2], %s8781_s15  ;;  %s8964_s17 = scalar_lea.vmem %s15628_s19, 4096 }
  0x24   : > { %914 = vmatprep.subr.bf16.mxu1 %v9285_v19  ;;  %v9344_v31 = vld [vmem:[%s15747_s3 + $0x64] ss:$8 sps:$4 sm:$0xff]   ;;  %v9356_v34 = vld [vmem:[%s15747_s3 + $0x60] ss:$8 sps:$4 sm:$0xff]   ;;  %v8883_v38 = vld [vmem:[%s9194_s21 + $0x78] sm:$0xff]   ;;  %p8965_p12 = scmp.ne.s32.totalorder %s15628_s19, %s8964_s17 }
  0x25   : > { %8580 = vmatpush3.bf16.msra.mxu0 %v9200_v2  ;;  %v9379_v39 = vld [vmem:[%s15746_s2 + $0x48] sm:$0xff]   ;;  %v9384_v40 = vld [vmem:[%s15746_s2 + $0x50] sm:$0xff]   ;;  %v9392_v41 = vld [vmem:[%s15746_s2 + $0x58] sm:$0xff]  }
  0x26   : > { %8581 = vmatprep.subr.bf16.mxu0 %v9206_v3  ;;  %v9397_v42 = vld [vmem:[%s15746_s2 + $0x60] sm:$0xff]   ;;  %v9404_v43 = vld [vmem:[%s15746_s2 + $0x68] sm:$0xff]   ;;  %v9409_v44 = vld [vmem:[%s15746_s2 + $0x70] sm:$0xff]   ;;  %p8966_p13 = pnand %p8965_p12, %p9165_p4 }
  0x27   : > { %915 = vmatpush1.bf16.msra.mxu1 %v9294_v21  ;;  %16238 = vst [vmem:[#allocation8_spill] sm:$0xff] %v9404_v43  ;;  %16239 = vst [vmem:[#allocation9_spill] sm:$0xff] %v9409_v44  ;;  %v9416_v45 = vld [vmem:[%s15746_s2 + $0x78] sm:$0xff]   ;;  %v8908_v48 = vld [vmem:[%s9194_s21 + $0x80] sm:$0xff]  }
  0x28   : > { %916 = vmatprep.subr.bf16.mxu1 %v9304_v23  ;;  %16240 = vst [vmem:[#allocation10_spill] sm:$0xff] %v9416_v45  ;;  %v9439_v46 = vld [vmem:[%s15747_s3 + $0x74] ss:$8 sps:$4 sm:$0xff]   ;;  %v9444_v47 = vld [vmem:[%s15747_s3 + $0x70] ss:$8 sps:$4 sm:$0xff]   ;;  %v8909_v56 = vld [vmem:[%s9194_s21 + $0x88] sm:$0xff]   ;;  %p8967_p0 = pneg %p8966_p13 }
  0x29   : > { %8582 = vmatpush3.bf16.msra.mxu0 %v9206_v3  ;;  %v8910_v58 = vld [vmem:[%s9194_s21 + $0x90] sm:$0xff]  }
  0x2a   : > { %8583 = vmatprep.subr.bf16.mxu0 %v9211_v4 }
  0x2b   : > { %917 = vmatpush1.bf16.msra.mxu1 %v9318_v26 }
  0x2c   : > { %918 = vmatprep.subr.bf16.mxu1 %v9325_v27 }
  0x2d   : > { %8584 = vmatpush3.bf16.msra.mxu0 %v9211_v4 }
  0x2e   : > { %8585 = vmatprep.subr.bf16.mxu0 %v9216_v5 }
  0x2f   : > { %919 = vmatpush1.bf16.msra.mxu1 %v9333_v29 }
  0x30   : > { %920 = vmatprep.subr.bf16.mxu1 %v9344_v31 }
  0x31   : > { %8586 = vmatpush3.bf16.msra.mxu0 %v9216_v5 }
  0x32   : > { %8587 = vmatprep.subr.bf16.mxu0 %v9221_v6 }
  0x33   : > { %921 = vmatpush1.bf16.msra.mxu1 %v9356_v34 }
  0x34   : > { %922 = vmatprep.subr.bf16.mxu1 %v9439_v46 }
  0x35   : > { %8588 = vmatpush3.bf16.msra.mxu0 %v9221_v6 }
  0x36   : > { %8589 = vmatprep.subr.bf16.mxu0 %v9226_v7 }
  0x37   : > { %923 = vmatpush1.bf16.msra.mxu1 %v9444_v47 }
  0x38   : > { %8673 = vmatprep.subr.bf16.mxu1 %v8908_v48 }
  0x39   : > { %8590 = vmatpush3.bf16.msra.mxu0 %v9226_v7 }
  0x3a   : > { %8591 = vmatprep.subr.bf16.mxu0 %v9230_v8 }
  0x3d   : > { %8592 = vmatpush3.bf16.msra.mxu0 %v9230_v8 }
  0x3e   : > { %8625 = vmatprep.subr.bf16.mxu0 %v8870_v12 }
  0x40   : > { %8594 = vmatmul.mubr.bf16.vlgmr.msra.gmra.mrb[0].mxu0 %v9261_v14 }
  0x41   : > { %8597 = vmatprep.mubr.bf16.mxu0 %v9273_v16  ;;  %8626 = vmatpush3.bf16.msra.mxu0 %v8870_v12  ;;  %v8911_v12 = vld [vmem:[%s9194_s21 + $0x98] sm:$0xff]  }
  0x42   : > { %8627 = vmatprep.subr.bf16.mxu0 %v8871_v17 }
  0x45   : > { %8628 = vmatpush3.bf16.msra.mxu0 %v8871_v17 }
  0x46   : > { %8629 = vmatprep.subr.bf16.mxu0 %v8874_v20 }
  0x48   : > { %8598 = vmatmul.mubr.bf16.gmra.mrb[4].mxu0 %v9299_v22 }
  0x49   : > { %8601 = vmatprep.mubr.bf16.mxu0 %v9311_v24  ;;  %8630 = vmatpush3.bf16.msra.mxu0 %v8874_v20  ;;  %v8912_v20 = vld [vmem:[%s9194_s21 + $0xa0] sm:$0xff]  }
  0x4a   : > { %8631 = vmatprep.subr.bf16.mxu0 %v8875_v25 }
  0x4d   : > { %8632 = vmatpush3.bf16.msra.mxu0 %v8875_v25  ;;  %v15752_v25 = vmov 0.0  }
  0x4e   : > { %8633 = vmatprep.subr.bf16.mxu0 %v8878_v28 }
  0x50   : > { %8602 = vmatmul.mubr.bf16.gmra.mrb[8].mxu0 %v9338_v30 }
  0x51   : > { %8605 = vmatprep.mubr.bf16.mxu0 %v9349_v32  ;;  %8634 = vmatpush3.bf16.msra.mxu0 %v8878_v28 }
  0x52   : > { %8635 = vmatprep.subr.bf16.mxu0 %v8879_v33 }
  0x55   : > { %8636 = vmatpush3.bf16.msra.mxu0 %v8879_v33 }
  0x56   : > { %8637 = vmatprep.subr.bf16.mxu0 %v8882_v35 }
  0x58   : > { %8606 = vmatmul.mubr.bf16.gmra.mrb[12].mxu0 %v9366_v36 }
  0x59   : > { %8609 = vmatprep.mubr.bf16.mxu0 %v9371_v37  ;;  %8638 = vmatpush3.bf16.msra.mxu0 %v8882_v35 }
  0x5a   : > { %8639 = vmatprep.subr.bf16.mxu0 %v8883_v38 }
  0x5d   : > { %8640 = vmatpush3.bf16.msra.mxu0 %v8883_v38 }
  0x5e   : > { %1582 = vmatprep.subr.bf16.mxu0 %v9236_v9 }
  0x60   : > { %8610 = vmatmul.mubr.bf16.gmra.mrb[16].mxu0 %v9379_v39 }
  0x61   : > { %8613 = vmatprep.mubr.bf16.mxu0 %v9384_v40 }
  0x68   : > { %8614 = vmatmul.mubr.bf16.gmra.mrb[20].mxu0 %v9392_v41 }
  0x69   : > { %8617 = vmatprep.mubr.bf16.mxu0 %v9397_v42 }
  0x70   : > { %8618 = vmatmul.mubr.bf16.gmra.mrb[24].mxu0 %v9404_v43 }
  0x71   : > { %8621 = vmatprep.mubr.bf16.mxu0 %v9409_v44 }
  0x78   : > { %8622 = vmatmul.mubr.bf16.gmra.mrb[28].mxu0 %v9416_v45 }
  0x79   : > { %8641 = vmatprep.mubr.bf16.mxu0 %v9184_v0 }
  0x80   : > { %8642 = vmatmul.mubr.bf16.vlgmr.msra.gmra.mrb[32].mxu0 %v9261_v14 }
  0x81   : > { %8645 = vmatprep.mubr.bf16.mxu0 %v9273_v16  ;;  %1583 = vmatpush1.bf16.msra.mxu0 %v9241_v10 }
  0x82   : > { %1584 = vmatprep.subr.bf16.mxu0 %v9246_v11 }
  0x85   : > { %1585 = vmatpush1.bf16.msra.mxu0 %v9256_v13 }
  0x86   : > { %1586 = vmatprep.subr.bf16.mxu0 %v9267_v15 }
  0x88   : > { %8646 = vmatmul.mubr.bf16.gmra.mrb[36].mxu0 %v9299_v22 }
  0x89   : > { %8649 = vmatprep.mubr.bf16.mxu0 %v9311_v24  ;;  %1587 = vmatpush1.bf16.msra.mxu0 %v9279_v18 }
  0x8a   : > { %1588 = vmatprep.subr.bf16.mxu0 %v9285_v19 }
  0x8d   : > { %1589 = vmatpush1.bf16.msra.mxu0 %v9294_v21 }
  0x8e   : > { %1590 = vmatprep.subr.bf16.mxu0 %v9304_v23 }
  0x90   : > { %8650 = vmatmul.mubr.bf16.gmra.mrb[40].mxu0 %v9338_v30 }
  0x91   : > { %8653 = vmatprep.mubr.bf16.mxu0 %v9349_v32  ;;  %1591 = vmatpush1.bf16.msra.mxu0 %v9318_v26 }
  0x92   : > { %1592 = vmatprep.subr.bf16.mxu0 %v9325_v27 }
  0x95   : > { %1593 = vmatpush1.bf16.msra.mxu0 %v9333_v29 }
  0x96   : > { %1594 = vmatprep.subr.bf16.mxu0 %v9344_v31 }
  0x98   : > { %8654 = vmatmul.mubr.bf16.gmra.mrb[44].mxu0 %v9366_v36 }
  0x99   : > { %8657 = vmatprep.mubr.bf16.mxu0 %v9371_v37  ;;  %1595 = vmatpush1.bf16.msra.mxu0 %v9356_v34 }
  0x9a   : > { %1596 = vmatprep.subr.bf16.mxu0 %v9439_v46 }
  0x9d   : > { %1597 = vmatpush1.bf16.msra.mxu0 %v9444_v47 }
  0x9e   : > { %8721 = vmatprep.subr.bf16.mxu0 %v15752_v25 }
  0xa0   : > { %8658 = vmatmul.mubr.bf16.gmra.mrb[48].mxu0 %v9379_v39 }
  0xa1   : > { %8661 = vmatprep.mubr.bf16.mxu0 %v9384_v40 }
  0xa8   : > { %8662 = vmatmul.mubr.bf16.gmra.mrb[52].mxu0 %v9392_v41 }
  0xa9   : > { %8665 = vmatprep.mubr.bf16.mxu0 %v9397_v42 }
  0xb0   : > { %8666 = vmatmul.mubr.bf16.gmra.mrb[56].mxu0 %v9404_v43 }
  0xb1   : > { %8669 = vmatprep.mubr.bf16.mxu0 %v9409_v44 }
  0xb8   : > { %8670 = vmatmul.mubr.bf16.gmra.mrb[60].mxu0 %v9416_v45 }
  0xb9   : > { %1614 = vmatprep.mubr.bf16.mxu0 %v15761_v49 }
 0x113   : > { %v8595_v50 = vpop.f32.mrb[0].mxu0 }
 0x114   : > { %v685_v51 = vpop.f32.mrb[1].mxu0 }
 0x115   : > { %v8596_v52 = vpop.f32.mrb[2].mxu0 }
 0x116   : > { %v813_v53 = vpack.c.bf16 %v8596_v52, %v8595_v50  ;;  %v688_v54 = vpop.f32.mrb[3].mxu0  ;;  %v8913_v50 = vld [vmem:[%s9194_s21 + $0xa8] sm:$0xff]   ;;  %v8914_v52 = vld [vmem:[%s9194_s21 + $0xb0] sm:$0xff]  }
 0x117   : > { %v812_v55 = vpack.c.bf16 %v688_v54, %v685_v51 }
 0x119   : > { %941 = vmatmul.mubr.bf16.vlgmr.msra.gmra.mrb[0].mxu1 %v812_v55 }
 0x11a   : > { %8674 = vmatpush3.bf16.msra.mxu1 %v8908_v48  ;;  %950 = vmatprep.mubr.bf16.mxu1 %v15761_v49 }
 0x11b   : > { %v8599_v57 = vpop.f32.mrb[4].mxu0  ;;  %8675 = vmatprep.subr.bf16.mxu1 %v8909_v56 }
 0x11c   : > { %v701_v59 = vpop.f32.mrb[5].mxu0 }
 0x11d   : > { %v8600_v60 = vpop.f32.mrb[6].mxu0 }
 0x11e   : > { %v815_v61 = vpack.c.bf16 %v8600_v60, %v8599_v57  ;;  %v704_v62 = vpop.f32.mrb[7].mxu0  ;;  %8676 = vmatpush3.bf16.msra.mxu1 %v8909_v56 }
 0x11f   : > { %v814_v63 = vpack.c.bf16 %v704_v62, %v701_v59  ;;  %8677 = vmatprep.subr.bf16.mxu1 %v8910_v58 }
 0x121   : > { %951 = vmatmul.mubr.bf16.gmra.mrb[4].mxu1 %v813_v53 }
 0x122   : > { %960 = vmatprep.mubr.bf16.mxu1 %v15761_v49  ;;  %8678 = vmatpush3.bf16.msra.mxu1 %v8910_v58  ;;  %v8915_v58 = vld [vmem:[%s9194_s21 + $0xb8] sm:$0xff]  }
 0x123   : > { %v8603_v17 = vpop.f32.mrb[8].mxu0  ;;  %8679 = vmatprep.subr.bf16.mxu1 %v8911_v12 }
 0x124   : > { %v717_v28 = vpop.f32.mrb[9].mxu0 }
 0x125   : > { %v8604_v33 = vpop.f32.mrb[10].mxu0 }
 0x126   : > { %v817_v35 = vpack.c.bf16 %v8604_v33, %v8603_v17  ;;  %v720_v38 = vpop.f32.mrb[11].mxu0  ;;  %8680 = vmatpush3.bf16.msra.mxu1 %v8911_v12 }
 0x127   : > { %v816_v48 = vpack.c.bf16 %v720_v38, %v717_v28  ;;  %8681 = vmatprep.subr.bf16.mxu1 %v8912_v20 }
 0x129   : > { %961 = vmatmul.mubr.bf16.gmra.mrb[8].mxu1 %v814_v63 }
 0x12a   : > { %970 = vmatprep.mubr.bf16.mxu1 %v15761_v49  ;;  %8682 = vmatpush3.bf16.msra.mxu1 %v8912_v20 }
 0x12b   : > { %v8607_v51 = vpop.f32.mrb[12].mxu0  ;;  %8683 = vmatprep.subr.bf16.mxu1 %v8913_v50 }
 0x12c   : > { %v733_v53 = vpop.f32.mrb[13].mxu0 }
 0x12d   : > { %v8608_v54 = vpop.f32.mrb[14].mxu0 }
 0x12e   : > { %v819_v55 = vpack.c.bf16 %v8608_v54, %v8607_v51  ;;  %v736_v56 = vpop.f32.mrb[15].mxu0  ;;  %8684 = vmatpush3.bf16.msra.mxu1 %v8913_v50 }
 0x12f   : > { %v818_v57 = vpack.c.bf16 %v736_v56, %v733_v53  ;;  %8685 = vmatprep.subr.bf16.mxu1 %v8914_v52 }
 0x131   : > { %971 = vmatmul.mubr.bf16.gmra.mrb[12].mxu1 %v815_v61 }
 0x132   : > { %980 = vmatprep.mubr.bf16.mxu1 %v15761_v49  ;;  %8686 = vmatpush3.bf16.msra.mxu1 %v8914_v52 }
 0x133   : > { %v8611_v59 = vpop.f32.mrb[16].mxu0  ;;  %8687 = vmatprep.subr.bf16.mxu1 %v8915_v58 }
 0x134   : > { %v749_v60 = vpop.f32.mrb[17].mxu0 }
 0x135   : > { %v8612_v62 = vpop.f32.mrb[18].mxu0 }
 0x136   : > { %v821_v63 = vpack.c.bf16 %v8612_v62, %v8611_v59  ;;  %v752_v12 = vpop.f32.mrb[19].mxu0  ;;  %8688 = vmatpush3.bf16.msra.mxu1 %v8915_v58 }
 0x137   : > { %v820_v17 = vpack.c.bf16 %v752_v12, %v749_v60  ;;  %2256 = vmatprep.subr.bf16.mxu1 %v9236_v9  ;;  %v16241_v12 = vmov 0.0  }
 0x139   : > { %981 = vmatmul.mubr.bf16.gmra.mrb[16].mxu1 %v816_v48 }
 0x13a   : > { %990 = vmatprep.mubr.bf16.mxu1 %v15761_v49 }
 0x13b   : > { %v9479_v20 = vpop.f32.mrb[20].mxu0 }
 0x13c   : > { %v765_v28 = vpop.f32.mrb[21].mxu0 }
 0x13d   : > { %v9481_v61 = vpop.f32.mrb[22].mxu0 }
 0x13e   : > { %v768_v38 = vpop.f32.mrb[23].mxu0 }
 0x13f   : > { %v822_v50 = vpack.c.bf16 %v768_v38, %v765_v28 }
 0x141   : > { %991 = vmatmul.mubr.bf16.gmra.mrb[20].mxu1 %v817_v35 }
 0x142   : > { %1000 = vmatprep.mubr.bf16.mxu1 %v15761_v49 }
 0x143   : > { %v9486_v51 = vpop.f32.mrb[24].mxu0 }
 0x144   : > { %v9488_v52 = vpop.f32.mrb[25].mxu0 }
 0x145   : > { %v9490_v48 = vpop.f32.mrb[26].mxu0 }
 0x146   : > { %v9494_v54 = vpop.f32.mrb[27].mxu0 }
 0x149   : > { %1001 = vmatmul.mubr.bf16.gmra.mrb[24].mxu1 %v818_v57 }
 0x14a   : > { %1010 = vmatprep.mubr.bf16.mxu1 %v15761_v49 }
 0x14b   : > { %v9499_v35 = vpop.f32.mrb[28].mxu0 }
 0x14c   : > { %v9501_v58 = vpop.f32.mrb[29].mxu0 }
 0x14d   : > { %v9503_v59 = vpop.f32.mrb[30].mxu0 }
 0x14e   : > { %v9507_v62 = vpop.f32.mrb[31].mxu0 }
 0x151   : > { %1011 = vmatmul.mubr.bf16.gmra.mrb[28].mxu1 %v819_v55 }
 0x152   : > { %1020 = vmatprep.mubr.bf16.mxu1 %v15761_v49 }
 0x153   : > { %v8643_v57 = vpop.f32.mrb[32].mxu0 }
 0x154   : > { %v1439_v28 = vpop.f32.mrb[33].mxu0 }
 0x155   : > { %v8644_v38 = vpop.f32.mrb[34].mxu0 }
 0x156   : > { %v1567_v53 = vpack.c.bf16 %v8644_v38, %v8643_v57  ;;  %v1442_v56 = vpop.f32.mrb[35].mxu0 }
 0x157   : > { %v1566_v33 = vpack.c.bf16 %v1442_v56, %v1439_v28 }
 0x159   : > { %1021 = vmatmul.mubr.bf16.gmra.mrb[32].mxu1 %v820_v17  ;;  %1615 = vmatmul.mubr.bf16.vlgmr.msra.gmra.mrb[64].mxu0 %v1566_v33 }
 0x15a   : > { %1030 = vmatprep.mubr.bf16.mxu1 %v15761_v49  ;;  %1624 = vmatprep.mubr.bf16.mxu0 %v15761_v49 }
 0x15b   : > { %v8647_v60 = vpop.f32.mrb[36].mxu0  ;;  %8722 = vmatpush3.bf16.msra.mxu0 %v9197_v1 }
 0x15c   : > { %v1455_v25 = vpop.f32.mrb[37].mxu0  ;;  %8723 = vmatprep.subr.bf16.mxu0 %v16241_v12 }
 0x15d   : > { %v8648_v55 = vpop.f32.mrb[38].mxu0 }
 0x15e   : > { %v1569_v45 = vpack.c.bf16 %v8648_v55, %v8647_v60  ;;  %v1458_v44 = vpop.f32.mrb[39].mxu0 }
 0x15f   : > { %v1568_v43 = vpack.c.bf16 %v1458_v44, %v1455_v25  ;;  %8724 = vmatpush3.bf16.msra.mxu0 %v9200_v2 }
 0x160   : > { %8725 = vmatprep.subr.bf16.mxu0 %v16241_v12 }
 0x161   : > { %1031 = vmatmul.mubr.bf16.gmra.mrb[36].mxu1 %v821_v63  ;;  %1625 = vmatmul.mubr.bf16.gmra.mrb[68].mxu0 %v1567_v53 }
 0x162   : > { %1040 = vmatprep.mubr.bf16.mxu1 %v15761_v49  ;;  %1634 = vmatprep.mubr.bf16.mxu0 %v15761_v49 }
 0x163   : > { %v8651_v17 = vpop.f32.mrb[40].mxu0  ;;  %8726 = vmatpush3.bf16.msra.mxu0 %v9206_v3 }
 0x164   : > { %v1471_v1 = vpop.f32.mrb[41].mxu0  ;;  %8727 = vmatprep.subr.bf16.mxu0 %v16241_v12 }
 0x165   : > { %v8652_v33 = vpop.f32.mrb[42].mxu0 }
 0x166   : > { %v1571_v56 = vpack.c.bf16 %v8652_v33, %v8651_v17  ;;  %v1474_v60 = vpop.f32.mrb[43].mxu0 }
 0x167   : > { %v1570_v44 = vpack.c.bf16 %v1474_v60, %v1471_v1  ;;  %8728 = vmatpush3.bf16.msra.mxu0 %v9211_v4  ;;  %v16242_v4 = vpack.c.bf16 %v9481_v61, %v9479_v20 }
 0x168   : > { %8729 = vmatprep.subr.bf16.mxu0 %v16241_v12 }
 0x169   : > { %1041 = vmatmul.mubr.bf16.gmra.mrb[40].mxu1 %v822_v50  ;;  %1635 = vmatmul.mubr.bf16.gmra.mrb[72].mxu0 %v1568_v43 }
 0x16a   : > { %1050 = vmatprep.mubr.bf16.mxu1 %v15761_v49  ;;  %1644 = vmatprep.mubr.bf16.mxu0 %v15761_v49 }
 0x16b   : > { %v8655_v2 = vpop.f32.mrb[44].mxu0  ;;  %8730 = vmatpush3.bf16.msra.mxu0 %v9216_v5 }
 0x16c   : > { %v1487_v3 = vpop.f32.mrb[45].mxu0  ;;  %8731 = vmatprep.subr.bf16.mxu0 %v16241_v12 }
 0x16d   : > { %v8656_v25 = vpop.f32.mrb[46].mxu0 }
 0x16e   : > { %v1573_v63 = vpack.c.bf16 %v8656_v25, %v8655_v2  ;;  %v1490_v53 = vpop.f32.mrb[47].mxu0 }
 0x16f   : > { %v1572_v57 = vpack.c.bf16 %v1490_v53, %v1487_v3  ;;  %8732 = vmatpush3.bf16.msra.mxu0 %v9221_v6  ;;  %v16245_v3 = vpack.c.bf16 %v9507_v62, %v9501_v58 }
 0x170   : > { %8733 = vmatprep.subr.bf16.mxu0 %v16241_v12 }
 0x171   : > { %1051 = vmatmul.mubr.bf16.gmra.mrb[44].mxu1 %v16242_v4  ;;  %1645 = vmatmul.mubr.bf16.gmra.mrb[76].mxu0 %v1569_v45  ;;  %v16243_v45 = vpack.c.bf16 %v9494_v54, %v9488_v52 }
 0x172   : > { %1060 = vmatprep.mubr.bf16.mxu1 %v15761_v49  ;;  %1654 = vmatprep.mubr.bf16.mxu0 %v15761_v49 }
 0x173   : > { %v8659_v5 = vpop.f32.mrb[48].mxu0  ;;  %8734 = vmatpush3.bf16.msra.mxu0 %v9226_v7 }
 0x174   : > { %v1503_v43 = vpop.f32.mrb[49].mxu0  ;;  %8735 = vmatprep.subr.bf16.mxu0 %v16241_v12 }
 0x175   : > { %v8660_v50 = vpop.f32.mrb[50].mxu0 }
 0x176   : > { %v1575_v28 = vpack.c.bf16 %v8660_v50, %v8659_v5  ;;  %v1506_v6 = vpop.f32.mrb[51].mxu0  ;;  %v16246_v5 = vpack.c.bf16 %v9503_v59, %v9499_v35 }
 0x177   : > { %v1574_v38 = vpack.c.bf16 %v1506_v6, %v1503_v43  ;;  %8736 = vmatpush3.bf16.msra.mxu0 %v9230_v8  ;;  %v16244_v8 = vpack.c.bf16 %v9490_v48, %v9486_v51 }
 0x178   : > { %2874 = vmatprep.subr.bf16.mxu0 %v9236_v9 }
 0x179   : > { %1061 = vmatmul.mubr.bf16.gmra.mrb[48].mxu1 %v16243_v45  ;;  %1655 = vmatmul.mubr.bf16.gmra.mrb[80].mxu0 %v1570_v44 }
 0x17a   : > { %1070 = vmatprep.mubr.bf16.mxu1 %v15761_v49  ;;  %1664 = vmatprep.mubr.bf16.mxu0 %v15761_v49 }
 0x17b   : > { %v8663_v7 = vpop.f32.mrb[52].mxu0 }
 0x17c   : > { %v1519_v20 = vpop.f32.mrb[53].mxu0 }
 0x17d   : > { %v8664_v61 = vpop.f32.mrb[54].mxu0 }
 0x17e   : > { %v1577_v55 = vpack.c.bf16 %v8664_v61, %v8663_v7  ;;  %v1522_v17 = vpop.f32.mrb[55].mxu0 }
 0x17f   : > { %v1576_v1 = vpack.c.bf16 %v1522_v17, %v1519_v20 }
 0x181   : > { %1071 = vmatmul.mubr.bf16.gmra.mrb[52].mxu1 %v16244_v8  ;;  %1665 = vmatmul.mubr.bf16.gmra.mrb[84].mxu0 %v1571_v56 }
 0x182   : > { %1080 = vmatprep.mubr.bf16.mxu1 %v15761_v49  ;;  %1674 = vmatprep.mubr.bf16.mxu0 %v15761_v49 }
 0x183   : > { %v8667_v52 = vpop.f32.mrb[56].mxu0 }
 0x184   : > { %v1535_v54 = vpop.f32.mrb[57].mxu0 }
 0x185   : > { %v8668_v33 = vpop.f32.mrb[58].mxu0 }
 0x186   : > { %v1579_v60 = vpack.c.bf16 %v8668_v33, %v8667_v52  ;;  %v1538_v44 = vpop.f32.mrb[59].mxu0 }
 0x187   : > { %v1578_v2 = vpack.c.bf16 %v1538_v44, %v1535_v54 }
 0x189   : > { %1081 = vmatmul.mubr.bf16.gmra.mrb[56].mxu1 %v16245_v3  ;;  %1675 = vmatmul.mubr.bf16.gmra.mrb[88].mxu0 %v1572_v57 }
 0x18a   : > { %1090 = vmatprep.mubr.bf16.mxu1 %v15761_v49  ;;  %1684 = vmatprep.mubr.bf16.mxu0 %v15761_v49 }
 0x18b   : > { %v8671_v51 = vpop.f32.mrb[60].mxu0 }
 0x18c   : > { %v1551_v48 = vpop.f32.mrb[61].mxu0 }
 0x18d   : > { %v8672_v56 = vpop.f32.mrb[62].mxu0 }
 0x18e   : > { %v1581_v25 = vpack.c.bf16 %v8672_v56, %v8671_v51  ;;  %v1554_v53 = vpop.f32.mrb[63].mxu0 }
 0x18f   : > { %v1580_v4 = vpack.c.bf16 %v1554_v53, %v1551_v48 }
 0x191   : > { %1091 = vmatmul.mubr.bf16.gmra.mrb[60].mxu1 %v16246_v5  ;;  %1685 = vmatmul.mubr.bf16.gmra.mrb[92].mxu0 %v1573_v63 }
 0x192   : > { %1694 = vmatprep.mubr.bf16.mxu0 %v15761_v49  ;;  %8689 = vmatprep.mubr.bf16.mxu1 %v9184_v0  ;;  %v16247_v0 = vld [vmem:[#allocation8_spill] sm:$0xff] }
 0x199   : > { %1695 = vmatmul.mubr.bf16.gmra.mrb[96].mxu0 %v1574_v38  ;;  %8690 = vmatmul.mubr.bf16.vlgmr.msra.gmra.mrb[64].mxu1 %v9261_v14  ;;  %v16249_v14 = vld [vmem:[#allocation10_spill] sm:$0xff] }
 0x19a   : > { %1704 = vmatprep.mubr.bf16.mxu0 %v15761_v49  ;;  %8693 = vmatprep.mubr.bf16.mxu1 %v9273_v16  ;;  %v506_v16 = vld [vmem:[%s15748_s4] sm:$0xf] }
 0x19b   : > { %2257 = vmatpush1.bf16.msra.mxu1 %v9241_v10 }
 0x19c   : > { %2258 = vmatprep.subr.bf16.mxu1 %v9246_v11 }
 0x19f   : > { %2259 = vmatpush1.bf16.msra.mxu1 %v9256_v13 }
 0x1a0   : > { %2260 = vmatprep.subr.bf16.mxu1 %v9267_v15 }
 0x1a1   : > { %1705 = vmatmul.mubr.bf16.gmra.mrb[100].mxu0 %v1575_v28  ;;  %8694 = vmatmul.mubr.bf16.gmra.mrb[68].mxu1 %v9299_v22 }
 0x1a2   : > { %1714 = vmatprep.mubr.bf16.mxu0 %v15761_v49  ;;  %8697 = vmatprep.mubr.bf16.mxu1 %v9311_v24 }
 0x1a3   : > { %2261 = vmatpush1.bf16.msra.mxu1 %v9279_v18 }
 0x1a4   : > { %2262 = vmatprep.subr.bf16.mxu1 %v9285_v19 }
 0x1a7   : > { %2263 = vmatpush1.bf16.msra.mxu1 %v9294_v21 }
 0x1a8   : > { %2264 = vmatprep.subr.bf16.mxu1 %v9304_v23 }
 0x1a9   : > { %1715 = vmatmul.mubr.bf16.gmra.mrb[104].mxu0 %v1576_v1  ;;  %8698 = vmatmul.mubr.bf16.gmra.mrb[72].mxu1 %v9338_v30 }
 0x1aa   : > { %1724 = vmatprep.mubr.bf16.mxu0 %v15761_v49  ;;  %8701 = vmatprep.mubr.bf16.mxu1 %v9349_v32 }
 0x1ab   : > { %2265 = vmatpush1.bf16.msra.mxu1 %v9318_v26 }
 0x1ac   : > { %2266 = vmatprep.subr.bf16.mxu1 %v9325_v27 }
 0x1af   : > { %2267 = vmatpush1.bf16.msra.mxu1 %v9333_v29 }
 0x1b0   : > { %2268 = vmatprep.subr.bf16.mxu1 %v9344_v31 }
 0x1b1   : > { %1725 = vmatmul.mubr.bf16.gmra.mrb[108].mxu0 %v1577_v55  ;;  %8702 = vmatmul.mubr.bf16.gmra.mrb[76].mxu1 %v9366_v36 }
 0x1b2   : > { %1734 = vmatprep.mubr.bf16.mxu0 %v15761_v49  ;;  %8705 = vmatprep.mubr.bf16.mxu1 %v9371_v37 }
 0x1b3   : > { %2269 = vmatpush1.bf16.msra.mxu1 %v9356_v34 }
 0x1b4   : > { %2270 = vmatprep.subr.bf16.mxu1 %v9439_v46 }
 0x1b7   : > { %2271 = vmatpush1.bf16.msra.mxu1 %v9444_v47 }
 0x1b8   : > { %2964 = vmatprep.subr.bf16.mxu1 %v9236_v9  ;;  %v16248_v9 = vld [vmem:[#allocation9_spill] sm:$0xff] }
 0x1b9   : > { %1735 = vmatmul.mubr.bf16.gmra.mrb[112].mxu0 %v1578_v2  ;;  %8706 = vmatmul.mubr.bf16.gmra.mrb[80].mxu1 %v9379_v39 }
 0x1ba   : > { %1744 = vmatprep.mubr.bf16.mxu0 %v15761_v49  ;;  %8709 = vmatprep.mubr.bf16.mxu1 %v9384_v40 }
 0x1c1   : > { %1745 = vmatmul.mubr.bf16.gmra.mrb[116].mxu0 %v1579_v60  ;;  %8710 = vmatmul.mubr.bf16.gmra.mrb[84].mxu1 %v9392_v41 }
 0x1c2   : > { %1754 = vmatprep.mubr.bf16.mxu0 %v15761_v49  ;;  %8713 = vmatprep.mubr.bf16.mxu1 %v9397_v42 }
 0x1c9   : > { %1755 = vmatmul.mubr.bf16.gmra.mrb[120].mxu0 %v1580_v4  ;;  %8714 = vmatmul.mubr.bf16.gmra.mrb[88].mxu1 %v16247_v0 }
 0x1ca   : > { %1764 = vmatprep.mubr.bf16.mxu0 %v15761_v49  ;;  %8717 = vmatprep.mubr.bf16.mxu1 %v16248_v9 }
 0x1d1   : > { %1765 = vmatmul.mubr.bf16.gmra.mrb[124].mxu0 %v1581_v25  ;;  %8718 = vmatmul.mubr.bf16.gmra.mrb[92].mxu1 %v16249_v14 }
 0x1d2   : > { %8737 = vmatprep.mubr.msk.bf16.mxu0 %vm9078_vm0, %v16241_v12  ;;  %2288 = vmatprep.mubr.bf16.mxu1 %v15761_v49 }
 0x1d9   : > { %8738 = vmatmul.mubr.bf16.vlgmr.msra.gmra.mrb[128].mxu0 %v506_v16 }
 0x1da   : > { %2875 = vmatpush1.bf16.msra.mxu0 %v9241_v10  ;;  %2906 = vmatprep.mubr.bf16.mxu0 %v15761_v49 }
 0x1db   : > { %2876 = vmatprep.subr.bf16.mxu0 %v9246_v11 }
 0x1de   : > { %2877 = vmatpush1.bf16.msra.mxu0 %v9256_v13 }
 0x1df   : > { %2878 = vmatprep.subr.bf16.mxu0 %v9267_v15 }
 0x1e2   : > { %2879 = vmatpush1.bf16.msra.mxu0 %v9279_v18 }
 0x1e3   : > { %2880 = vmatprep.subr.bf16.mxu0 %v9285_v19 }
 0x1e6   : > { %2881 = vmatpush1.bf16.msra.mxu0 %v9294_v21 }
 0x1e7   : > { %2882 = vmatprep.subr.bf16.mxu0 %v9304_v23 }
 0x1ea   : > { %2883 = vmatpush1.bf16.msra.mxu0 %v9318_v26 }
 0x1eb   : > { %2884 = vmatprep.subr.bf16.mxu0 %v9325_v27 }
 0x1ec   : > { %v942_v10 = vpop.f32.mrb[0].mxu1 }
 0x1ed   : > { %v944_v22 = vpop.f32.mrb[1].mxu1  ;;  %v1101_v50 = vmul.f32 2.0, %v942_v10 }
 0x1ee   : > { %v9614_v24 = vpop.f32.mrb[2].mxu1  ;;  %2885 = vmatpush1.bf16.msra.mxu0 %v9333_v29  ;;  %v1102_v28 = vmul.f32 2.0, %v944_v22 }
 0x1ef   : > { %v9617_v11 = vpop.f32.mrb[3].mxu1  ;;  %2886 = vmatprep.subr.bf16.mxu0 %v9344_v31  ;;  %v9682_v45 = vadd.f32 -1.0, %v1101_v50 }
 0x1f0   : > { %v9686_v55 = vadd.f32 -1.0, %v1102_v28 }
 0x1f1   : > { %v15760_v44 = vclamps-f32 %v9682_v45, 1.0 }
 0x1f2   : > { %2887 = vmatpush1.bf16.msra.mxu0 %v9356_v34  ;;  %v15759_v3 = vclamps-f32 %v9686_v55, 1.0 }
 0x1f3   : > { %2888 = vmatprep.subr.bf16.mxu0 %v9439_v46 }
 0x1f4   : > { %v9622_v13 = vpop.f32.mrb[4].mxu1 }
 0x1f5   : > { %v9624_v15 = vpop.f32.mrb[5].mxu1 }
 0x1f6   : > { %v9626_v18 = vpop.f32.mrb[6].mxu1  ;;  %2889 = vmatpush1.bf16.msra.mxu0 %v9444_v47 }
 0x1f7   : > { %v9629_v19 = vpop.f32.mrb[7].mxu1  ;;  %8741 = vmatprep.subr.bf16.mxu0 %v16241_v12 }
 0x1fc   : > { %v9632_v21 = vpop.f32.mrb[8].mxu1 }
 0x1fd   : > { %v9634_v23 = vpop.f32.mrb[9].mxu1 }
 0x1fe   : > { %v9636_v26 = vpop.f32.mrb[10].mxu1 }
 0x1ff   : > { %v9638_v27 = vpop.f32.mrb[11].mxu1 }
 0x204   : > { %v9640_v29 = vpop.f32.mrb[12].mxu1 }
 0x205   : > { %v9642_v30 = vpop.f32.mrb[13].mxu1 }
 0x206   : > { %v9644_v31 = vpop.f32.mrb[14].mxu1 }
 0x207   : > { %16250 = vst [vmem:[#allocation8_spill] sm:$0xff] %v9644_v31  ;;  %v9646_v32 = vpop.f32.mrb[15].mxu1 }
 0x208   : > { %16251 = vst [vmem:[#allocation9_spill] sm:$0xff] %v9646_v32 }
 0x20c   : > { %v9648_v34 = vpop.f32.mrb[16].mxu1 }
 0x20d   : > { %16252 = vst [vmem:[#allocation10_spill] sm:$0xff] %v9648_v34  ;;  %v9650_v36 = vpop.f32.mrb[17].mxu1 }
 0x20e   : > { %16253 = vst [vmem:[#allocation11_spill] sm:$0xff] %v9650_v36  ;;  %v9652_v37 = vpop.f32.mrb[18].mxu1 }
 0x20f   : > { %16254 = vst [vmem:[#allocation12_spill] sm:$0xff] %v9652_v37  ;;  %v9654_v39 = vpop.f32.mrb[19].mxu1 }
 0x210   : > { %16255 = vst [vmem:[#allocation13_spill] sm:$0xff] %v9654_v39 }
 0x214   : > { %v9656_v40 = vpop.f32.mrb[20].mxu1 }
 0x215   : > { %16256 = vst [vmem:[#allocation14_spill] sm:$0xff] %v9656_v40  ;;  %v9658_v41 = vpop.f32.mrb[21].mxu1 }
 0x216   : > { %16257 = vst [vmem:[#allocation15_spill] sm:$0xff] %v9658_v41  ;;  %v9660_v42 = vpop.f32.mrb[22].mxu1 }
 0x217   : > { %16258 = vst [vmem:[#allocation16_spill] sm:$0xff] %v9660_v42  ;;  %v9662_v46 = vpop.f32.mrb[23].mxu1 }
 0x218   : > { %16259 = vst [vmem:[#allocation17_spill] sm:$0xff] %v9662_v46 }
 0x21c   : > { %v9664_v47 = vpop.f32.mrb[24].mxu1 }
 0x21d   : > { %16260 = vst [vmem:[#allocation18_spill] sm:$0xff] %v9664_v47  ;;  %v9666_v35 = vpop.f32.mrb[25].mxu1 }
 0x21e   : > { %16261 = vst [vmem:[#allocation19_spill] sm:$0xff] %v9666_v35  ;;  %v9668_v58 = vpop.f32.mrb[26].mxu1 }
 0x21f   : > { %16262 = vst [vmem:[#allocation20_spill] sm:$0xff] %v9668_v58  ;;  %v9670_v59 = vpop.f32.mrb[27].mxu1 }
 0x220   : > { %16263 = vst [vmem:[#allocation21_spill] sm:$0xff] %v9670_v59 }
 0x224   : > { %v9672_v62 = vpop.f32.mrb[28].mxu1 }
 0x225   : > { %16264 = vst [vmem:[#allocation22_spill] sm:$0xff] %v9672_v62  ;;  %v9674_v63 = vpop.f32.mrb[29].mxu1 }
 0x226   : > { %16265 = vst [vmem:[#allocation23_spill] sm:$0xff] %v9674_v63  ;;  %v9676_v57 = vpop.f32.mrb[30].mxu1 }
 0x227   : > { %16266 = vst [vmem:[#allocation24_spill] sm:$0xff] %v9676_v57  ;;  %v9678_v43 = vpop.f32.mrb[31].mxu1 }
 0x228   : > { %16267 = vst [vmem:[#allocation25_spill] sm:$0xff] %v9678_v43 }
 0x22c   : > { %v9680_v6 = vpop.f32.mrb[32].mxu1  ;;  %v1616_v38 = vpop.f32.mrb[64].mxu0 }
 0x22d   : > { %16268 = vst [vmem:[#allocation26_spill] sm:$0xff] %v9680_v6  ;;  %v1775_v7 = vmul.f32 2.0, %v1616_v38  ;;  %v9684_v20 = vpop.f32.mrb[33].mxu1  ;;  %v1618_v61 = vpop.f32.mrb[65].mxu0 }
 0x22e   : > { %16269 = vst [vmem:[#allocation27_spill] sm:$0xff] %v9684_v20  ;;  %v1776_v17 = vmul.f32 2.0, %v1618_v61  ;;  %v9688_v1 = vpop.f32.mrb[34].mxu1  ;;  %v9690_v8 = vpop.f32.mrb[66].mxu0 }
 0x22f   : > { %16270 = vst [vmem:[#allocation28_spill] sm:$0xff] %v9688_v1  ;;  %16271 = vst [vmem:[#allocation29_spill] sm:$0xff] %v9690_v8  ;;  %v9692_v52 = vadd.f32 -1.0, %v1775_v7  ;;  %v9694_v54 = vpop.f32.mrb[35].mxu1  ;;  %v9696_v33 = vpop.f32.mrb[67].mxu0 }
 0x230   : > { %16273 = vst [vmem:[#allocation31_spill] sm:$0xff] %v9694_v54  ;;  %16274 = vst [vmem:[#allocation32_spill] sm:$0xff] %v9696_v33  ;;  %v9698_v60 = vadd.f32 -1.0, %v1776_v17 }
 0x231   : > { %16272 = vst [vmem:[#allocation30_spill] sm:$0xff] %v9692_v52  ;;  %v15758_v2 = vclamps-f32 %v9692_v52, 1.0 }
 0x232   : > { %16275 = vst [vmem:[#allocation33_spill] sm:$0xff] %v9698_v60  ;;  %v15757_v51 = vclamps-f32 %v9698_v60, 1.0 }
 0x233   : > { %v9708_v48 = vadd.f32 %v15758_v2, %v15760_v44 }
 0x234   : > { %v9714_v56 = vadd.f32 %v15757_v51, %v15759_v3  ;;  %v9716_v25 = vpop.f32.mrb[36].mxu1  ;;  %v9718_v53 = vpop.f32.mrb[68].mxu0 }
 0x235   : > { %16276 = vst [vmem:[#allocation34_spill] sm:$0xff] %v9708_v48  ;;  %16278 = vst [vmem:[#allocation36_spill] sm:$0xff] %v9716_v25  ;;  %v9720_v4 = vpop.f32.mrb[37].mxu1  ;;  %v9722_v5 = vpop.f32.mrb[69].mxu0 }
 0x236   : > { %16277 = vst [vmem:[#allocation35_spill] sm:$0xff] %v9714_v56  ;;  %16279 = vst [vmem:[#allocation37_spill] sm:$0xff] %v9718_v53  ;;  %v9724_v0 = vpop.f32.mrb[38].mxu1  ;;  %v9726_v9 = vpop.f32.mrb[70].mxu0 }
 0x237   : > { %16280 = vst [vmem:[#allocation38_spill] sm:$0xff] %v9720_v4  ;;  %16281 = vst [vmem:[#allocation39_spill] sm:$0xff] %v9722_v5  ;;  %v9728_v14 = vpop.f32.mrb[39].mxu1  ;;  %v9730_v16 = vpop.f32.mrb[71].mxu0 }
 0x238   : > { %16282 = vst [vmem:[#allocation40_spill] sm:$0xff] %v9724_v0  ;;  %16283 = vst [vmem:[#allocation41_spill] sm:$0xff] %v9726_v9 }
 0x239   : > { %16284 = vst [vmem:[#allocation42_spill] sm:$0xff] %v9728_v14  ;;  %16285 = vst [vmem:[#allocation43_spill] sm:$0xff] %v9730_v16 }
 0x23c   : > { %v9732_v10 = vpop.f32.mrb[40].mxu1  ;;  %v9734_v22 = vpop.f32.mrb[72].mxu0 }
 0x23d   : > { %16286 = vst [vmem:[#allocation44_spill] sm:$0xff] %v9732_v10  ;;  %16287 = vst [vmem:[#allocation45_spill] sm:$0xff] %v9734_v22  ;;  %v9736_v50 = vpop.f32.mrb[41].mxu1  ;;  %v9738_v28 = vpop.f32.mrb[73].mxu0 }
 0x23e   : > { %16288 = vst [vmem:[#allocation46_spill] sm:$0xff] %v9738_v28  ;;  %v9740_v38 = vpop.f32.mrb[42].mxu1  ;;  %v9742_v7 = vpop.f32.mrb[74].mxu0 }
 0x23f   : > { %16289 = vst [vmem:[#allocation47_spill] sm:$0xff] %v9742_v7  ;;  %v9744_v61 = vpop.f32.mrb[43].mxu1  ;;  %v9746_v17 = vpop.f32.mrb[75].mxu0 }
 0x240   : > { %16290 = vst [vmem:[#allocation48_spill] sm:$0xff] %v9744_v61  ;;  %16291 = vst [vmem:[#allocation49_spill] sm:$0xff] %v9746_v17 }
 0x244   : > { %v9748_v51 = vpop.f32.mrb[44].mxu1  ;;  %v9750_v2 = vpop.f32.mrb[76].mxu0 }
 0x245   : > { %16292 = vst [vmem:[#allocation50_spill] sm:$0xff] %v9750_v2  ;;  %v9752_v3 = vpop.f32.mrb[45].mxu1  ;;  %v9754_v44 = vpop.f32.mrb[77].mxu0 }
 0x246   : > { %16293 = vst [vmem:[#allocation51_spill] sm:$0xff] %v9754_v44  ;;  %v9756_v49 = vpop.f32.mrb[46].mxu1  ;;  %v9758_v56 = vpop.f32.mrb[78].mxu0  ;;  %v1146_v46 = vmul.f32 2.0, %v9752_v3 }
 0x247   : > { %16294 = vst [vmem:[#allocation52_spill] sm:$0xff] %v9758_v56  ;;  %v9760_v48 = vpop.f32.mrb[47].mxu1  ;;  %v9762_v28 = vpop.f32.mrb[79].mxu0 }
 0x248   : > { %16295 = vst [vmem:[#allocation53_spill] sm:$0xff] %v9762_v28 }
 0x24c   : > { %v9764_v7 = vpop.f32.mrb[48].mxu1  ;;  %v9766_v61 = vpop.f32.mrb[80].mxu0 }
 0x24d   : > { %16296 = vst [vmem:[#allocation54_spill] sm:$0xff] %v9766_v61  ;;  %v9768_v17 = vpop.f32.mrb[49].mxu1  ;;  %v9770_v22 = vpop.f32.mrb[81].mxu0 }
 0x24e   : > { %16297 = vst [vmem:[#allocation55_spill] sm:$0xff] %v9770_v22  ;;  %v9772_v2 = vpop.f32.mrb[50].mxu1  ;;  %v9774_v10 = vpop.f32.mrb[82].mxu0 }
 0x24f   : > { %16298 = vst [vmem:[#allocation56_spill] sm:$0xff] %v9774_v10  ;;  %v9776_v44 = vpop.f32.mrb[51].mxu1  ;;  %v9778_v16 = vpop.f32.mrb[83].mxu0 }
 0x250   : > { %16299 = vst [vmem:[#allocation57_spill] sm:$0xff] %v9778_v16 }
 0x254   : > { %v9780_v56 = vpop.f32.mrb[52].mxu1  ;;  %v9782_v14 = vpop.f32.mrb[84].mxu0 }
 0x255   : > { %16300 = vst [vmem:[#allocation58_spill] sm:$0xff] %v9782_v14  ;;  %v9784_v28 = vpop.f32.mrb[53].mxu1  ;;  %v9786_v60 = vpop.f32.mrb[85].mxu0 }
 0x256   : > { %16301 = vst [vmem:[#allocation59_spill] sm:$0xff] %v9786_v60  ;;  %v9788_v61 = vpop.f32.mrb[54].mxu1  ;;  %v9790_v9 = vpop.f32.mrb[86].mxu0 }
 0x257   : > { %16302 = vst [vmem:[#allocation60_spill] sm:$0xff] %v9790_v9  ;;  %v9792_v22 = vpop.f32.mrb[55].mxu1  ;;  %v9794_v0 = vpop.f32.mrb[87].mxu0 }
 0x258   : > { %16303 = vst [vmem:[#allocation61_spill] sm:$0xff] %v9794_v0 }
 0x25c   : > { %v9796_v10 = vpop.f32.mrb[56].mxu1  ;;  %v9798_v52 = vpop.f32.mrb[88].mxu0 }
 0x25d   : > { %16304 = vst [vmem:[#allocation62_spill] sm:$0xff] %v9798_v52  ;;  %v9800_v16 = vpop.f32.mrb[57].mxu1  ;;  %v9802_v5 = vpop.f32.mrb[89].mxu0 }
 0x25e   : > { %16305 = vst [vmem:[#allocation63_spill] sm:$0xff] %v9802_v5  ;;  %v9804_v14 = vpop.f32.mrb[58].mxu1  ;;  %v9806_v4 = vpop.f32.mrb[90].mxu0 }
 0x25f   : > { %16306 = vst [vmem:[#allocation64_spill] sm:$0xff] %v9806_v4  ;;  %v9808_v60 = vpop.f32.mrb[59].mxu1  ;;  %v9810_v53 = vpop.f32.mrb[91].mxu0 }
 0x260   : > { %16307 = vst [vmem:[#allocation65_spill] sm:$0xff] %v9810_v53 }
 0x264   : > { %v9812_v9 = vpop.f32.mrb[60].mxu1  ;;  %v9814_v25 = vpop.f32.mrb[92].mxu0 }
 0x265   : > { %16308 = vst [vmem:[#allocation66_spill] sm:$0xff] %v9814_v25  ;;  %v9816_v0 = vpop.f32.mrb[61].mxu1  ;;  %v9818_v33 = vpop.f32.mrb[93].mxu0 }
 0x266   : > { %16309 = vst [vmem:[#allocation67_spill] sm:$0xff] %v9818_v33  ;;  %v9820_v52 = vpop.f32.mrb[62].mxu1  ;;  %v9822_v54 = vpop.f32.mrb[94].mxu0 }
 0x267   : > { %16310 = vst [vmem:[#allocation68_spill] sm:$0xff] %v9822_v54  ;;  %v9824_v5 = vpop.f32.mrb[63].mxu1  ;;  %v9826_v8 = vpop.f32.mrb[95].mxu0 }
 0x268   : > { %16311 = vst [vmem:[#allocation69_spill] sm:$0xff] %v9826_v8 }
 0x26c   : > { %v9828_v4 = vpop.f32.mrb[96].mxu0  ;;  %v8691_v1 = vpop.f32.mrb[64].mxu1 }
 0x26d   : > { %16312 = vst [vmem:[#allocation70_spill] sm:$0xff] %v9828_v4  ;;  %v9830_v53 = vpop.f32.mrb[97].mxu0  ;;  %v2113_v20 = vpop.f32.mrb[65].mxu1 }
 0x26e   : > { %16313 = vst [vmem:[#allocation71_spill] sm:$0xff] %v9830_v53  ;;  %v9832_v6 = vpop.f32.mrb[98].mxu0  ;;  %v8692_v25 = vpop.f32.mrb[66].mxu1 }
 0x26f   : > { %16314 = vst [vmem:[#allocation72_spill] sm:$0xff] %v9832_v6  ;;  %v9834_v43 = vpop.f32.mrb[99].mxu0  ;;  %v2116_v33 = vpop.f32.mrb[67].mxu1  ;;  %v2241_v8 = vpack.c.bf16 %v8692_v25, %v8691_v1 }
 0x270   : > { %16315 = vst [vmem:[#allocation73_spill] sm:$0xff] %v9834_v43  ;;  %v2240_v53 = vpack.c.bf16 %v2116_v33, %v2113_v20  ;;  %v16320_v43 = vmov 0  }
 0x272   : > { %2289 = vmatmul.mubr.bf16.vlgmr.msra.gmra.mrb[96].mxu1 %v2240_v53  ;;  %v8917_v53 = vld [vmem:[%s15747_s3 + $0x14] ss:$8 sps:$4 sm:$0xff]  }
 0x273   : > { %2298 = vmatprep.mubr.bf16.mxu1 %v16320_v43 }
 0x274   : > { %v9836_v57 = vpop.f32.mrb[100].mxu0  ;;  %v9838_v63 = vpop.f32.mrb[68].mxu1 }
 0x275   : > { %16316 = vst [vmem:[#allocation74_spill] sm:$0xff] %v9836_v57  ;;  %v9840_v54 = vpop.f32.mrb[101].mxu0  ;;  %v9842_v62 = vpop.f32.mrb[69].mxu1  ;;  %v8916_v57 = vld [vmem:[%s15747_s3] ss:$8 sps:$4 sm:$0xff]  }
 0x276   : > { %16317 = vst [vmem:[#allocation75_spill] sm:$0xff] %v9840_v54  ;;  %v9844_v4 = vpop.f32.mrb[102].mxu0  ;;  %v9846_v59 = vpop.f32.mrb[70].mxu1  ;;  %2965 = vmatpush1.bf16.msra.mxu1 %v8916_v57  ;;  %v1142_v54 = vmul.f32 2.0, %v9736_v50  ;;  %v1145_v57 = vmul.f32 2.0, %v9748_v51 }
 0x277   : > { %16318 = vst [vmem:[#allocation76_spill] sm:$0xff] %v9844_v4  ;;  %v9848_v58 = vpop.f32.mrb[103].mxu0  ;;  %v9850_v6 = vpop.f32.mrb[71].mxu1  ;;  %2966 = vmatprep.subr.bf16.mxu1 %v8917_v53  ;;  %v8919_v53 = vld [vmem:[%s15747_s3 + $0x24] ss:$8 sps:$4 sm:$0xff]  }
 0x278   : > { %16319 = vst [vmem:[#allocation77_spill] sm:$0xff] %v9848_v58  ;;  %v1143_v58 = vmul.f32 2.0, %v9740_v38  ;;  %v8918_v38 = vld [vmem:[%s15747_s3 + $0x10] ss:$8 sps:$4 sm:$0xff]   ;;  %v9883_v51 = vadd.f32 -1.0, %v1142_v54  ;;  %v1148_v54 = vmul.f32 2.0, %v9760_v48 }
 0x279   : > { %v8921_v48 = vld [vmem:[%s15747_s3 + $0x34] ss:$8 sps:$4 sm:$0xff]  }
 0x27a   : > { %2967 = vmatpush1.bf16.msra.mxu1 %v8918_v38  ;;  %16323 = vst [vmem:[#allocation80_spill] sm:$0xff] %v9883_v51  ;;  %v16330_v3 = vclamps-f32 %v9883_v51, 1.0 }
 0x27b   : > { %2968 = vmatprep.subr.bf16.mxu1 %v8919_v53  ;;  %2299 = vmatmul.mubr.bf16.gmra.mrb[100].mxu1 %v2241_v8  ;;  %v9917_v8 = vadd.f32 -1.0, %v1146_v46 }
 0x27c   : > { %v9857_v1 = vpop.f32.mrb[104].mxu0  ;;  %v9863_v33 = vpop.f32.mrb[72].mxu1  ;;  %2308 = vmatprep.mubr.bf16.mxu1 %v16320_v43 }
 0x27d   : > { %16321 = vst [vmem:[#allocation78_spill] sm:$0xff] %v9857_v1  ;;  %v1718_v50 = vpop.f32.mrb[105].mxu0  ;;  %v9870_v4 = vpop.f32.mrb[73].mxu1  ;;  %16328 = vst [vmem:[#allocation85_spill] sm:$0xff] %v9917_v8 }
 0x27e   : > { %v1720_v1 = vpop.f32.mrb[106].mxu0  ;;  %v9872_v35 = vpop.f32.mrb[74].mxu1  ;;  %v1816_v25 = vmul.f32 2.0, %v1718_v50  ;;  %v9890_v50 = vadd.f32 -1.0, %v1145_v57  ;;  %v9929_v57 = vadd.f32 -1.0, %v1148_v54 }
 0x27f   : > { %v1817_v47 = vmul.f32 2.0, %v1720_v1  ;;  %v9874_v20 = vpop.f32.mrb[107].mxu0  ;;  %v9878_v42 = vpop.f32.mrb[75].mxu1  ;;  %v9888_v1 = vadd.f32 -1.0, %v1143_v58  ;;  %v8920_v58 = vld [vmem:[%s15747_s3 + $0x20] ss:$8 sps:$4 sm:$0xff]  }
 0x280   : > { %16322 = vst [vmem:[#allocation79_spill] sm:$0xff] %v9874_v20  ;;  %16325 = vst [vmem:[#allocation82_spill] sm:$0xff] %v9890_v50  ;;  %v1147_v20 = vmul.f32 2.0, %v9756_v49  ;;  %v9894_v41 = vadd.f32 -1.0, %v1816_v25  ;;  %2969 = vmatpush1.bf16.msra.mxu1 %v8920_v58 }
 0x281   : > { %16324 = vst [vmem:[#allocation81_spill] sm:$0xff] %v9888_v1  ;;  %v9896_v40 = vadd.f32 -1.0, %v1817_v47  ;;  %2970 = vmatprep.subr.bf16.mxu1 %v8921_v48  ;;  %16333 = vst [vmem:[#allocation88_spill] sm:$0xff] %v9929_v57  ;;  %v16334_v32 = vclamps-f32 %v9888_v1, 1.0  ;;  %v1104_v1 = vmul.f32 2.0, %v9617_v11  ;;  %v10543_v11 = vld [vmem:[%s10302_s22 + $0x160] sm:$0xff] }
 0x282   : > { %16326 = vst [vmem:[#allocation83_spill] sm:$0xff] %v9894_v41  ;;  %v9919_v49 = vadd.f32 -1.0, %v1147_v20  ;;  %v16331_v37 = vclamps-f32 %v9894_v41, 1.0  ;;  %16461 = vst [vmem:[#allocation187_spill] sm:$0xff] %v10543_v11 }
 0x283   : > { %16327 = vst [vmem:[#allocation84_spill] sm:$0xff] %v9896_v40  ;;  %v16335_v46 = vclamps-f32 %v9896_v40, 1.0 }
 0x284   : > { %v1726_v47 = vpop.f32.mrb[108].mxu0  ;;  %v9908_v25 = vpop.f32.mrb[76].mxu1  ;;  %16329 = vst [vmem:[#allocation86_spill] sm:$0xff] %v9919_v49  ;;  %v9925_v36 = vadd.f32 %v16331_v37, %v16330_v3  ;;  %v8922_v37 = vld [vmem:[%s15747_s3 + $0x30] ss:$8 sps:$4 sm:$0xff]  }
 0x285   : > { %v1819_v53 = vmul.f32 2.0, %v1726_v47  ;;  %v1728_v38 = vpop.f32.mrb[109].mxu0  ;;  %v9914_v39 = vpop.f32.mrb[77].mxu1  ;;  %v1149_v47 = vmul.f32 2.0, %v9764_v7  ;;  %v9936_v58 = vadd.f32 %v16335_v46, %v16334_v32  ;;  %2971 = vmatpush1.bf16.msra.mxu1 %v8922_v37  ;;  %v8923_v32 = vld [vmem:[%s15747_s3 + $0x44] ss:$8 sps:$4 sm:$0xff]  }
 0x286   : > { %16332 = vst [vmem:[#allocation87_spill] sm:$0xff] %v9925_v36  ;;  %v1730_v34 = vpop.f32.mrb[110].mxu0  ;;  %v9927_v48 = vpop.f32.mrb[78].mxu1  ;;  %v1820_v54 = vmul.f32 2.0, %v1728_v38  ;;  %2972 = vmatprep.subr.bf16.mxu1 %v8923_v32  ;;  %v1151_v46 = vmul.f32 2.0, %v9772_v2 }
 0x287   : > { %16336 = vst [vmem:[#allocation89_spill] sm:$0xff] %v9936_v58  ;;  %v9938_v20 = vadd.f32 -1.0, %v1819_v53  ;;  %v1732_v51 = vpop.f32.mrb[111].mxu0  ;;  %v9940_v31 = vpop.f32.mrb[79].mxu1  ;;  %v1821_v3 = vmul.f32 2.0, %v1730_v34  ;;  %v1150_v53 = vmul.f32 2.0, %v9768_v17  ;;  %v16338_v58 = vpack.c.bf16 %v9850_v6, %v9842_v62 }
 0x288   : > { %v1822_v36 = vmul.f32 2.0, %v1732_v51  ;;  %v1152_v51 = vmul.f32 2.0, %v9776_v44  ;;  %v9959_v37 = vadd.f32 -1.0, %v1820_v54  ;;  %v16342_v6 = vclamps-f32 %v9890_v50, 1.0  ;;  %v8924_v44 = vld [vmem:[%s15747_s3 + $0x40] ss:$8 sps:$4 sm:$0xff]  }
 0x289   : > { %16337 = vst [vmem:[#allocation90_spill] sm:$0xff] %v9938_v20  ;;  %2309 = vmatmul.mubr.bf16.gmra.mrb[104].mxu1 %v16338_v58  ;;  %v15766_v38 = vclamps-f32 %v9938_v20, 1.0  ;;  %v9961_v7 = vadd.f32 -1.0, %v1821_v3  ;;  %v9988_v2 = vadd.f32 -1.0, %v1150_v53  ;;  %v9993_v54 = vadd.f32 -1.0, %v1151_v46 }
 0x28a   : > { %16339 = vst [vmem:[#allocation91_spill] sm:$0xff] %v9959_v37  ;;  %v9963_v32 = vadd.f32 -1.0, %v1822_v36  ;;  %2318 = vmatprep.mubr.bf16.mxu1 %v16320_v43  ;;  %2973 = vmatpush1.bf16.msra.mxu1 %v8924_v44  ;;  %v1153_v44 = vmul.f32 2.0, %v9780_v56  ;;  %v9995_v3 = vadd.f32 -1.0, %v1152_v51  ;;  %v16348_v20 = vclamps-f32 %v9917_v8, 1.0 }
 0x28b   : > { %16340 = vst [vmem:[#allocation92_spill] sm:$0xff] %v9961_v7  ;;  %v9972_v17 = vadd.f32 %v15766_v38, %v16342_v6  ;;  %v8925_v6 = vld [vmem:[%s15747_s3 + $0x54] ss:$8 sps:$4 sm:$0xff]   ;;  %v9986_v38 = vadd.f32 -1.0, %v1149_v47  ;;  %16345 = vst [vmem:[#allocation96_spill] sm:$0xff] %v9988_v2  ;;  %v16349_v40 = vclamps-f32 %v9959_v37, 1.0 }
 0x28c   : > { %16341 = vst [vmem:[#allocation93_spill] sm:$0xff] %v9963_v32  ;;  %v1736_v34 = vpop.f32.mrb[112].mxu0  ;;  %v9981_v62 = vpop.f32.mrb[80].mxu1  ;;  %2974 = vmatprep.subr.bf16.mxu1 %v8925_v6  ;;  %16346 = vst [vmem:[#allocation97_spill] sm:$0xff] %v9993_v54  ;;  %v16351_v47 = vclamps-f32 %v9919_v49, 1.0  ;;  %v16352_v53 = vclamps-f32 %v9961_v7, 1.0 }
 0x28d   : > { %16343 = vst [vmem:[#allocation94_spill] sm:$0xff] %v9972_v17  ;;  %16344 = vst [vmem:[#allocation95_spill] sm:$0xff] %v9986_v38  ;;  %v1823_v36 = vmul.f32 2.0, %v1736_v34  ;;  %v1738_v58 = vpop.f32.mrb[113].mxu0  ;;  %v9991_v17 = vpop.f32.mrb[81].mxu1  ;;  %v10001_v41 = vadd.f32 %v16349_v40, %v16348_v20  ;;  %v1154_v46 = vmul.f32 2.0, %v9784_v28 }
 0x28e   : > { %16347 = vst [vmem:[#allocation98_spill] sm:$0xff] %v9995_v3  ;;  %v10007_v6 = vadd.f32 %v16352_v53, %v16351_v47  ;;  %v1740_v56 = vpop.f32.mrb[114].mxu0  ;;  %v10009_v34 = vpop.f32.mrb[82].mxu1  ;;  %v16354_v51 = vclamps-f32 %v9929_v57, 1.0  ;;  %v16355_v50 = vclamps-f32 %v9963_v32, 1.0  ;;  %v1824_v40 = vmul.f32 2.0, %v1738_v58 }
 0x28f   : > { %16350 = vst [vmem:[#allocation99_spill] sm:$0xff] %v10001_v41  ;;  %v10018_v37 = vadd.f32 -1.0, %v1823_v36  ;;  %v1742_v20 = vpop.f32.mrb[115].mxu0  ;;  %v10020_v41 = vpop.f32.mrb[83].mxu1  ;;  %v8926_v47 = vld [vmem:[%s15747_s3 + $0x50] ss:$8 sps:$4 sm:$0xff]  }
 0x290   : > { %16353 = vst [vmem:[#allocation100_spill] sm:$0xff] %v10007_v6  ;;  %v10016_v8 = vadd.f32 %v16355_v50, %v16354_v51  ;;  %2975 = vmatpush1.bf16.msra.mxu1 %v8926_v47  ;;  %v1825_v53 = vmul.f32 2.0, %v1740_v56  ;;  %v1826_v6 = vmul.f32 2.0, %v1742_v20  ;;  %v8927_v36 = vld [vmem:[%s15747_s3 + $0x64] ss:$8 sps:$4 sm:$0xff]   ;;  %v15775_v58 = vclamps-f32 %v9986_v38, 1.0 }
 0x291   : > { %16357 = vst [vmem:[#allocation102_spill] sm:$0xff] %v10018_v37  ;;  %2976 = vmatprep.subr.bf16.mxu1 %v8927_v36  ;;  %v10033_v51 = vadd.f32 -1.0, %v1153_v44  ;;  %v16359_v47 = vpack.c.bf16 %v9846_v59, %v9838_v63  ;;  %v15774_v56 = vclamps-f32 %v10018_v37, 1.0  ;;  %v10039_v20 = vadd.f32 -1.0, %v1824_v40  ;;  %v10459_v38 = vld [vmem:[%s10302_s22 + $0x130] sm:$0xff]  ;;  %v10462_v49 = vld [vmem:[%s10302_s22 + $0xb8] sm:$0xff] }
 0x292   : > { %16356 = vst [vmem:[#allocation101_spill] sm:$0xff] %v10016_v8  ;;  %v15780_v28 = vclamps-f32 %v9988_v2, 1.0  ;;  %v1155_v50 = vmul.f32 2.0, %v9788_v61  ;;  %v10043_v8 = vadd.f32 -1.0, %v1825_v53  ;;  %v10045_v32 = vadd.f32 -1.0, %v1826_v6  ;;  %16448 = vst [vmem:[#allocation175_spill] sm:$0xff] %v10459_v38 }
 0x293   : > { %16358 = vst [vmem:[#allocation103_spill] sm:$0xff] %v10033_v51  ;;  %2319 = vmatmul.mubr.bf16.gmra.mrb[108].mxu1 %v16359_v47  ;;  %16360 = vst [vmem:[#allocation104_spill] sm:$0xff] %v10039_v20  ;;  %v10054_v59 = vadd.f32 %v15774_v56, %v15775_v58  ;;  %v15779_v63 = vclamps-f32 %v10039_v20, 1.0  ;;  %v8928_v61 = vld [vmem:[%s15747_s3 + $0x60] ss:$8 sps:$4 sm:$0xff]   ;;  %v10060_v6 = vadd.f32 -1.0, %v1154_v46 }
 0x294   : > { %16361 = vst [vmem:[#allocation105_spill] sm:$0xff] %v10043_v8  ;;  %16362 = vst [vmem:[#allocation106_spill] sm:$0xff] %v10045_v32  ;;  %2328 = vmatprep.mubr.bf16.mxu1 %v16320_v43  ;;  %2977 = vmatpush1.bf16.msra.mxu1 %v8928_v61  ;;  %v1156_v40 = vmul.f32 2.0, %v9792_v22  ;;  %v1746_v36 = vpop.f32.mrb[116].mxu0  ;;  %v10065_v44 = vpop.f32.mrb[84].mxu1  ;;  %v10079_v47 = vadd.f32 -1.0, %v1155_v50 }
 0x295   : > { %16363 = vst [vmem:[#allocation107_spill] sm:$0xff] %v10054_v59  ;;  %16364 = vst [vmem:[#allocation108_spill] sm:$0xff] %v10060_v6  ;;  %v8929_v56 = vld [vmem:[%s15747_s3 + $0x74] ss:$8 sps:$4 sm:$0xff]   ;;  %v10075_v46 = vadd.f32 %v15779_v63, %v15780_v28  ;;  %v1827_v22 = vmul.f32 2.0, %v1746_v36  ;;  %v1748_v61 = vpop.f32.mrb[117].mxu0 }
 0x296   : > { %2978 = vmatprep.subr.bf16.mxu1 %v8929_v56  ;;  %v10077_v53 = vpop.f32.mrb[85].mxu1  ;;  %16366 = vst [vmem:[#allocation110_spill] sm:$0xff] %v10079_v47  ;;  %v1157_v59 = vmul.f32 2.0, %v9796_v10  ;;  %v16367_v37 = vclamps-f32 %v9993_v54, 1.0  ;;  %v16368_v56 = vclamps-f32 %v10043_v8, 1.0  ;;  %v16370_v58 = vclamps-f32 %v9995_v3, 1.0 }
 0x297   : > { %16365 = vst [vmem:[#allocation109_spill] sm:$0xff] %v10075_v46  ;;  %v16371_v20 = vclamps-f32 %v10045_v32, 1.0  ;;  %v1750_v36 = vpop.f32.mrb[118].mxu0  ;;  %v10094_v28 = vpop.f32.mrb[86].mxu1  ;;  %v10096_v46 = vadd.f32 -1.0, %v1827_v22  ;;  %v1828_v50 = vmul.f32 2.0, %v1748_v61  ;;  %v16375_v54 = vpack.c.bf16 %v9878_v42, %v9870_v4 }
 0x298   : > { %v10086_v7 = vadd.f32 %v16368_v56, %v16367_v37  ;;  %v1829_v2 = vmul.f32 2.0, %v1750_v36  ;;  %v1752_v10 = vpop.f32.mrb[119].mxu0  ;;  %v10100_v8 = vpop.f32.mrb[87].mxu1  ;;  %v8930_v37 = vld [vmem:[%s15747_s3 + $0x70] ss:$8 sps:$4 sm:$0xff]   ;;  %v1158_v36 = vmul.f32 2.0, %v9800_v16 }
 0x299   : > { %v10092_v63 = vadd.f32 %v16371_v20, %v16370_v58  ;;  %16373 = vst [vmem:[#allocation113_spill] sm:$0xff] %v10096_v46  ;;  %2979 = vmatpush1.bf16.msra.mxu1 %v8930_v37  ;;  %v10106_v20 = vadd.f32 -1.0, %v1156_v40  ;;  %v1830_v56 = vmul.f32 2.0, %v1752_v10  ;;  %v8931_v61 = vld [vmem:[%s15747_s3 + $0x4] ss:$8 sps:$4 sm:$0xff]   ;;  %v15784_v37 = vclamps-f32 %v10096_v46, 1.0 }
 0x29a   : > { %16369 = vst [vmem:[#allocation111_spill] sm:$0xff] %v10086_v7  ;;  %3056 = vmatprep.subr.bf16.mxu1 %v8931_v61  ;;  %v10118_v58 = vadd.f32 -1.0, %v1828_v50  ;;  %v10120_v40 = vadd.f32 -1.0, %v1829_v2  ;;  %v10123_v22 = vadd.f32 -1.0, %v1157_v59  ;;  %v1160_v16 = vmul.f32 2.0, %v9808_v60  ;;  %v10451_v3 = vld [vmem:[%s10302_s22 + $0xb0] sm:$0xff] }
 0x29b   : > { %16372 = vst [vmem:[#allocation112_spill] sm:$0xff] %v10092_v63  ;;  %16374 = vst [vmem:[#allocation114_spill] sm:$0xff] %v10106_v20  ;;  %2329 = vmatmul.mubr.bf16.gmra.mrb[112].mxu1 %v16375_v54  ;;  %v1159_v63 = vmul.f32 2.0, %v9804_v14  ;;  %v10126_v7 = vadd.f32 -1.0, %v1830_v56  ;;  %v16380_v42 = vclamps-f32 %v10033_v51, 1.0  ;;  %v10142_v61 = vadd.f32 -1.0, %v1158_v36 }
 0x29c   : > { %16376 = vst [vmem:[#allocation115_spill] sm:$0xff] %v10118_v58  ;;  %16377 = vst [vmem:[#allocation116_spill] sm:$0xff] %v10120_v40  ;;  %2338 = vmatprep.mubr.bf16.mxu1 %v16320_v43  ;;  %v15788_v2 = vclamps-f32 %v10118_v58, 1.0  ;;  %v15790_v54 = vclamps-f32 %v10120_v40, 1.0  ;;  %v1756_v50 = vpop.f32.mrb[120].mxu0  ;;  %v10140_v56 = vpop.f32.mrb[88].mxu1 }
 0x29d   : > { %16378 = vst [vmem:[#allocation117_spill] sm:$0xff] %v10123_v22  ;;  %16379 = vst [vmem:[#allocation118_spill] sm:$0xff] %v10126_v7  ;;  %v10134_v4 = vadd.f32 %v15784_v37, %v16380_v42  ;;  %v16383_v60 = vclamps-f32 %v10060_v6, 1.0  ;;  %v16385_v42 = vclamps-f32 %v10079_v47, 1.0  ;;  %v1758_v59 = vpop.f32.mrb[121].mxu0  ;;  %v16387_v36 = vclamps-f32 %v10106_v20, 1.0 }
 0x29e   : > { %16382 = vst [vmem:[#allocation120_spill] sm:$0xff] %v10142_v61  ;;  %v16388_v46 = vclamps-f32 %v10126_v7, 1.0  ;;  %v1831_v58 = vmul.f32 2.0, %v1756_v50  ;;  %v10167_v47 = vadd.f32 -1.0, %v1159_v63  ;;  %v15797_v63 = vclamps-f32 %v10142_v61, 1.0  ;;  %v10428_v61 = vld [vmem:[%s10302_s22 + $0x118] sm:$0xff] }
 0x29f   : > { %16381 = vst [vmem:[#allocation119_spill] sm:$0xff] %v10134_v4  ;;  %v10148_v10 = vadd.f32 %v15788_v2, %v16383_v60  ;;  %v10154_v37 = vadd.f32 %v15790_v54, %v16385_v42  ;;  %v10156_v4 = vpop.f32.mrb[89].mxu1  ;;  %v1832_v60 = vmul.f32 2.0, %v1758_v59  ;;  %v1760_v2 = vpop.f32.mrb[122].mxu0  ;;  %v10169_v42 = vadd.f32 -1.0, %v1160_v16  ;;  %16442 = vst [vmem:[#allocation169_spill] sm:$0xff] %v10428_v61 }
 0x2a0   : > { %v10163_v32 = vadd.f32 %v16388_v46, %v16387_v36  ;;  %16390 = vst [vmem:[#allocation124_spill] sm:$0xff] %v10167_v47  ;;  %v1833_v54 = vmul.f32 2.0, %v1760_v2  ;;  %v10175_v20 = vadd.f32 -1.0, %v1831_v58  ;;  %v1161_v16 = vmul.f32 2.0, %v9812_v9  ;;  %v10434_v6 = vld [vmem:[%s10302_s22 + $0x120] sm:$0xff]  ;;  %v10448_v51 = vld [vmem:[%s10302_s22 + $0x128] sm:$0xff] }
 0x2a1   : > { %16384 = vst [vmem:[#allocation121_spill] sm:$0xff] %v10148_v10  ;;  %16386 = vst [vmem:[#allocation122_spill] sm:$0xff] %v10154_v37  ;;  %v10165_v10 = vpop.f32.mrb[90].mxu1  ;;  %v1762_v37 = vpop.f32.mrb[123].mxu0  ;;  %v10177_v46 = vadd.f32 -1.0, %v1832_v60  ;;  %v1162_v2 = vmul.f32 2.0, %v9816_v0  ;;  %v16394_v36 = vpack.c.bf16 %v9872_v35, %v9863_v33 }
 0x2a2   : > { %16389 = vst [vmem:[#allocation123_spill] sm:$0xff] %v10163_v32  ;;  %16391 = vst [vmem:[#allocation125_spill] sm:$0xff] %v10169_v42  ;;  %v10173_v40 = vpop.f32.mrb[91].mxu1  ;;  %v1834_v50 = vmul.f32 2.0, %v1762_v37  ;;  %v10187_v14 = vadd.f32 -1.0, %v1833_v54  ;;  %v1163_v58 = vmul.f32 2.0, %v9820_v52 }
 0x2a3   : > { %16392 = vst [vmem:[#allocation126_spill] sm:$0xff] %v10175_v20  ;;  %16393 = vst [vmem:[#allocation127_spill] sm:$0xff] %v10177_v46  ;;  %2339 = vmatmul.mubr.bf16.gmra.mrb[116].mxu1 %v16394_v36  ;;  %v15793_v60 = vclamps-f32 %v10175_v20, 1.0  ;;  %v15796_v37 = vclamps-f32 %v10177_v46, 1.0  ;;  %v15801_v9 = vclamps-f32 %v10167_v47, 1.0  ;;  %v1164_v0 = vmul.f32 2.0, %v9824_v5 }
 0x2a4   : > { %16395 = vst [vmem:[#allocation128_spill] sm:$0xff] %v10187_v14  ;;  %v10192_v32 = vadd.f32 -1.0, %v1834_v50  ;;  %2348 = vmatprep.mubr.bf16.mxu1 %v16320_v43  ;;  %v15800_v59 = vclamps-f32 %v10187_v14, 1.0  ;;  %v16397_v33 = vclamps-f32 %v10123_v22, 1.0  ;;  %v1766_v50 = vpop.f32.mrb[124].mxu0  ;;  %v10211_v36 = vpop.f32.mrb[92].mxu1 }
 0x2a5   : > { %v10209_v54 = vadd.f32 %v15796_v37, %v15797_v63  ;;  %v10213_v5 = vadd.f32 -1.0, %v1161_v16  ;;  %v10222_v20 = vpop.f32.mrb[93].mxu1  ;;  %v10224_v46 = vadd.f32 -1.0, %v1162_v2  ;;  %v10226_v37 = vadd.f32 -1.0, %v1163_v58  ;;  %16444 = vst [vmem:[#allocation171_spill] sm:$0xff] %v10434_v6  ;;  %16446 = vst [vmem:[#allocation173_spill] sm:$0xff] %v10448_v51 }
 0x2a6   : > { %16396 = vst [vmem:[#allocation129_spill] sm:$0xff] %v10192_v32  ;;  %v10203_v52 = vadd.f32 %v15793_v60, %v16397_v33  ;;  %v10219_v35 = vadd.f32 %v15800_v59, %v15801_v9  ;;  %v15804_v33 = vclamps-f32 %v10192_v32, 1.0  ;;  %v1835_v60 = vmul.f32 2.0, %v1766_v50  ;;  %v10228_v16 = vpop.f32.mrb[94].mxu1  ;;  %16447 = vst [vmem:[#allocation174_spill] sm:$0xff] %v10451_v3  ;;  %v8938_v22 = vld [vmem:[%s9194_s21 + $0x70] sm:$0xff]  }
 0x2a7   : > { %16399 = vst [vmem:[#allocation131_spill] sm:$0xff] %v10209_v54  ;;  %16400 = vst [vmem:[#allocation132_spill] sm:$0xff] %v10213_v5  ;;  %v10230_v7 = vadd.f32 -1.0, %v1164_v0  ;;  %v16405_v14 = vclamps-f32 %v10169_v42, 1.0  ;;  %v10240_v2 = vpop.f32.mrb[95].mxu1  ;;  %v15806_v42 = vclamps-f32 %v10213_v5, 1.0  ;;  %v16433_v32 = vpack.c.bf16 %v10009_v34, %v9981_v62 }
 0x2a8   : > { %16398 = vst [vmem:[#allocation130_spill] sm:$0xff] %v10203_v52  ;;  %16401 = vst [vmem:[#allocation133_spill] sm:$0xff] %v10219_v35  ;;  %v1768_v52 = vpop.f32.mrb[125].mxu0  ;;  %v10238_v50 = vadd.f32 -1.0, %v1835_v60  ;;  %v15814_v47 = vclamps-f32 %v10226_v37, 1.0  ;;  %v10406_v62 = vld [vmem:[%s10302_s22 + $0x108] sm:$0xff] }
 0x2a9   : > { %16402 = vst [vmem:[#allocation134_spill] sm:$0xff] %v10224_v46  ;;  %16403 = vst [vmem:[#allocation135_spill] sm:$0xff] %v10226_v37  ;;  %v1836_v63 = vmul.f32 2.0, %v1768_v52  ;;  %v1770_v54 = vpop.f32.mrb[126].mxu0  ;;  %v10236_v59 = vadd.f32 %v15804_v33, %v16405_v14  ;;  %v16409_v14 = vpack.c.bf16 %v9940_v31, %v9914_v39  ;;  %v10409_v34 = vld [vmem:[%s10302_s22 + $0x90] sm:$0xff]  ;;  %v10441_v5 = vld [vmem:[%s10302_s22 + $0xa8] sm:$0xff] }
 0x2aa   : > { %16404 = vst [vmem:[#allocation136_spill] sm:$0xff] %v10230_v7  ;;  %16407 = vst [vmem:[#allocation138_spill] sm:$0xff] %v10238_v50  ;;  %v1837_v9 = vmul.f32 2.0, %v1770_v54  ;;  %v1772_v35 = vpop.f32.mrb[127].mxu0  ;;  %v15805_v60 = vclamps-f32 %v10238_v50, 1.0  ;;  %v10417_v37 = vld [vmem:[%s10302_s22 + $0x110] sm:$0xff] }
 0x2ab   : > { %16406 = vst [vmem:[#allocation137_spill] sm:$0xff] %v10236_v59  ;;  %v10242_v58 = vadd.f32 -1.0, %v1836_v63  ;;  %v1838_v52 = vmul.f32 2.0, %v1772_v35  ;;  %2349 = vmatmul.mubr.bf16.gmra.mrb[120].mxu1 %v16409_v14  ;;  %v15809_v63 = vclamps-f32 %v10224_v46, 1.0  ;;  %16438 = vst [vmem:[#allocation165_spill] sm:$0xff] %v10406_v62  ;;  %v8937_v59 = vld [vmem:[%s9194_s21 + $0x68] sm:$0xff]  }
 0x2ac   : > { %v10253_v54 = vadd.f32 -1.0, %v1837_v9  ;;  %2358 = vmatprep.mubr.bf16.mxu1 %v16320_v43  ;;  %v10265_v31 = vadd.f32 %v15805_v60, %v15806_v42  ;;  %v15813_v9 = vclamps-f32 %v10230_v7, 1.0  ;;  %v2867_v0 = vpop.f32.mrb[128].mxu0  ;;  %v10388_v7 = vld [vmem:[%s10302_s22 + $0x80] sm:$0xff]  ;;  %16439 = vst [vmem:[#allocation166_spill] sm:$0xff] %v10409_v34  ;;  %16440 = vst [vmem:[#allocation167_spill] sm:$0xff] %v10417_v37 }
 0x2ad   : > { %16408 = vst [vmem:[#allocation139_spill] sm:$0xff] %v10242_v58  ;;  %v15808_v35 = vclamps-f32 %v10242_v58, 1.0  ;;  %v10257_v33 = vadd.f32 -1.0, %v1838_v52  ;;  %v2873_v42 = vpack.c.bf16 %v2867_v0, %v2867_v0  ;;  %v8739_v50 = vpop.f32.mrb[129].mxu0  ;;  %v10317_v0 = vld [vmem:[%s10302_s22 + $0x10] sm:$0xff]  ;;  %16435 = vst [vmem:[#allocation162_spill] sm:$0xff] %v10388_v7 }
 0x2ae   : > { %16410 = vst [vmem:[#allocation140_spill] sm:$0xff] %v10253_v54  ;;  %16412 = vst [vmem:[#allocation142_spill] sm:$0xff] %v10265_v31  ;;  %v15811_v39 = vclamps-f32 %v10253_v54, 1.0  ;;  %v8933_v50 = vld [vmem:[%s9194_s21 + $0x48] sm:$0xff]   ;;  %v10360_v31 = vld [vmem:[%s10302_s22 + $0x58] sm:$0xff]  ;;  %v1103_v61 = vmul.f32 2.0, %v9614_v24 }
 0x2af   : > { %16411 = vst [vmem:[#allocation141_spill] sm:$0xff] %v10257_v33  ;;  %v10273_v52 = vadd.f32 %v15808_v35, %v15809_v63  ;;  %v15812_v14 = vclamps-f32 %v10257_v33, 1.0  ;;  %v2870_v63 = vpop.f32.mrb[130].mxu0  ;;  %2907 = vmatmul.mubr.bf16.vlgmr.msra.gmra.mrb[132].mxu0 %v2873_v42  ;;  %v10310_v42 = vld [vmem:[%s10302_s22] sm:$0xff]  ;;  %16420 = vst [vmem:[#allocation148_spill] sm:$0xff] %v10317_v0  ;;  %v10385_v33 = vld [vmem:[%s10302_s22 + $0x78] sm:$0xff] }
 0x2b0   : > { %v10280_v60 = vadd.f32 %v15811_v39, %v15814_v47  ;;  %v8740_v58 = vpop.f32.mrb[131].mxu0  ;;  %8757 = vmatprep.mubr.msk.bf16.mxu0 %vm9078_vm0, %v16241_v12  ;;  %v16416_v39 = vpack.c.bf16 %v9927_v48, %v9908_v25  ;;  %v8934_v25 = vld [vmem:[%s9194_s21 + $0x50] sm:$0xff]   ;;  %v16417_v48 = vpack.c.bf16 %v10020_v41, %v9991_v17  ;;  %16418 = vst [vmem:[#allocation146_spill] sm:$0xff] %v10310_v42  ;;  %v10320_v63 = vld [vmem:[%s10302_s22 + $0x18] sm:$0xff]  ;;  %v10343_v17 = vld [vmem:[%s10302_s22 + $0x40] sm:$0xff]  ;;  %v1107_v3 = vmul.f32 2.0, %v9626_v18 }
 0x2b1   : > { %16413 = vst [vmem:[#allocation143_spill] sm:$0xff] %v10273_v52  ;;  %v10286_v35 = vadd.f32 %v15812_v14, %v15813_v9  ;;  %v8932_v52 = vld [vmem:[%s9194_s21 + $0x40] sm:$0xff]   ;;  %v10314_v58 = vld [vmem:[%s10302_s22 + $0x8] sm:$0xff]  ;;  %16421 = vst [vmem:[#allocation149_spill] sm:$0xff] %v10320_v63  ;;  %v16468_v18 = vunpack.c.l.bf16 %v10310_v42 }
 0x2b2   : > { %16414 = vst [vmem:[#allocation144_spill] sm:$0xff] %v10280_v60  ;;  %8742 = vmatpush3.bf16.msra.mxu0 %v8932_v52  ;;  %16419 = vst [vmem:[#allocation147_spill] sm:$0xff] %v10314_v58  ;;  %v8935_v52 = vld [vmem:[%s9194_s21 + $0x58] sm:$0xff]   ;;  %v10350_v14 = vld [vmem:[%s10302_s22 + $0x48] sm:$0xff] }
 0x2b3   : > { %16415 = vst [vmem:[#allocation145_spill] sm:$0xff] %v10286_v35  ;;  %2359 = vmatmul.mubr.bf16.gmra.mrb[124].mxu1 %v16416_v39  ;;  %8743 = vmatprep.subr.bf16.mxu0 %v16241_v12  ;;  %v10323_v39 = vld [vmem:[%s10302_s22 + $0x20] sm:$0xff]  ;;  %v10340_v47 = vld [vmem:[%s10302_s22 + $0x38] sm:$0xff]  ;;  %16426 = vst [vmem:[#allocation154_spill] sm:$0xff] %v10343_v17 }
 0x2b4   : > { %2368 = vmatprep.mubr.bf16.mxu1 %v16320_v43  ;;  %16422 = vst [vmem:[#allocation150_spill] sm:$0xff] %v10323_v39  ;;  %16425 = vst [vmem:[#allocation153_spill] sm:$0xff] %v10340_v47  ;;  %v10363_v54 = vld [vmem:[%s10302_s22 + $0x60] sm:$0xff]  ;;  %v10371_v60 = vld [vmem:[%s10302_s22 + $0x68] sm:$0xff] }
 0x2b5   : > { %16427 = vst [vmem:[#allocation155_spill] sm:$0xff] %v10350_v14  ;;  %16429 = vst [vmem:[#allocation157_spill] sm:$0xff] %v10360_v31  ;;  %v10374_v41 = vld [vmem:[%s10302_s22 + $0x70] sm:$0xff]  ;;  %v10396_v9 = vld [vmem:[%s10302_s22 + $0x100] sm:$0xff] }
 0x2b6   : > { %8744 = vmatpush3.bf16.msra.mxu0 %v8933_v50  ;;  %v10329_v50 = vld [vmem:[%s10302_s22 + $0x28] sm:$0xff]  ;;  %16430 = vst [vmem:[#allocation158_spill] sm:$0xff] %v10363_v54  ;;  %16431 = vst [vmem:[#allocation159_spill] sm:$0xff] %v10371_v60  ;;  %v10431_v46 = vld [vmem:[%s10302_s22 + $0xa0] sm:$0xff] }
 0x2b7   : > { %8745 = vmatprep.subr.bf16.mxu0 %v16241_v12  ;;  %16423 = vst [vmem:[#allocation151_spill] sm:$0xff] %v10329_v50  ;;  %16432 = vst [vmem:[#allocation160_spill] sm:$0xff] %v10374_v41  ;;  %v10399_v35 = vld [vmem:[%s10302_s22 + $0x88] sm:$0xff]  ;;  %v10465_v57 = vld [vmem:[%s10302_s22 + $0x138] sm:$0xff] }
 0x2b8   : > { %16434 = vst [vmem:[#allocation161_spill] sm:$0xff] %v10385_v33  ;;  %16436 = vst [vmem:[#allocation163_spill] sm:$0xff] %v10396_v9  ;;  %v10484_v34 = vld [vmem:[%s10302_s22 + $0x140] sm:$0xff]  ;;  %v10502_v6 = vld [vmem:[%s10302_s22 + $0xd0] sm:$0xff] }
 0x2b9   : > { %16437 = vst [vmem:[#allocation164_spill] sm:$0xff] %v10399_v35  ;;  %16443 = vst [vmem:[#allocation170_spill] sm:$0xff] %v10431_v46  ;;  %v10516_v51 = vld [vmem:[%s10302_s22 + $0x158] sm:$0xff]  ;;  %v8941_v24 = vld [vmem:[%s9194_s21 + $0x80] sm:$0xff]  }
 0x2ba   : > { %8746 = vmatpush3.bf16.msra.mxu0 %v8934_v25  ;;  %v10332_v25 = vld [vmem:[%s10302_s22 + $0x30] sm:$0xff]  ;;  %16445 = vst [vmem:[#allocation172_spill] sm:$0xff] %v10441_v5  ;;  %16449 = vst [vmem:[#allocation176_spill] sm:$0xff] %v10462_v49 }
 0x2bb   : > { %2369 = vmatmul.mubr.bf16.gmra.mrb[128].mxu1 %v16417_v48  ;;  %8747 = vmatprep.subr.bf16.mxu0 %v16241_v12  ;;  %16424 = vst [vmem:[#allocation152_spill] sm:$0xff] %v10332_v25  ;;  %v8936_v48 = vld [vmem:[%s9194_s21 + $0x60] sm:$0xff]   ;;  %16450 = vst [vmem:[#allocation177_spill] sm:$0xff] %v10465_v57 }
 0x2bc   : > { %2378 = vmatprep.mubr.bf16.mxu1 %v16320_v43  ;;  %16453 = vst [vmem:[#allocation179_spill] sm:$0xff] %v10484_v34  ;;  %16456 = vst [vmem:[#allocation182_spill] sm:$0xff] %v10502_v6  ;;  %v10533_v57 = vld [vmem:[%s10302_s22 + $0xe0] sm:$0xff]  ;;  %v8942_v34 = vld [vmem:[%s9194_s21 + $0x88] sm:$0xff]   ;;  %v10589_v6 = vadd.f32 -1.0, %v1107_v3  ;;  %v1111_v3 = vmul.f32 2.0, %v9636_v26  ;;  %v16475_v26 = vpack.c.bf16 %v10173_v40, %v10156_v4  ;;  %v16480_v40 = vunpack.c.h.bf16 %v10314_v58 }
 0x2bd   : > { %16459 = vst [vmem:[#allocation185_spill] sm:$0xff] %v10516_v51  ;;  %16460 = vst [vmem:[#allocation186_spill] sm:$0xff] %v10533_v57  ;;  %v10583_v57 = vld [vmem:[%s10302_s22 + $0xf8] sm:$0xff] }
 0x2be   : > { %8748 = vmatpush3.bf16.msra.mxu0 %v8935_v52  ;;  %v10353_v52 = vld [vmem:[%s10302_s22 + $0x50] sm:$0xff]  ;;  %16467 = vst [vmem:[#allocation192_spill] sm:$0xff] %v10583_v57  ;;  %v16605_v57 = vld [vmem:[#allocation37_spill] sm:$0xff] }
 0x2bf   : > { %8749 = vmatprep.subr.bf16.mxu0 %v16241_v12  ;;  %16428 = vst [vmem:[#allocation156_spill] sm:$0xff] %v10353_v52 }
 0x2c2   : > { %8750 = vmatpush3.bf16.msra.mxu0 %v8936_v48  ;;  %v10505_v48 = vld [vmem:[%s10302_s22 + $0x150] sm:$0xff] }
 0x2c3   : > { %2379 = vmatmul.mubr.bf16.gmra.mrb[132].mxu1 %v16433_v32  ;;  %8751 = vmatprep.subr.bf16.mxu0 %v16241_v12  ;;  %v10420_v32 = vld [vmem:[%s10302_s22 + $0x98] sm:$0xff]  ;;  %16457 = vst [vmem:[#allocation183_spill] sm:$0xff] %v10505_v48  ;;  %v16463_v48 = vpack.c.bf16 %v10094_v28, %v10065_v44  ;;  %v10564_v28 = vadd.f32 -1.0, %v1104_v1  ;;  %v1108_v44 = vmul.f32 2.0, %v9629_v19 }
 0x2c4   : > { %2388 = vmatprep.mubr.bf16.mxu1 %v16320_v43  ;;  %16441 = vst [vmem:[#allocation168_spill] sm:$0xff] %v10420_v32  ;;  %v16451_v32 = vpack.c.bf16 %v10100_v8, %v10077_v53  ;;  %v10494_v8 = vld [vmem:[%s10302_s22 + $0x148] sm:$0xff]  ;;  %v8939_v53 = vld [vmem:[%s9194_s21 + $0x78] sm:$0xff]  }
 0x2c5   : > { %16455 = vst [vmem:[#allocation181_spill] sm:$0xff] %v10494_v8  ;;  %v1105_v8 = vmul.f32 2.0, %v9622_v13  ;;  %v1106_v13 = vmul.f32 2.0, %v9624_v15  ;;  %v10570_v15 = vld [vmem:[%s10302_s22 + $0x170] sm:$0xff]  ;;  %v10593_v19 = vadd.f32 -1.0, %v1108_v44  ;;  %v16481_v4 = vclamps-f32 %v10564_v28, 1.0 }
 0x2c6   : > { %8752 = vmatpush3.bf16.msra.mxu0 %v8937_v59  ;;  %v10476_v59 = vld [vmem:[%s10302_s22 + $0xc0] sm:$0xff]  ;;  %16466 = vst [vmem:[#allocation191_spill] sm:$0xff] %v10570_v15  ;;  %v8943_v44 = vld [vmem:[%s9194_s21 + $0x90] sm:$0xff]   ;;  %v1779_v15 = vmul.f32 2.0, %v16605_v57 }
 0x2c7   : > { %8753 = vmatprep.subr.bf16.mxu0 %v16241_v12  ;;  %16452 = vst [vmem:[#allocation178_spill] sm:$0xff] %v10476_v59  ;;  %v10546_v59 = vld [vmem:[%s10302_s22 + $0xe8] sm:$0xff]  ;;  %v10577_v1 = vadd.f32 -1.0, %v1105_v8  ;;  %v10587_v5 = vadd.f32 -1.0, %v1106_v13  ;;  %v1110_v13 = vmul.f32 2.0, %v9634_v23  ;;  %v10607_v8 = vld [vmem:[%s10302_s22 + $0x178] sm:$0xff]  ;;  %v16490_v23 = vunpack.c.l.bf16 %v10320_v63 }
 0x2c8   : > { %16462 = vst [vmem:[#allocation188_spill] sm:$0xff] %v10546_v59  ;;  %16471 = vst [vmem:[#allocation194_spill] sm:$0xff] %v10607_v8  ;;  %v8947_v8 = vld [vmem:[%s9194_s21 + $0xb0] sm:$0xff]  }
 0x2ca   : > { %8754 = vmatpush3.bf16.msra.mxu0 %v8938_v22  ;;  %v10487_v22 = vld [vmem:[%s10302_s22 + $0xc8] sm:$0xff] }
 0x2cb   : > { %2389 = vmatmul.mubr.bf16.gmra.mrb[136].mxu1 %v16451_v32  ;;  %8755 = vmatprep.subr.bf16.mxu0 %v16241_v12  ;;  %16454 = vst [vmem:[#allocation180_spill] sm:$0xff] %v10487_v22  ;;  %v10513_v32 = vld [vmem:[%s10302_s22 + $0xd8] sm:$0xff]  ;;  %v10558_v22 = vld [vmem:[%s10302_s22 + $0x168] sm:$0xff] }
 0x2cc   : > { %2398 = vmatprep.mubr.bf16.mxu1 %v16320_v43  ;;  %16458 = vst [vmem:[#allocation184_spill] sm:$0xff] %v10513_v32  ;;  %16464 = vst [vmem:[#allocation189_spill] sm:$0xff] %v10558_v22  ;;  %v10561_v32 = vld [vmem:[%s10302_s22 + $0xf0] sm:$0xff]  ;;  %v16469_v22 = vclamps-f32 %v9682_v45, 1.0  ;;  %v1114_v45 = vmul.f32 2.0, %v9642_v30  ;;  %v16487_v30 = vunpack.c.h.bf16 %v10317_v0 }
 0x2cd   : > { %16465 = vst [vmem:[#allocation190_spill] sm:$0xff] %v10561_v32 }
 0x2ce   : > { %8756 = vmatpush3.bf16.msra.mxu0 %v8939_v53  ;;  %v10525_v53 = vld [vmem:[%s15748_s4] sm:$0xf]  ;;  %v10601_v59 = vsub.f32 %v16469_v22, %v16468_v18  ;;  %v1112_v22 = vmul.f32 2.0, %v9638_v27  ;;  %v16476_v18 = vunpack.c.l.bf16 %v10314_v58  ;;  %v10648_v27 = vadd.f32 -1.0, %v1111_v3 }
 0x2cf   : > { %8761 = vmatprep.subr.bf16.mxu0 %v16241_v12 }
 0x2d0   : > { %16470 = vst [vmem:[#allocation193_spill] sm:$0xff] %v10601_v59 }
 0x2d1   : > { %8758 = vmatmul.mubr.bf16.vlgmr.msra.gmra.mrb[136].mxu0 %v10525_v53 }
 0x2d2   : > { %8762 = vmatpush3.bf16.msra.mxu0 %v8941_v24  ;;  %8777 = vmatprep.mubr.msk.bf16.mxu0 %vm9078_vm0, %v16241_v12  ;;  %v10552_v24 = vadd.f32 -1.0, %v1103_v61  ;;  %v1109_v61 = vmul.f32 2.0, %v9632_v21  ;;  %v16472_v21 = vunpack.c.h.bf16 %v10310_v42  ;;  %v10653_v42 = vld [vmem:[%s10302_s22 + $0x188] sm:$0xff] }
 0x2d3   : > { %2399 = vmatmul.mubr.bf16.gmra.mrb[140].mxu1 %v16463_v48  ;;  %8763 = vmatprep.subr.bf16.mxu0 %v16241_v12  ;;  %v16473_v48 = vclamps-f32 %v9686_v55, 1.0  ;;  %16483 = vst [vmem:[#allocation199_spill] sm:$0xff] %v10653_v42 }
 0x2d4   : > { %2408 = vmatprep.mubr.bf16.mxu1 %v16320_v43 }
 0x2d5   : > { %v10614_v51 = vsub.f32 %v16473_v48, %v16472_v21  ;;  %v10646_v48 = vadd.f32 -1.0, %v1110_v13  ;;  %v1113_v21 = vmul.f32 2.0, %v9640_v29  ;;  %v10662_v13 = vadd.f32 -1.0, %v1112_v22  ;;  %v16493_v22 = vld [vmem:[#allocation8_spill] sm:$0xff] }
 0x2d6   : > { %8764 = vmatpush3.bf16.msra.mxu0 %v8942_v34  ;;  %v10633_v34 = vld [vmem:[%s10302_s22 + $0x180] sm:$0xff]  ;;  %v1115_v59 = vmul.f32 2.0, %v16493_v22  ;;  %v16494_v29 = vunpack.c.h.bf16 %v10320_v63  ;;  %v10700_v63 = vadd.f32 -1.0, %v1114_v45 }
 0x2d7   : > { %8765 = vmatprep.subr.bf16.mxu0 %v16241_v12  ;;  %16474 = vst [vmem:[#allocation195_spill] sm:$0xff] %v10614_v51  ;;  %16479 = vst [vmem:[#allocation197_spill] sm:$0xff] %v10633_v34  ;;  %v8944_v51 = vld [vmem:[%s9194_s21 + $0x98] sm:$0xff]   ;;  %v10698_v3 = vadd.f32 -1.0, %v1113_v21  ;;  %v10728_v22 = vld [vmem:[%s10302_s22 + $0x1a0] sm:$0xff] }
 0x2d8   : > { %v10711_v45 = vadd.f32 -1.0, %v1115_v59  ;;  %v8946_v59 = vld [vmem:[%s9194_s21 + $0xa8] sm:$0xff]   ;;  %v16528_v34 = vld [vmem:[#allocation16_spill] sm:$0xff] }
 0x2da   : > { %8766 = vmatpush3.bf16.msra.mxu0 %v8943_v44  ;;  %v16477_v44 = vclamps-f32 %v10552_v24, 1.0 }
 0x2db   : > { %2409 = vmatmul.mubr.bf16.gmra.mrb[144].mxu1 %v16475_v26  ;;  %8767 = vmatprep.subr.bf16.mxu0 %v16241_v12  ;;  %v10640_v26 = vsub.f32 %v16481_v4, %v16480_v40  ;;  %v16484_v40 = vunpack.c.l.bf16 %v10317_v0 }
 0x2dc   : > { %v10627_v55 = vsub.f32 %v16477_v44, %v16476_v18  ;;  %2418 = vmatprep.mubr.bf16.mxu1 %v16320_v43  ;;  %v10643_v18 = vadd.f32 -1.0, %v1109_v61  ;;  %v16485_v61 = vclamps-f32 %v10577_v1, 1.0  ;;  %v16488_v44 = vclamps-f32 %v10587_v5, 1.0 }
 0x2dd   : > { %16482 = vst [vmem:[#allocation198_spill] sm:$0xff] %v10640_v26  ;;  %v10691_v26 = vld [vmem:[%s10302_s22 + $0x190] sm:$0xff] }
 0x2de   : > { %16478 = vst [vmem:[#allocation196_spill] sm:$0xff] %v10627_v55  ;;  %8768 = vmatpush3.bf16.msra.mxu0 %v8944_v51  ;;  %v10660_v4 = vsub.f32 %v16485_v61, %v16484_v40  ;;  %v10671_v51 = vsub.f32 %v16488_v44, %v16487_v30  ;;  %v16491_v40 = vclamps-f32 %v10589_v6, 1.0  ;;  %v16497_v44 = vld [vmem:[#allocation9_spill] sm:$0xff]  ;;  %v16511_v55 = vunpack.c.l.bf16 %v10329_v50 }
 0x2df   : > { %8769 = vmatprep.subr.bf16.mxu0 %v16241_v12  ;;  %v1116_v30 = vmul.f32 2.0, %v16497_v44  ;;  %16498 = vst [vmem:[#allocation9_spill] sm:$0xff] %v10691_v26  ;;  %v16500_v44 = vld [vmem:[#allocation10_spill] sm:$0xff]  ;;  %v16512_v26 = vclamps-f32 %v10648_v27, 1.0 }
 0x2e0   : > { %16486 = vst [vmem:[#allocation200_spill] sm:$0xff] %v10660_v4  ;;  %16489 = vst [vmem:[#allocation201_spill] sm:$0xff] %v10671_v51  ;;  %v10677_v61 = vsub.f32 %v16491_v40, %v16490_v23  ;;  %v16495_v4 = vclamps-f32 %v10593_v19, 1.0  ;;  %v10694_v23 = vld [vmem:[%s10302_s22 + $0x198] sm:$0xff]  ;;  %v1117_v0 = vmul.f32 2.0, %v16500_v44  ;;  %v16502_v40 = vpack.c.bf16 %v10165_v10, %v10140_v56 }
 0x2e1   : > { %16499 = vst [vmem:[#allocation203_spill] sm:$0xff] %v10694_v23  ;;  %v16501_v51 = vld [vmem:[#allocation11_spill] sm:$0xff]  ;;  %v10723_v56 = vadd.f32 -1.0, %v1116_v30  ;;  %v16509_v44 = vclamps-f32 %v10646_v48, 1.0  ;;  %v16519_v30 = vld [vmem:[#allocation14_spill] sm:$0xff] }
 0x2e2   : > { %16492 = vst [vmem:[#allocation202_spill] sm:$0xff] %v10677_v61  ;;  %v10685_v58 = vsub.f32 %v16495_v4, %v16494_v29  ;;  %v8945_v4 = vld [vmem:[%s9194_s21 + $0xa0] sm:$0xff]   ;;  %v16504_v61 = vclamps-f32 %v10643_v18, 1.0  ;;  %16507 = vst [vmem:[#allocation11_spill] sm:$0xff] %v10728_v22 }
 0x2e3   : > { %8770 = vmatpush3.bf16.msra.mxu0 %v8945_v4  ;;  %2419 = vmatmul.mubr.bf16.gmra.mrb[148].mxu1 %v16502_v40  ;;  %v16506_v40 = vld [vmem:[#allocation12_spill] sm:$0xff]  ;;  %v16508_v4 = vunpack.c.h.bf16 %v10323_v39 }
 0x2e4   : > { %16496 = vst [vmem:[#allocation8_spill] sm:$0xff] %v10685_v58  ;;  %v1118_v58 = vmul.f32 2.0, %v16501_v51  ;;  %8771 = vmatprep.subr.bf16.mxu0 %v16241_v12  ;;  %2428 = vmatprep.mubr.bf16.mxu1 %v16320_v43  ;;  %v16503_v51 = vunpack.c.l.bf16 %v10323_v39  ;;  %v1119_v29 = vmul.f32 2.0, %v16506_v40  ;;  %v10745_v40 = vld [vmem:[%s10302_s22 + $0x1a8] sm:$0xff]  ;;  %v16515_v39 = vunpack.c.h.bf16 %v10329_v50 }
 0x2e5   : > { %v10734_v21 = vsub.f32 %v16509_v44, %v16508_v4  ;;  %16514 = vst [vmem:[#allocation205_spill] sm:$0xff] %v10745_v40  ;;  %v16516_v4 = vclamps-f32 %v10662_v13, 1.0  ;;  %v16526_v50 = vclamps-f32 %v10700_v63, 1.0 }
 0x2e6   : > { %v10721_v10 = vsub.f32 %v16504_v61, %v16503_v51  ;;  %v10740_v61 = vsub.f32 %v16512_v26, %v16511_v55  ;;  %v16518_v55 = vld [vmem:[#allocation13_spill] sm:$0xff]  ;;  %v16523_v51 = vclamps-f32 %v10698_v3, 1.0 }
 0x2e7   : > { %16510 = vst [vmem:[#allocation12_spill] sm:$0xff] %v10734_v21  ;;  %8772 = vmatpush3.bf16.msra.mxu0 %v8946_v59  ;;  %v10752_v44 = vsub.f32 %v16516_v4, %v16515_v39  ;;  %v10754_v21 = vadd.f32 -1.0, %v1117_v0  ;;  %v1120_v26 = vmul.f32 2.0, %v16518_v55  ;;  %v16520_v59 = vld [vmem:[#allocation15_spill] sm:$0xff]  ;;  %v10765_v39 = vld [vmem:[%s10302_s22 + $0x1b0] sm:$0xff]  ;;  %v1123_v0 = vmul.f32 2.0, %v16528_v34 }
 0x2e8   : > { %16505 = vst [vmem:[#allocation10_spill] sm:$0xff] %v10721_v10  ;;  %16513 = vst [vmem:[#allocation204_spill] sm:$0xff] %v10740_v61  ;;  %v10756_v10 = vadd.f32 -1.0, %v1118_v58  ;;  %8773 = vmatprep.subr.bf16.mxu0 %v16241_v12  ;;  %v1121_v61 = vmul.f32 2.0, %v16519_v30  ;;  %v1122_v23 = vmul.f32 2.0, %v16520_v59  ;;  %v10768_v58 = vadd.f32 -1.0, %v1119_v29 }
 0x2e9   : > { %16517 = vst [vmem:[#allocation206_spill] sm:$0xff] %v10752_v44  ;;  %16521 = vst [vmem:[#allocation13_spill] sm:$0xff] %v10765_v39  ;;  %v16522_v44 = vunpack.c.l.bf16 %v10332_v25  ;;  %v16525_v59 = vunpack.c.h.bf16 %v10332_v25  ;;  %v10789_v22 = vadd.f32 -1.0, %v1120_v26  ;;  %v16531_v34 = vunpack.c.l.bf16 %v10340_v47  ;;  %v16548_v39 = vld [vmem:[#allocation21_spill] sm:$0xff] }
 0x2ea   : > { %v10805_v26 = vadd.f32 -1.0, %v1121_v61  ;;  %v10807_v29 = vadd.f32 -1.0, %v1122_v23  ;;  %v10820_v61 = vadd.f32 -1.0, %v1123_v0  ;;  %v16539_v23 = vld [vmem:[#allocation19_spill] sm:$0xff]  ;;  %v16546_v0 = vclamps-f32 %v10756_v10, 1.0 }
 0x2eb   : > { %v10776_v30 = vsub.f32 %v16523_v51, %v16522_v44  ;;  %v10782_v42 = vsub.f32 %v16526_v50, %v16525_v59  ;;  %8774 = vmatpush3.bf16.msra.mxu0 %v8947_v8  ;;  %v10793_v44 = vld [vmem:[%s10302_s22 + $0x1b8] sm:$0xff]  ;;  %v16530_v50 = vpack.c.bf16 %v10240_v2, %v10222_v20  ;;  %v16532_v8 = vclamps-f32 %v10711_v45, 1.0  ;;  %v16534_v51 = vld [vmem:[#allocation17_spill] sm:$0xff] }
 0x2ec   : > { %16529 = vst [vmem:[#allocation16_spill] sm:$0xff] %v10793_v44  ;;  %8775 = vmatprep.subr.bf16.mxu0 %v16241_v12  ;;  %v1124_v4 = vmul.f32 2.0, %v16534_v51  ;;  %v16535_v20 = vunpack.c.h.bf16 %v10340_v47  ;;  %v16536_v2 = vclamps-f32 %v10723_v56, 1.0  ;;  %v16538_v12 = vld [vmem:[#allocation18_spill] sm:$0xff]  ;;  %v16540_v51 = vld [vmem:[#allocation20_spill] sm:$0xff] }
 0x2ed   : > { %16524 = vst [vmem:[#allocation14_spill] sm:$0xff] %v10776_v30  ;;  %16527 = vst [vmem:[#allocation15_spill] sm:$0xff] %v10782_v42  ;;  %2429 = vmatmul.mubr.bf16.gmra.mrb[152].mxu1 %v16530_v50  ;;  %v10803_v59 = vsub.f32 %v16532_v8, %v16531_v34  ;;  %v1125_v25 = vmul.f32 2.0, %v16538_v12  ;;  %v1126_v8 = vmul.f32 2.0, %v16539_v23  ;;  %v10826_v47 = vld [vmem:[%s10302_s22 + $0x1c0] sm:$0xff]  ;;  %v8948_v30 = vld [vmem:[%s9194_s21 + $0xb8] sm:$0xff]   ;;  %v16545_v34 = vunpack.c.h.bf16 %v10343_v17 }
 0x2ee   : > { %2438 = vmatprep.mubr.bf16.mxu1 %v16320_v43  ;;  %v10815_v50 = vsub.f32 %v16536_v2, %v16535_v20  ;;  %16541 = vst [vmem:[#allocation18_spill] sm:$0xff] %v10826_v47  ;;  %v16542_v20 = vunpack.c.l.bf16 %v10343_v17  ;;  %v16543_v2 = vclamps-f32 %v10754_v21, 1.0  ;;  %v16550_v17 = vunpack.c.l.bf16 %v10350_v14  ;;  %v10869_v44 = vld [vmem:[%s10302_s22 + $0x1d0] sm:$0xff]  ;;  %v16558_v42 = vld [vmem:[#allocation23_spill] sm:$0xff]  ;;  %s9079_s21 = smov 127  }
 0x2ef   : > { %16533 = vst [vmem:[#allocation207_spill] sm:$0xff] %v10803_v59  ;;  %v1127_v59 = vmul.f32 2.0, %v16540_v51  ;;  %8776 = vmatpush3.bf16.msra.mxu0 %v8948_v30  ;;  %v10839_v55 = vsub.f32 %v16546_v0, %v16545_v34  ;;  %v16551_v34 = vclamps-f32 %v10768_v58, 1.0  ;;  %v10857_v23 = vadd.f32 -1.0, %v1125_v25 }
 0x2f0   : > { %16537 = vst [vmem:[#allocation17_spill] sm:$0xff] %v10815_v50  ;;  %v10833_v12 = vsub.f32 %v16543_v2, %v16542_v20  ;;  %v10845_v50 = vadd.f32 -1.0, %v1124_v4  ;;  %v1128_v20 = vmul.f32 2.0, %v16548_v39  ;;  %v10849_v2 = vld [vmem:[%s10302_s22 + $0x1c8] sm:$0xff]  ;;  %v10863_v30 = vadd.f32 -1.0, %v1126_v8 }
 0x2f1   : > { %16547 = vst [vmem:[#allocation20_spill] sm:$0xff] %v10839_v55  ;;  %16549 = vst [vmem:[#allocation21_spill] sm:$0xff] %v10849_v2  ;;  %v10855_v0 = vsub.f32 %v16551_v34, %v16550_v17  ;;  %v10865_v39 = vadd.f32 -1.0, %v1127_v59  ;;  %v16553_v55 = vld [vmem:[#allocation22_spill] sm:$0xff]  ;;  %v16555_v17 = vunpack.c.h.bf16 %v10350_v14  ;;  %v16556_v25 = vclamps-f32 %v10789_v22, 1.0  ;;  %v16567_v8 = vld [vmem:[#allocation25_spill] sm:$0xff] }
 0x2f2   : > { %16544 = vst [vmem:[#allocation19_spill] sm:$0xff] %v10833_v12  ;;  %8778 = vmatmul.mubr.bf16.vlgmr.msra.gmra.mrb[140].mxu0 %v10525_v53  ;;  %v1129_v12 = vmul.f32 2.0, %v16553_v55  ;;  %16554 = vst [vmem:[#allocation22_spill] sm:$0xff] %v10869_v44  ;;  %v1130_v51 = vmul.f32 2.0, %v16558_v42  ;;  %v16559_v59 = vpack.c.bf16 %v10228_v16, %v10211_v36  ;;  %v16560_v55 = vunpack.c.l.bf16 %v10353_v52  ;;  %v16566_v16 = vld [vmem:[#allocation24_spill] sm:$0xff] }
 0x2f3   : > { %16552 = vst [vmem:[#allocation208_spill] sm:$0xff] %v10855_v0  ;;  %v10875_v34 = vsub.f32 %v16556_v25, %v16555_v17  ;;  %v16561_v4 = vclamps-f32 %v10805_v26, 1.0  ;;  %v16563_v14 = vunpack.c.h.bf16 %v10353_v52  ;;  %v16564_v17 = vclamps-f32 %v10807_v29, 1.0  ;;  %v10904_v52 = vld [vmem:[%s10302_s22 + $0x1d8] sm:$0xff] }
 0x2f4   : > { %v10896_v53 = vadd.f32 -1.0, %v1128_v20  ;;  %16568 = vst [vmem:[#allocation24_spill] sm:$0xff] %v10904_v52  ;;  %v10914_v36 = vadd.f32 -1.0, %v1129_v12  ;;  %v16575_v2 = vunpack.c.h.bf16 %v10360_v31  ;;  %v16583_v20 = vunpack.c.h.bf16 %v10363_v54 }
 0x2f5   : > { %16557 = vst [vmem:[#allocation209_spill] sm:$0xff] %v10875_v34  ;;  %2439 = vmatmul.mubr.bf16.gmra.mrb[156].mxu1 %v16559_v59  ;;  %v10887_v0 = vsub.f32 %v16561_v4, %v16560_v55  ;;  %v10893_v25 = vsub.f32 %v16564_v17, %v16563_v14  ;;  %v1131_v59 = vmul.f32 2.0, %v16566_v16  ;;  %v1132_v4 = vmul.f32 2.0, %v16567_v8  ;;  %v16574_v34 = vld [vmem:[#allocation27_spill] sm:$0xff] }
 0x2f6   : > { %2996 = vmatprep.mubr.bf16.mxu1 %v16320_v43  ;;  %v16569_v14 = vunpack.c.l.bf16 %v10360_v31  ;;  %v16570_v17 = vclamps-f32 %v10820_v61, 1.0  ;;  %16572 = vst [vmem:[#allocation211_spill] sm:$0xff] %v10914_v36  ;;  %v10916_v16 = vadd.f32 -1.0, %v1130_v51  ;;  %v1134_v55 = vmul.f32 2.0, %v16574_v34 }
 0x2f7   : > { %16562 = vst [vmem:[#allocation23_spill] sm:$0xff] %v10887_v0  ;;  %16565 = vst [vmem:[#allocation210_spill] sm:$0xff] %v10893_v25  ;;  %v16573_v0 = vld [vmem:[#allocation26_spill] sm:$0xff]  ;;  %v10931_v25 = vld [vmem:[%s10302_s22 + $0x1e0] sm:$0xff]  ;;  %v16580_v34 = vclamps-f32 %v10857_v23, 1.0  ;;  %v10939_v43 = vadd.f32 -1.0, %v1131_v59  ;;  %v16586_v51 = vunpack.c.l.bf16 %v10371_v60  ;;  %v16607_v47 = vunpack.c.l.bf16 %v10385_v33 }
 0x2f8   : > { %v10910_v42 = vsub.f32 %v16570_v17, %v16569_v14  ;;  %v1133_v8 = vmul.f32 2.0, %v16573_v0  ;;  %v16576_v14 = vclamps-f32 %v10845_v50, 1.0  ;;  %16578 = vst [vmem:[#allocation27_spill] sm:$0xff] %v10931_v25  ;;  %v16579_v0 = vunpack.c.l.bf16 %v10363_v54 }
 0x2f9   : > { %v10941_v31 = vadd.f32 -1.0, %v1132_v4  ;;  %v16584_v12 = vclamps-f32 %v10863_v30, 1.0  ;;  %v16587_v52 = vclamps-f32 %v10865_v39, 1.0 }
 0x2fa   : > { %16571 = vst [vmem:[#allocation25_spill] sm:$0xff] %v10910_v42  ;;  %v10925_v17 = vsub.f32 %v16576_v14, %v16575_v2  ;;  %v10937_v42 = vsub.f32 %v16580_v34, %v16579_v0  ;;  %v16582_v2 = vld [vmem:[#allocation28_spill] sm:$0xff]  ;;  %v16589_v0 = vld [vmem:[#allocation29_spill] sm:$0xff]  ;;  %v10962_v54 = vadd.f32 -1.0, %v1133_v8  ;;  %v16602_v8 = vunpack.c.h.bf16 %v10374_v41 }
 0x2fb   : > { %v1135_v14 = vmul.f32 2.0, %v16582_v2  ;;  %v10954_v44 = vsub.f32 %v16587_v52, %v16586_v51  ;;  %v1777_v4 = vmul.f32 2.0, %v16589_v0  ;;  %v10959_v34 = vld [vmem:[%s10302_s22 + $0x1e8] sm:$0xff]  ;;  %v16593_v52 = vclamps-f32 %v10896_v53, 1.0 }
 0x2fc   : > { %16577 = vst [vmem:[#allocation26_spill] sm:$0xff] %v10925_v17  ;;  %16581 = vst [vmem:[#allocation212_spill] sm:$0xff] %v10937_v42  ;;  %v10948_v17 = vsub.f32 %v16584_v12, %v16583_v20  ;;  %v10964_v42 = vadd.f32 -1.0, %v1134_v55  ;;  %v16592_v12 = vunpack.c.h.bf16 %v10371_v60  ;;  %v10982_v60 = vld [vmem:[%s10302_s22 + $0x1f0] sm:$0xff]  ;;  %v16610_v20 = vunpack.c.h.bf16 %v10385_v33 }
 0x2fd   : > { %16588 = vst [vmem:[#allocation213_spill] sm:$0xff] %v10954_v44  ;;  %16590 = vst [vmem:[#allocation29_spill] sm:$0xff] %v10959_v34  ;;  %v16595_v44 = vld [vmem:[#allocation31_spill] sm:$0xff]  ;;  %v10978_v2 = vadd.f32 -1.0, %v1135_v14  ;;  %v16603_v14 = vclamps-f32 %v10916_v16, 1.0  ;;  %v16611_v25 = vclamps-f32 %v10941_v31, 1.0 }
 0x2fe   : > { %16585 = vst [vmem:[#allocation28_spill] sm:$0xff] %v10948_v17  ;;  %16591 = vst [vmem:[#allocation214_spill] sm:$0xff] %v10962_v54  ;;  %v10971_v51 = vsub.f32 %v16593_v52, %v16592_v12  ;;  %v1136_v59 = vmul.f32 2.0, %v16595_v44  ;;  %v16596_v17 = vld [vmem:[#allocation32_spill] sm:$0xff]  ;;  %v16598_v12 = vunpack.c.l.bf16 %v10374_v41  ;;  %v16599_v52 = vclamps-f32 %v10914_v36, 1.0  ;;  %v11002_v36 = vld [vmem:[%s10302_s22 + $0x1f8] sm:$0xff] }
 0x2ff   : > { %v1778_v0 = vmul.f32 2.0, %v16596_v17  ;;  %16597 = vst [vmem:[#allocation31_spill] sm:$0xff] %v10982_v60  ;;  %v16601_v17 = vld [vmem:[#allocation36_spill] sm:$0xff]  ;;  %v10996_v55 = vsub.f32 %v16603_v14, %v16602_v8  ;;  %16606 = vst [vmem:[#allocation37_spill] sm:$0xff] %v11002_v36  ;;  %v16608_v8 = vclamps-f32 %v10939_v43, 1.0  ;;  %v11018_v57 = vsub.f32 %v16611_v25, %v16610_v20  ;;  %v16613_v41 = vld [vmem:[#allocation38_spill] sm:$0xff] }
 0x300   : > { %16594 = vst [vmem:[#allocation215_spill] sm:$0xff] %v10971_v51  ;;  %v10988_v44 = vsub.f32 %v16599_v52, %v16598_v12  ;;  %v7621_v51 = vadd.f32 -1.0, %v1777_v4  ;;  %v1137_v40 = vmul.f32 2.0, %v16601_v17  ;;  %v11004_v12 = vadd.f32 -1.0, %v1136_v59  ;;  %v16614_v17 = vld [vmem:[#allocation39_spill] sm:$0xff]  ;;  %v16619_v20 = vld [vmem:[#allocation30_spill] sm:$0xff] }
 0x301   : > { %16604 = vst [vmem:[#allocation36_spill] sm:$0xff] %v10996_v55  ;;  %v7622_v4 = vadd.f32 -1.0, %v1778_v0  ;;  %v11012_v14 = vsub.f32 %v16608_v8, %v16607_v47  ;;  %16612 = vst [vmem:[#allocation217_spill] sm:$0xff] %v11018_v57  ;;  %v1138_v0 = vmul.f32 2.0, %v16613_v41  ;;  %v1780_v60 = vmul.f32 2.0, %v16614_v17  ;;  %v16625_v34 = vld [vmem:[#allocation40_spill] sm:$0xff] }
 0x302   : > { %16600 = vst [vmem:[#allocation32_spill] sm:$0xff] %v10988_v44  ;;  %v7685_v55 = vclamps-f32 %v7621_v51, 1.0  ;;  %v11022_v52 = vadd.f32 -1.0, %v1137_v40  ;;  %v16615_v47 = vunpack.c.l.bf16 %v10388_v7  ;;  %v16616_v8 = vclamps-f32 %v10962_v54, 1.0  ;;  %v16628_v54 = vld [vmem:[#allocation33_spill] sm:$0xff] }
 0x303   : > { %16609 = vst [vmem:[#allocation216_spill] sm:$0xff] %v11012_v14  ;;  %v16618_v25 = vunpack.c.l.bf16 %v10396_v9  ;;  %v16620_v57 = vclamps-f32 %v16619_v20, 1.0  ;;  %v16622_v41 = vunpack.c.h.bf16 %v10388_v7  ;;  %v16623_v40 = vclamps-f32 %v10964_v42, 1.0 }
 0x304   : > { %v11030_v33 = vsub.f32 %v16616_v8, %v16615_v47  ;;  %v7623_v17 = vadd.f32 -1.0, %v1779_v15  ;;  %v7686_v14 = vclamps-f32 %v7622_v4, 1.0  ;;  %v1139_v36 = vmul.f32 2.0, %v16625_v34  ;;  %v16626_v47 = vld [vmem:[#allocation41_spill] sm:$0xff] }
 0x305   : > { %v11036_v59 = vsub.f32 %v16620_v57, %v16618_v25  ;;  %v11042_v51 = vsub.f32 %v16623_v40, %v16622_v41  ;;  %v1781_v8 = vmul.f32 2.0, %v16626_v47  ;;  %v16629_v20 = vclamps-f32 %v16628_v54, 1.0  ;;  %v16634_v40 = vld [vmem:[#allocation42_spill] sm:$0xff]  ;;  %v16636_v54 = vld [vmem:[#allocation43_spill] sm:$0xff] }
 0x306   : > { %16617 = vst [vmem:[#allocation38_spill] sm:$0xff] %v11030_v33  ;;  %v16627_v33 = vunpack.c.h.bf16 %v10396_v9  ;;  %v16631_v25 = vunpack.c.l.bf16 %v10399_v35  ;;  %v11059_v15 = vadd.f32 -1.0, %v1138_v0  ;;  %v1140_v4 = vmul.f32 2.0, %v16634_v40  ;;  %v16640_v0 = vld [vmem:[#allocation45_spill] sm:$0xff] }
 0x307   : > { %16621 = vst [vmem:[#allocation39_spill] sm:$0xff] %v11036_v59  ;;  %16624 = vst [vmem:[#allocation30_spill] sm:$0xff] %v11042_v51  ;;  %v16632_v59 = vclamps-f32 %v10978_v2, 1.0  ;;  %v16635_v34 = vclamps-f32 %v10552_v24, 1.0  ;;  %v7624_v9 = vadd.f32 -1.0, %v1780_v60  ;;  %v7687_v7 = vclamps-f32 %v7623_v17, 1.0 }
 0x308   : > { %v11051_v57 = vsub.f32 %v16629_v20, %v16627_v33  ;;  %v1782_v33 = vmul.f32 2.0, %v16636_v54  ;;  %v16637_v20 = vunpack.c.l.bf16 %v10406_v62  ;;  %v16641_v40 = vunpack.c.h.bf16 %v10399_v35 }
 0x309   : > { %v11057_v41 = vsub.f32 %v16632_v59, %v16631_v25  ;;  %v11064_v44 = vadd.f32 %v7685_v55, %v16635_v34  ;;  %v16639_v59 = vld [vmem:[#allocation44_spill] sm:$0xff]  ;;  %v16642_v24 = vclamps-f32 %v11004_v12, 1.0  ;;  %v16644_v47 = vclamps-f32 %v10564_v28, 1.0 }
 0x30a   : > { %16630 = vst [vmem:[#allocation40_spill] sm:$0xff] %v11051_v57  ;;  %v11070_v57 = vsub.f32 %v7685_v55, %v16637_v20  ;;  %v1141_v25 = vmul.f32 2.0, %v16639_v59  ;;  %v11084_v54 = vadd.f32 -1.0, %v1139_v36  ;;  %v7625_v51 = vadd.f32 -1.0, %v1781_v8  ;;  %v16656_v20 = vld [vmem:[#allocation48_spill] sm:$0xff] }
 0x30b   : > { %16633 = vst [vmem:[#allocation41_spill] sm:$0xff] %v11057_v41  ;;  %v1783_v41 = vmul.f32 2.0, %v16640_v0  ;;  %v11078_v34 = vsub.f32 %v16642_v24, %v16641_v40  ;;  %v11082_v60 = vadd.f32 %v7686_v14, %v16644_v47  ;;  %v16646_v55 = vunpack.c.h.bf16 %v10406_v62  ;;  %v16648_v0 = vld [vmem:[#allocation46_spill] sm:$0xff] }
 0x30c   : > { %16638 = vst [vmem:[#allocation33_spill] sm:$0xff] %v11070_v57  ;;  %v11091_v59 = vadd.f32 -1.0, %v1140_v4  ;;  %v1784_v35 = vmul.f32 2.0, %v16648_v0  ;;  %v16649_v57 = vld [vmem:[#allocation166_spill] sm:$0xff]  ;;  %v16651_v24 = vclamps-f32 %v11022_v52, 1.0  ;;  %v7688_v47 = vclamps-f32 %v7624_v9, 1.0 }
 0x30d   : > { %16643 = vst [vmem:[#allocation42_spill] sm:$0xff] %v11078_v34  ;;  %16645 = vst [vmem:[#allocation43_spill] sm:$0xff] %v11082_v60  ;;  %v11088_v17 = vsub.f32 %v7686_v14, %v16646_v55  ;;  %v16650_v40 = vunpack.c.l.bf16 %v16649_v57  ;;  %v7626_v36 = vadd.f32 -1.0, %v1782_v33  ;;  %v16653_v34 = vld [vmem:[#allocation47_spill] sm:$0xff]  ;;  %v16654_v62 = vclamps-f32 %v10577_v1, 1.0  ;;  %v16659_v9 = vld [vmem:[#allocation49_spill] sm:$0xff] }
 0x30e   : > { %v1785_v8 = vmul.f32 2.0, %v16653_v34  ;;  %v11105_v55 = vadd.f32 -1.0, %v1141_v25  ;;  %v7627_v4 = vadd.f32 -1.0, %v1783_v41  ;;  %v16657_v0 = vunpack.c.l.bf16 %v10417_v37 }
 0x30f   : > { %16647 = vst [vmem:[#allocation44_spill] sm:$0xff] %v11088_v17  ;;  %v11098_v28 = vsub.f32 %v16651_v24, %v16650_v40  ;;  %v11103_v14 = vadd.f32 %v7687_v7, %v16654_v62  ;;  %v1144_v17 = vmul.f32 2.0, %v16656_v20  ;;  %v7689_v24 = vclamps-f32 %v7625_v51, 1.0 }
 0x310   : > { %v11110_v60 = vsub.f32 %v7687_v7, %v16657_v0  ;;  %v1786_v33 = vmul.f32 2.0, %v16659_v9  ;;  %v16660_v34 = vunpack.c.h.bf16 %v16649_v57  ;;  %v16661_v1 = vclamps-f32 %v11059_v15, 1.0 }
 0x311   : > { %16652 = vst [vmem:[#allocation45_spill] sm:$0xff] %v11098_v28  ;;  %16655 = vst [vmem:[#allocation46_spill] sm:$0xff] %v11103_v14  ;;  %v7628_v41 = vadd.f32 -1.0, %v1784_v35  ;;  %v16663_v28 = vld [vmem:[#allocation50_spill] sm:$0xff]  ;;  %v16664_v14 = vclamps-f32 %v10587_v5, 1.0  ;;  %v16666_v0 = vunpack.c.h.bf16 %v10417_v37  ;;  %v7690_v9 = vclamps-f32 %v7626_v36, 1.0 }
 0x312   : > { %16658 = vst [vmem:[#allocation47_spill] sm:$0xff] %v11110_v60  ;;  %v11118_v62 = vsub.f32 %v16661_v1, %v16660_v34  ;;  %v1787_v20 = vmul.f32 2.0, %v16663_v28  ;;  %v7629_v40 = vadd.f32 -1.0, %v1785_v8  ;;  %v7691_v60 = vclamps-f32 %v7627_v4, 1.0  ;;  %v16668_v1 = vld [vmem:[#allocation51_spill] sm:$0xff]  ;;  %v16669_v35 = vld [vmem:[#allocation168_spill] sm:$0xff] }
 0x313   : > { %v11124_v7 = vadd.f32 %v7688_v47, %v16664_v14  ;;  %v11128_v51 = vsub.f32 %v7688_v47, %v16666_v0  ;;  %v11131_v34 = vadd.f32 -1.0, %v1144_v17  ;;  %v1788_v25 = vmul.f32 2.0, %v16668_v1  ;;  %v16674_v36 = vld [vmem:[#allocation52_spill] sm:$0xff]  ;;  %v16675_v0 = vld [vmem:[#allocation169_spill] sm:$0xff] }
 0x314   : > { %16662 = vst [vmem:[#allocation48_spill] sm:$0xff] %v11118_v62  ;;  %v16670_v62 = vunpack.c.l.bf16 %v16669_v35  ;;  %v16671_v28 = vclamps-f32 %v11084_v54, 1.0  ;;  %v16673_v14 = vclamps-f32 %v10589_v6, 1.0  ;;  %v7630_v47 = vadd.f32 -1.0, %v1786_v33 }
 0x315   : > { %16665 = vst [vmem:[#allocation49_spill] sm:$0xff] %v11124_v7  ;;  %16667 = vst [vmem:[#allocation50_spill] sm:$0xff] %v11128_v51  ;;  %v1789_v8 = vmul.f32 2.0, %v16674_v36  ;;  %v16676_v57 = vunpack.c.l.bf16 %v16675_v0  ;;  %v16678_v17 = vunpack.c.h.bf16 %v16669_v35  ;;  %v16679_v1 = vclamps-f32 %v11091_v59, 1.0 }
 0x316   : > { %v11138_v5 = vsub.f32 %v16671_v28, %v16670_v62  ;;  %v11142_v37 = vadd.f32 %v7689_v24, %v16673_v14  ;;  %v7692_v7 = vclamps-f32 %v7628_v41, 1.0  ;;  %v7631_v62 = vadd.f32 -1.0, %v1787_v20 }
 0x317   : > { %v11147_v4 = vsub.f32 %v7689_v24, %v16676_v57  ;;  %v11153_v51 = vsub.f32 %v16679_v1, %v16678_v17  ;;  %v16681_v28 = vclamps-f32 %v10593_v19, 1.0  ;;  %v16682_v33 = vunpack.c.h.bf16 %v16675_v0  ;;  %v16689_v1 = vld [vmem:[#allocation171_spill] sm:$0xff] }
 0x318   : > { %16672 = vst [vmem:[#allocation51_spill] sm:$0xff] %v11138_v5  ;;  %v7693_v36 = vclamps-f32 %v7629_v40, 1.0  ;;  %v16684_v5 = vld [vmem:[#allocation53_spill] sm:$0xff]  ;;  %v16685_v24 = vunpack.c.l.bf16 %v10431_v46  ;;  %v16686_v35 = vclamps-f32 %v11105_v55, 1.0  ;;  %v16688_v41 = vclamps-f32 %v10643_v18, 1.0 }
 0x319   : > { %16677 = vst [vmem:[#allocation52_spill] sm:$0xff] %v11147_v4  ;;  %16680 = vst [vmem:[#allocation218_spill] sm:$0xff] %v11153_v51  ;;  %v11157_v6 = vadd.f32 %v7690_v9, %v16681_v28  ;;  %v11161_v14 = vsub.f32 %v7690_v9, %v16682_v33  ;;  %v1790_v57 = vmul.f32 2.0, %v16684_v5  ;;  %v7632_v17 = vadd.f32 -1.0, %v1788_v25  ;;  %v16692_v5 = vld [vmem:[#allocation54_spill] sm:$0xff]  ;;  %v16698_v25 = vld [vmem:[#allocation55_spill] sm:$0xff] }
 0x31a   : > { %v11168_v4 = vsub.f32 %v16686_v35, %v16685_v24  ;;  %v11172_v20 = vadd.f32 %v7691_v60, %v16688_v41  ;;  %v16690_v28 = vunpack.c.l.bf16 %v16689_v1  ;;  %v7694_v40 = vclamps-f32 %v7630_v47, 1.0  ;;  %v16701_v47 = vld [vmem:[#allocation172_spill] sm:$0xff] }
 0x31b   : > { %16683 = vst [vmem:[#allocation219_spill] sm:$0xff] %v11161_v14  ;;  %v7633_v33 = vadd.f32 -1.0, %v1789_v8  ;;  %v1791_v51 = vmul.f32 2.0, %v16692_v5  ;;  %v16693_v0 = vunpack.c.h.bf16 %v10431_v46  ;;  %v16694_v14 = vld [vmem:[#allocation80_spill] sm:$0xff]  ;;  %v16697_v18 = vclamps-f32 %v10646_v48, 1.0  ;;  %v16703_v5 = vld [vmem:[#allocation81_spill] sm:$0xff] }
 0x31c   : > { %16687 = vst [vmem:[#allocation53_spill] sm:$0xff] %v11168_v4  ;;  %v11177_v9 = vsub.f32 %v7691_v60, %v16690_v28  ;;  %v16695_v35 = vclamps-f32 %v16694_v14, 1.0  ;;  %v7695_v19 = vclamps-f32 %v7631_v62, 1.0  ;;  %v1792_v4 = vmul.f32 2.0, %v16698_v25 }
 0x31d   : > { %v11188_v41 = vadd.f32 %v7692_v7, %v16697_v18  ;;  %v16699_v60 = vunpack.c.h.bf16 %v16689_v1  ;;  %v16702_v8 = vunpack.c.l.bf16 %v16701_v47  ;;  %v7634_v48 = vadd.f32 -1.0, %v1790_v57  ;;  %v16713_v1 = vld [vmem:[#allocation56_spill] sm:$0xff]  ;;  %v16715_v57 = vld [vmem:[#allocation57_spill] sm:$0xff] }
 0x31e   : > { %16691 = vst [vmem:[#allocation220_spill] sm:$0xff] %v11177_v9  ;;  %v11184_v24 = vsub.f32 %v16695_v35, %v16693_v0  ;;  %v16704_v9 = vclamps-f32 %v16703_v5, 1.0  ;;  %v16706_v0 = vclamps-f32 %v10648_v27, 1.0  ;;  %v16707_v35 = vld [vmem:[#allocation173_spill] sm:$0xff]  ;;  %v16710_v25 = vunpack.c.h.bf16 %v16701_v47  ;;  %v16718_v47 = vld [vmem:[#allocation174_spill] sm:$0xff] }
 0x31f   : > { %v11193_v28 = vsub.f32 %v7692_v7, %v16699_v60  ;;  %v16708_v18 = vunpack.c.l.bf16 %v16707_v35  ;;  %v16711_v7 = vclamps-f32 %v11131_v34, 1.0  ;;  %v1793_v5 = vmul.f32 2.0, %v16713_v1 }
 0x320   : > { %16696 = vst [vmem:[#allocation54_spill] sm:$0xff] %v11184_v24  ;;  %v11199_v46 = vsub.f32 %v16704_v9, %v16702_v8  ;;  %v11203_v14 = vadd.f32 %v7693_v36, %v16706_v0  ;;  %v7696_v24 = vclamps-f32 %v7632_v17, 1.0  ;;  %v16714_v9 = vclamps-f32 %v10662_v13, 1.0 }
 0x321   : > { %16700 = vst [vmem:[#allocation80_spill] sm:$0xff] %v11193_v28  ;;  %v11207_v62 = vsub.f32 %v7693_v36, %v16708_v18  ;;  %v11213_v60 = vsub.f32 %v16711_v7, %v16710_v25  ;;  %v7697_v27 = vclamps-f32 %v7633_v33, 1.0  ;;  %v7635_v0 = vadd.f32 -1.0, %v1791_v51  ;;  %v16720_v28 = vld [vmem:[#allocation82_spill] sm:$0xff] }
 0x322   : > { %16705 = vst [vmem:[#allocation55_spill] sm:$0xff] %v11199_v46  ;;  %v11218_v8 = vadd.f32 %v7694_v40, %v16714_v9  ;;  %v1794_v46 = vmul.f32 2.0, %v16715_v57  ;;  %v16716_v36 = vunpack.c.h.bf16 %v16707_v35  ;;  %v16721_v25 = vclamps-f32 %v16720_v28, 1.0  ;;  %v16727_v57 = vld [vmem:[#allocation85_spill] sm:$0xff]  ;;  %v16730_v35 = vld [vmem:[#allocation58_spill] sm:$0xff] }
 0x323   : > { %16709 = vst [vmem:[#allocation81_spill] sm:$0xff] %v11207_v62  ;;  %16712 = vst [vmem:[#allocation221_spill] sm:$0xff] %v11213_v60  ;;  %v16719_v62 = vunpack.c.l.bf16 %v16718_v47  ;;  %v16723_v17 = vclamps-f32 %v10698_v3, 1.0  ;;  %v7636_v13 = vadd.f32 -1.0, %v1792_v4  ;;  %v16724_v33 = vunpack.c.l.bf16 %v10459_v38 }
 0x324   : > { %v11223_v18 = vsub.f32 %v7694_v40, %v16716_v36  ;;  %v16726_v9 = vunpack.c.h.bf16 %v16718_v47  ;;  %v16728_v40 = vclamps-f32 %v16727_v57, 1.0  ;;  %v7698_v60 = vclamps-f32 %v7634_v48, 1.0 }
 0x325   : > { %v11229_v7 = vsub.f32 %v16721_v25, %v16719_v62  ;;  %v11233_v1 = vadd.f32 %v7695_v19, %v16723_v17  ;;  %v11237_v51 = vsub.f32 %v7695_v19, %v16724_v33  ;;  %v1795_v28 = vmul.f32 2.0, %v16730_v35  ;;  %v16734_v19 = vld [vmem:[#allocation59_spill] sm:$0xff] }
 0x326   : > { %16717 = vst [vmem:[#allocation56_spill] sm:$0xff] %v11223_v18  ;;  %v11243_v36 = vsub.f32 %v16728_v40, %v16726_v9  ;;  %v16731_v62 = vclamps-f32 %v10700_v63, 1.0  ;;  %v16732_v3 = vunpack.c.h.bf16 %v10459_v38  ;;  %v7637_v17 = vadd.f32 -1.0, %v1793_v5  ;;  %v16744_v5 = vld [vmem:[#allocation88_spill] sm:$0xff]  ;;  %v16778_v18 = vld [vmem:[#allocation181_spill] sm:$0xff] }
 0x327   : > { %16722 = vst [vmem:[#allocation57_spill] sm:$0xff] %v11229_v7  ;;  %16725 = vst [vmem:[#allocation82_spill] sm:$0xff] %v11237_v51  ;;  %v1796_v33 = vmul.f32 2.0, %v16734_v19  ;;  %v16735_v47 = vunpack.c.l.bf16 %v10462_v49  ;;  %v16736_v7 = vld [vmem:[#allocation86_spill] sm:$0xff]  ;;  %v16739_v48 = vclamps-f32 %v10711_v45, 1.0  ;;  %v7699_v63 = vclamps-f32 %v7635_v0, 1.0 }
 0x328   : > { %16729 = vst [vmem:[#allocation85_spill] sm:$0xff] %v11243_v36  ;;  %v11248_v25 = vadd.f32 %v7696_v24, %v16731_v62  ;;  %v11252_v4 = vsub.f32 %v7696_v24, %v16732_v3  ;;  %v16737_v57 = vclamps-f32 %v16736_v7, 1.0  ;;  %v7638_v40 = vadd.f32 -1.0, %v1794_v46  ;;  %v16740_v62 = vld [vmem:[#allocation177_spill] sm:$0xff]  ;;  %v16747_v7 = vld [vmem:[#allocation60_spill] sm:$0xff] }
 0x329   : > { %v11263_v35 = vadd.f32 %v7697_v27, %v16739_v48  ;;  %v16741_v36 = vunpack.c.l.bf16 %v16740_v62  ;;  %v16743_v24 = vunpack.c.h.bf16 %v10462_v49  ;;  %v16745_v3 = vclamps-f32 %v16744_v5, 1.0 }
 0x32a   : > { %16733 = vst [vmem:[#allocation58_spill] sm:$0xff] %v11252_v4  ;;  %v11259_v9 = vsub.f32 %v16737_v57, %v16735_v47  ;;  %v7700_v4 = vclamps-f32 %v7636_v13, 1.0  ;;  %v1797_v47 = vmul.f32 2.0, %v16747_v7  ;;  %v16748_v57 = vclamps-f32 %v10723_v56, 1.0  ;;  %v16757_v7 = vld [vmem:[#allocation62_spill] sm:$0xff] }
 0x32b   : > { %v11267_v38 = vsub.f32 %v7697_v27, %v16741_v36  ;;  %v11273_v19 = vsub.f32 %v16745_v3, %v16743_v24  ;;  %v16749_v0 = vunpack.c.h.bf16 %v16740_v62  ;;  %v7639_v48 = vadd.f32 -1.0, %v1795_v28  ;;  %v16751_v27 = vld [vmem:[#allocation61_spill] sm:$0xff]  ;;  %v16759_v62 = vld [vmem:[#allocation179_spill] sm:$0xff] }
 0x32c   : > { %16738 = vst [vmem:[#allocation59_spill] sm:$0xff] %v11259_v9  ;;  %v11278_v45 = vadd.f32 %v7698_v60, %v16748_v57  ;;  %v1798_v36 = vmul.f32 2.0, %v16751_v27  ;;  %v16752_v9 = vld [vmem:[#allocation178_spill] sm:$0xff]  ;;  %v7701_v13 = vclamps-f32 %v7637_v17, 1.0  ;;  %v7640_v3 = vadd.f32 -1.0, %v1796_v33  ;;  %v16762_v27 = vld [vmem:[#allocation63_spill] sm:$0xff] }
 0x32d   : > { %16742 = vst [vmem:[#allocation86_spill] sm:$0xff] %v11267_v38  ;;  %16746 = vst [vmem:[#allocation88_spill] sm:$0xff] %v11273_v19  ;;  %v11282_v46 = vsub.f32 %v7698_v60, %v16749_v0  ;;  %v16753_v49 = vunpack.c.l.bf16 %v16752_v9  ;;  %v16754_v38 = vld [vmem:[#allocation95_spill] sm:$0xff]  ;;  %v1799_v19 = vmul.f32 2.0, %v16757_v7  ;;  %v16758_v56 = vclamps-f32 %v10754_v21, 1.0  ;;  %v16768_v7 = vld [vmem:[#allocation64_spill] sm:$0xff] }
 0x32e   : > { %v16755_v5 = vclamps-f32 %v16754_v38, 1.0  ;;  %v16760_v60 = vunpack.c.l.bf16 %v16759_v62  ;;  %v7702_v28 = vclamps-f32 %v7638_v40, 1.0  ;;  %v16763_v51 = vunpack.c.h.bf16 %v16752_v9  ;;  %v16764_v38 = vld [vmem:[#allocation96_spill] sm:$0xff] }
 0x32f   : > { %16750 = vst [vmem:[#allocation60_spill] sm:$0xff] %v11282_v46  ;;  %v11294_v57 = vadd.f32 %v7699_v63, %v16758_v56  ;;  %v1800_v46 = vmul.f32 2.0, %v16762_v27  ;;  %v16767_v17 = vclamps-f32 %v10756_v10, 1.0  ;;  %v7641_v21 = vadd.f32 -1.0, %v1797_v47  ;;  %v16771_v40 = vld [vmem:[#allocation180_spill] sm:$0xff]  ;;  %v16773_v27 = vld [vmem:[#allocation97_spill] sm:$0xff] }
 0x330   : > { %v11289_v24 = vsub.f32 %v16755_v5, %v16753_v49  ;;  %v11298_v0 = vsub.f32 %v7699_v63, %v16760_v60  ;;  %v16765_v49 = vclamps-f32 %v16764_v38, 1.0  ;;  %v1801_v56 = vmul.f32 2.0, %v16768_v7 }
 0x331   : > { %v11309_v33 = vadd.f32 %v7700_v4, %v16767_v17  ;;  %v16772_v60 = vunpack.c.l.bf16 %v16771_v40  ;;  %v7703_v38 = vclamps-f32 %v7639_v48, 1.0  ;;  %v7704_v17 = vclamps-f32 %v7640_v3, 1.0 }
 0x332   : > { %16756 = vst [vmem:[#allocation61_spill] sm:$0xff] %v11289_v24  ;;  %16761 = vst [vmem:[#allocation95_spill] sm:$0xff] %v11298_v0  ;;  %v11305_v5 = vsub.f32 %v16765_v49, %v16763_v51  ;;  %v16769_v24 = vunpack.c.h.bf16 %v16759_v62  ;;  %v16774_v0 = vclamps-f32 %v16773_v27, 1.0  ;;  %v7642_v51 = vadd.f32 -1.0, %v1798_v36 }
 0x333   : > { %v16776_v49 = vclamps-f32 %v10768_v58, 1.0  ;;  %v7643_v47 = vadd.f32 -1.0, %v1799_v19  ;;  %v16779_v62 = vunpack.c.l.bf16 %v16778_v18  ;;  %v16785_v48 = vclamps-f32 %v10789_v22, 1.0 }
 0x334   : > { %16766 = vst [vmem:[#allocation62_spill] sm:$0xff] %v11305_v5  ;;  %v11314_v63 = vsub.f32 %v7700_v4, %v16769_v24  ;;  %v11320_v9 = vsub.f32 %v16774_v0, %v16772_v60  ;;  %v16777_v5 = vld [vmem:[#allocation65_spill] sm:$0xff]  ;;  %v16781_v24 = vunpack.c.h.bf16 %v16771_v40  ;;  %v7644_v58 = vadd.f32 -1.0, %v1800_v46  ;;  %v16791_v40 = vld [vmem:[#allocation103_spill] sm:$0xff] }
 0x335   : > { %v11324_v10 = vadd.f32 %v7701_v13, %v16776_v49  ;;  %v1802_v7 = vmul.f32 2.0, %v16777_v5  ;;  %v11329_v4 = vsub.f32 %v7701_v13, %v16779_v62  ;;  %v11339_v36 = vadd.f32 %v7702_v28, %v16785_v48  ;;  %v16788_v49 = vld [vmem:[#allocation66_spill] sm:$0xff] }
 0x336   : > { %16770 = vst [vmem:[#allocation63_spill] sm:$0xff] %v11314_v63  ;;  %16775 = vst [vmem:[#allocation96_spill] sm:$0xff] %v11320_v9  ;;  %v16782_v63 = vld [vmem:[#allocation98_spill] sm:$0xff]  ;;  %v16786_v3 = vunpack.c.h.bf16 %v16778_v18  ;;  %v7705_v5 = vclamps-f32 %v7641_v21, 1.0  ;;  %v7645_v60 = vadd.f32 -1.0, %v1801_v56  ;;  %v1803_v62 = vmul.f32 2.0, %v16788_v49 }
 0x337   : > { %16780 = vst [vmem:[#allocation64_spill] sm:$0xff] %v11329_v4  ;;  %v16783_v27 = vclamps-f32 %v16782_v63, 1.0  ;;  %v16789_v13 = vld [vmem:[#allocation182_spill] sm:$0xff]  ;;  %v16792_v4 = vclamps-f32 %v16791_v40, 1.0  ;;  %v16799_v56 = vld [vmem:[#allocation108_spill] sm:$0xff] }
 0x338   : > { %v11343_v19 = vsub.f32 %v7702_v28, %v16786_v3  ;;  %v16790_v9 = vunpack.c.l.bf16 %v16789_v13  ;;  %v7706_v28 = vclamps-f32 %v7642_v51, 1.0  ;;  %v16798_v21 = vunpack.c.h.bf16 %v16789_v13 }
 0x339   : > { %v11335_v0 = vsub.f32 %v16783_v27, %v16781_v24  ;;  %v16794_v24 = vclamps-f32 %v10805_v26, 1.0  ;;  %v16795_v27 = vld [vmem:[#allocation183_spill] sm:$0xff]  ;;  %v16800_v3 = vclamps-f32 %v16799_v56, 1.0  ;;  %v7708_v13 = vclamps-f32 %v7644_v58, 1.0 }
 0x33a   : > { %16787 = vst [vmem:[#allocation65_spill] sm:$0xff] %v11343_v19  ;;  %v11350_v63 = vsub.f32 %v16792_v4, %v16790_v9  ;;  %v16796_v46 = vunpack.c.l.bf16 %v16795_v27  ;;  %v7707_v9 = vclamps-f32 %v7643_v47, 1.0  ;;  %v7646_v4 = vadd.f32 -1.0, %v1802_v7  ;;  %v16810_v56 = vld [vmem:[#allocation67_spill] sm:$0xff]  ;;  %v16877_v19 = vld [vmem:[#allocation78_spill] sm:$0xff] }
 0x33b   : > { %16784 = vst [vmem:[#allocation97_spill] sm:$0xff] %v11335_v0  ;;  %v11354_v22 = vadd.f32 %v7703_v38, %v16794_v24  ;;  %v11364_v49 = vsub.f32 %v16800_v3, %v16798_v21  ;;  %v16802_v0 = vclamps-f32 %v10807_v29, 1.0  ;;  %v16803_v26 = vunpack.c.h.bf16 %v16795_v27  ;;  %v16816_v27 = vld [vmem:[#allocation114_spill] sm:$0xff] }
 0x33c   : > { %16793 = vst [vmem:[#allocation98_spill] sm:$0xff] %v11350_v63  ;;  %v11358_v48 = vsub.f32 %v7703_v38, %v16796_v46  ;;  %v16805_v63 = vld [vmem:[#allocation184_spill] sm:$0xff]  ;;  %v16807_v46 = vld [vmem:[#allocation110_spill] sm:$0xff]  ;;  %v1804_v21 = vmul.f32 2.0, %v16810_v56  ;;  %v16811_v3 = vclamps-f32 %v10820_v61, 1.0  ;;  %v16819_v58 = vclamps-f32 %v10845_v50, 1.0 }
 0x33d   : > { %16801 = vst [vmem:[#allocation103_spill] sm:$0xff] %v11364_v49  ;;  %v11368_v40 = vadd.f32 %v7704_v17, %v16802_v0  ;;  %v11372_v24 = vsub.f32 %v7704_v17, %v16803_v26  ;;  %v16806_v38 = vunpack.c.l.bf16 %v16805_v63  ;;  %v16808_v51 = vclamps-f32 %v16807_v46, 1.0  ;;  %v16812_v0 = vld [vmem:[#allocation185_spill] sm:$0xff]  ;;  %v16822_v56 = vld [vmem:[#allocation186_spill] sm:$0xff] }
 0x33e   : > { %16797 = vst [vmem:[#allocation66_spill] sm:$0xff] %v11358_v48  ;;  %v11383_v29 = vadd.f32 %v7705_v5, %v16811_v3  ;;  %v16813_v47 = vunpack.c.l.bf16 %v16812_v0  ;;  %v7709_v49 = vclamps-f32 %v7645_v60, 1.0  ;;  %v7647_v17 = vadd.f32 -1.0, %v1803_v62 }
 0x33f   : > { %16804 = vst [vmem:[#allocation108_spill] sm:$0xff] %v11372_v24  ;;  %v11378_v48 = vsub.f32 %v16808_v51, %v16806_v38  ;;  %v16815_v26 = vunpack.c.h.bf16 %v16805_v63  ;;  %v16817_v24 = vclamps-f32 %v16816_v27, 1.0  ;;  %v11397_v38 = vadd.f32 %v7706_v28, %v16819_v58 }
 0x340   : > { %v11387_v7 = vsub.f32 %v7705_v5, %v16813_v47  ;;  %v16820_v61 = vunpack.c.h.bf16 %v16812_v0  ;;  %v16823_v3 = vunpack.c.l.bf16 %v16822_v56  ;;  %v16824_v5 = vld [vmem:[#allocation117_spill] sm:$0xff]  ;;  %v16827_v62 = vclamps-f32 %v10857_v23, 1.0 }
 0x341   : > { %16809 = vst [vmem:[#allocation110_spill] sm:$0xff] %v11378_v48  ;;  %v11393_v46 = vsub.f32 %v16817_v24, %v16815_v26  ;;  %v16825_v47 = vclamps-f32 %v16824_v5, 1.0  ;;  %v16828_v27 = vunpack.c.l.bf16 %v10543_v11  ;;  %v7710_v50 = vclamps-f32 %v7646_v4, 1.0  ;;  %v16830_v26 = vld [vmem:[#allocation68_spill] sm:$0xff] }
 0x342   : > { %16814 = vst [vmem:[#allocation67_spill] sm:$0xff] %v11387_v7  ;;  %v11401_v51 = vsub.f32 %v7706_v28, %v16820_v61  ;;  %v11411_v63 = vadd.f32 %v7707_v9, %v16827_v62  ;;  %v1805_v58 = vmul.f32 2.0, %v16830_v26  ;;  %v16831_v28 = vunpack.c.h.bf16 %v16822_v56  ;;  %v16832_v61 = vld [vmem:[#allocation120_spill] sm:$0xff] }
 0x343   : > { %16818 = vst [vmem:[#allocation114_spill] sm:$0xff] %v11393_v46  ;;  %v11407_v60 = vsub.f32 %v16825_v47, %v16823_v3  ;;  %v11415_v24 = vsub.f32 %v7707_v9, %v16828_v27  ;;  %v16833_v46 = vclamps-f32 %v16832_v61, 1.0  ;;  %v16835_v3 = vclamps-f32 %v10863_v30, 1.0  ;;  %v16838_v9 = vld [vmem:[#allocation188_spill] sm:$0xff] }
 0x344   : > { %16821 = vst [vmem:[#allocation222_spill] sm:$0xff] %v11401_v51  ;;  %v16836_v23 = vunpack.c.h.bf16 %v10543_v11  ;;  %v7648_v62 = vadd.f32 -1.0, %v1804_v21  ;;  %v16839_v27 = vunpack.c.l.bf16 %v16838_v9  ;;  %v16840_v4 = vld [vmem:[#allocation124_spill] sm:$0xff]  ;;  %v16843_v56 = vclamps-f32 %v10865_v39, 1.0  ;;  %v16849_v21 = vld [vmem:[#allocation125_spill] sm:$0xff] }
 0x345   : > { %16826 = vst [vmem:[#allocation117_spill] sm:$0xff] %v11407_v60  ;;  %16829 = vst [vmem:[#allocation223_spill] sm:$0xff] %v11415_v24  ;;  %v11422_v48 = vsub.f32 %v16833_v46, %v16831_v28  ;;  %v11426_v5 = vadd.f32 %v7708_v13, %v16835_v3  ;;  %v16841_v60 = vclamps-f32 %v16840_v4, 1.0  ;;  %v7711_v46 = vclamps-f32 %v7647_v17, 1.0  ;;  %v16844_v28 = vld [vmem:[#allocation69_spill] sm:$0xff]  ;;  %v16852_v4 = vld [vmem:[#allocation70_spill] sm:$0xff] }
 0x346   : > { %v11430_v47 = vsub.f32 %v7708_v13, %v16836_v23  ;;  %v11440_v61 = vadd.f32 %v7709_v49, %v16843_v56  ;;  %v1806_v30 = vmul.f32 2.0, %v16844_v28  ;;  %v16845_v3 = vld [vmem:[#allocation189_spill] sm:$0xff]  ;;  %v16848_v13 = vunpack.c.h.bf16 %v16838_v9 }
 0x347   : > { %16834 = vst [vmem:[#allocation68_spill] sm:$0xff] %v11422_v48  ;;  %v11436_v26 = vsub.f32 %v16841_v60, %v16839_v27  ;;  %v16846_v48 = vunpack.c.l.bf16 %v16845_v3  ;;  %v16850_v23 = vclamps-f32 %v16849_v21, 1.0  ;;  %v1807_v60 = vmul.f32 2.0, %v16852_v4  ;;  %v16853_v27 = vld [vmem:[#allocation71_spill] sm:$0xff]  ;;  %v16859_v21 = vld [vmem:[#allocation132_spill] sm:$0xff] }
 0x348   : > { %16837 = vst [vmem:[#allocation120_spill] sm:$0xff] %v11430_v47  ;;  %v16854_v39 = vclamps-f32 %v10896_v53, 1.0  ;;  %v16855_v17 = vunpack.c.h.bf16 %v16845_v3  ;;  %v16858_v9 = vunpack.c.l.bf16 %v10561_v32  ;;  %v7712_v4 = vclamps-f32 %v7648_v62, 1.0  ;;  %v16863_v47 = vld [vmem:[#allocation74_spill] sm:$0xff]  ;;  %v16868_v3 = vld [vmem:[#allocation76_spill] sm:$0xff]  ;;  %v16872_v62 = vld [vmem:[#allocation77_spill] sm:$0xff] }
 0x349   : > { %16842 = vst [vmem:[#allocation124_spill] sm:$0xff] %v11436_v26  ;;  %v11445_v24 = vsub.f32 %v7709_v49, %v16846_v48  ;;  %v11451_v11 = vsub.f32 %v16850_v23, %v16848_v13  ;;  %v1808_v26 = vmul.f32 2.0, %v16853_v27  ;;  %v7649_v48 = vadd.f32 -1.0, %v1805_v58  ;;  %v16857_v49 = vld [vmem:[#allocation72_spill] sm:$0xff] }
 0x34a   : > { %v11457_v56 = vadd.f32 %v7710_v50, %v16854_v39  ;;  %v11461_v28 = vsub.f32 %v7710_v50, %v16855_v17  ;;  %v16860_v13 = vclamps-f32 %v16859_v21, 1.0  ;;  %v1811_v53 = vmul.f32 2.0, %v16863_v47  ;;  %v16864_v39 = vld [vmem:[#allocation211_spill] sm:$0xff]  ;;  %v16874_v47 = vld [vmem:[#allocation134_spill] sm:$0xff] }
 0x34b   : > { %16847 = vst [vmem:[#allocation69_spill] sm:$0xff] %v11445_v24  ;;  %16851 = vst [vmem:[#allocation125_spill] sm:$0xff] %v11451_v11  ;;  %v1809_v24 = vmul.f32 2.0, %v16857_v49  ;;  %v16862_v11 = vld [vmem:[#allocation73_spill] sm:$0xff]  ;;  %v16865_v0 = vclamps-f32 %v16864_v39, 1.0  ;;  %v7650_v50 = vadd.f32 -1.0, %v1806_v30 }
 0x34c   : > { %16856 = vst [vmem:[#allocation70_spill] sm:$0xff] %v11461_v28  ;;  %v11468_v23 = vsub.f32 %v16860_v13, %v16858_v9  ;;  %v1810_v27 = vmul.f32 2.0, %v16862_v11  ;;  %v16867_v17 = vld [vmem:[#allocation75_spill] sm:$0xff]  ;;  %v1813_v49 = vmul.f32 2.0, %v16868_v3  ;;  %v7651_v9 = vadd.f32 -1.0, %v1807_v60 }
 0x34d   : > { %v11474_v51 = vadd.f32 %v7711_v46, %v16865_v0  ;;  %v1812_v58 = vmul.f32 2.0, %v16867_v17  ;;  %v16869_v28 = vld [vmem:[#allocation191_spill] sm:$0xff]  ;;  %v7652_v21 = vadd.f32 -1.0, %v1808_v26  ;;  %v1814_v13 = vmul.f32 2.0, %v16872_v62 }
 0x34e   : > { %16861 = vst [vmem:[#allocation71_spill] sm:$0xff] %v11468_v23  ;;  %v16870_v7 = vunpack.c.l.bf16 %v16869_v28  ;;  %v16873_v11 = vunpack.c.h.bf16 %v10561_v32  ;;  %v16875_v23 = vclamps-f32 %v16874_v47, 1.0  ;;  %v7713_v0 = vclamps-f32 %v7649_v48, 1.0  ;;  %v16880_v60 = vld [vmem:[#allocation79_spill] sm:$0xff] }
 0x34f   : > { %16866 = vst [vmem:[#allocation72_spill] sm:$0xff] %v11474_v51  ;;  %v7653_v30 = vadd.f32 -1.0, %v1809_v24  ;;  %v1815_v17 = vmul.f32 2.0, %v16877_v19  ;;  %v16878_v3 = vclamps-f32 %v10916_v16, 1.0  ;;  %v1818_v26 = vmul.f32 2.0, %v16880_v60  ;;  %v16885_v24 = vld [vmem:[#allocation135_spill] sm:$0xff] }
 0x350   : > { %v11480_v18 = vsub.f32 %v7711_v46, %v16870_v7  ;;  %v11487_v39 = vsub.f32 %v16875_v23, %v16873_v11  ;;  %v7654_v7 = vadd.f32 -1.0, %v1810_v27  ;;  %v7655_v46 = vadd.f32 -1.0, %v1811_v53  ;;  %v16883_v11 = vld [vmem:[#allocation192_spill] sm:$0xff]  ;;  %v16890_v60 = vld [vmem:[#allocation194_spill] sm:$0xff] }
 0x351   : > { %v11492_v51 = vadd.f32 %v7712_v4, %v16878_v3  ;;  %v16881_v62 = vunpack.c.h.bf16 %v16869_v28  ;;  %v7714_v32 = vclamps-f32 %v7650_v50, 1.0  ;;  %v7656_v47 = vadd.f32 -1.0, %v1812_v58 }
 0x352   : > { %16871 = vst [vmem:[#allocation132_spill] sm:$0xff] %v11480_v18  ;;  %16876 = vst [vmem:[#allocation73_spill] sm:$0xff] %v11487_v39  ;;  %v7657_v23 = vadd.f32 -1.0, %v1813_v49  ;;  %v16884_v48 = vunpack.c.l.bf16 %v16883_v11  ;;  %v16886_v39 = vclamps-f32 %v16885_v24, 1.0  ;;  %v7715_v16 = vclamps-f32 %v7651_v9, 1.0 }
 0x353   : > { %16879 = vst [vmem:[#allocation74_spill] sm:$0xff] %v11492_v51  ;;  %v11497_v18 = vsub.f32 %v7712_v4, %v16881_v62  ;;  %v7716_v3 = vclamps-f32 %v7652_v21, 1.0  ;;  %v7658_v51 = vadd.f32 -1.0, %v1814_v13  ;;  %v16888_v27 = vclamps-f32 %v10939_v43, 1.0  ;;  %v16894_v62 = vld [vmem:[#allocation136_spill] sm:$0xff] }
 0x354   : > { %v11503_v19 = vsub.f32 %v16886_v39, %v16884_v48  ;;  %v16891_v28 = vunpack.c.l.bf16 %v16890_v60  ;;  %v7717_v50 = vclamps-f32 %v7653_v30, 1.0  ;;  %v7659_v58 = vadd.f32 -1.0, %v1815_v17  ;;  %v16901_v30 = vld [vmem:[#allocation214_spill] sm:$0xff] }
 0x355   : > { %16882 = vst [vmem:[#allocation211_spill] sm:$0xff] %v11497_v18  ;;  %v11507_v53 = vadd.f32 %v7713_v0, %v16888_v27  ;;  %v16893_v49 = vunpack.c.h.bf16 %v16883_v11  ;;  %v16895_v18 = vclamps-f32 %v16894_v62, 1.0  ;;  %v7718_v39 = vclamps-f32 %v7654_v7, 1.0  ;;  %v16904_v62 = vld [vmem:[#allocation197_spill] sm:$0xff] }
 0x356   : > { %16887 = vst [vmem:[#allocation75_spill] sm:$0xff] %v11503_v19  ;;  %v11511_v4 = vsub.f32 %v7713_v0, %v16891_v28  ;;  %v7719_v9 = vclamps-f32 %v7655_v46, 1.0  ;;  %v7662_v21 = vadd.f32 -1.0, %v1818_v26  ;;  %v16897_v13 = vclamps-f32 %v10941_v31, 1.0 }
 0x357   : > { %16889 = vst [vmem:[#allocation76_spill] sm:$0xff] %v11507_v53  ;;  %v11517_v24 = vsub.f32 %v16895_v18, %v16893_v49  ;;  %v16899_v48 = vunpack.c.h.bf16 %v16890_v60  ;;  %v7720_v28 = vclamps-f32 %v7656_v47, 1.0  ;;  %v7721_v0 = vclamps-f32 %v7657_v23, 1.0  ;;  %v16913_v23 = vld [vmem:[#allocation199_spill] sm:$0xff]  ;;  %v11828_v60 = vld [vmem:[%s10302_s22 + $0x2b0] sm:$0xff] }
 0x358   : > { %16892 = vst [vmem:[#allocation77_spill] sm:$0xff] %v11511_v4  ;;  %v11521_v43 = vadd.f32 %v7714_v32, %v16897_v13  ;;  %v16902_v17 = vclamps-f32 %v16901_v30, 1.0  ;;  %v16905_v18 = vunpack.c.l.bf16 %v16904_v62  ;;  %v16907_v7 = vclamps-f32 %v10964_v42, 1.0  ;;  %17053 = vst [vmem:[#allocation265_spill] sm:$0xff] %v11828_v60 }
 0x359   : > { %16896 = vst [vmem:[#allocation134_spill] sm:$0xff] %v11517_v24  ;;  %v11525_v27 = vsub.f32 %v7714_v32, %v16899_v48  ;;  %v7722_v31 = vclamps-f32 %v7658_v51, 1.0  ;;  %v16909_v26 = vunpack.c.h.bf16 %v16904_v62  ;;  %v16911_v32 = vclamps-f32 %v10978_v2, 1.0  ;;  %v11784_v62 = vld [vmem:[%s10302_s22 + $0x270] sm:$0xff] }
 0x35a   : > { %16898 = vst [vmem:[#allocation78_spill] sm:$0xff] %v11521_v43  ;;  %v11529_v11 = vadd.f32 %v7715_v16, %v16902_v17  ;;  %v11533_v49 = vsub.f32 %v7715_v16, %v16905_v18  ;;  %v11537_v46 = vadd.f32 %v7716_v3, %v16907_v7  ;;  %v16914_v48 = vunpack.c.l.bf16 %v16913_v23  ;;  %17045 = vst [vmem:[#allocation257_spill] sm:$0xff] %v11784_v62 }
 0x35b   : > { %16900 = vst [vmem:[#allocation79_spill] sm:$0xff] %v11525_v27  ;;  %v11541_v13 = vsub.f32 %v7716_v3, %v16909_v26  ;;  %v11545_v47 = vadd.f32 %v7717_v50, %v16911_v32  ;;  %v7723_v17 = vclamps-f32 %v7659_v58, 1.0  ;;  %v16916_v16 = vclamps-f32 %v11004_v12, 1.0  ;;  %v16922_v26 = vld [vmem:[#allocation9_spill] sm:$0xff] }
 0x35c   : > { %16903 = vst [vmem:[#allocation135_spill] sm:$0xff] %v11529_v11  ;;  %16906 = vst [vmem:[#allocation136_spill] sm:$0xff] %v11533_v49  ;;  %v11549_v30 = vsub.f32 %v7717_v50, %v16914_v48  ;;  %v16918_v42 = vunpack.c.h.bf16 %v16913_v23  ;;  %v16920_v3 = vclamps-f32 %v11022_v52, 1.0  ;;  %v7726_v2 = vclamps-f32 %v7662_v21, 1.0  ;;  %v16931_v52 = vld [vmem:[#allocation203_spill] sm:$0xff]  ;;  %v11794_v49 = vld [vmem:[%s10302_s22 + $0x280] sm:$0xff] }
 0x35d   : > { %16908 = vst [vmem:[#allocation214_spill] sm:$0xff] %v11537_v46  ;;  %16910 = vst [vmem:[#allocation224_spill] sm:$0xff] %v11541_v13  ;;  %v11553_v18 = vadd.f32 %v7718_v39, %v16916_v16  ;;  %v16923_v32 = vunpack.c.l.bf16 %v16922_v26  ;;  %v16925_v50 = vclamps-f32 %v11059_v15, 1.0  ;;  %v16927_v12 = vunpack.c.h.bf16 %v16922_v26  ;;  %v11791_v23 = vld [vmem:[%s10302_s22 + $0x278] sm:$0xff]  ;;  %v11801_v27 = vld [vmem:[%s10302_s22 + $0x288] sm:$0xff]  ;;  %v2290_v13 = vpop.f32.mrb[96].mxu1 }
 0x35e   : > { %16912 = vst [vmem:[#allocation225_spill] sm:$0xff] %v11545_v47  ;;  %16915 = vst [vmem:[#allocation226_spill] sm:$0xff] %v11549_v30  ;;  %v11557_v51 = vsub.f32 %v7718_v39, %v16918_v42  ;;  %v11561_v7 = vadd.f32 %v7719_v9, %v16920_v3  ;;  %v16929_v39 = vclamps-f32 %v11084_v54, 1.0  ;;  %v16932_v42 = vunpack.c.l.bf16 %v16931_v52  ;;  %v11781_v30 = vld [vmem:[%s10302_s22 + $0x268] sm:$0xff] }
 0x35f   : > { %16917 = vst [vmem:[#allocation227_spill] sm:$0xff] %v11553_v18  ;;  %v11565_v24 = vsub.f32 %v7719_v9, %v16923_v32  ;;  %v11569_v58 = vadd.f32 %v7720_v28, %v16925_v50  ;;  %v11573_v48 = vsub.f32 %v7720_v28, %v16927_v12  ;;  %v16934_v9 = vclamps-f32 %v11091_v59, 1.0  ;;  %v16957_v50 = vld [vmem:[#allocation13_spill] sm:$0xff]  ;;  %17044 = vst [vmem:[#allocation256_spill] sm:$0xff] %v11781_v30 }
 0x360   : > { %16919 = vst [vmem:[#allocation228_spill] sm:$0xff] %v11557_v51  ;;  %16921 = vst [vmem:[#allocation229_spill] sm:$0xff] %v11561_v7  ;;  %v11577_v16 = vadd.f32 %v7721_v0, %v16929_v39  ;;  %v11581_v21 = vsub.f32 %v7721_v0, %v16932_v42  ;;  %v16936_v15 = vunpack.c.h.bf16 %v16931_v52  ;;  %v16939_v12 = vclamps-f32 %v11105_v55, 1.0  ;;  %v16941_v39 = vld [vmem:[#allocation11_spill] sm:$0xff]  ;;  %v16948_v52 = vld [vmem:[#allocation205_spill] sm:$0xff] }
 0x361   : > { %16924 = vst [vmem:[#allocation230_spill] sm:$0xff] %v11565_v24  ;;  %16926 = vst [vmem:[#allocation231_spill] sm:$0xff] %v11569_v58  ;;  %v11585_v3 = vadd.f32 %v7722_v31, %v16934_v9  ;;  %v16942_v19 = vunpack.c.l.bf16 %v16941_v39  ;;  %v16944_v0 = vunpack.c.h.bf16 %v16941_v39  ;;  %v16945_v42 = vld [vmem:[#allocation83_spill] sm:$0xff]  ;;  %v16953_v55 = vclamps-f32 %v11131_v34, 1.0  ;;  %v16966_v34 = vld [vmem:[#allocation16_spill] sm:$0xff] }
 0x362   : > { %16928 = vst [vmem:[#allocation232_spill] sm:$0xff] %v11573_v48  ;;  %16930 = vst [vmem:[#allocation233_spill] sm:$0xff] %v11577_v16  ;;  %v11589_v32 = vsub.f32 %v7722_v31, %v16936_v15  ;;  %v11594_v54 = vadd.f32 %v7723_v17, %v16939_v12  ;;  %v16946_v59 = vclamps-f32 %v16945_v42, 1.0  ;;  %v16949_v31 = vunpack.c.l.bf16 %v16948_v52  ;;  %v16950_v15 = vld [vmem:[#allocation84_spill] sm:$0xff]  ;;  %v16959_v42 = vld [vmem:[#allocation90_spill] sm:$0xff] }
 0x363   : > { %16933 = vst [vmem:[#allocation234_spill] sm:$0xff] %v11581_v21  ;;  %16935 = vst [vmem:[#allocation235_spill] sm:$0xff] %v11585_v3  ;;  %v11598_v26 = vsub.f32 %v7723_v17, %v16942_v19  ;;  %v11614_v12 = vadd.f32 %v7726_v2, %v16953_v55  ;;  %v16955_v19 = vunpack.c.h.bf16 %v16948_v52  ;;  %v16958_v39 = vunpack.c.l.bf16 %v16957_v50  ;;  %v16968_v55 = vld [vmem:[#allocation92_spill] sm:$0xff]  ;;  %v16972_v52 = vld [vmem:[#allocation93_spill] sm:$0xff] }
 0x364   : > { %16937 = vst [vmem:[#allocation236_spill] sm:$0xff] %v11589_v32  ;;  %16940 = vst [vmem:[#allocation237_spill] sm:$0xff] %v11594_v54  ;;  %v11604_v9 = vsub.f32 %v16946_v59, %v16944_v0  ;;  %v16951_v32 = vclamps-f32 %v16950_v15, 1.0  ;;  %v16962_v59 = vunpack.c.h.bf16 %v16957_v50  ;;  %v16996_v21 = vld [vmem:[#allocation113_spill] sm:$0xff]  ;;  %v2449_v16 = vmul.f32 2.0, %v2290_v13  ;;  %v11834_v58 = vld [vmem:[%s10302_s22 + $0x2b8] sm:$0xff] }
 0x365   : > { %16943 = vst [vmem:[#allocation238_spill] sm:$0xff] %v11598_v26  ;;  %16954 = vst [vmem:[#allocation239_spill] sm:$0xff] %v11614_v12  ;;  %v11618_v17 = vsub.f32 %v7726_v2, %v16955_v19  ;;  %v16960_v26 = vclamps-f32 %v16959_v42, 1.0  ;;  %v16971_v19 = vunpack.c.h.bf16 %v16966_v34  ;;  %v16973_v42 = vclamps-f32 %v16972_v52, 1.0  ;;  %v11821_v12 = vld [vmem:[%s10302_s22 + $0x2a8] sm:$0xff]  ;;  %v11851_v13 = vld [vmem:[%s10302_s22 + $0x2d0] sm:$0xff] }
 0x366   : > { %16947 = vst [vmem:[#allocation83_spill] sm:$0xff] %v11604_v9  ;;  %v11610_v28 = vsub.f32 %v16951_v32, %v16949_v31  ;;  %v16963_v9 = vld [vmem:[#allocation91_spill] sm:$0xff]  ;;  %v16967_v31 = vunpack.c.l.bf16 %v16966_v34  ;;  %v16985_v34 = vld [vmem:[#allocation21_spill] sm:$0xff]  ;;  %17046 = vst [vmem:[#allocation258_spill] sm:$0xff] %v11791_v23 }
 0x367   : > { %16956 = vst [vmem:[#allocation240_spill] sm:$0xff] %v11618_v17  ;;  %v11624_v0 = vsub.f32 %v16960_v26, %v16958_v39  ;;  %v16964_v15 = vclamps-f32 %v16963_v9, 1.0  ;;  %v11642_v26 = vsub.f32 %v16973_v42, %v16971_v19  ;;  %v16975_v39 = vld [vmem:[#allocation18_spill] sm:$0xff]  ;;  %v16986_v52 = vunpack.c.l.bf16 %v16985_v34  ;;  %v16987_v19 = vld [vmem:[#allocation105_spill] sm:$0xff]  ;;  %17047 = vst [vmem:[#allocation259_spill] sm:$0xff] %v11794_v49 }
 0x368   : > { %16952 = vst [vmem:[#allocation84_spill] sm:$0xff] %v11610_v28  ;;  %v16969_v28 = vclamps-f32 %v16968_v55, 1.0  ;;  %v16976_v50 = vunpack.c.l.bf16 %v16975_v39  ;;  %v16981_v55 = vunpack.c.h.bf16 %v16975_v39  ;;  %v16988_v42 = vclamps-f32 %v16987_v19, 1.0  ;;  %v17001_v19 = vld [vmem:[#allocation115_spill] sm:$0xff]  ;;  %17048 = vst [vmem:[#allocation260_spill] sm:$0xff] %v11801_v27  ;;  %v11846_v27 = vld [vmem:[%s10302_s22 + $0x2c8] sm:$0xff] }
 0x369   : > { %16961 = vst [vmem:[#allocation90_spill] sm:$0xff] %v11624_v0  ;;  %v11630_v32 = vsub.f32 %v16964_v15, %v16962_v59  ;;  %16974 = vst [vmem:[#allocation93_spill] sm:$0xff] %v11642_v26  ;;  %v16977_v0 = vld [vmem:[#allocation102_spill] sm:$0xff]  ;;  %v11651_v59 = vld [vmem:[%s10302_s22 + $0x200] sm:$0xff]  ;;  %v3113_v15 = vlaneseq }
 0x36a   : > { %v11636_v2 = vsub.f32 %v16969_v28, %v16967_v31  ;;  %v16978_v9 = vclamps-f32 %v16977_v0, 1.0  ;;  %16980 = vst [vmem:[#allocation241_spill] sm:$0xff] %v11651_v59  ;;  %v11663_v26 = vsub.f32 %v16988_v42, %v16986_v52  ;;  %v16991_v0 = vld [vmem:[#allocation106_spill] sm:$0xff]  ;;  %v17004_v42 = vld [vmem:[#allocation24_spill] sm:$0xff]  ;;  %17052 = vst [vmem:[#allocation264_spill] sm:$0xff] %v11821_v12 }
 0x36b   : > { %16965 = vst [vmem:[#allocation91_spill] sm:$0xff] %v11630_v32  ;;  %v16982_v32 = vld [vmem:[#allocation104_spill] sm:$0xff]  ;;  %17054 = vst [vmem:[#allocation266_spill] sm:$0xff] %v11834_v58  ;;  %v17060_v54 = vld [vmem:[#allocation34_spill] sm:$0xff] }
 0x36c   : > { %16970 = vst [vmem:[#allocation92_spill] sm:$0xff] %v11636_v2  ;;  %v11648_v17 = vsub.f32 %v16978_v9, %v16976_v50  ;;  %v16983_v28 = vclamps-f32 %v16982_v32, 1.0  ;;  %16989 = vst [vmem:[#allocation105_spill] sm:$0xff] %v11663_v26  ;;  %v16990_v50 = vunpack.c.h.bf16 %v16985_v34  ;;  %v16992_v9 = vclamps-f32 %v16991_v0, 1.0  ;;  %v16994_v2 = vld [vmem:[#allocation22_spill] sm:$0xff]  ;;  %v17006_v26 = vld [vmem:[#allocation116_spill] sm:$0xff] }
 0x36d   : > { %v16995_v39 = vunpack.c.l.bf16 %v16994_v2  ;;  %v16997_v32 = vclamps-f32 %v16996_v21, 1.0  ;;  %v17005_v34 = vunpack.c.l.bf16 %v17004_v42  ;;  %v17007_v0 = vclamps-f32 %v17006_v26, 1.0  ;;  %v17010_v21 = vld [vmem:[#allocation118_spill] sm:$0xff]  ;;  %17056 = vst [vmem:[#allocation268_spill] sm:$0xff] %v11846_v27  ;;  %17057 = vst [vmem:[#allocation269_spill] sm:$0xff] %v11851_v13  ;;  %v11863_v3 = vld [vmem:[%s10302_s22 + $0x2e0] sm:$0xff] }
 0x36e   : > { %16979 = vst [vmem:[#allocation102_spill] sm:$0xff] %v11648_v17  ;;  %v11657_v31 = vsub.f32 %v16983_v28, %v16981_v55  ;;  %v11669_v17 = vsub.f32 %v16992_v9, %v16990_v50  ;;  %v11678_v55 = vld [vmem:[%s10302_s22 + $0x208] sm:$0xff]  ;;  %v17000_v28 = vunpack.c.h.bf16 %v16994_v2  ;;  %v17009_v9 = vunpack.c.h.bf16 %v17004_v42  ;;  %v17015_v2 = vld [vmem:[#allocation126_spill] sm:$0xff]  ;;  %17059 = vst [vmem:[#allocation271_spill] sm:$0xff] %v11863_v3 }
 0x36f   : > { %v11675_v48 = vsub.f32 %v16997_v32, %v16995_v39  ;;  %16999 = vst [vmem:[#allocation242_spill] sm:$0xff] %v11678_v55  ;;  %v11690_v50 = vsub.f32 %v17007_v0, %v17005_v34  ;;  %v17011_v39 = vclamps-f32 %v17010_v21, 1.0  ;;  %v17016_v24 = vclamps-f32 %v17015_v2, 1.0  ;;  %v17021_v34 = vld [vmem:[#allocation127_spill] sm:$0xff]  ;;  %v17024_v21 = vld [vmem:[#allocation29_spill] sm:$0xff] }
 0x370   : > { %16984 = vst [vmem:[#allocation104_spill] sm:$0xff] %v11657_v31  ;;  %16993 = vst [vmem:[#allocation106_spill] sm:$0xff] %v11669_v17  ;;  %v17002_v31 = vclamps-f32 %v17001_v19, 1.0  ;;  %v17022_v0 = vclamps-f32 %v17021_v34, 1.0  ;;  %v11733_v34 = vld [vmem:[%s10302_s22 + $0x228] sm:$0xff]  ;;  %v17066_v13 = vld [vmem:[#allocation43_spill] sm:$0xff]  ;;  %v17068_v3 = vunpack.c.l.bf16 %v11651_v59 }
 0x371   : > { %16998 = vst [vmem:[#allocation113_spill] sm:$0xff] %v11675_v48  ;;  %17008 = vst [vmem:[#allocation116_spill] sm:$0xff] %v11690_v50  ;;  %v11696_v32 = vsub.f32 %v17011_v39, %v17009_v9  ;;  %v17013_v48 = vld [vmem:[#allocation27_spill] sm:$0xff]  ;;  %v17025_v9 = vunpack.c.l.bf16 %v17024_v21  ;;  %v17026_v39 = vld [vmem:[#allocation128_spill] sm:$0xff] }
 0x372   : > { %v11684_v52 = vsub.f32 %v17002_v31, %v17000_v28  ;;  %v17014_v17 = vunpack.c.l.bf16 %v17013_v48  ;;  %v11705_v31 = vld [vmem:[%s10302_s22 + $0x210] sm:$0xff]  ;;  %v11708_v28 = vld [vmem:[%s10302_s22 + $0x218] sm:$0xff]  ;;  %v17020_v26 = vunpack.c.h.bf16 %v17013_v48  ;;  %17034 = vst [vmem:[#allocation246_spill] sm:$0xff] %v11733_v34  ;;  %v11746_v48 = vand.u32 127, %v3113_v15  ;;  %v11871_v49 = vld [vmem:[%s10302_s22 + $0x2e8] sm:$0xff] }
 0x373   : > { %17012 = vst [vmem:[#allocation118_spill] sm:$0xff] %v11696_v32  ;;  %17018 = vst [vmem:[#allocation243_spill] sm:$0xff] %v11705_v31  ;;  %v17027_v32 = vclamps-f32 %v17026_v39, 1.0  ;;  %v11741_v39 = vld [vmem:[%s10302_s22 + $0x230] sm:$0xff] }
 0x374   : > { %17003 = vst [vmem:[#allocation115_spill] sm:$0xff] %v11684_v52  ;;  %v11702_v19 = vsub.f32 %v17016_v24, %v17014_v17  ;;  %17019 = vst [vmem:[#allocation244_spill] sm:$0xff] %v11708_v28  ;;  %v11714_v42 = vsub.f32 %v17022_v0, %v17020_v26  ;;  %v17029_v24 = vunpack.c.h.bf16 %v17024_v21  ;;  %v17030_v17 = vld [vmem:[#allocation129_spill] sm:$0xff]  ;;  %v11730_v52 = vld [vmem:[%s10302_s22 + $0x220] sm:$0xff]  ;;  %v2292_v0 = vpop.f32.mrb[97].mxu1 }
 0x375   : > { %v11720_v50 = vsub.f32 %v17027_v32, %v17025_v9  ;;  %v17031_v2 = vclamps-f32 %v17030_v17, 1.0  ;;  %17033 = vst [vmem:[#allocation245_spill] sm:$0xff] %v11730_v52  ;;  %v11738_v9 = vshrl.u32 %v3113_v15, 7  ;;  %17035 = vst [vmem:[#allocation247_spill] sm:$0xff] %v11741_v39  ;;  %v11749_v26 = vld [vmem:[%s10302_s22 + $0x238] sm:$0xff]  ;;  %v11752_v21 = vld [vmem:[%s10302_s22 + $0x240] sm:$0xff] }
 0x376   : > { %17017 = vst [vmem:[#allocation126_spill] sm:$0xff] %v11702_v19  ;;  %17023 = vst [vmem:[#allocation127_spill] sm:$0xff] %v11714_v42  ;;  %v11759_v17 = vld [vmem:[%s10302_s22 + $0x248] sm:$0xff]  ;;  %v11771_v42 = vld [vmem:[%s10302_s22 + $0x258] sm:$0xff]  ;;  %v2450_v4 = vmul.f32 2.0, %v2292_v0  ;;  %v2294_v51 = vpop.f32.mrb[98].mxu1 }
 0x377   : > { %17028 = vst [vmem:[#allocation128_spill] sm:$0xff] %v11720_v50  ;;  %v11726_v19 = vsub.f32 %v17031_v2, %v17029_v24  ;;  %17036 = vst [vmem:[#allocation248_spill] sm:$0xff] %v11746_v48  ;;  %v11762_v50 = vld [vmem:[%s10302_s22 + $0x250] sm:$0xff]  ;;  %v11766_v2 = vadd.s32 128, %v11746_v48  ;;  %v11774_v24 = vld [vmem:[%s10302_s22 + $0x260] sm:$0xff]  ;;  %vm3245_vm1 = vcmp.lt.s32.totalorder %v11738_v9, 1 }
 0x378   : > { %17037 = vst [vmem:[#allocation249_spill] sm:$0xff] %v11749_v26  ;;  %17038 = vst [vmem:[#allocation250_spill] sm:$0xff] %v11752_v21  ;;  %v11804_v32 = vld [vmem:[%s10302_s22 + $0x290] sm:$0xff]  ;;  %v11814_v15 = vld [vmem:[%s10302_s22 + $0x2a0] sm:$0xff]  ;;  %v7755_v48 = vadd.f32 -1.0, %v2449_v16  ;;  %v7756_v7 = vadd.f32 -1.0, %v2450_v4 }
 0x379   : > { %17032 = vst [vmem:[#allocation129_spill] sm:$0xff] %v11726_v19  ;;  %17039 = vst [vmem:[#allocation251_spill] sm:$0xff] %v11759_v17  ;;  %v2451_v19 = vmul.f32 2.0, %v2294_v51  ;;  %vm3542_vm2 = vcmp.lt.s32.totalorder %v11738_v9, 7  ;;  %vm3149_vm7 = vcmp.eq.s32.totalorder %v11738_v9, 0 }
 0x37a   : > { %17040 = vst [vmem:[#allocation252_spill] sm:$0xff] %v11762_v50  ;;  %17041 = vst [vmem:[#allocation253_spill] sm:$0xff] %v11766_v2  ;;  %v11811_v2 = vld [vmem:[%s10302_s22 + $0x298] sm:$0xff]  ;;  %v7819_v12 = vclamps-f32 %v7755_v48, 1.0  ;;  %v7820_v0 = vclamps-f32 %v7756_v7, 1.0 }
 0x37b   : > { %17042 = vst [vmem:[#allocation254_spill] sm:$0xff] %v11771_v42  ;;  %17043 = vst [vmem:[#allocation255_spill] sm:$0xff] %v11774_v24  ;;  %v7757_v16 = vadd.f32 -1.0, %v2451_v19 }
 0x37c   : > { %17049 = vst [vmem:[#allocation261_spill] sm:$0xff] %v11804_v32  ;;  %17050 = vst [vmem:[#allocation262_spill] sm:$0xff] %v11811_v2  ;;  %v11841_v32 = vld [vmem:[%s10302_s22 + $0x2c0] sm:$0xff]  ;;  %v2296_v2 = vpop.f32.mrb[99].mxu1  ;;  %v11866_v58 = vadd.f32 %v7819_v12, %v17060_v54 }
 0x37d   : > { %17051 = vst [vmem:[#allocation263_spill] sm:$0xff] %v11814_v15  ;;  %17055 = vst [vmem:[#allocation267_spill] sm:$0xff] %v11841_v32  ;;  %v2452_v23 = vmul.f32 2.0, %v2296_v2  ;;  %v11856_v15 = vld [vmem:[%s10302_s22 + $0x2d8] sm:$0xff]  ;;  %v7821_v48 = vclamps-f32 %v7757_v16, 1.0  ;;  %v2300_v4 = vpop.f32.mrb[100].mxu1 }
 0x37e   : > { %17058 = vst [vmem:[#allocation270_spill] sm:$0xff] %v11856_v15  ;;  %17061 = vst [vmem:[#allocation34_spill] sm:$0xff] %v11866_v58  ;;  %v17063_v32 = vld [vmem:[#allocation35_spill] sm:$0xff]  ;;  %v2453_v16 = vmul.f32 2.0, %v2300_v4  ;;  %v2302_v18 = vpop.f32.mrb[101].mxu1  ;;  %v16037_v19 = vrot.slane %v11866_v58, 7 }
 0x37f   : > { %v11858_v60 = vadd.f32 -1.0, %v2452_v23  ;;  %17062 = vst [vmem:[#allocation272_spill] sm:$0xff] %v11871_v49  ;;  %v11874_v7 = vadd.f32 %v7820_v0, %v17063_v32  ;;  %v11880_v54 = vadd.f32 %v7821_v48, %v11064_v44  ;;  %v2454_v47 = vmul.f32 2.0, %v2302_v18  ;;  %v2304_v62 = vpop.f32.mrb[102].mxu1  ;;  %v17076_v49 = vld [vmem:[#allocation49_spill] sm:$0xff] }
 0x380   : > { %v11892_v2 = vadd.f32 -1.0, %v2453_v16  ;;  %v2455_v4 = vmul.f32 2.0, %v2304_v62  ;;  %v2306_v15 = vpop.f32.mrb[103].mxu1  ;;  %v17070_v18 = vunpack.c.h.bf16 %v11651_v59 }
 0x381   : > { %17064 = vst [vmem:[#allocation35_spill] sm:$0xff] %v11874_v7  ;;  %v16032_v23 = vclamps-f32 %v11858_v60, 1.0  ;;  %17065 = vst [vmem:[#allocation273_spill] sm:$0xff] %v11880_v54  ;;  %v3183_v51 = vrot.slane %v11880_v54, 7  ;;  %v11904_v46 = vadd.f32 -1.0, %v2454_v47  ;;  %v2456_v27 = vmul.f32 2.0, %v2306_v15 }
 0x382   : > { %v7823_v16 = vclamps-f32 %v11892_v2, 1.0  ;;  %v11907_v44 = vadd.f32 -1.0, %v2455_v4  ;;  %v17074_v4 = vld [vmem:[#allocation46_spill] sm:$0xff] }
 0x383   : > { %v11887_v32 = vadd.f32 %v16032_v23, %v17066_v13  ;;  %v11898_v13 = vsub.f32 %v7819_v12, %v17068_v3  ;;  %v11902_v23 = vsub.f32 %v7820_v0, %v17070_v18  ;;  %v3306_v62 = vsel %vm3245_vm1, %v16037_v19, %v3183_v51 }
 0x384   : > { %v17072_v12 = vunpack.c.l.bf16 %v11678_v55  ;;  %v7824_v47 = vclamps-f32 %v11904_v46, 1.0  ;;  %v11920_v15 = vadd.f32 -1.0, %v2456_v27  ;;  %v11924_v18 = vadd.f32 %v7823_v16, %v17074_v4 }
 0x385   : > { %17067 = vst [vmem:[#allocation43_spill] sm:$0xff] %v11887_v32  ;;  %17069 = vst [vmem:[#allocation274_spill] sm:$0xff] %v11898_v13  ;;  %v16040_v59 = vclamps-f32 %v11907_v44, 1.0  ;;  %v3745_v27 = vadd.f32 %v3306_v62, %v11880_v54  ;;  %v17077_v19 = vrot.slane %v11887_v32, 7 }
 0x386   : > { %17071 = vst [vmem:[#allocation275_spill] sm:$0xff] %v11902_v23  ;;  %v11917_v0 = vsub.f32 %v7821_v48, %v17072_v12  ;;  %17075 = vst [vmem:[#allocation46_spill] sm:$0xff] %v11924_v18  ;;  %v11929_v23 = vadd.f32 %v7824_v47, %v17076_v49  ;;  %v2310_v48 = vpop.f32.mrb[104].mxu1  ;;  %v3482_v13 = vrot.slane %v11924_v18, 1  ;;  %v17078_v49 = vrot.slane %v11874_v7, 7 }
 0x387   : > { %v11937_v46 = vadd.f32 %v16040_v59, %v11142_v37  ;;  %v2457_v4 = vmul.f32 2.0, %v2310_v48  ;;  %v2312_v2 = vpop.f32.mrb[105].mxu1  ;;  %v17079_v12 = vclamps-f32 %v11920_v15, 1.0  ;;  %v17080_v7 = vrot.slane %v11880_v54, 1 }
 0x388   : > { %17073 = vst [vmem:[#allocation276_spill] sm:$0xff] %v11917_v0  ;;  %v3307_v3 = vsel %vm3245_vm1, %v17078_v49, %v17077_v19  ;;  %v2458_v58 = vmul.f32 2.0, %v2312_v2  ;;  %v2314_v0 = vpop.f32.mrb[106].mxu1  ;;  %v3483_v48 = vrot.slane %v11929_v23, 1  ;;  %v3185_v49 = vrot.slane %v11924_v18, 7 }
 0x389   : > { %v11949_v62 = vadd.f32 %v17079_v12, %v11157_v6  ;;  %v11953_v59 = vadd.f32 -1.0, %v2457_v4  ;;  %v2459_v11 = vmul.f32 2.0, %v2314_v0  ;;  %v2316_v30 = vpop.f32.mrb[107].mxu1  ;;  %v3601_v19 = vsel %vm3542_vm2, %v17080_v7, %v3482_v13 }
 0x38a   : > { %v11960_v43 = vadd.f32 -1.0, %v2458_v58  ;;  %v2460_v6 = vmul.f32 2.0, %v2316_v30  ;;  %v11962_v2 = vadd.f32 %v3745_v27, %v3601_v19  ;;  %v3746_v12 = vadd.f32 %v3307_v3, %v11887_v32 }
 0x38b   : > { %v7827_v37 = vclamps-f32 %v11953_v59, 1.0  ;;  %v11966_v4 = vadd.f32 -1.0, %v2459_v11  ;;  %v17081_v0 = vrot.slane %v11887_v32, 1  ;;  %v3304_v7 = vsel %vm3245_vm1, %v3183_v51, %v3185_v49 }
 0x38c   : > { %v16050_v58 = vclamps-f32 %v11960_v43, 1.0  ;;  %v11975_v53 = vadd.f32 -1.0, %v2460_v6  ;;  %4138 = vrot.lane.b32.xlu1 %v11962_v2, %s9079_s21  ;;  %3875 = vrot.lane.b32.xlu0 %v11962_v2, %s9080_s30  ;;  %v3484_v11 = vrot.slane %v11937_v46, 1  ;;  %v3747_v30 = vadd.f32 %v3304_v7, %v11924_v18  ;;  %v2320_v18 = vpop.f32.mrb[108].mxu1 }
 0x38d   : > { %v3602_v54 = vsel %vm3542_vm2, %v17081_v0, %v3483_v48  ;;  %v17082_v59 = vunpack.c.h.bf16 %v11678_v55  ;;  %v17083_v51 = vclamps-f32 %v11858_v60, 1.0  ;;  %v11990_v27 = vadd.f32 %v7827_v37, %v11172_v20 }
 0x38e   : > { %v16051_v19 = vclamps-f32 %v11966_v4, 1.0  ;;  %v11997_v0 = vadd.f32 %v16050_v58, %v11188_v41  ;;  %v12000_v55 = vadd.f32 %v3746_v12, %v3602_v54  ;;  %v3599_v60 = vsel %vm3542_vm2, %v3482_v13, %v3484_v11  ;;  %v2322_v41 = vpop.f32.mrb[109].mxu1 }
 0x38f   : > { %v11987_v3 = vsub.f32 %v17083_v51, %v17082_v59  ;;  %v17086_v20 = vunpack.c.l.bf16 %v11705_v31  ;;  %v2461_v6 = vmul.f32 2.0, %v2320_v18  ;;  %v12013_v58 = vadd.f32 %v3747_v30, %v3599_v60 }
 0x390   : > { %17085 = vst [vmem:[#allocation277_spill] sm:$0xff] %v11997_v0  ;;  %v12011_v51 = vadd.f32 %v16051_v19, %v11203_v14  ;;  %v17089_v7 = vunpack.c.h.bf16 %v11705_v31  ;;  %v17091_v13 = vclamps-f32 %v11975_v53, 1.0  ;;  %3939 = vrot.lane.b32.xlu1 %v12000_v55, %s9080_s30  ;;  %v17093_v14 = vrot.slane %v11929_v23, 7 }
 0x391   : > { %17084 = vst [vmem:[#allocation49_spill] sm:$0xff] %v11987_v3  ;;  %v12006_v59 = vsub.f32 %v7823_v16, %v17086_v20  ;;  %v2462_v16 = vmul.f32 2.0, %v2322_v41  ;;  %v2324_v20 = vpop.f32.mrb[110].mxu1  ;;  %v17094_v18 = vrot.slane %v11887_v32, 7  ;;  %v12032_v60 = vadd.f32 -1.0, %v2461_v6  ;;  %4140 = vrot.lane.b32.xlu0 %v12013_v58, %s9079_s21 }
 0x392   : > { %17088 = vst [vmem:[#allocation279_spill] sm:$0xff] %v12011_v51  ;;  %v12017_v54 = vsub.f32 %v7824_v47, %v17089_v7  ;;  %v12022_v12 = vadd.f32 %v17091_v13, %v11218_v8  ;;  %v2463_v47 = vmul.f32 2.0, %v2324_v20  ;;  %v2326_v8 = vpop.f32.mrb[111].mxu1  ;;  %v3485_v7 = vrot.slane %v11949_v62, 1 }
 0x393   : > { %17087 = vst [vmem:[#allocation278_spill] sm:$0xff] %v12006_v59  ;;  %v3305_v30 = vsel %vm3245_vm1, %v17094_v18, %v17093_v14  ;;  %v12038_v13 = vadd.f32 -1.0, %v2462_v16  ;;  %v2464_v19 = vmul.f32 2.0, %v2326_v8  ;;  %v3187_v31 = vrot.slane %v11937_v46, 7 }
 0x394   : > { %17090 = vst [vmem:[#allocation280_spill] sm:$0xff] %v12017_v54  ;;  %17092 = vst [vmem:[#allocation281_spill] sm:$0xff] %v12022_v12  ;;  %v3748_v41 = vadd.f32 %v3305_v30, %v11929_v23  ;;  %v3486_v54 = vrot.slane %v11990_v27, 1  ;;  %v7831_v14 = vclamps-f32 %v12032_v60, 1.0  ;;  %v12043_v6 = vadd.f32 -1.0, %v2463_v47  ;;  %4202 = vrot.lane.b32.xlu1 %v12000_v55, %s9079_s21 }
 0x395   : > { %v3600_v18 = vsel %vm3542_vm2, %v3483_v48, %v3485_v7  ;;  %v7832_v59 = vclamps-f32 %v12038_v13, 1.0  ;;  %v12049_v3 = vadd.f32 -1.0, %v2464_v19  ;;  %v3302_v30 = vsel %vm3245_vm1, %v3185_v49, %v3187_v31 }
 0x396   : > { %v12053_v16 = vadd.f32 %v3748_v41, %v3600_v18  ;;  %v17095_v60 = vunpack.c.l.bf16 %v11708_v28  ;;  %v17096_v47 = vclamps-f32 %v11907_v44, 1.0  ;;  %v12064_v48 = vadd.f32 %v7831_v14, %v11233_v1  ;;  %v2330_v1 = vpop.f32.mrb[112].mxu1 }
 0x397   : > { %v16056_v19 = vclamps-f32 %v12043_v6, 1.0  ;;  %v3597_v13 = vsel %vm3542_vm2, %v3484_v11, %v3486_v54  ;;  %v17099_v41 = vunpack.c.h.bf16 %v11708_v28  ;;  %v17100_v18 = vclamps-f32 %v11920_v15, 1.0 }
 0x398   : > { %v12061_v8 = vsub.f32 %v17096_v47, %v17095_v60  ;;  %17098 = vst [vmem:[#allocation283_spill] sm:$0xff] %v12064_v48  ;;  %v12076_v49 = vadd.f32 %v7832_v59, %v11248_v25  ;;  %3941 = vrot.lane.b32.xlu0 %v12053_v16, %s9080_s30  ;;  %v3749_v60 = vadd.f32 %v3302_v30, %v11937_v46  ;;  %v17103_v47 = vunpack.c.l.bf16 %v11730_v52  ;;  %v2332_v25 = vpop.f32.mrb[113].mxu1 }
 0x399   : > { %v12073_v20 = vsub.f32 %v17100_v18, %v17099_v41  ;;  %v12089_v15 = vadd.f32 %v16056_v19, %v11263_v35  ;;  %v2465_v41 = vmul.f32 2.0, %v2330_v1  ;;  %v17106_v18 = vrot.slane %v11990_v27, 7  ;;  %3877 = vrot.lane.b32.xlu1 %v12013_v58, %s9080_s30  ;;  %v2334_v1 = vpop.f32.mrb[114].mxu1 }
 0x39a   : > { %17097 = vst [vmem:[#allocation282_spill] sm:$0xff] %v12061_v8  ;;  %17102 = vst [vmem:[#allocation285_spill] sm:$0xff] %v12076_v49  ;;  %v12084_v11 = vsub.f32 %v7827_v37, %v17103_v47  ;;  %v17107_v28 = vunpack.c.h.bf16 %v11730_v52  ;;  %v17108_v30 = vclamps-f32 %v11960_v43, 1.0  ;;  %v17110_v37 = vclamps-f32 %v12049_v3, 1.0 }
 0x39b   : > { %17101 = vst [vmem:[#allocation284_spill] sm:$0xff] %v12073_v20  ;;  %17105 = vst [vmem:[#allocation287_spill] sm:$0xff] %v12089_v15  ;;  %v3300_v44 = vsel %vm3245_vm1, %v3187_v31, %v17106_v18  ;;  %v2466_v35 = vmul.f32 2.0, %v2332_v25  ;;  %v12108_v19 = vadd.f32 %v3749_v60, %v3597_v13  ;;  %v2467_v31 = vmul.f32 2.0, %v2334_v1  ;;  %v2336_v18 = vpop.f32.mrb[115].mxu1 }
 0x39c   : > { %17104 = vst [vmem:[#allocation286_spill] sm:$0xff] %v12084_v11  ;;  %v12099_v20 = vsub.f32 %v17108_v30, %v17107_v28  ;;  %v12104_v47 = vadd.f32 %v17110_v37, %v11278_v45  ;;  %v12110_v11 = vadd.f32 -1.0, %v2465_v41  ;;  %v3488_v43 = vrot.slane %v12011_v51, 1  ;;  %4204 = vrot.lane.b32.xlu0 %v12053_v16, %s9079_s21 }
 0x39d   : > { %v3751_v28 = vadd.f32 %v3300_v44, %v11990_v27  ;;  %v12114_v30 = vadd.f32 -1.0, %v2466_v35  ;;  %v2468_v45 = vmul.f32 2.0, %v2336_v18  ;;  %v3188_v25 = vrot.slane %v11949_v62, 7  ;;  %3879 = vrot.lane.b32.xlu1 %v12108_v19, %s9080_s30 }
 0x39e   : > { %17109 = vst [vmem:[#allocation288_spill] sm:$0xff] %v12099_v20  ;;  %17111 = vst [vmem:[#allocation289_spill] sm:$0xff] %v12104_v47  ;;  %v3487_v37 = vrot.slane %v11997_v0, 1  ;;  %v7835_v13 = vclamps-f32 %v12110_v11, 1.0  ;;  %v12121_v60 = vadd.f32 -1.0, %v2467_v31  ;;  %v3595_v41 = vsel %vm3542_vm2, %v3486_v54, %v3488_v43 }
 0x39f   : > { %v7836_v44 = vclamps-f32 %v12114_v30, 1.0  ;;  %v12127_v35 = vadd.f32 -1.0, %v2468_v45  ;;  %v12131_v18 = vadd.f32 %v3751_v28, %v3595_v41  ;;  %v17113_v52 = vrot.slane %v11929_v23, 7 }
 0x3a0   : > { %v17114_v31 = vunpack.c.l.bf16 %v11733_v34  ;;  %v17115_v54 = vclamps-f32 %v11966_v4, 1.0  ;;  %v12144_v30 = vadd.f32 %v7835_v13, %v11294_v57  ;;  %v16061_v45 = vclamps-f32 %v12121_v60, 1.0  ;;  %v2340_v57 = vpop.f32.mrb[116].mxu1 }
 0x3a1   : > { %17112 = vst [vmem:[#allocation290_spill] sm:$0xff] %v12131_v18  ;;  %v3303_v11 = vsel %vm3245_vm1, %v17113_v52, %v3188_v25  ;;  %v3598_v28 = vsel %vm3542_vm2, %v3485_v7, %v3487_v37  ;;  %v17118_v41 = vunpack.c.h.bf16 %v11733_v34  ;;  %v17119_v1 = vclamps-f32 %v11975_v53, 1.0  ;;  %3881 = vrot.lane.b32.xlu0 %v12131_v18, %s9080_s30  ;;  %4142 = vrot.lane.b32.xlu1 %v12108_v19, %s9079_s21 }
 0x3a2   : > { %v12141_v20 = vsub.f32 %v17115_v54, %v17114_v31  ;;  %17117 = vst [vmem:[#allocation292_spill] sm:$0xff] %v12144_v30  ;;  %v12156_v52 = vadd.f32 %v7836_v44, %v11309_v33  ;;  %v3750_v31 = vadd.f32 %v3303_v11, %v11949_v62  ;;  %v17122_v54 = vunpack.c.l.bf16 %v11741_v39  ;;  %v2342_v33 = vpop.f32.mrb[117].mxu1 }
 0x3a3   : > { %v12153_v8 = vsub.f32 %v17119_v1, %v17118_v41  ;;  %v12169_v53 = vadd.f32 %v16061_v45, %v11324_v10  ;;  %v2469_v1 = vmul.f32 2.0, %v2340_v57  ;;  %v17125_v41 = vrot.slane %v11997_v0, 7  ;;  %v2344_v10 = vpop.f32.mrb[118].mxu1 }
 0x3a4   : > { %17116 = vst [vmem:[#allocation291_spill] sm:$0xff] %v12141_v20  ;;  %17121 = vst [vmem:[#allocation294_spill] sm:$0xff] %v12156_v52  ;;  %v12164_v7 = vsub.f32 %v7831_v14, %v17122_v54  ;;  %v17126_v34 = vunpack.c.h.bf16 %v11741_v39  ;;  %v17128_v14 = vclamps-f32 %v12127_v35, 1.0  ;;  %v2470_v54 = vmul.f32 2.0, %v2342_v33 }
 0x3a5   : > { %17120 = vst [vmem:[#allocation293_spill] sm:$0xff] %v12153_v8  ;;  %17124 = vst [vmem:[#allocation296_spill] sm:$0xff] %v12169_v53  ;;  %v3301_v4 = vsel %vm3245_vm1, %v3188_v25, %v17125_v41  ;;  %v12186_v57 = vadd.f32 %v3750_v31, %v3598_v28  ;;  %v12188_v45 = vadd.f32 -1.0, %v2469_v1  ;;  %v2346_v25 = vpop.f32.mrb[119].mxu1  ;;  %v3489_v41 = vrot.slane %v12022_v12, 1  ;;  %4144 = vrot.lane.b32.xlu0 %v12131_v18, %s9079_s21 }
 0x3a6   : > { %17123 = vst [vmem:[#allocation295_spill] sm:$0xff] %v12164_v7  ;;  %v12177_v8 = vsub.f32 %v7832_v59, %v17126_v34  ;;  %v12182_v11 = vadd.f32 %v17128_v14, %v11339_v36  ;;  %v2471_v7 = vmul.f32 2.0, %v2344_v10  ;;  %v3752_v34 = vadd.f32 %v3301_v4, %v11997_v0 }
 0x3a7   : > { %v12192_v59 = vadd.f32 -1.0, %v2470_v54  ;;  %v2472_v36 = vmul.f32 2.0, %v2346_v25  ;;  %v3191_v33 = vrot.slane %v12011_v51, 7  ;;  %v3490_v14 = vrot.slane %v12064_v48, 1  ;;  %3943 = vrot.lane.b32.xlu1 %v12186_v57, %s9080_s30 }
 0x3a8   : > { %17127 = vst [vmem:[#allocation297_spill] sm:$0xff] %v12177_v8  ;;  %17129 = vst [vmem:[#allocation298_spill] sm:$0xff] %v12182_v11  ;;  %v7839_v28 = vclamps-f32 %v12188_v45, 1.0  ;;  %v12199_v31 = vadd.f32 -1.0, %v2471_v7  ;;  %v3596_v1 = vsel %vm3542_vm2, %v3487_v37, %v3489_v41  ;;  %v17130_v39 = vrot.slane %v11990_v27, 7 }
 0x3a9   : > { %v12205_v54 = vadd.f32 -1.0, %v2472_v36  ;;  %v12209_v25 = vadd.f32 %v3752_v34, %v3596_v1  ;;  %v17131_v7 = vunpack.c.l.bf16 %v11749_v26  ;;  %v17132_v37 = vclamps-f32 %v12043_v6, 1.0 }
 0x3aa   : > { %v3298_v45 = vsel %vm3245_vm1, %v17130_v39, %v3191_v33  ;;  %v12222_v10 = vadd.f32 %v7839_v28, %v11354_v22  ;;  %v3593_v34 = vsel %vm3542_vm2, %v3488_v43, %v3490_v14  ;;  %v17135_v1 = vunpack.c.h.bf16 %v11749_v26  ;;  %v2350_v22 = vpop.f32.mrb[120].mxu1 }
 0x3ab   : > { %v12219_v8 = vsub.f32 %v17132_v37, %v17131_v7  ;;  %v17136_v4 = vclamps-f32 %v12049_v3, 1.0  ;;  %v17138_v39 = vclamps-f32 %v12192_v59, 1.0  ;;  %3945 = vrot.lane.b32.xlu0 %v12209_v25, %s9080_s30  ;;  %v3753_v37 = vadd.f32 %v3298_v45, %v12011_v51  ;;  %4206 = vrot.lane.b32.xlu1 %v12186_v57, %s9079_s21 }
 0x3ac   : > { %17134 = vst [vmem:[#allocation300_spill] sm:$0xff] %v12222_v10  ;;  %v17140_v43 = vunpack.c.l.bf16 %v11752_v21  ;;  %v17142_v3 = vclamps-f32 %v12199_v31, 1.0  ;;  %v17145_v26 = vunpack.c.h.bf16 %v11752_v21  ;;  %v2908_v21 = vpop.f32.mrb[132].mxu0 }
 0x3ad   : > { %17133 = vst [vmem:[#allocation299_spill] sm:$0xff] %v12219_v8  ;;  %v12231_v20 = vsub.f32 %v17136_v4, %v17135_v1  ;;  %v12236_v6 = vadd.f32 %v17138_v39, %v11368_v40  ;;  %v2473_v1 = vmul.f32 2.0, %v2350_v22  ;;  %v2352_v40 = vpop.f32.mrb[121].mxu1  ;;  %v17144_v39 = vrot.slane %v12064_v48, 7 }
 0x3ae   : > { %v12244_v36 = vsub.f32 %v7835_v13, %v17140_v43  ;;  %v12249_v4 = vadd.f32 %v17142_v3, %v11383_v29  ;;  %v17147_v13 = vclamps-f32 %v12205_v54, 1.0  ;;  %v2474_v43 = vmul.f32 2.0, %v2352_v40  ;;  %v2354_v29 = vpop.f32.mrb[122].mxu1 }
 0x3af   : > { %17137 = vst [vmem:[#allocation301_spill] sm:$0xff] %v12231_v20  ;;  %17139 = vst [vmem:[#allocation302_spill] sm:$0xff] %v12236_v6  ;;  %v3296_v7 = vsel %vm3245_vm1, %v3191_v33, %v17144_v39  ;;  %v12257_v20 = vsub.f32 %v7836_v44, %v17145_v26  ;;  %v12266_v22 = vadd.f32 %v3753_v37, %v3593_v34  ;;  %v12268_v3 = vadd.f32 -1.0, %v2473_v1  ;;  %v2356_v33 = vpop.f32.mrb[123].mxu1 }
 0x3b0   : > { %17141 = vst [vmem:[#allocation303_spill] sm:$0xff] %v12244_v36  ;;  %17143 = vst [vmem:[#allocation304_spill] sm:$0xff] %v12249_v4  ;;  %v12262_v45 = vadd.f32 %v17147_v13, %v11397_v38  ;;  %v2475_v36 = vmul.f32 2.0, %v2354_v29  ;;  %v16068_v39 = vrot.slane %v12089_v15, 1  ;;  %v3755_v26 = vadd.f32 %v3296_v7, %v12064_v48  ;;  %4208 = vrot.lane.b32.xlu0 %v12209_v25, %s9079_s21 }
 0x3b1   : > { %17146 = vst [vmem:[#allocation305_spill] sm:$0xff] %v12257_v20  ;;  %17149 = vst [vmem:[#allocation307_spill] sm:$0xff] %v12266_v22  ;;  %v12272_v44 = vadd.f32 -1.0, %v2474_v43  ;;  %v2476_v38 = vmul.f32 2.0, %v2356_v33  ;;  %v3192_v40 = vrot.slane %v12022_v12, 7  ;;  %v3491_v13 = vrot.slane %v12076_v49, 1  ;;  %3883 = vrot.lane.b32.xlu1 %v12266_v22, %s9080_s30 }
 0x3b2   : > { %17148 = vst [vmem:[#allocation306_spill] sm:$0xff] %v12262_v45  ;;  %v12279_v37 = vadd.f32 -1.0, %v2475_v36  ;;  %v3591_v1 = vsel %vm3542_vm2, %v3490_v14, %v16068_v39  ;;  %v17151_v34 = vrot.slane %v11997_v0, 7  ;;  %v17152_v20 = vunpack.c.l.bf16 %v11759_v17  ;;  %v2910_v43 = vpop.f32.mrb[133].mxu0 }
 0x3b3   : > { %v12287_v29 = vadd.f32 -1.0, %v2476_v38  ;;  %v12291_v33 = vadd.f32 %v3755_v26, %v3591_v1  ;;  %v17153_v14 = vclamps-f32 %v12121_v60, 1.0  ;;  %v17155_v38 = vclamps-f32 %v12268_v3, 1.0  ;;  %v2912_v43 = vpop.f32.mrb[134].mxu0 }
 0x3b4   : > { %v3299_v36 = vsel %vm3245_vm1, %v17151_v34, %v3192_v40  ;;  %v3594_v1 = vsel %vm3542_vm2, %v3489_v41, %v3491_v13  ;;  %v17157_v34 = vunpack.c.h.bf16 %v11759_v17  ;;  %v17158_v21 = vclamps-f32 %v12127_v35, 1.0  ;;  %v2913_v17 = vpop.f32.mrb[135].mxu0 }
 0x3b5   : > { %17150 = vst [vmem:[#allocation308_spill] sm:$0xff] %v12291_v33  ;;  %v12301_v39 = vsub.f32 %v17153_v14, %v17152_v20  ;;  %v12306_v7 = vadd.f32 %v17155_v38, %v11411_v63  ;;  %v17160_v20 = vclamps-f32 %v12272_v44, 1.0  ;;  %3885 = vrot.lane.b32.xlu0 %v12291_v33, %s9080_s30  ;;  %v2360_v14 = vpop.f32.mrb[124].mxu1  ;;  %v3754_v41 = vadd.f32 %v3299_v36, %v12022_v12 }
 0x3b6   : > { %v12315_v8 = vsub.f32 %v17158_v21, %v17157_v34  ;;  %v17161_v38 = vunpack.c.l.bf16 %v11762_v50  ;;  %v17163_v35 = vclamps-f32 %v12279_v37, 1.0  ;;  %v2362_v21 = vpop.f32.mrb[125].mxu1  ;;  %v17166_v36 = vunpack.c.h.bf16 %v11762_v50  ;;  %4146 = vrot.lane.b32.xlu1 %v12266_v22, %s9079_s21 }
 0x3b7   : > { %17154 = vst [vmem:[#allocation309_spill] sm:$0xff] %v12301_v39  ;;  %17156 = vst [vmem:[#allocation310_spill] sm:$0xff] %v12306_v7  ;;  %v12320_v60 = vadd.f32 %v17160_v20, %v11426_v5  ;;  %v2477_v5 = vmul.f32 2.0, %v2360_v14  ;;  %v17165_v20 = vrot.slane %v12076_v49, 7  ;;  %v17167_v43 = vclamps-f32 %v12192_v59, 1.0  ;;  %v2364_v14 = vpop.f32.mrb[126].mxu1 }
 0x3b8   : > { %17159 = vst [vmem:[#allocation311_spill] sm:$0xff] %v12315_v8  ;;  %v12328_v26 = vsub.f32 %v7839_v28, %v17161_v38  ;;  %v12333_v34 = vadd.f32 %v17163_v35, %v11440_v61  ;;  %v17169_v28 = vclamps-f32 %v12287_v29, 1.0  ;;  %v2478_v61 = vmul.f32 2.0, %v2362_v21 }
 0x3b9   : > { %v3297_v63 = vsel %vm3245_vm1, %v3192_v40, %v17165_v20  ;;  %v12343_v8 = vsub.f32 %v17167_v43, %v17166_v36  ;;  %v12352_v35 = vadd.f32 %v3754_v41, %v3594_v1  ;;  %v12354_v40 = vadd.f32 -1.0, %v2477_v5  ;;  %v2366_v20 = vpop.f32.mrb[127].mxu1  ;;  %4148 = vrot.lane.b32.xlu0 %v12291_v33, %s9079_s21 }
 0x3ba   : > { %17162 = vst [vmem:[#allocation312_spill] sm:$0xff] %v12328_v26  ;;  %17164 = vst [vmem:[#allocation313_spill] sm:$0xff] %v12333_v34  ;;  %v12348_v38 = vadd.f32 %v17169_v28, %v11457_v56  ;;  %v2479_v17 = vmul.f32 2.0, %v2364_v14  ;;  %v3493_v59 = vrot.slane %v12104_v47, 1  ;;  %v3756_v36 = vadd.f32 %v3297_v63, %v12076_v49  ;;  %v17177_v14 = vld [vmem:[#allocation72_spill] sm:$0xff] }
 0x3bb   : > { %17168 = vst [vmem:[#allocation314_spill] sm:$0xff] %v12343_v8  ;;  %17171 = vst [vmem:[#allocation316_spill] sm:$0xff] %v12352_v35  ;;  %v12358_v43 = vadd.f32 -1.0, %v2478_v61  ;;  %v2480_v56 = vmul.f32 2.0, %v2366_v20  ;;  %v3195_v21 = vrot.slane %v12089_v15, 7  ;;  %v3494_v28 = vrot.slane %v12144_v30, 1  ;;  %3947 = vrot.lane.b32.xlu1 %v12352_v35, %s9080_s30 }
 0x3bc   : > { %17170 = vst [vmem:[#allocation315_spill] sm:$0xff] %v12348_v38  ;;  %v7847_v1 = vclamps-f32 %v12354_v40, 1.0  ;;  %v12365_v41 = vadd.f32 -1.0, %v2479_v17  ;;  %v3592_v5 = vsel %vm3542_vm2, %v3491_v13, %v3493_v59  ;;  %v17173_v50 = vrot.slane %v12064_v48, 7  ;;  %v17183_v48 = vld [vmem:[#allocation74_spill] sm:$0xff] }
 0x3bd   : > { %v7848_v63 = vclamps-f32 %v12358_v43, 1.0  ;;  %v12371_v61 = vadd.f32 -1.0, %v2480_v56  ;;  %v12375_v20 = vadd.f32 %v3756_v36, %v3592_v5  ;;  %v17174_v17 = vunpack.c.l.bf16 %v11771_v42 }
 0x3be   : > { %v3294_v40 = vsel %vm3245_vm1, %v17173_v50, %v3195_v21  ;;  %v17175_v13 = vclamps-f32 %v12199_v31, 1.0  ;;  %v12388_v43 = vadd.f32 %v7847_v1, %v17177_v14  ;;  %v17179_v26 = vrot.slane %v12089_v15, 1  ;;  %v2370_v14 = vpop.f32.mrb[128].mxu1 }
 0x3bf   : > { %17172 = vst [vmem:[#allocation317_spill] sm:$0xff] %v12375_v20  ;;  %v17180_v5 = vunpack.c.h.bf16 %v11771_v42  ;;  %v17181_v50 = vclamps-f32 %v12205_v54, 1.0  ;;  %v12402_v31 = vadd.f32 %v7848_v63, %v17183_v48  ;;  %3949 = vrot.lane.b32.xlu0 %v12375_v20, %s9080_s30  ;;  %v17185_v56 = vunpack.c.l.bf16 %v11774_v24  ;;  %v17188_v54 = vld [vmem:[#allocation76_spill] sm:$0xff]  ;;  %4210 = vrot.lane.b32.xlu1 %v12352_v35, %s9079_s21 }
 0x3c0   : > { %v12385_v8 = vsub.f32 %v17175_v13, %v17174_v17  ;;  %17178 = vst [vmem:[#allocation72_spill] sm:$0xff] %v12388_v43  ;;  %v3589_v36 = vsel %vm3542_vm2, %v17179_v26, %v3494_v28  ;;  %v3757_v13 = vadd.f32 %v3294_v40, %v12089_v15  ;;  %v17186_v26 = vclamps-f32 %v12268_v3, 1.0  ;;  %v17195_v3 = vld [vmem:[#allocation78_spill] sm:$0xff] }
 0x3c1   : > { %v12399_v39 = vsub.f32 %v17181_v50, %v17180_v5  ;;  %17184 = vst [vmem:[#allocation74_spill] sm:$0xff] %v12402_v31  ;;  %v17189_v5 = vclamps-f32 %v12365_v41, 1.0  ;;  %v2481_v48 = vmul.f32 2.0, %v2370_v14  ;;  %v17191_v17 = vrot.slane %v12144_v30, 7 }
 0x3c2   : > { %17176 = vst [vmem:[#allocation318_spill] sm:$0xff] %v12385_v8  ;;  %v12412_v42 = vsub.f32 %v17186_v26, %v17185_v56  ;;  %v17192_v40 = vunpack.c.h.bf16 %v11774_v24  ;;  %v17193_v15 = vclamps-f32 %v12272_v44, 1.0  ;;  %v17196_v56 = vclamps-f32 %v12371_v61, 1.0 }
 0x3c3   : > { %17182 = vst [vmem:[#allocation319_spill] sm:$0xff] %v12399_v39  ;;  %v12417_v50 = vadd.f32 %v17189_v5, %v17188_v54  ;;  %v2372_v39 = vpop.f32.mrb[129].mxu1  ;;  %v3292_v8 = vsel %vm3245_vm1, %v3195_v21, %v17191_v17  ;;  %v12436_v5 = vadd.f32 %v3757_v13, %v3589_v36  ;;  %v3496_v44 = vrot.slane %v12169_v53, 1  ;;  %4212 = vrot.lane.b32.xlu0 %v12375_v20, %s9079_s21 }
 0x3c4   : > { %17187 = vst [vmem:[#allocation320_spill] sm:$0xff] %v12412_v42  ;;  %v12427_v33 = vsub.f32 %v17193_v15, %v17192_v40  ;;  %v12432_v26 = vadd.f32 %v17196_v56, %v17195_v3  ;;  %v2482_v54 = vmul.f32 2.0, %v2372_v39  ;;  %v2374_v14 = vpop.f32.mrb[130].mxu1  ;;  %v12438_v42 = vadd.f32 -1.0, %v2481_v48 }
 0x3c5   : > { %17190 = vst [vmem:[#allocation76_spill] sm:$0xff] %v12417_v50  ;;  %17198 = vst [vmem:[#allocation322_spill] sm:$0xff] %v12436_v5  ;;  %v2483_v21 = vmul.f32 2.0, %v2374_v14  ;;  %v2376_v17 = vpop.f32.mrb[131].mxu1  ;;  %v3759_v15 = vadd.f32 %v3292_v8, %v12144_v30  ;;  %v3196_v3 = vrot.slane %v12104_v47, 7  ;;  %v3495_v56 = vrot.slane %v12156_v52, 1  ;;  %3887 = vrot.lane.b32.xlu1 %v12436_v5, %s9080_s30 }
 0x3c6   : > { %17194 = vst [vmem:[#allocation321_spill] sm:$0xff] %v12427_v33  ;;  %17197 = vst [vmem:[#allocation78_spill] sm:$0xff] %v12432_v26  ;;  %v12442_v40 = vadd.f32 -1.0, %v2482_v54  ;;  %v2484_v39 = vmul.f32 2.0, %v2376_v17  ;;  %v7851_v36 = vclamps-f32 %v12438_v42, 1.0  ;;  %v3587_v48 = vsel %vm3542_vm2, %v3494_v28, %v3496_v44  ;;  %v17205_v14 = vld [vmem:[#allocation135_spill] sm:$0xff] }
 0x3c7   : > { %v12449_v13 = vadd.f32 -1.0, %v2483_v21  ;;  %v12459_v17 = vadd.f32 %v3759_v15, %v3587_v48  ;;  %v17200_v24 = vrot.slane %v12076_v49, 7  ;;  %v17201_v21 = vld [vmem:[#allocation256_spill] sm:$0xff]  ;;  %v17203_v28 = vclamps-f32 %v12279_v37, 1.0 }
 0x3c8   : > { %v7852_v8 = vclamps-f32 %v12442_v40, 1.0  ;;  %v12455_v54 = vadd.f32 -1.0, %v2484_v39  ;;  %v17202_v33 = vunpack.c.l.bf16 %v17201_v21  ;;  %v12472_v40 = vadd.f32 %v7851_v36, %v17205_v14 }
 0x3c9   : > { %17199 = vst [vmem:[#allocation323_spill] sm:$0xff] %v12459_v17  ;;  %v3295_v42 = vsel %vm3245_vm1, %v17200_v24, %v3196_v3  ;;  %v3590_v15 = vsel %vm3542_vm2, %v3493_v59, %v3495_v56  ;;  %v17207_v48 = vunpack.c.h.bf16 %v17201_v21  ;;  %v17208_v49 = vclamps-f32 %v12287_v29, 1.0  ;;  %v17210_v24 = vld [vmem:[#allocation214_spill] sm:$0xff]  ;;  %3889 = vrot.lane.b32.xlu0 %v12459_v17, %s9080_s30  ;;  %v17215_v21 = vld [vmem:[#allocation225_spill] sm:$0xff]  ;;  %4150 = vrot.lane.b32.xlu1 %v12436_v5, %s9079_s21 }
 0x3ca   : > { %v12469_v12 = vsub.f32 %v17203_v28, %v17202_v33  ;;  %17206 = vst [vmem:[#allocation135_spill] sm:$0xff] %v12472_v40  ;;  %v12484_v51 = vadd.f32 %v7852_v8, %v17210_v24  ;;  %v2380_v33 = vpop.f32.mrb[132].mxu1  ;;  %v3758_v14 = vadd.f32 %v3295_v42, %v12104_v47  ;;  %v17212_v28 = vld [vmem:[#allocation257_spill] sm:$0xff]  ;;  %v17216_v29 = vclamps-f32 %v12449_v13, 1.0  ;;  %v17221_v42 = vld [vmem:[#allocation227_spill] sm:$0xff] }
 0x3cb   : > { %v12481_v20 = vsub.f32 %v17208_v49, %v17207_v48  ;;  %v17213_v39 = vunpack.c.l.bf16 %v17212_v28  ;;  %v2485_v48 = vmul.f32 2.0, %v2380_v33  ;;  %v2382_v24 = vpop.f32.mrb[133].mxu1 }
 0x3cc   : > { %17204 = vst [vmem:[#allocation324_spill] sm:$0xff] %v12469_v12  ;;  %17211 = vst [vmem:[#allocation214_spill] sm:$0xff] %v12484_v51  ;;  %v12497_v49 = vadd.f32 %v17216_v29, %v17215_v21  ;;  %v17219_v12 = vunpack.c.h.bf16 %v17212_v28  ;;  %v2384_v21 = vpop.f32.mrb[134].mxu1  ;;  %v12514_v33 = vadd.f32 %v3758_v14, %v3590_v15  ;;  %v17226_v28 = vrot.slane %v12144_v30, 7 }
 0x3cd   : > { %17209 = vst [vmem:[#allocation325_spill] sm:$0xff] %v12481_v20  ;;  %v12492_v59 = vsub.f32 %v7847_v1, %v17213_v39  ;;  %v17218_v20 = vrot.slane %v12156_v52, 7  ;;  %v17222_v1 = vclamps-f32 %v12455_v54, 1.0  ;;  %v12516_v29 = vadd.f32 -1.0, %v2485_v48  ;;  %4152 = vrot.lane.b32.xlu0 %v12459_v17, %s9079_s21 }
 0x3ce   : > { %17217 = vst [vmem:[#allocation225_spill] sm:$0xff] %v12497_v49  ;;  %v12505_v22 = vsub.f32 %v7848_v63, %v17219_v12  ;;  %17224 = vst [vmem:[#allocation328_spill] sm:$0xff] %v12514_v33  ;;  %v2487_v47 = vmul.f32 2.0, %v2384_v21  ;;  %3951 = vrot.lane.b32.xlu1 %v12514_v33, %s9080_s30  ;;  %v17231_v21 = vld [vmem:[#allocation229_spill] sm:$0xff]  ;;  %v17234_v30 = vclamps-f32 %v12371_v61, 1.0 }
 0x3cf   : > { %17214 = vst [vmem:[#allocation326_spill] sm:$0xff] %v12492_v59  ;;  %v3293_v37 = vsel %vm3245_vm1, %v3196_v3, %v17218_v20  ;;  %v12510_v39 = vadd.f32 %v17222_v1, %v17221_v42  ;;  %v2486_v59 = vmul.f32 2.0, %v2382_v24  ;;  %v2386_v20 = vpop.f32.mrb[135].mxu1  ;;  %v3497_v3 = vrot.slane %v12182_v11, 1  ;;  %v17242_v61 = vld [vmem:[#allocation233_spill] sm:$0xff] }
 0x3d0   : > { %17220 = vst [vmem:[#allocation327_spill] sm:$0xff] %v12505_v22  ;;  %v3760_v12 = vadd.f32 %v3293_v37, %v12156_v52  ;;  %v2488_v24 = vmul.f32 2.0, %v2386_v20  ;;  %v3199_v42 = vrot.slane %v12169_v53, 7  ;;  %v3498_v1 = vrot.slane %v12222_v10, 1 }
 0x3d1   : > { %17223 = vst [vmem:[#allocation227_spill] sm:$0xff] %v12510_v39  ;;  %v12520_v63 = vadd.f32 -1.0, %v2486_v59  ;;  %v7855_v15 = vclamps-f32 %v12516_v29, 1.0  ;;  %v12527_v14 = vadd.f32 -1.0, %v2487_v47  ;;  %v3588_v48 = vsel %vm3542_vm2, %v3495_v56, %v3497_v3  ;;  %v17227_v29 = vld [vmem:[#allocation258_spill] sm:$0xff] }
 0x3d2   : > { %v12533_v59 = vadd.f32 -1.0, %v2488_v24  ;;  %v12537_v20 = vadd.f32 %v3760_v12, %v3588_v48  ;;  %v3290_v47 = vsel %vm3245_vm1, %v17226_v28, %v3199_v42  ;;  %v17228_v22 = vunpack.c.l.bf16 %v17227_v29  ;;  %v17236_v28 = vld [vmem:[#allocation231_spill] sm:$0xff]  ;;  %4214 = vrot.lane.b32.xlu1 %v12514_v33, %s9079_s21 }
 0x3d3   : > { %v17229_v56 = vclamps-f32 %v12365_v41, 1.0  ;;  %v12550_v37 = vadd.f32 %v7855_v15, %v17231_v21  ;;  %v3585_v12 = vsel %vm3542_vm2, %v3496_v44, %v3498_v1  ;;  %v17233_v48 = vunpack.c.h.bf16 %v17227_v29  ;;  %v2390_v21 = vpop.f32.mrb[136].mxu1  ;;  %v17239_v44 = vld [vmem:[#allocation259_spill] sm:$0xff] }
 0x3d4   : > { %17225 = vst [vmem:[#allocation329_spill] sm:$0xff] %v12537_v20  ;;  %v17237_v35 = vclamps-f32 %v12520_v63, 1.0  ;;  %3953 = vrot.lane.b32.xlu0 %v12537_v20, %s9080_s30  ;;  %v17240_v24 = vunpack.c.l.bf16 %v17239_v44  ;;  %v17262_v33 = vclamps-f32 %v12455_v54, 1.0  ;;  %v17270_v54 = vld [vmem:[#allocation89_spill] sm:$0xff] }
 0x3d5   : > { %v12547_v17 = vsub.f32 %v17229_v56, %v17228_v22  ;;  %17232 = vst [vmem:[#allocation229_spill] sm:$0xff] %v12550_v37  ;;  %v12559_v5 = vsub.f32 %v17234_v30, %v17233_v48  ;;  %v3761_v56 = vadd.f32 %v3290_v47, %v12169_v53  ;;  %v17243_v30 = vclamps-f32 %v12527_v14, 1.0  ;;  %v17248_v47 = vld [vmem:[#allocation235_spill] sm:$0xff] }
 0x3d6   : > { %v12564_v41 = vadd.f32 %v17237_v35, %v17236_v28  ;;  %v12572_v29 = vsub.f32 %v7851_v36, %v17240_v24  ;;  %v2392_v35 = vpop.f32.mrb[137].mxu1  ;;  %v17245_v28 = vrot.slane %v12222_v10, 7  ;;  %v17249_v36 = vclamps-f32 %v12533_v59, 1.0 }
 0x3d7   : > { %17230 = vst [vmem:[#allocation330_spill] sm:$0xff] %v12547_v17  ;;  %17235 = vst [vmem:[#allocation331_spill] sm:$0xff] %v12559_v5  ;;  %v12577_v48 = vadd.f32 %v17243_v30, %v17242_v61  ;;  %v2489_v5 = vmul.f32 2.0, %v2390_v21  ;;  %v17246_v17 = vunpack.c.h.bf16 %v17239_v44  ;;  %v2394_v21 = vpop.f32.mrb[138].mxu1  ;;  %v12594_v61 = vadd.f32 %v3761_v56, %v3585_v12  ;;  %v12625_v44 = vpop.f32.mrb[136].mxu0 }
 0x3d8   : > { %17238 = vst [vmem:[#allocation231_spill] sm:$0xff] %v12564_v41  ;;  %17241 = vst [vmem:[#allocation332_spill] sm:$0xff] %v12572_v29  ;;  %v3288_v22 = vsel %vm3245_vm1, %v3199_v42, %v17245_v28  ;;  %v12590_v24 = vadd.f32 %v17249_v36, %v17248_v47  ;;  %v2490_v29 = vmul.f32 2.0, %v2392_v35  ;;  %v2491_v53 = vmul.f32 2.0, %v2394_v21  ;;  %v2396_v42 = vpop.f32.mrb[139].mxu1  ;;  %4216 = vrot.lane.b32.xlu0 %v12537_v20, %s9079_s21 }
 0x3d9   : > { %17244 = vst [vmem:[#allocation233_spill] sm:$0xff] %v12577_v48  ;;  %v12585_v0 = vsub.f32 %v7852_v8, %v17246_v17  ;;  %17251 = vst [vmem:[#allocation334_spill] sm:$0xff] %v12594_v61  ;;  %v12596_v30 = vadd.f32 -1.0, %v2489_v5  ;;  %v16096_v28 = vrot.slane %v12249_v4, 1  ;;  %v3763_v8 = vadd.f32 %v3288_v22, %v12222_v10  ;;  %3891 = vrot.lane.b32.xlu1 %v12594_v61, %s9080_s30 }
 0x3da   : > { %17250 = vst [vmem:[#allocation235_spill] sm:$0xff] %v12590_v24  ;;  %v12600_v17 = vadd.f32 -1.0, %v2490_v29  ;;  %v2492_v35 = vmul.f32 2.0, %v2396_v42  ;;  %v3200_v47 = vrot.slane %v12182_v11, 7  ;;  %v3499_v36 = vrot.slane %v12236_v6, 1 }
 0x3db   : > { %17247 = vst [vmem:[#allocation333_spill] sm:$0xff] %v12585_v0  ;;  %v12607_v5 = vadd.f32 -1.0, %v2491_v53  ;;  %v3583_v56 = vsel %vm3542_vm2, %v3498_v1, %v16096_v28  ;;  %v17253_v12 = vrot.slane %v12156_v52, 7  ;;  %v17254_v0 = vld [vmem:[#allocation260_spill] sm:$0xff]  ;;  %v17256_v28 = vclamps-f32 %v12449_v13, 1.0  ;;  %v8759_v52 = vpop.f32.mrb[137].mxu0 }
 0x3dc   : > { %v12615_v21 = vadd.f32 -1.0, %v2492_v35  ;;  %v12619_v42 = vadd.f32 %v3763_v8, %v3583_v56  ;;  %v17255_v1 = vunpack.c.l.bf16 %v17254_v0  ;;  %v17258_v35 = vld [vmem:[#allocation237_spill] sm:$0xff]  ;;  %v17259_v22 = vclamps-f32 %v12596_v30, 1.0  ;;  %v17264_v13 = vld [vmem:[#allocation87_spill] sm:$0xff]  ;;  %v2960_v52 = vpop.f32.mrb[138].mxu0 }
 0x3dd   : > { %v3291_v53 = vsel %vm3245_vm1, %v17253_v12, %v3200_v47  ;;  %v3586_v56 = vsel %vm3542_vm2, %v3497_v3, %v3499_v36  ;;  %v17261_v12 = vunpack.c.h.bf16 %v17254_v0  ;;  %v17267_v8 = vld [vmem:[#allocation261_spill] sm:$0xff]  ;;  %v17275_v52 = vclamps-f32 %v12520_v63, 1.0  ;;  %4154 = vrot.lane.b32.xlu1 %v12594_v61, %s9079_s21  ;;  %v17293_v61 = vld [vmem:[#allocation99_spill] sm:$0xff] }
 0x3de   : > { %17252 = vst [vmem:[#allocation335_spill] sm:$0xff] %v12619_v42  ;;  %v12631_v29 = vsub.f32 %v17256_v28, %v17255_v1  ;;  %v12636_v20 = vadd.f32 %v17259_v22, %v17258_v35  ;;  %v17265_v28 = vclamps-f32 %v12600_v17, 1.0  ;;  %3893 = vrot.lane.b32.xlu0 %v12619_v42, %s9080_s30  ;;  %v2400_v35 = vpop.f32.mrb[140].mxu1  ;;  %v3762_v3 = vadd.f32 %v3291_v53, %v12182_v11 }
 0x3df   : > { %v12645_v18 = vsub.f32 %v17262_v33, %v17261_v12  ;;  %v17268_v0 = vunpack.c.l.bf16 %v17267_v8  ;;  %v17271_v33 = vclamps-f32 %v12607_v5, 1.0  ;;  %v17273_v22 = vrot.slane %v12236_v6, 7 }
 0x3e0   : > { %17257 = vst [vmem:[#allocation336_spill] sm:$0xff] %v12631_v29  ;;  %17260 = vst [vmem:[#allocation237_spill] sm:$0xff] %v12636_v20  ;;  %v12650_v1 = vadd.f32 %v17265_v28, %v17264_v13  ;;  %v2493_v13 = vmul.f32 2.0, %v2400_v35  ;;  %v2402_v28 = vpop.f32.mrb[141].mxu1  ;;  %v17274_v53 = vunpack.c.h.bf16 %v17267_v8  ;;  %v16106_v63 = vrot.slane %v12262_v45, 1 }
 0x3e1   : > { %17263 = vst [vmem:[#allocation337_spill] sm:$0xff] %v12645_v18  ;;  %v12658_v29 = vsub.f32 %v7855_v15, %v17268_v0  ;;  %v12663_v12 = vadd.f32 %v17271_v33, %v17270_v54  ;;  %v3289_v18 = vsel %vm3245_vm1, %v3200_v47, %v17273_v22  ;;  %v17277_v0 = vld [vmem:[#allocation239_spill] sm:$0xff]  ;;  %v17278_v15 = vclamps-f32 %v12615_v21, 1.0  ;;  %v2404_v35 = vpop.f32.mrb[142].mxu1 }
 0x3e2   : > { %17266 = vst [vmem:[#allocation87_spill] sm:$0xff] %v12650_v1  ;;  %v8760_v1 = vpop.f32.mrb[139].mxu0  ;;  %v12673_v11 = vsub.f32 %v17275_v52, %v17274_v53  ;;  %v2494_v54 = vmul.f32 2.0, %v2402_v28  ;;  %v12682_v33 = vadd.f32 %v3762_v3, %v3586_v56  ;;  %v12684_v47 = vadd.f32 -1.0, %v2493_v13  ;;  %v2406_v22 = vpop.f32.mrb[143].mxu1  ;;  %4156 = vrot.lane.b32.xlu0 %v12619_v42, %s9079_s21 }
 0x3e3   : > { %17269 = vst [vmem:[#allocation338_spill] sm:$0xff] %v12658_v29  ;;  %17272 = vst [vmem:[#allocation89_spill] sm:$0xff] %v12663_v12  ;;  %v12678_v29 = vadd.f32 %v17278_v15, %v17277_v0  ;;  %v2495_v1 = vmul.f32 2.0, %v2404_v35  ;;  %v3764_v53 = vadd.f32 %v3289_v18, %v12236_v6  ;;  %v2496_v0 = vmul.f32 2.0, %v2406_v22 }
 0x3e4   : > { %17276 = vst [vmem:[#allocation339_spill] sm:$0xff] %v12673_v11  ;;  %17280 = vst [vmem:[#allocation340_spill] sm:$0xff] %v12682_v33  ;;  %v7800_v52 = vadd.f32 -1.0, %v2494_v54  ;;  %v3203_v28 = vrot.slane %v12249_v4, 7  ;;  %v3502_v15 = vrot.slane %v12306_v7, 1  ;;  %v7863_v56 = vclamps-f32 %v12684_v47, 1.0  ;;  %3955 = vrot.lane.b32.xlu1 %v12682_v33, %s9080_s30 }
 0x3e5   : > { %17279 = vst [vmem:[#allocation239_spill] sm:$0xff] %v12678_v29  ;;  %v12693_v3 = vadd.f32 -1.0, %v2495_v1  ;;  %v3584_v13 = vsel %vm3542_vm2, %v3499_v36, %v16106_v63  ;;  %v12700_v35 = vadd.f32 -1.0, %v2496_v0  ;;  %v17282_v8 = vrot.slane %v12222_v10, 7  ;;  %v17283_v1 = vld [vmem:[#allocation262_spill] sm:$0xff] }
 0x3e6   : > { %v7864_v54 = vclamps-f32 %v7800_v52, 1.0  ;;  %v12704_v22 = vadd.f32 %v3764_v53, %v3584_v13  ;;  %v17284_v11 = vunpack.c.l.bf16 %v17283_v1  ;;  %v17285_v42 = vclamps-f32 %v12527_v14, 1.0  ;;  %v17287_v63 = vld [vmem:[#allocation94_spill] sm:$0xff] }
 0x3e7   : > { %v3286_v47 = vsel %vm3245_vm1, %v17282_v8, %v3203_v28  ;;  %v12717_v52 = vadd.f32 %v7863_v56, %v17287_v63  ;;  %v7865_v0 = vclamps-f32 %v12693_v3, 1.0  ;;  %v17289_v18 = vrot.slane %v12249_v4, 1  ;;  %v17295_v3 = vld [vmem:[#allocation263_spill] sm:$0xff] }
 0x3e8   : > { %17281 = vst [vmem:[#allocation341_spill] sm:$0xff] %v12704_v22  ;;  %v12714_v36 = vsub.f32 %v17285_v42, %v17284_v11  ;;  %v17290_v13 = vunpack.c.h.bf16 %v17283_v1  ;;  %v17291_v8 = vclamps-f32 %v12533_v59, 1.0  ;;  %v12731_v14 = vadd.f32 %v7864_v54, %v17293_v61  ;;  %3957 = vrot.lane.b32.xlu0 %v12704_v22, %s9080_s30  ;;  %v2410_v42 = vpop.f32.mrb[144].mxu1  ;;  %v17299_v59 = vld [vmem:[#allocation100_spill] sm:$0xff]  ;;  %4218 = vrot.lane.b32.xlu1 %v12682_v33, %s9079_s21 }
 0x3e9   : > { %17288 = vst [vmem:[#allocation94_spill] sm:$0xff] %v12717_v52  ;;  %v3581_v53 = vsel %vm3542_vm2, %v17289_v18, %v3502_v15  ;;  %v3765_v63 = vadd.f32 %v3286_v47, %v12249_v4  ;;  %v17297_v18 = vclamps-f32 %v12596_v30, 1.0  ;;  %v2412_v61 = vpop.f32.mrb[145].mxu1  ;;  %v17303_v47 = vclamps-f32 %v12600_v17, 1.0  ;;  %v17305_v52 = vld [vmem:[#allocation101_spill] sm:$0xff] }
 0x3ea   : > { %17286 = vst [vmem:[#allocation342_spill] sm:$0xff] %v12714_v36  ;;  %v12728_v10 = vsub.f32 %v17291_v8, %v17290_v13  ;;  %17294 = vst [vmem:[#allocation99_spill] sm:$0xff] %v12731_v14  ;;  %v17296_v36 = vunpack.c.l.bf16 %v17295_v3  ;;  %v12744_v13 = vadd.f32 %v7865_v0, %v17299_v59  ;;  %v2497_v8 = vmul.f32 2.0, %v2410_v42  ;;  %v2414_v42 = vpop.f32.mrb[146].mxu1 }
 0x3eb   : > { %v17302_v14 = vunpack.c.h.bf16 %v17295_v3  ;;  %v17306_v30 = vclamps-f32 %v12700_v35, 1.0  ;;  %v12763_v59 = vadd.f32 %v3765_v63, %v3581_v53  ;;  %v16116_v3 = vrot.slane %v12333_v34, 1 }
 0x3ec   : > { %17292 = vst [vmem:[#allocation343_spill] sm:$0xff] %v12728_v10  ;;  %v12741_v1 = vsub.f32 %v17297_v18, %v17296_v36  ;;  %17300 = vst [vmem:[#allocation100_spill] sm:$0xff] %v12744_v13  ;;  %v17301_v10 = vrot.slane %v12306_v7, 7  ;;  %v2498_v18 = vmul.f32 2.0, %v2412_v61  ;;  %4220 = vrot.lane.b32.xlu0 %v12704_v22, %s9079_s21  ;;  %v3204_v61 = vrot.slane %v12262_v45, 7 }
 0x3ed   : > { %v12754_v4 = vsub.f32 %v17303_v47, %v17302_v14  ;;  %v12759_v36 = vadd.f32 %v17306_v30, %v17305_v52  ;;  %17308 = vst [vmem:[#allocation346_spill] sm:$0xff] %v12763_v59  ;;  %v3503_v47 = vrot.slane %v12320_v60, 1  ;;  %v3579_v53 = vsel %vm3542_vm2, %v3502_v15, %v16116_v3  ;;  %3895 = vrot.lane.b32.xlu1 %v12763_v59, %s9080_s30  ;;  %v17317_v3 = vld [vmem:[#allocation107_spill] sm:$0xff] }
 0x3ee   : > { %17298 = vst [vmem:[#allocation344_spill] sm:$0xff] %v12741_v1  ;;  %v3284_v11 = vsel %vm3245_vm1, %v3203_v28, %v17301_v10  ;;  %v7803_v1 = vadd.f32 -1.0, %v2497_v8  ;;  %v2499_v10 = vmul.f32 2.0, %v2414_v42  ;;  %v2416_v28 = vpop.f32.mrb[147].mxu1  ;;  %v7804_v14 = vadd.f32 -1.0, %v2498_v18  ;;  %v17309_v8 = vld [vmem:[#allocation264_spill] sm:$0xff] }
 0x3ef   : > { %17304 = vst [vmem:[#allocation345_spill] sm:$0xff] %v12754_v4  ;;  %17307 = vst [vmem:[#allocation101_spill] sm:$0xff] %v12759_v36  ;;  %v3767_v17 = vadd.f32 %v3284_v11, %v12306_v7  ;;  %v2500_v52 = vmul.f32 2.0, %v2416_v28  ;;  %v17310_v11 = vunpack.c.l.bf16 %v17309_v8  ;;  %v17311_v18 = vclamps-f32 %v12607_v5, 1.0 }
 0x3f0   : > { %v7867_v30 = vclamps-f32 %v7803_v1, 1.0  ;;  %v7805_v4 = vadd.f32 -1.0, %v2499_v10  ;;  %v7868_v28 = vclamps-f32 %v7804_v14, 1.0  ;;  %v17314_v10 = vunpack.c.h.bf16 %v17309_v8 }
 0x3f1   : > { %v12780_v42 = vsub.f32 %v17311_v18, %v17310_v11  ;;  %v7806_v22 = vadd.f32 -1.0, %v2500_v52  ;;  %v12784_v1 = vadd.f32 %v3767_v17, %v3579_v53  ;;  %v17315_v33 = vclamps-f32 %v12615_v21, 1.0  ;;  %v17319_v52 = vld [vmem:[#allocation265_spill] sm:$0xff]  ;;  %4158 = vrot.lane.b32.xlu1 %v12763_v59, %s9079_s21 }
 0x3f2   : > { %v12793_v63 = vadd.f32 %v7867_v30, %v17317_v3  ;;  %v7869_v36 = vclamps-f32 %v7805_v4, 1.0  ;;  %v17318_v5 = vrot.slane %v12236_v6, 7  ;;  %v17320_v11 = vunpack.c.l.bf16 %v17319_v52  ;;  %v17324_v21 = vld [vmem:[#allocation109_spill] sm:$0xff]  ;;  %v2420_v4 = vpop.f32.mrb[148].mxu1  ;;  %v17326_v3 = vld [vmem:[#allocation111_spill] sm:$0xff] }
 0x3f3   : > { %17312 = vst [vmem:[#allocation347_spill] sm:$0xff] %v12780_v42  ;;  %17313 = vst [vmem:[#allocation348_spill] sm:$0xff] %v12784_v1  ;;  %v12790_v15 = vsub.f32 %v17315_v33, %v17314_v10  ;;  %v17322_v17 = vunpack.c.h.bf16 %v17319_v52  ;;  %v12808_v33 = vadd.f32 %v7868_v28, %v17324_v21  ;;  %v7870_v10 = vclamps-f32 %v7806_v22, 1.0  ;;  %3897 = vrot.lane.b32.xlu0 %v12784_v1, %s9080_s30  ;;  %v17330_v22 = vld [vmem:[#allocation266_spill] sm:$0xff] }
 0x3f4   : > { %v3287_v14 = vsel %vm3245_vm1, %v17318_v5, %v3204_v61  ;;  %v12801_v18 = vsub.f32 %v7863_v56, %v17320_v11  ;;  %v12813_v8 = vadd.f32 %v7869_v36, %v17326_v3  ;;  %v2501_v5 = vmul.f32 2.0, %v2420_v4 }
 0x3f5   : > { %17316 = vst [vmem:[#allocation349_spill] sm:$0xff] %v12790_v15  ;;  %v12805_v53 = vsub.f32 %v7864_v54, %v17322_v17  ;;  %17325 = vst [vmem:[#allocation109_spill] sm:$0xff] %v12808_v33  ;;  %v2422_v15 = vpop.f32.mrb[149].mxu1  ;;  %v17328_v56 = vrot.slane %v12262_v45, 1  ;;  %v17329_v54 = vrot.slane %v12320_v60, 7  ;;  %v17331_v21 = vunpack.c.l.bf16 %v17330_v22 }
 0x3f6   : > { %17321 = vst [vmem:[#allocation107_spill] sm:$0xff] %v12801_v18  ;;  %17327 = vst [vmem:[#allocation111_spill] sm:$0xff] %v12813_v8  ;;  %v2502_v3 = vmul.f32 2.0, %v2422_v15  ;;  %v2424_v4 = vpop.f32.mrb[150].mxu1  ;;  %v3766_v42 = vadd.f32 %v3287_v14, %v12262_v45  ;;  %v16124_v8 = vrot.slane %v12348_v38, 1  ;;  %v3207_v15 = vrot.slane %v12333_v34, 7 }
 0x3f7   : > { %17323 = vst [vmem:[#allocation350_spill] sm:$0xff] %v12805_v53  ;;  %v3582_v11 = vsel %vm3542_vm2, %v17328_v56, %v3503_v47  ;;  %v3285_v17 = vsel %vm3245_vm1, %v3204_v61, %v17329_v54  ;;  %v12825_v52 = vsub.f32 %v7865_v0, %v17331_v21  ;;  %v17333_v53 = vld [vmem:[#allocation112_spill] sm:$0xff]  ;;  %v7807_v56 = vadd.f32 -1.0, %v2501_v5  ;;  %v2426_v33 = vpop.f32.mrb[151].mxu1  ;;  %4160 = vrot.lane.b32.xlu0 %v12784_v1, %s9079_s21 }
 0x3f8   : > { %v12828_v18 = vadd.f32 %v7870_v10, %v17333_v53  ;;  %v2503_v6 = vmul.f32 2.0, %v2424_v4  ;;  %v3768_v61 = vadd.f32 %v3285_v17, %v12320_v60  ;;  %v7808_v54 = vadd.f32 -1.0, %v2502_v3 }
 0x3f9   : > { %17332 = vst [vmem:[#allocation351_spill] sm:$0xff] %v12825_v52  ;;  %v2504_v0 = vmul.f32 2.0, %v2426_v33  ;;  %v12837_v53 = vadd.f32 %v3766_v42, %v3582_v11  ;;  %v7871_v21 = vclamps-f32 %v7807_v56, 1.0  ;;  %v3580_v14 = vsel %vm3542_vm2, %v3503_v47, %v16124_v8  ;;  %v17341_v47 = vld [vmem:[#allocation119_spill] sm:$0xff] }
 0x3fa   : > { %17334 = vst [vmem:[#allocation112_spill] sm:$0xff] %v12828_v18  ;;  %v7809_v52 = vadd.f32 -1.0, %v2503_v6  ;;  %v3506_v5 = vrot.slane %v12388_v43, 1  ;;  %v17335_v17 = vunpack.c.h.bf16 %v17330_v22  ;;  %v17336_v3 = vclamps-f32 %v12700_v35, 1.0  ;;  %v17338_v6 = vld [vmem:[#allocation267_spill] sm:$0xff] }
 0x3fb   : > { %v7872_v33 = vclamps-f32 %v7808_v54, 1.0  ;;  %v7810_v42 = vadd.f32 -1.0, %v2504_v0  ;;  %3959 = vrot.lane.b32.xlu1 %v12837_v53, %s9080_s30  ;;  %v12853_v11 = vadd.f32 %v3768_v61, %v3580_v14  ;;  %v17339_v56 = vunpack.c.l.bf16 %v17338_v6 }
 0x3fc   : > { %v12849_v4 = vsub.f32 %v17336_v3, %v17335_v17  ;;  %v12860_v8 = vadd.f32 %v7871_v21, %v17341_v47  ;;  %v7873_v45 = vclamps-f32 %v7809_v52, 1.0  ;;  %v17343_v22 = vrot.slane %v12306_v7, 7  ;;  %v17346_v17 = vld [vmem:[#allocation268_spill] sm:$0xff]  ;;  %v17349_v3 = vld [vmem:[#allocation121_spill] sm:$0xff]  ;;  %v2430_v52 = vpop.f32.mrb[152].mxu1  ;;  %v17350_v47 = vld [vmem:[#allocation122_spill] sm:$0xff] }
 0x3fd   : > { %v12857_v1 = vsub.f32 %v7867_v30, %v17339_v56  ;;  %v17344_v54 = vunpack.c.h.bf16 %v17338_v6  ;;  %v17347_v61 = vunpack.c.l.bf16 %v17346_v17  ;;  %v12875_v30 = vadd.f32 %v7872_v33, %v17349_v3  ;;  %3961 = vrot.lane.b32.xlu0 %v12853_v11, %s9080_s30 }
 0x3fe   : > { %17337 = vst [vmem:[#allocation352_spill] sm:$0xff] %v12849_v4  ;;  %17342 = vst [vmem:[#allocation119_spill] sm:$0xff] %v12860_v8  ;;  %v3282_v35 = vsel %vm3245_vm1, %v17343_v22, %v3207_v15  ;;  %v7874_v56 = vclamps-f32 %v7810_v42, 1.0  ;;  %v2505_v22 = vmul.f32 2.0, %v2430_v52  ;;  %v2432_v4 = vpop.f32.mrb[153].mxu1  ;;  %v17353_v42 = vunpack.c.h.bf16 %v17346_v17 }
 0x3ff   : > { %17340 = vst [vmem:[#allocation353_spill] sm:$0xff] %v12857_v1  ;;  %v12868_v0 = vsub.f32 %v7868_v28, %v17344_v54  ;;  %v12872_v14 = vsub.f32 %v7869_v36, %v17347_v61  ;;  %v12880_v1 = vadd.f32 %v7873_v45, %v17350_v47  ;;  %v17352_v28 = vrot.slane %v12333_v34, 1  ;;  %4222 = vrot.lane.b32.xlu1 %v12837_v53, %s9079_s21  ;;  %v2434_v52 = vpop.f32.mrb[154].mxu1 }
 0x400   : > { %v12890_v3 = vsub.f32 %v7870_v10, %v17353_v42  ;;  %v3769_v47 = vadd.f32 %v3282_v35, %v12333_v34  ;;  %v7811_v36 = vadd.f32 -1.0, %v2505_v22  ;;  %v2506_v59 = vmul.f32 2.0, %v2432_v4  ;;  %v2436_v8 = vpop.f32.mrb[155].mxu1 }
 0x401   : > { %17345 = vst [vmem:[#allocation354_spill] sm:$0xff] %v12868_v0  ;;  %17348 = vst [vmem:[#allocation355_spill] sm:$0xff] %v12872_v14  ;;  %v3577_v54 = vsel %vm3542_vm2, %v17352_v28, %v3506_v5  ;;  %v17355_v14 = vld [vmem:[#allocation123_spill] sm:$0xff]  ;;  %v17357_v0 = vld [vmem:[#allocation269_spill] sm:$0xff]  ;;  %v2507_v61 = vmul.f32 2.0, %v2434_v52  ;;  %4224 = vrot.lane.b32.xlu0 %v12853_v11, %s9079_s21  ;;  %v2508_v35 = vmul.f32 2.0, %v2436_v8 }
 0x402   : > { %17351 = vst [vmem:[#allocation121_spill] sm:$0xff] %v12880_v1  ;;  %17354 = vst [vmem:[#allocation122_spill] sm:$0xff] %v12890_v3  ;;  %v12893_v6 = vadd.f32 %v7874_v56, %v17355_v14  ;;  %v17358_v7 = vunpack.c.l.bf16 %v17357_v0  ;;  %v17360_v10 = vunpack.c.h.bf16 %v17357_v0  ;;  %v17362_v14 = vld [vmem:[#allocation270_spill] sm:$0xff]  ;;  %v12912_v34 = vadd.f32 %v3769_v47, %v3577_v54  ;;  %v12927_v54 = vpop.f32.mrb[140].mxu0 }
 0x403   : > { %v17363_v3 = vunpack.c.l.bf16 %v17362_v14  ;;  %v12914_v22 = vadd.f32 -1.0, %v2507_v61  ;;  %v17367_v4 = vrot.slane %v12388_v43, 7  ;;  %v8779_v47 = vpop.f32.mrb[141].mxu0 }
 0x404   : > { %17356 = vst [vmem:[#allocation123_spill] sm:$0xff] %v12893_v6  ;;  %v12900_v28 = vsub.f32 %v7871_v21, %v17358_v7  ;;  %v12904_v42 = vsub.f32 %v7872_v33, %v17360_v10  ;;  %17365 = vst [vmem:[#allocation359_spill] sm:$0xff] %v12912_v34  ;;  %v7875_v7 = vclamps-f32 %v7811_v36, 1.0  ;;  %v7812_v21 = vadd.f32 -1.0, %v2506_v59  ;;  %3899 = vrot.lane.b32.xlu1 %v12912_v34, %s9080_s30  ;;  %v17369_v59 = vld [vmem:[#allocation130_spill] sm:$0xff] }
 0x405   : > { %v12908_v17 = vsub.f32 %v7873_v45, %v17363_v3  ;;  %17366 = vst [vmem:[#allocation360_spill] sm:$0xff] %v12914_v22  ;;  %v3280_v33 = vsel %vm3245_vm1, %v3207_v15, %v17367_v4  ;;  %v12921_v10 = vadd.f32 -1.0, %v2508_v35  ;;  %v3208_v15 = vrot.slane %v12348_v38, 7  ;;  %v17374_v35 = vld [vmem:[#allocation131_spill] sm:$0xff] }
 0x406   : > { %17359 = vst [vmem:[#allocation356_spill] sm:$0xff] %v12900_v28  ;;  %17361 = vst [vmem:[#allocation357_spill] sm:$0xff] %v12904_v42  ;;  %v3771_v8 = vadd.f32 %v3280_v33, %v12388_v43  ;;  %v12930_v36 = vadd.f32 %v7875_v7, %v17369_v59  ;;  %v7876_v61 = vclamps-f32 %v7812_v21, 1.0  ;;  %v17371_v4 = vunpack.c.h.bf16 %v17362_v14  ;;  %v3052_v21 = vpop.f32.mrb[142].mxu0  ;;  %v17376_v14 = vld [vmem:[#allocation271_spill] sm:$0xff]  ;;  %v17379_v28 = vld [vmem:[#allocation133_spill] sm:$0xff] }
 0x407   : > { %17364 = vst [vmem:[#allocation358_spill] sm:$0xff] %v12908_v17  ;;  %17368 = vst [vmem:[#allocation361_spill] sm:$0xff] %v12921_v10  ;;  %v17373_v33 = vrot.slane %v12417_v50, 1  ;;  %v2440_v17 = vpop.f32.mrb[156].mxu1  ;;  %v17377_v45 = vunpack.c.l.bf16 %v17376_v14  ;;  %v17382_v21 = vld [vmem:[#allocation137_spill] sm:$0xff]  ;;  %v17383_v3 = vclamps-f32 %v12921_v10, 1.0 }
 0x408   : > { %17370 = vst [vmem:[#allocation130_spill] sm:$0xff] %v12930_v36  ;;  %v12937_v52 = vsub.f32 %v7874_v56, %v17371_v4  ;;  %v12948_v42 = vadd.f32 %v7876_v61, %v17374_v35  ;;  %v2442_v56 = vpop.f32.mrb[157].mxu1  ;;  %v8780_v4 = vpop.f32.mrb[143].mxu0  ;;  %4162 = vrot.lane.b32.xlu1 %v12912_v34, %s9079_s21  ;;  %v3210_v10 = vrot.slane %v12402_v31, 7 }
 0x409   : > { %v3575_v59 = vsel %vm3542_vm2, %v3506_v5, %v17373_v33  ;;  %v17380_v5 = vclamps-f32 %v12914_v22, 1.0  ;;  %v12962_v0 = vadd.f32 %v17383_v3, %v17382_v21  ;;  %v2444_v35 = vpop.f32.mrb[158].mxu1  ;;  %v3507_v4 = vrot.slane %v12402_v31, 1 }
 0x40a   : > { %17372 = vst [vmem:[#allocation362_spill] sm:$0xff] %v12937_v52  ;;  %17375 = vst [vmem:[#allocation131_spill] sm:$0xff] %v12948_v42  ;;  %v12952_v52 = vsub.f32 %v7875_v7, %v17377_v45  ;;  %v12968_v7 = vadd.f32 %v3771_v8, %v3575_v59  ;;  %v2509_v45 = vmul.f32 2.0, %v2440_v17  ;;  %v17387_v22 = vunpack.c.h.bf16 %v17376_v14 }
 0x40b   : > { %v12957_v33 = vadd.f32 %v17380_v5, %v17379_v28  ;;  %17384 = vst [vmem:[#allocation137_spill] sm:$0xff] %v12962_v0  ;;  %v17386_v28 = vrot.slane %v12320_v60, 7  ;;  %v2510_v8 = vmul.f32 2.0, %v2442_v56  ;;  %v2511_v59 = vmul.f32 2.0, %v2444_v35 }
 0x40c   : > { %17378 = vst [vmem:[#allocation363_spill] sm:$0xff] %v12952_v52  ;;  %17385 = vst [vmem:[#allocation364_spill] sm:$0xff] %v12968_v7  ;;  %v2446_v52 = vpop.f32.mrb[159].mxu1  ;;  %v12979_v34 = vsub.f32 %v7876_v61, %v17387_v22  ;;  %3901 = vrot.lane.b32.xlu0 %v12968_v7, %s9080_s30  ;;  %v12983_v17 = vadd.f32 -1.0, %v2509_v45  ;;  %v3509_v22 = vrot.slane %v12432_v26, 1 }
 0x40d   : > { %17381 = vst [vmem:[#allocation133_spill] sm:$0xff] %v12957_v33  ;;  %v3283_v5 = vsel %vm3245_vm1, %v17386_v28, %v3208_v15  ;;  %v2512_v47 = vmul.f32 2.0, %v2446_v52  ;;  %v17390_v28 = vrot.slane %v12348_v38, 1  ;;  %v12993_v14 = vadd.f32 -1.0, %v2510_v8  ;;  %v17403_v52 = vld [vmem:[#allocation145_spill] sm:$0xff] }
 0x40e   : > { %17388 = vst [vmem:[#allocation365_spill] sm:$0xff] %v12979_v34  ;;  %17389 = vst [vmem:[#allocation366_spill] sm:$0xff] %v12983_v17  ;;  %v3770_v21 = vadd.f32 %v3283_v5, %v12348_v38  ;;  %v16140_v61 = vclamps-f32 %v12983_v17, 1.0  ;;  %v12995_v45 = vadd.f32 -1.0, %v2511_v59  ;;  %v3211_v5 = vrot.slane %v12417_v50, 7  ;;  %v17395_v38 = vld [vmem:[#allocation142_spill] sm:$0xff] }
 0x40f   : > { %v3578_v3 = vsel %vm3542_vm2, %v17390_v28, %v3507_v4  ;;  %17391 = vst [vmem:[#allocation367_spill] sm:$0xff] %v12993_v14  ;;  %v12997_v56 = vadd.f32 -1.0, %v2512_v47  ;;  %v3281_v28 = vsel %vm3245_vm1, %v3208_v15, %v3210_v10  ;;  %v16147_v59 = vclamps-f32 %v12993_v14, 1.0  ;;  %v17397_v34 = vld [vmem:[#allocation143_spill] sm:$0xff] }
 0x410   : > { %17392 = vst [vmem:[#allocation368_spill] sm:$0xff] %v12995_v45  ;;  %v13000_v35 = vadd.f32 %v3770_v21, %v3578_v3  ;;  %v13009_v8 = vadd.f32 %v16140_v61, %v17395_v38  ;;  %4164 = vrot.lane.b32.xlu0 %v12968_v7, %s9079_s21  ;;  %v3576_v15 = vsel %vm3542_vm2, %v3507_v4, %v3509_v22  ;;  %v3510_v38 = vrot.slane %v12472_v40, 1 }
 0x411   : > { %17393 = vst [vmem:[#allocation369_spill] sm:$0xff] %v12997_v56  ;;  %v3772_v21 = vadd.f32 %v3281_v28, %v12402_v31  ;;  %v13027_v47 = vadd.f32 %v16147_v59, %v17397_v34  ;;  %v17399_v3 = vrot.slane %v12388_v43, 7  ;;  %v17400_v31 = vld [vmem:[#allocation144_spill] sm:$0xff]  ;;  %v17401_v7 = vclamps-f32 %v12995_v45, 1.0  ;;  %v4139_v28 = vpop.permute.xlu1 %4138  ;;  %v3876_v34 = vpop.permute.xlu0 %3875 }
 0x412   : > { %17394 = vst [vmem:[#allocation370_spill] sm:$0xff] %v13000_v35  ;;  %17396 = vst [vmem:[#allocation142_spill] sm:$0xff] %v13009_v8  ;;  %3963 = vrot.lane.b32.xlu1 %v13000_v35, %s9080_s30  ;;  %v17404_v0 = vclamps-f32 %v12997_v56, 1.0  ;;  %v3214_v59 = vrot.slane %v12484_v51, 7  ;;  %v16158_v45 = vrot.slane %v12510_v39, 1 }
 0x413   : > { %17398 = vst [vmem:[#allocation143_spill] sm:$0xff] %v13027_v47  ;;  %v3278_v17 = vsel %vm3245_vm1, %v17399_v3, %v3211_v5  ;;  %v13038_v61 = vadd.f32 %v17401_v7, %v17400_v31  ;;  %v13047_v43 = vadd.f32 %v3772_v21, %v3576_v15  ;;  %v17407_v3 = vrot.slane %v12417_v50, 1 }
 0x414   : > { %v13043_v14 = vadd.f32 %v17404_v0, %v17403_v52  ;;  %v3773_v52 = vadd.f32 %v3278_v17, %v12417_v50  ;;  %v3213_v15 = vrot.slane %v12472_v40, 7  ;;  %v3512_v21 = vrot.slane %v12497_v49, 1 }
 0x415   : > { %17402 = vst [vmem:[#allocation144_spill] sm:$0xff] %v13038_v61  ;;  %17406 = vst [vmem:[#allocation371_spill] sm:$0xff] %v13047_v43  ;;  %v3573_v4 = vsel %vm3542_vm2, %v17407_v3, %v3510_v38  ;;  %3965 = vrot.lane.b32.xlu0 %v13047_v43, %s9080_s30  ;;  %v17408_v3 = vld [vmem:[#allocation248_spill] sm:$0xff]  ;;  %v3212_v7 = vrot.slane %v12432_v26, 7  ;;  %v3511_v0 = vrot.slane %v12484_v51, 1 }
 0x416   : > { %17405 = vst [vmem:[#allocation145_spill] sm:$0xff] %v13043_v14  ;;  %4226 = vrot.lane.b32.xlu1 %v13000_v35, %s9079_s21  ;;  %vm3871_vm3 = vcmp.ge.s32.totalorder %v17408_v3, 1  ;;  %vm4001_vm4 = vcmp.lt.s32.totalorder %v17408_v3, 1  ;;  %v13069_v31 = vadd.f32 %v3773_v52, %v3573_v4  ;;  %v3276_v17 = vsel %vm3245_vm1, %v3211_v5, %v3213_v15  ;;  %v17410_v52 = vld [vmem:[#allocation253_spill] sm:$0xff] }
 0x417   : > { %v3571_v56 = vsel %vm3542_vm2, %v3510_v38, %v3512_v21  ;;  %v3775_v50 = vadd.f32 %v3276_v17, %v12472_v40  ;;  %v3279_v14 = vsel %vm3245_vm1, %v3210_v10, %v3212_v7  ;;  %v3574_v47 = vsel %vm3542_vm2, %v3509_v22, %v3511_v0  ;;  %v13097_v22 = vld [vmem:[%s15749_s5 + $0x8] sm:$0xff]  ;;  %v3940_v17 = vpop.permute.xlu1 %3939 }
 0x418   : > { %17409 = vst [vmem:[#allocation248_spill] sm:$0xff] %v13069_v31  ;;  %v3277_v4 = vsel %vm3245_vm1, %v3212_v7, %v3214_v59  ;;  %v3774_v5 = vadd.f32 %v3279_v14, %v12432_v26  ;;  %v3572_v38 = vsel %vm3542_vm2, %v3511_v0, %v16158_v45  ;;  %vm4135_vm5 = vcmp.le.s32.totalorder %v17410_v52, 254  ;;  %v17412_v14 = vld [vmem:[#allocation273_spill] sm:$0xff]  ;;  %v13109_v0 = vld [vmem:[%s15749_s5 + $0x10] sm:$0xff] }
 0x419   : > { %4228 = vrot.lane.b32.xlu0 %v13047_v43, %s9079_s21  ;;  %v3776_v10 = vadd.f32 %v3277_v4, %v12484_v51  ;;  %v13099_v7 = vadd.f32 %v3775_v50, %v3571_v56  ;;  %vm4264_vm6 = vcmp.lt.s32.totalorder %v17408_v3, 127  ;;  %v4527_v40 = vmul.f32 3.0, %v17412_v14  ;;  %v4141_v56 = vpop.permute.xlu0 %4140 }
 0x41a   : > { %3903 = vrot.lane.b32.xlu1 %v13069_v31, %s9080_s30  ;;  %v13104_v26 = vmul.f32 3.0, %v11887_v32  ;;  %v4003_v4 = vsel %vm4001_vm4, %v3876_v34, %v3940_v17  ;;  %v4035_v50 = vsel %vm4001_vm4, %v3940_v17, %v3876_v34  ;;  %v13115_v45 = vadd.f32 %v3774_v5, %v3574_v47  ;;  %v17413_v34 = vld [vmem:[#allocation46_spill] sm:$0xff] }
 0x41b   : > { %17411 = vst [vmem:[#allocation253_spill] sm:$0xff] %v13099_v7  ;;  %v13117_v51 = vadd.f32 %v3776_v10, %v3572_v38  ;;  %v4072_v32 = vsel %vm3871_vm3, %v4035_v50, 0.0  ;;  %v4400_v14 = vadd.f32 %v4003_v4, %v12000_v55  ;;  %v4751_v61 = vunpack.c.l.bf16 %v13097_v22  ;;  %v4203_v10 = vpop.permute.xlu1 %4202 }
 0x41c   : > { %v4752_v8 = vunpack.c.h.bf16 %v13097_v22  ;;  %v4399_v47 = vadd.f32 %v4072_v32, %v11962_v2  ;;  %v13130_v5 = vmul.f32 3.0, %v17413_v34  ;;  %v13133_v38 = vmul.f32 3.0, %v11929_v23 }
 0x41d   : > { %3905 = vrot.lane.b32.xlu0 %v13099_v7, %s9080_s30  ;;  %v3215_v22 = vrot.slane %v12497_v49, 7  ;;  %v3514_v4 = vrot.slane %v12550_v37, 1  ;;  %v4266_v32 = vsel %vm4264_vm6, %v4139_v28, %v4203_v10  ;;  %v4298_v2 = vsel %vm4264_vm6, %v4203_v10, %v4139_v28 }
 0x41e   : > { %4166 = vrot.lane.b32.xlu1 %v13069_v31, %s9079_s21  ;;  %v3216_v34 = vrot.slane %v12510_v39, 7  ;;  %v4336_v55 = vsel %vm4135_vm5, %v4298_v2, 0.0  ;;  %v4463_v17 = vadd.f32 %v4399_v47, %v4266_v32  ;;  %v3942_v31 = vpop.permute.xlu0 %3941  ;;  %v17414_v23 = vrot.slane %v12550_v37, 7 }
 0x41f   : > { %v3274_v43 = vsel %vm3245_vm1, %v3213_v15, %v3215_v22  ;;  %v3569_v50 = vsel %vm3542_vm2, %v3512_v21, %v3514_v4  ;;  %v4464_v28 = vadd.f32 %v4400_v14, %v4336_v55  ;;  %v3515_v32 = vrot.slane %v12564_v41, 1  ;;  %v3878_v2 = vpop.permute.xlu1 %3877 }
 0x420   : > { %v3777_v10 = vadd.f32 %v3274_v43, %v12497_v49  ;;  %v3272_v47 = vsel %vm3245_vm1, %v3215_v22, %v17414_v23  ;;  %v4591_v15 = vmul.f32 0.33333334, %v4463_v17  ;;  %v17415_v21 = vrot.slane %v12577_v48, 1 }
 0x421   : > { %4168 = vrot.lane.b32.xlu0 %v13099_v7, %s9079_s21  ;;  %v3779_v35 = vadd.f32 %v3272_v47, %v12550_v37  ;;  %v3275_v14 = vsel %vm3245_vm1, %v3214_v59, %v3216_v34  ;;  %v4592_v43 = vmul.f32 0.33333334, %v4464_v28  ;;  %v4004_v55 = vsel %vm4001_vm4, %v3878_v2, %v3942_v31 }
 0x422   : > { %3967 = vrot.lane.b32.xlu1 %v13115_v45, %s9080_s30  ;;  %v3567_v7 = vsel %vm3542_vm2, %v3514_v4, %v17415_v21  ;;  %v4036_v22 = vsel %vm4001_vm4, %v3942_v31, %v3878_v2  ;;  %v13173_v17 = vadd.f32 %v3777_v10, %v3569_v50  ;;  %v4655_v23 = vsub.f32 %v4527_v40, %v4591_v15  ;;  %v4205_v47 = vpop.permute.xlu0 %4204 }
 0x423   : > { %v4074_v49 = vsel %vm3871_vm3, %v4036_v22, 0.0  ;;  %v4402_v4 = vadd.f32 %v4004_v55, %v12053_v16  ;;  %v13178_v21 = vadd.f32 %v3779_v35, %v3567_v7  ;;  %v4656_v59 = vsub.f32 %v13104_v26, %v4592_v43  ;;  %v13194_v7 = vpop.permute.xlu1 %3879 }
 0x424   : > { %v4401_v31 = vadd.f32 %v4074_v49, %v12013_v58  ;;  %v4267_v40 = vsel %vm4264_vm6, %v4141_v56, %v4205_v47  ;;  %v16171_v50 = vrot.slane %v12564_v41, 7  ;;  %v4815_v16 = vsub.f32 %v4751_v61, %v4655_v23  ;;  %v13221_v23 = vld [vmem:[%s15749_s5 + $0x18] sm:$0xff] }
 0x425   : > { %17416 = vst [vmem:[#allocation46_spill] sm:$0xff] %v13178_v21  ;;  %3969 = vrot.lane.b32.xlu0 %v13117_v51, %s9080_s30  ;;  %v4299_v35 = vsel %vm4264_vm6, %v4205_v47, %v4141_v56  ;;  %v17417_v26 = vrot.slane %v12510_v39, 1  ;;  %v3778_v58 = vadd.f32 %v3275_v14, %v12510_v39  ;;  %v4816_v49 = vsub.f32 %v4752_v8, %v4656_v59 }
 0x426   : > { %4230 = vrot.lane.b32.xlu1 %v13115_v45, %s9079_s21  ;;  %v4338_v10 = vsel %vm4135_vm5, %v4299_v35, 0.0  ;;  %v4465_v15 = vadd.f32 %v4401_v31, %v4267_v40  ;;  %v3273_v61 = vsel %vm3245_vm1, %v3216_v34, %v16171_v50  ;;  %v4879_v56 = vmax.f32 %v4815_v16, 0.0  ;;  %v13223_v59 = vpop.permute.xlu0 %3881 }
 0x427   : > { %v3570_v28 = vsel %vm3542_vm2, %v17417_v26, %v3515_v32  ;;  %v4466_v2 = vadd.f32 %v4402_v4, %v4338_v10  ;;  %v16170_v55 = vrot.slane %v12590_v24, 1  ;;  %v4880_v22 = vmax.f32 %v4816_v49, 0.0  ;;  %v13233_v35 = vpop.permute.xlu1 %4142 }
 0x428   : > { %v13207_v43 = vadd.f32 %v3778_v58, %v3570_v28  ;;  %v4593_v8 = vmul.f32 0.33333334, %v4465_v15  ;;  %v3780_v14 = vadd.f32 %v3273_v61, %v12564_v41  ;;  %v2963_v34 = vpack.c.bf16 %v12625_v44, %v12625_v44 }
 0x429   : > { %4232 = vrot.lane.b32.xlu0 %v13117_v51, %s9079_s21  ;;  %v4943_v4 = vmin.f32 %v4879_v56, 1.0  ;;  %v4594_v47 = vmul.f32 0.33333334, %v4466_v2  ;;  %v3568_v31 = vsel %vm3542_vm2, %v3515_v32, %v16170_v55  ;;  %v13230_v40 = vmul.f32 3.0, %v11937_v46  ;;  %v8949_v46 = vld [vmem:[%s15747_s3] ss:$8 sps:$4 sm:$0xff]  }
 0x42a   : > { %17418 = vst [vmem:[#allocation372_spill] sm:$0xff] %v13207_v43  ;;  %3907 = vrot.lane.b32.xlu1 %v13173_v17, %s9080_s30  ;;  %v4944_v16 = vmin.f32 %v4880_v22, 1.0  ;;  %v4657_v44 = vsub.f32 %v13130_v5, %v4593_v8  ;;  %v13235_v26 = vadd.f32 %v3780_v14, %v3568_v31  ;;  %v13238_v28 = vmul.f32 3.0, %v11949_v62  ;;  %2997 = vmatmul.mubr.bf16.vlgmr.msra.gmra.mrb[160].mxu1 %v2963_v34  ;;  %v17422_v2 = vld [vmem:[#allocation196_spill] sm:$0xff]  ;;  %v17423_v8 = vld [vmem:[#allocation33_spill] sm:$0xff] }
 0x42b   : > { %v5007_v58 = vmul.f32 0.95, %v4943_v4  ;;  %v4658_v49 = vsub.f32 %v13133_v38, %v4594_v47  ;;  %3057 = vmatpush1.bf16.msra.mxu1 %v8949_v46  ;;  %v17420_v5 = vmov 0   ;;  %v17421_v62 = vunpack.c.l.bf16 %v13109_v0  ;;  %v17424_v34 = vld [vmem:[#allocation276_spill] sm:$0xff] }
 0x42c   : > { %17419 = vst [vmem:[#allocation373_spill] sm:$0xff] %v13235_v26  ;;  %3088 = vmatprep.mubr.bf16.mxu1 %v17420_v5  ;;  %v5008_v15 = vmul.f32 0.95, %v4944_v16  ;;  %v8446_v61 = vpack.c.bf16 %v4944_v16, %v4943_v4  ;;  %v13254_v38 = vmul.f32 3.0, %v11990_v27  ;;  %v17425_v4 = vunpack.c.h.bf16 %v13109_v0  ;;  %v8950_v16 = vld [vmem:[%s15747_s3 + $0x14] ss:$8 sps:$4 sm:$0xff]  }
 0x42d   : > { %v4817_v56 = vsub.f32 %v17421_v62, %v4657_v44  ;;  %3909 = vrot.lane.b32.xlu0 %v13178_v21, %s9080_s30  ;;  %v5231_v22 = vmul.f32 %v17422_v2, %v5007_v58  ;;  %v5872_v14 = vmul.f32 %v17423_v8, %v5007_v58  ;;  %v6514_v47 = vmul.f32 %v17424_v34, %v5007_v58  ;;  %v17426_v44 = vld [vmem:[#allocation198_spill] sm:$0xff]  ;;  %v17427_v5 = vld [vmem:[#allocation44_spill] sm:$0xff]  ;;  %v17428_v27 = vld [vmem:[#allocation49_spill] sm:$0xff] }
 0x42e   : > { %4170 = vrot.lane.b32.xlu1 %v13173_v17, %s9079_s21  ;;  %v4818_v31 = vsub.f32 %v17425_v4, %v4658_v49  ;;  %3058 = vmatprep.subr.bf16.mxu1 %v8950_v16  ;;  %v5232_v46 = vmul.f32 %v17426_v44, %v5008_v15  ;;  %v5873_v62 = vmul.f32 %v17427_v5, %v5008_v15  ;;  %v17429_v0 = vld [vmem:[#allocation147_spill] sm:$0xff]  ;;  %v17431_v8 = vld [vmem:[#allocation165_spill] sm:$0xff]  ;;  %v17433_v16 = vld [vmem:[#allocation242_spill] sm:$0xff]  ;;  %v13279_v5 = vpop.permute.xlu0 %4144 }
 0x42f   : > { %v6515_v55 = vmul.f32 %v17428_v27, %v5008_v15  ;;  %7186 = vst [vmem:[%s13269_s12 + $0x8] sm:$0xff] %v8446_v61  ;;  %v4881_v58 = vmax.f32 %v4817_v56, 0.0  ;;  %v17430_v49 = vunpack.c.l.bf16 %v17429_v0  ;;  %v17432_v34 = vunpack.c.l.bf16 %v17431_v8  ;;  %v8951_v15 = vld [vmem:[%s15747_s3 + $0x10] ss:$8 sps:$4 sm:$0xff]  }
 0x430   : > { %v17434_v50 = vunpack.c.l.bf16 %v17433_v16  ;;  %v4882_v32 = vmax.f32 %v4818_v31, 0.0  ;;  %3059 = vmatpush1.bf16.msra.mxu1 %v8951_v15  ;;  %v17435_v61 = vunpack.c.h.bf16 %v17429_v0  ;;  %v17436_v27 = vunpack.c.h.bf16 %v17431_v8 }
 0x431   : > { %v5295_v2 = vadd.f32 %v5231_v22, %v17430_v49  ;;  %v5936_v4 = vadd.f32 %v5872_v14, %v17432_v34  ;;  %v17437_v49 = vunpack.c.h.bf16 %v17433_v16  ;;  %v4945_v34 = vmin.f32 %v4881_v58, 1.0  ;;  %4172 = vrot.lane.b32.xlu0 %v13178_v21, %s9079_s21 }
 0x432   : > { %v6578_v44 = vadd.f32 %v6514_v47, %v17434_v50  ;;  %v5296_v56 = vadd.f32 %v5232_v46, %v17435_v61  ;;  %v5937_v22 = vadd.f32 %v5873_v62, %v17436_v27  ;;  %3971 = vrot.lane.b32.xlu1 %v13207_v43, %s9080_s30  ;;  %v3944_v50 = vpop.permute.xlu1 %3943  ;;  %v4946_v10 = vmin.f32 %v4882_v32, 1.0  ;;  %v8952_v46 = vld [vmem:[%s15747_s3 + $0x24] ss:$8 sps:$4 sm:$0xff]   ;;  %v3946_v39 = vpop.permute.xlu0 %3945 }
 0x433   : > { %v6579_v14 = vadd.f32 %v6515_v55, %v17437_v49  ;;  %v7897_v47 = vclamps-f32 %v5295_v2, 1.0  ;;  %v8025_v31 = vclamps-f32 %v5936_v4, 1.0  ;;  %3060 = vmatprep.subr.bf16.mxu1 %v8952_v46  ;;  %v5009_v58 = vmul.f32 0.95, %v4945_v34  ;;  %v8953_v2 = vld [vmem:[%s15747_s3 + $0x20] ss:$8 sps:$4 sm:$0xff]  }
 0x434   : > { %v8185_v15 = vclamps-f32 %v6578_v44, 1.0  ;;  %v7898_v62 = vclamps-f32 %v5296_v56, 1.0  ;;  %v8026_v0 = vclamps-f32 %v5937_v22, 1.0  ;;  %v5010_v8 = vmul.f32 0.95, %v4946_v10  ;;  %3061 = vmatpush1.bf16.msra.mxu1 %v8953_v2  ;;  %v17438_v27 = vld [vmem:[#allocation200_spill] sm:$0xff] }
 0x435   : > { %v8186_v55 = vclamps-f32 %v6579_v14, 1.0  ;;  %v8447_v16 = vpack.c.bf16 %v4946_v10, %v4945_v34  ;;  %v4005_v61 = vsel %vm4001_vm4, %v13194_v7, %v3944_v50  ;;  %v4037_v32 = vsel %vm4001_vm4, %v3944_v50, %v13194_v7  ;;  %3973 = vrot.lane.b32.xlu0 %v13235_v26, %s9080_s30  ;;  %v17439_v10 = vld [vmem:[#allocation201_spill] sm:$0xff]  ;;  %v17440_v14 = vld [vmem:[#allocation47_spill] sm:$0xff]  ;;  %v17441_v46 = vld [vmem:[#allocation50_spill] sm:$0xff] }
 0x436   : > { %v8350_v4 = vpack.c.bf16 %v7898_v62, %v7897_v47  ;;  %v8382_v44 = vpack.c.bf16 %v8026_v0, %v8025_v31  ;;  %v5233_v22 = vmul.f32 %v17438_v27, %v5009_v58  ;;  %v5234_v49 = vmul.f32 %v17439_v10, %v5010_v8  ;;  %v17442_v7 = vld [vmem:[#allocation278_spill] sm:$0xff]  ;;  %4234 = vrot.lane.b32.xlu1 %v13207_v43, %s9079_s21  ;;  %v17443_v47 = vld [vmem:[#allocation148_spill] sm:$0xff] }
 0x437   : > { %v8414_v56 = vpack.c.bf16 %v8186_v55, %v8185_v15  ;;  %v5874_v34 = vmul.f32 %v17440_v14, %v5009_v58  ;;  %v5875_v21 = vmul.f32 %v17441_v46, %v5010_v8  ;;  %v6516_v50 = vmul.f32 %v17442_v7, %v5009_v58  ;;  %7187 = vst [vmem:[%s13269_s12 + $0x10] sm:$0xff] %v8447_v16  ;;  %v17445_v62 = vld [vmem:[#allocation280_spill] sm:$0xff]  ;;  %v8954_v16 = vld [vmem:[%s15747_s3 + $0x34] ss:$8 sps:$4 sm:$0xff]  }
 0x438   : > { %5678 = vst [vmem:[%s13318_s10 + $0x8] sm:$0xff] %v8350_v4  ;;  %8120 = vst [vmem:[%s13318_s10 + $0x108] sm:$0xff] %v8382_v44  ;;  %v17444_v31 = vunpack.c.l.bf16 %v17443_v47  ;;  %v6517_v0 = vmul.f32 %v17445_v62, %v5010_v8  ;;  %v4076_v55 = vsel %vm3871_vm3, %v4037_v32, 0.0  ;;  %v4404_v58 = vadd.f32 %v4005_v61, %v12186_v57  ;;  %3062 = vmatprep.subr.bf16.mxu1 %v8954_v16  ;;  %v17447_v44 = vld [vmem:[#allocation167_spill] sm:$0xff]  ;;  %v4207_v32 = vpop.permute.xlu1 %4206 }
 0x439   : > { %8280 = vst [vmem:[%s13318_s10 + $0x208] sm:$0xff] %v8414_v56  ;;  %v17446_v2 = vunpack.c.h.bf16 %v17443_v47  ;;  %v17448_v56 = vunpack.c.l.bf16 %v17447_v44  ;;  %v17450_v8 = vld [vmem:[#allocation243_spill] sm:$0xff]  ;;  %4236 = vrot.lane.b32.xlu0 %v13235_v26, %s9079_s21 }
 0x43a   : > { %v5297_v15 = vadd.f32 %v5233_v22, %v17444_v31  ;;  %v17449_v22 = vunpack.c.h.bf16 %v17447_v44  ;;  %v17451_v14 = vunpack.c.l.bf16 %v17450_v8  ;;  %v8955_v57 = vld [vmem:[%s15747_s3 + $0x30] ss:$8 sps:$4 sm:$0xff]   ;;  %v17452_v7 = vunpack.c.h.bf16 %v17450_v8 }
 0x43b   : > { %v5298_v4 = vadd.f32 %v5234_v49, %v17446_v2  ;;  %v5938_v27 = vadd.f32 %v5874_v34, %v17448_v56  ;;  %3063 = vmatpush1.bf16.msra.mxu1 %v8955_v57  ;;  %v4403_v49 = vadd.f32 %v4076_v55, %v12108_v19  ;;  %v4006_v34 = vsel %vm4001_vm4, %v13223_v59, %v3946_v39  ;;  %v13364_v2 = vld [vmem:[%s15749_s5 + $0x20] sm:$0xff] }
 0x43c   : > { %v5939_v10 = vadd.f32 %v5875_v21, %v17449_v22  ;;  %v6580_v46 = vadd.f32 %v6516_v50, %v17451_v14  ;;  %v7899_v61 = vclamps-f32 %v5297_v15, 1.0  ;;  %v6581_v47 = vadd.f32 %v6517_v0, %v17452_v7  ;;  %v8956_v21 = vld [vmem:[%s15747_s3 + $0x44] ss:$8 sps:$4 sm:$0xff]   ;;  %v17453_v22 = vld [vmem:[#allocation290_spill] sm:$0xff] }
 0x43d   : > { %3064 = vmatprep.subr.bf16.mxu1 %v8956_v21  ;;  %v7900_v50 = vclamps-f32 %v5298_v4, 1.0  ;;  %v8027_v31 = vclamps-f32 %v5938_v27, 1.0  ;;  %v4038_v19 = vsel %vm4001_vm4, %v3946_v39, %v13223_v59  ;;  %v4406_v0 = vadd.f32 %v4006_v34, %v12209_v25  ;;  %v4209_v39 = vpop.permute.xlu0 %4208  ;;  %v8957_v59 = vld [vmem:[%s15747_s3 + $0x40] ss:$8 sps:$4 sm:$0xff]  }
 0x43e   : > { %v8028_v15 = vclamps-f32 %v5939_v10, 1.0  ;;  %v8187_v62 = vclamps-f32 %v6580_v46, 1.0  ;;  %v8188_v16 = vclamps-f32 %v6581_v47, 1.0  ;;  %v4268_v55 = vsel %vm4264_vm6, %v13233_v35, %v4207_v32  ;;  %v8958_v46 = vld [vmem:[%s15747_s3 + $0x54] ss:$8 sps:$4 sm:$0xff]  }
 0x43f   : > { %v8351_v4 = vpack.c.bf16 %v7900_v50, %v7899_v61  ;;  %v4078_v56 = vsel %vm3871_vm3, %v4038_v19, 0.0  ;;  %v4300_v25 = vsel %vm4264_vm6, %v4207_v32, %v13233_v35  ;;  %3065 = vmatpush1.bf16.msra.mxu1 %v8957_v59  ;;  %v4467_v14 = vadd.f32 %v4403_v49, %v4268_v55  ;;  %v17454_v32 = vld [vmem:[#allocation277_spill] sm:$0xff] }
 0x440   : > { %v8383_v44 = vpack.c.bf16 %v8028_v15, %v8027_v31  ;;  %v8415_v27 = vpack.c.bf16 %v8188_v16, %v8187_v62  ;;  %v4405_v10 = vadd.f32 %v4078_v56, %v17453_v22  ;;  %v4340_v8 = vsel %vm4135_vm5, %v4300_v25, 0.0  ;;  %3066 = vmatprep.subr.bf16.mxu1 %v8958_v46  ;;  %v8959_v62 = vld [vmem:[%s15747_s3 + $0x50] ss:$8 sps:$4 sm:$0xff]  }
 0x441   : > { %5679 = vst [vmem:[%s13318_s10 + $0x10] sm:$0xff] %v8351_v4  ;;  %v4468_v35 = vadd.f32 %v4404_v58, %v4340_v8  ;;  %v4534_v57 = vmul.f32 3.0, %v17454_v32  ;;  %v4757_v61 = vunpack.c.l.bf16 %v13364_v2  ;;  %v4758_v7 = vunpack.c.h.bf16 %v13364_v2  ;;  %v13405_v4 = vpop.permute.xlu1 %3883 }
 0x442   : > { %8121 = vst [vmem:[%s13318_s10 + $0x110] sm:$0xff] %v8383_v44  ;;  %8281 = vst [vmem:[%s13318_s10 + $0x210] sm:$0xff] %v8415_v27  ;;  %v4595_v47 = vmul.f32 0.33333334, %v4467_v14  ;;  %v4269_v49 = vsel %vm4264_vm6, %v13279_v5, %v4209_v39  ;;  %v4301_v34 = vsel %vm4264_vm6, %v4209_v39, %v13279_v5  ;;  %v3219_v21 = vrot.slane %v12577_v48, 7 }
 0x443   : > { %v4596_v50 = vmul.f32 0.33333334, %v4468_v35  ;;  %v4342_v58 = vsel %vm4135_vm5, %v4301_v34, 0.0  ;;  %v4469_v31 = vadd.f32 %v4405_v10, %v4269_v49  ;;  %v3518_v15 = vrot.slane %v12636_v20, 1  ;;  %3067 = vmatpush1.bf16.msra.mxu1 %v8959_v62  ;;  %v8960_v44 = vld [vmem:[%s15747_s3 + $0x64] ss:$8 sps:$4 sm:$0xff]  }
 0x444   : > { %v4659_v16 = vsub.f32 %v13230_v40, %v4595_v47  ;;  %v4470_v19 = vadd.f32 %v4406_v0, %v4342_v58  ;;  %v17455_v55 = vrot.slane %v12550_v37, 7  ;;  %v16176_v2 = vrot.slane %v12636_v20, 7  ;;  %3068 = vmatprep.subr.bf16.mxu1 %v8960_v44  ;;  %v8961_v47 = vld [vmem:[%s15747_s3 + $0x60] ss:$8 sps:$4 sm:$0xff]  }
 0x445   : > { %v4660_v56 = vsub.f32 %v13238_v28, %v4596_v50  ;;  %v4597_v25 = vmul.f32 0.33333334, %v4469_v31  ;;  %v17456_v40 = vrot.slane %v12577_v48, 1  ;;  %v17457_v59 = vunpack.c.l.bf16 %v13221_v23 }
 0x446   : > { %v3270_v5 = vsel %vm3245_vm1, %v17455_v55, %v3219_v21  ;;  %v4598_v22 = vmul.f32 0.33333334, %v4470_v19  ;;  %v3268_v10 = vsel %vm3245_vm1, %v3219_v21, %v16176_v2  ;;  %v16175_v8 = vrot.slane %v12663_v12, 1  ;;  %v13445_v55 = vpop.permute.xlu0 %3885 }
 0x447   : > { %v3565_v0 = vsel %vm3542_vm2, %v17456_v40, %v3518_v15  ;;  %v3781_v39 = vadd.f32 %v3270_v5, %v12577_v48  ;;  %v4819_v27 = vsub.f32 %v17457_v59, %v4659_v16  ;;  %v17458_v28 = vunpack.c.h.bf16 %v13221_v23  ;;  %3069 = vmatpush1.bf16.msra.mxu1 %v8961_v47  ;;  %v17465_v47 = vld [vmem:[#allocation202_spill] sm:$0xff] }
 0x448   : > { %v4661_v46 = vsub.f32 %v13254_v38, %v4597_v25  ;;  %v3783_v32 = vadd.f32 %v3268_v10, %v12636_v20  ;;  %v4662_v34 = vsub.f32 %v4534_v57, %v4598_v22  ;;  %v3563_v21 = vsel %vm3542_vm2, %v3518_v15, %v16175_v8  ;;  %v8962_v38 = vld [vmem:[%s15747_s3 + $0x74] ss:$8 sps:$4 sm:$0xff]   ;;  %v13447_v15 = vpop.permute.xlu1 %4146 }
 0x449   : > { %v4820_v14 = vsub.f32 %v17458_v28, %v4660_v56  ;;  %v13426_v35 = vadd.f32 %v3781_v39, %v3565_v0  ;;  %v4883_v49 = vmax.f32 %v4819_v27, 0.0  ;;  %v3220_v23 = vrot.slane %v12590_v24, 7  ;;  %3070 = vmatprep.subr.bf16.mxu1 %v8962_v38  ;;  %v17461_v57 = vld [vmem:[#allocation87_spill] sm:$0xff]  ;;  %v17467_v38 = vld [vmem:[#allocation282_spill] sm:$0xff] }
 0x44a   : > { %v4821_v58 = vsub.f32 %v4757_v61, %v4661_v46  ;;  %v13442_v31 = vadd.f32 %v3783_v32, %v3563_v21  ;;  %v16177_v62 = vrot.slane %v17461_v57, 1  ;;  %v4822_v19 = vsub.f32 %v4758_v7, %v4662_v34  ;;  %v8963_v39 = vld [vmem:[%s15747_s3 + $0x70] ss:$8 sps:$4 sm:$0xff]   ;;  %v17466_v34 = vld [vmem:[#allocation52_spill] sm:$0xff] }
 0x44b   : > { %17459 = vst [vmem:[#allocation196_spill] sm:$0xff] %v13426_v35  ;;  %v4884_v50 = vmax.f32 %v4820_v14, 0.0  ;;  %3911 = vrot.lane.b32.xlu1 %v13426_v35, %s9080_s30  ;;  %v4947_v16 = vmin.f32 %v4883_v49, 1.0  ;;  %v17462_v5 = vrot.slane %v12564_v41, 7  ;;  %v16174_v61 = vrot.slane %v17461_v57, 7  ;;  %3071 = vmatpush1.bf16.msra.mxu1 %v8963_v39 }
 0x44c   : > { %17460 = vst [vmem:[#allocation33_spill] sm:$0xff] %v13442_v31  ;;  %v4885_v25 = vmax.f32 %v4821_v58, 0.0  ;;  %3913 = vrot.lane.b32.xlu0 %v13442_v31, %s9080_s30  ;;  %v17463_v7 = vrot.slane %v12590_v24, 1  ;;  %v4886_v27 = vmax.f32 %v4822_v19, 0.0  ;;  %v17468_v19 = vld [vmem:[#allocation8_spill] sm:$0xff] }
 0x44d   : > { %v3271_v44 = vsel %vm3245_vm1, %v17462_v5, %v3220_v23  ;;  %v4948_v56 = vmin.f32 %v4884_v50, 1.0  ;;  %v5011_v59 = vmul.f32 0.95, %v4947_v16  ;;  %v3269_v22 = vsel %vm3245_vm1, %v3220_v23, %v16174_v61  ;;  %v17469_v23 = vld [vmem:[#allocation219_spill] sm:$0xff]  ;;  %v17475_v61 = vld [vmem:[#allocation244_spill] sm:$0xff] }
 0x44e   : > { %v3566_v40 = vsel %vm3542_vm2, %v17463_v7, %v16177_v62  ;;  %v3782_v0 = vadd.f32 %v3271_v44, %v12590_v24  ;;  %v4949_v46 = vmin.f32 %v4885_v25, 1.0  ;;  %v4950_v58 = vmin.f32 %v4886_v27, 1.0  ;;  %v17470_v7 = vld [vmem:[#allocation284_spill] sm:$0xff] }
 0x44f   : > { %v5012_v28 = vmul.f32 0.95, %v4948_v56  ;;  %v8448_v14 = vpack.c.bf16 %v4948_v56, %v4947_v16  ;;  %4174 = vrot.lane.b32.xlu1 %v13426_v35, %s9079_s21  ;;  %v5235_v49 = vmul.f32 %v17465_v47, %v5011_v59  ;;  %v5876_v21 = vmul.f32 %v17466_v34, %v5011_v59  ;;  %v17471_v56 = vld [vmem:[#allocation149_spill] sm:$0xff] }
 0x450   : > { %v13473_v32 = vadd.f32 %v3782_v0, %v3566_v40  ;;  %v6518_v50 = vmul.f32 %v17467_v38, %v5011_v59  ;;  %v5013_v16 = vmul.f32 0.95, %v4949_v46  ;;  %4176 = vrot.lane.b32.xlu0 %v13442_v31, %s9079_s21  ;;  %v17472_v25 = vunpack.c.l.bf16 %v17471_v56  ;;  %v17473_v0 = vld [vmem:[#allocation169_spill] sm:$0xff] }
 0x451   : > { %v5236_v5 = vmul.f32 %v17468_v19, %v5012_v28  ;;  %v5877_v44 = vmul.f32 %v17469_v23, %v5012_v28  ;;  %v6519_v39 = vmul.f32 %v17470_v7, %v5012_v28  ;;  %7188 = vst [vmem:[%s13269_s12 + $0x18] sm:$0xff] %v8448_v14  ;;  %v17474_v47 = vunpack.c.l.bf16 %v17473_v0  ;;  %v13490_v19 = vpop.permute.xlu0 %4148  ;;  %v3948_v23 = vpop.permute.xlu1 %3947 }
 0x452   : > { %17464 = vst [vmem:[#allocation276_spill] sm:$0xff] %v13473_v32  ;;  %v5299_v40 = vadd.f32 %v5235_v49, %v17472_v25  ;;  %v17476_v59 = vunpack.c.l.bf16 %v17475_v61  ;;  %v5014_v38 = vmul.f32 0.95, %v4950_v58  ;;  %v17477_v28 = vunpack.c.h.bf16 %v17471_v56  ;;  %v17480_v49 = vld [vmem:[#allocation10_spill] sm:$0xff] }
 0x453   : > { %v5940_v34 = vadd.f32 %v5876_v21, %v17474_v47  ;;  %v17478_v7 = vunpack.c.h.bf16 %v17473_v0  ;;  %v17479_v2 = vunpack.c.h.bf16 %v17475_v61  ;;  %v5237_v25 = vmul.f32 %v17480_v49, %v5013_v16  ;;  %3975 = vrot.lane.b32.xlu1 %v13473_v32, %s9080_s30  ;;  %v17485_v61 = vld [vmem:[#allocation220_spill] sm:$0xff] }
 0x454   : > { %v6582_v27 = vadd.f32 %v6518_v50, %v17476_v59  ;;  %v5300_v14 = vadd.f32 %v5236_v5, %v17477_v28  ;;  %v7901_v21 = vclamps-f32 %v5299_v40, 1.0  ;;  %v17481_v59 = vld [vmem:[#allocation12_spill] sm:$0xff]  ;;  %v17482_v5 = vld [vmem:[#allocation150_spill] sm:$0xff] }
 0x455   : > { %v5941_v8 = vadd.f32 %v5877_v44, %v17478_v7  ;;  %v6583_v62 = vadd.f32 %v6519_v39, %v17479_v2  ;;  %v8029_v50 = vclamps-f32 %v5940_v34, 1.0  ;;  %v5238_v10 = vmul.f32 %v17481_v59, %v5014_v38  ;;  %v17486_v7 = vld [vmem:[#allocation80_spill] sm:$0xff]  ;;  %v17487_v34 = vld [vmem:[#allocation286_spill] sm:$0xff]  ;;  %v4211_v35 = vpop.permute.xlu1 %4210 }
 0x456   : > { %v8189_v47 = vclamps-f32 %v6582_v27, 1.0  ;;  %v7902_v24 = vclamps-f32 %v5300_v14, 1.0  ;;  %v17483_v28 = vunpack.c.l.bf16 %v17482_v5  ;;  %v17484_v44 = vunpack.c.h.bf16 %v17482_v5 }
 0x457   : > { %v8030_v31 = vclamps-f32 %v5941_v8, 1.0  ;;  %v8190_v56 = vclamps-f32 %v6583_v62, 1.0  ;;  %v5878_v39 = vmul.f32 %v17485_v61, %v5013_v16  ;;  %v5879_v40 = vmul.f32 %v17486_v7, %v5014_v38  ;;  %4238 = vrot.lane.b32.xlu1 %v13473_v32, %s9079_s21  ;;  %v17491_v61 = vld [vmem:[#allocation288_spill] sm:$0xff]  ;;  %v3950_v7 = vpop.permute.xlu0 %3949 }
 0x458   : > { %v5301_v0 = vadd.f32 %v5237_v25, %v17483_v28  ;;  %v5302_v2 = vadd.f32 %v5238_v10, %v17484_v44  ;;  %v6520_v27 = vmul.f32 %v17487_v34, %v5013_v16  ;;  %v8352_v49 = vpack.c.bf16 %v7902_v24, %v7901_v21  ;;  %v17488_v25 = vld [vmem:[#allocation171_spill] sm:$0xff]  ;;  %v17492_v24 = vld [vmem:[#allocation245_spill] sm:$0xff] }
 0x459   : > { %v8384_v59 = vpack.c.bf16 %v8030_v31, %v8029_v50  ;;  %v8416_v14 = vpack.c.bf16 %v8190_v56, %v8189_v47  ;;  %v17489_v5 = vunpack.c.l.bf16 %v17488_v25  ;;  %v17490_v10 = vunpack.c.h.bf16 %v17488_v25  ;;  %v17499_v25 = vld [vmem:[#allocation307_spill] sm:$0xff] }
 0x45a   : > { %v7903_v8 = vclamps-f32 %v5301_v0, 1.0  ;;  %v7904_v62 = vclamps-f32 %v5302_v2, 1.0  ;;  %v6521_v48 = vmul.f32 %v17491_v61, %v5014_v38  ;;  %5680 = vst [vmem:[%s13318_s10 + $0x18] sm:$0xff] %v8352_v49  ;;  %v17493_v31 = vunpack.c.l.bf16 %v17492_v24 }
 0x45b   : > { %v5942_v28 = vadd.f32 %v5878_v39, %v17489_v5  ;;  %v5943_v44 = vadd.f32 %v5879_v40, %v17490_v10  ;;  %8122 = vst [vmem:[%s13318_s10 + $0x118] sm:$0xff] %v8384_v59  ;;  %8282 = vst [vmem:[%s13318_s10 + $0x218] sm:$0xff] %v8416_v14  ;;  %v8449_v21 = vpack.c.bf16 %v4950_v58, %v4949_v46  ;;  %v17494_v50 = vrot.slane %v12678_v29, 1 }
 0x45c   : > { %v6584_v16 = vadd.f32 %v6520_v27, %v17493_v31  ;;  %v17495_v47 = vrot.slane %v17461_v57, 1  ;;  %v3784_v0 = vadd.f32 %v3269_v22, %v17461_v57  ;;  %v8353_v38 = vpack.c.bf16 %v7904_v62, %v7903_v8  ;;  %v4722_v62 = vld [vmem:[%s15749_s5 + $0x28] sm:$0xff] }
 0x45d   : > { %v8031_v2 = vclamps-f32 %v5942_v28, 1.0  ;;  %v8032_v39 = vclamps-f32 %v5943_v44, 1.0  ;;  %v17496_v40 = vunpack.c.h.bf16 %v17492_v24  ;;  %7189 = vst [vmem:[%s13269_s12 + $0x20] sm:$0xff] %v8449_v21  ;;  %v4007_v46 = vsel %vm4001_vm4, %v13405_v4, %v3948_v23  ;;  %v17500_v28 = vld [vmem:[#allocation279_spill] sm:$0xff]  ;;  %v17501_v24 = vld [vmem:[#allocation317_spill] sm:$0xff] }
 0x45e   : > { %v3564_v56 = vsel %vm3542_vm2, %v17495_v47, %v17494_v50  ;;  %v8191_v49 = vclamps-f32 %v6584_v16, 1.0  ;;  %v4039_v58 = vsel %vm4001_vm4, %v3948_v23, %v13405_v4  ;;  %5681 = vst [vmem:[%s13318_s10 + $0x20] sm:$0xff] %v8353_v38  ;;  %v4008_v4 = vsel %vm4001_vm4, %v13445_v55, %v3950_v7  ;;  %v17502_v16 = vld [vmem:[#allocation281_spill] sm:$0xff]  ;;  %v4723_v50 = vld [vmem:[%s15749_s5 + $0x30] sm:$0xff]  ;;  %v4213_v47 = vpop.permute.xlu0 %4212 }
 0x45f   : > { %v6585_v34 = vadd.f32 %v6521_v48, %v17496_v40  ;;  %v13531_v27 = vadd.f32 %v3784_v0, %v3564_v56  ;;  %v8385_v22 = vpack.c.bf16 %v8032_v39, %v8031_v2  ;;  %v4080_v14 = vsel %vm3871_vm3, %v4039_v58, 0.0  ;;  %v17498_v48 = vld [vmem:[#allocation316_spill] sm:$0xff]  ;;  %v13564_v56 = vpop.permute.xlu1 %3887 }
 0x460   : > { %v4408_v8 = vadd.f32 %v4007_v46, %v17498_v48  ;;  %v4407_v5 = vadd.f32 %v4080_v14, %v17499_v25  ;;  %v4040_v23 = vsel %vm4001_vm4, %v3950_v7, %v13445_v55  ;;  %v4535_v10 = vmul.f32 3.0, %v17500_v28  ;;  %v17503_v0 = vld [vmem:[#allocation308_spill] sm:$0xff]  ;;  %v17505_v46 = vld [vmem:[#allocation285_spill] sm:$0xff] }
 0x461   : > { %17497 = vst [vmem:[#allocation198_spill] sm:$0xff] %v13531_v27  ;;  %v8192_v59 = vclamps-f32 %v6585_v34, 1.0  ;;  %3977 = vrot.lane.b32.xlu0 %v13531_v27, %s9080_s30  ;;  %8123 = vst [vmem:[%s13318_s10 + $0x120] sm:$0xff] %v8385_v22  ;;  %v4082_v61 = vsel %vm3871_vm3, %v4040_v23, 0.0  ;;  %v4410_v31 = vadd.f32 %v4008_v4, %v17501_v24  ;;  %v4536_v21 = vmul.f32 3.0, %v17502_v16  ;;  %v17504_v34 = vld [vmem:[#allocation283_spill] sm:$0xff] }
 0x462   : > { %v4409_v55 = vadd.f32 %v4082_v61, %v17503_v0  ;;  %v4759_v7 = vunpack.c.l.bf16 %v4722_v62  ;;  %v4760_v38 = vunpack.c.h.bf16 %v4722_v62  ;;  %v4270_v2 = vsel %vm4264_vm6, %v13447_v15, %v4211_v35  ;;  %v17506_v23 = vld [vmem:[#allocation94_spill] sm:$0xff] }
 0x463   : > { %v8417_v44 = vpack.c.bf16 %v8192_v59, %v8191_v49  ;;  %v4302_v39 = vsel %vm4264_vm6, %v4211_v35, %v13447_v15  ;;  %v4471_v40 = vadd.f32 %v4407_v5, %v4270_v2  ;;  %v4537_v49 = vmul.f32 3.0, %v17504_v34 }
 0x464   : > { %v4538_v58 = vmul.f32 3.0, %v17505_v46  ;;  %v4344_v22 = vsel %vm4135_vm5, %v4302_v39, 0.0  ;;  %v4761_v59 = vunpack.c.l.bf16 %v4723_v50  ;;  %v4762_v14 = vunpack.c.h.bf16 %v4723_v50 }
 0x465   : > { %8283 = vst [vmem:[%s13318_s10 + $0x220] sm:$0xff] %v8417_v44  ;;  %4240 = vrot.lane.b32.xlu0 %v13531_v27, %s9079_s21  ;;  %v4271_v48 = vsel %vm4264_vm6, %v13490_v19, %v4213_v47  ;;  %v4472_v62 = vadd.f32 %v4408_v8, %v4344_v22  ;;  %v4599_v25 = vmul.f32 0.33333334, %v4471_v40  ;;  %v4303_v35 = vsel %vm4264_vm6, %v4213_v47, %v13490_v19  ;;  %v13591_v8 = vpop.permute.xlu1 %4150 }
 0x466   : > { %v4473_v15 = vadd.f32 %v4409_v55, %v4271_v48  ;;  %v4346_v5 = vsel %vm4135_vm5, %v4303_v35, 0.0  ;;  %v3223_v4 = vrot.slane %v12663_v12, 7  ;;  %v3522_v28 = vrot.slane %v17506_v23, 1 }
 0x467   : > { %v16185_v44 = vrot.slane %v17506_v23, 7  ;;  %v4600_v61 = vmul.f32 0.33333334, %v4472_v62  ;;  %v4663_v24 = vsub.f32 %v4535_v10, %v4599_v25  ;;  %v4474_v16 = vadd.f32 %v4410_v31, %v4346_v5 }
 0x468   : > { %v4601_v50 = vmul.f32 0.33333334, %v4473_v15  ;;  %v17507_v0 = vrot.slane %v12636_v20, 7  ;;  %v17508_v47 = vrot.slane %v12663_v12, 1  ;;  %v16184_v10 = vrot.slane %v12744_v13, 1 }
 0x469   : > { %v3264_v2 = vsel %vm3245_vm1, %v3223_v4, %v16185_v44  ;;  %v4664_v31 = vsub.f32 %v4536_v21, %v4600_v61  ;;  %v4823_v39 = vsub.f32 %v4759_v7, %v4663_v24  ;;  %v4602_v40 = vmul.f32 0.33333334, %v4474_v16  ;;  %v17512_v61 = vld [vmem:[#allocation99_spill] sm:$0xff]  ;;  %v17525_v44 = vld [vmem:[#allocation246_spill] sm:$0xff] }
 0x46a   : > { %v3266_v19 = vsel %vm3245_vm1, %v17507_v0, %v3223_v4  ;;  %v3561_v55 = vsel %vm3542_vm2, %v17508_v47, %v3522_v28  ;;  %v4665_v34 = vsub.f32 %v4537_v49, %v4601_v50  ;;  %v3559_v22 = vsel %vm3542_vm2, %v3522_v28, %v16184_v10 }
 0x46b   : > { %v3785_v46 = vadd.f32 %v3266_v19, %v12663_v12  ;;  %v3787_v48 = vadd.f32 %v3264_v2, %v17506_v23  ;;  %v3224_v62 = vrot.slane %v12678_v29, 7  ;;  %v4824_v25 = vsub.f32 %v4760_v38, %v4664_v31  ;;  %v13622_v19 = vpop.permute.xlu1 %3951  ;;  %v13628_v38 = vpop.permute.xlu0 %3889 }
 0x46c   : > { %v4887_v35 = vmax.f32 %v4823_v39, 0.0  ;;  %v4666_v15 = vsub.f32 %v4538_v58, %v4602_v40  ;;  %v4825_v5 = vsub.f32 %v4761_v59, %v4665_v34  ;;  %v17511_v7 = vrot.slane %v17461_v57, 7 }
 0x46d   : > { %v13613_v4 = vadd.f32 %v3785_v46, %v3561_v55  ;;  %v13615_v21 = vadd.f32 %v3787_v48, %v3559_v22  ;;  %v3523_v24 = vrot.slane %v17512_v61, 1  ;;  %v4888_v28 = vmax.f32 %v4824_v25, 0.0  ;;  %v17514_v55 = vld [vmem:[#allocation101_spill] sm:$0xff] }
 0x46e   : > { %v3267_v49 = vsel %vm3245_vm1, %v17511_v7, %v3224_v62  ;;  %v4951_v16 = vmin.f32 %v4887_v35, 1.0  ;;  %v4826_v50 = vsub.f32 %v4762_v14, %v4666_v15  ;;  %v4889_v0 = vmax.f32 %v4825_v5, 0.0  ;;  %v17515_v15 = vld [vmem:[#allocation204_spill] sm:$0xff]  ;;  %v17516_v7 = vld [vmem:[#allocation81_spill] sm:$0xff] }
 0x46f   : > { %17509 = vst [vmem:[#allocation44_spill] sm:$0xff] %v13613_v4  ;;  %17510 = vst [vmem:[#allocation49_spill] sm:$0xff] %v13615_v21  ;;  %3915 = vrot.lane.b32.xlu1 %v13613_v4, %s9080_s30  ;;  %3917 = vrot.lane.b32.xlu0 %v13615_v21, %s9080_s30  ;;  %v17513_v58 = vrot.slane %v12678_v29, 1  ;;  %v3786_v47 = vadd.f32 %v3267_v49, %v12678_v29  ;;  %v16183_v14 = vrot.slane %v17512_v61, 7  ;;  %v16182_v2 = vrot.slane %v17514_v55, 1  ;;  %v4215_v41 = vpop.permute.xlu1 %4214 }
 0x470   : > { %v4952_v31 = vmin.f32 %v4888_v28, 1.0  ;;  %v5015_v39 = vmul.f32 0.95, %v4951_v16  ;;  %v4890_v40 = vmax.f32 %v4826_v50, 0.0  ;;  %v13637_v34 = vmin.f32 %v4889_v0, 1.0  ;;  %v17517_v28 = vld [vmem:[#allocation291_spill] sm:$0xff] }
 0x471   : > { %v3562_v59 = vsel %vm3542_vm2, %v17513_v58, %v3523_v24  ;;  %v3265_v22 = vsel %vm3245_vm1, %v3224_v62, %v16183_v14  ;;  %v3560_v48 = vsel %vm3542_vm2, %v3523_v24, %v16182_v2  ;;  %v13653_v25 = vsel %vm4001_vm4, %v13564_v56, %v13622_v19  ;;  %v17519_v2 = vld [vmem:[#allocation151_spill] sm:$0xff] }
 0x472   : > { %v13639_v46 = vadd.f32 %v3786_v47, %v3562_v59  ;;  %v5016_v35 = vmul.f32 0.95, %v4952_v31  ;;  %v5239_v5 = vmul.f32 %v17515_v15, %v5015_v39  ;;  %v5880_v49 = vmul.f32 %v17516_v7, %v5015_v39  ;;  %v17518_v59 = vld [vmem:[#allocation206_spill] sm:$0xff]  ;;  %v17521_v7 = vld [vmem:[#allocation56_spill] sm:$0xff] }
 0x473   : > { %v6522_v50 = vmul.f32 %v17517_v28, %v5015_v39  ;;  %v8450_v62 = vpack.c.bf16 %v4952_v31, %v4951_v16  ;;  %v4954_v0 = vmin.f32 %v4890_v40, 1.0  ;;  %v5017_v58 = vmul.f32 0.95, %v13637_v34  ;;  %4178 = vrot.lane.b32.xlu1 %v13613_v4, %s9079_s21  ;;  %4180 = vrot.lane.b32.xlu0 %v13615_v21, %s9079_s21  ;;  %v17522_v39 = vld [vmem:[#allocation173_spill] sm:$0xff]  ;;  %v17527_v21 = vld [vmem:[#allocation14_spill] sm:$0xff] }
 0x474   : > { %v3788_v24 = vadd.f32 %v3265_v22, %v17512_v61  ;;  %v5240_v47 = vmul.f32 %v17518_v59, %v5016_v35  ;;  %v17520_v15 = vunpack.c.l.bf16 %v17519_v2  ;;  %v5881_v10 = vmul.f32 %v17521_v7, %v5016_v35  ;;  %v17524_v40 = vld [vmem:[#allocation293_spill] sm:$0xff]  ;;  %v13675_v22 = vpop.permute.xlu0 %4152 }
 0x475   : > { %v17523_v16 = vunpack.c.l.bf16 %v17522_v39  ;;  %v6523_v28 = vmul.f32 %v17524_v40, %v5016_v35  ;;  %v17526_v29 = vunpack.c.l.bf16 %v17525_v44  ;;  %7190 = vst [vmem:[%s13269_s12 + $0x28] sm:$0xff] %v8450_v62  ;;  %v5018_v4 = vmul.f32 0.95, %v4954_v0  ;;  %v17531_v40 = vld [vmem:[#allocation15_spill] sm:$0xff] }
 0x476   : > { %v5303_v14 = vadd.f32 %v5239_v5, %v17520_v15  ;;  %v5241_v57 = vmul.f32 %v17527_v21, %v5017_v58  ;;  %v17528_v59 = vunpack.c.h.bf16 %v17519_v2  ;;  %v17529_v15 = vunpack.c.h.bf16 %v17522_v39 }
 0x477   : > { %v5944_v31 = vadd.f32 %v5880_v49, %v17523_v16  ;;  %v6586_v12 = vadd.f32 %v6522_v50, %v17526_v29  ;;  %v17530_v49 = vunpack.c.h.bf16 %v17525_v44  ;;  %v5242_v29 = vmul.f32 %v17531_v40, %v5018_v4  ;;  %v17532_v50 = vld [vmem:[#allocation152_spill] sm:$0xff]  ;;  %3979 = vrot.lane.b32.xlu1 %v13639_v46, %s9080_s30  ;;  %v17538_v40 = vld [vmem:[#allocation175_spill] sm:$0xff] }
 0x478   : > { %v5304_v20 = vadd.f32 %v5240_v47, %v17528_v59  ;;  %v7905_v5 = vclamps-f32 %v5303_v14, 1.0  ;;  %v5945_v7 = vadd.f32 %v5881_v10, %v17529_v15  ;;  %v17533_v62 = vunpack.c.l.bf16 %v17532_v50  ;;  %v17534_v47 = vld [vmem:[#allocation82_spill] sm:$0xff] }
 0x479   : > { %v8033_v27 = vclamps-f32 %v5944_v31, 1.0  ;;  %v6587_v35 = vadd.f32 %v6523_v28, %v17530_v49  ;;  %v8193_v16 = vclamps-f32 %v6586_v12, 1.0  ;;  %v5882_v14 = vmul.f32 %v17534_v47, %v5017_v58  ;;  %v17535_v59 = vld [vmem:[#allocation58_spill] sm:$0xff]  ;;  %v17537_v28 = vld [vmem:[#allocation295_spill] sm:$0xff] }
 0x47a   : > { %v5305_v32 = vadd.f32 %v5241_v57, %v17533_v62  ;;  %v7906_v21 = vclamps-f32 %v5304_v20, 1.0  ;;  %v8034_v2 = vclamps-f32 %v5945_v7, 1.0  ;;  %v5883_v39 = vmul.f32 %v17535_v59, %v5018_v4 }
 0x47b   : > { %v8194_v10 = vclamps-f32 %v6587_v35, 1.0  ;;  %v17536_v44 = vunpack.c.h.bf16 %v17532_v50  ;;  %v6524_v15 = vmul.f32 %v17537_v28, %v5017_v58  ;;  %v17539_v62 = vunpack.c.l.bf16 %v17538_v40  ;;  %v17541_v35 = vld [vmem:[#allocation297_spill] sm:$0xff]  ;;  %v17542_v50 = vld [vmem:[#allocation247_spill] sm:$0xff]  ;;  %4242 = vrot.lane.b32.xlu1 %v13639_v46, %s9079_s21 }
 0x47c   : > { %v7907_v31 = vclamps-f32 %v5305_v32, 1.0  ;;  %v8354_v49 = vpack.c.bf16 %v7906_v21, %v7905_v5  ;;  %v8386_v57 = vpack.c.bf16 %v8034_v2, %v8033_v27  ;;  %v17540_v7 = vunpack.c.h.bf16 %v17538_v40  ;;  %v17548_v28 = vld [vmem:[#allocation287_spill] sm:$0xff]  ;;  %v13743_v40 = vpop.permute.xlu1 %3891 }
 0x47d   : > { %v5306_v12 = vadd.f32 %v5242_v29, %v17536_v44  ;;  %v5946_v20 = vadd.f32 %v5882_v14, %v17539_v62  ;;  %v8418_v59 = vpack.c.bf16 %v8194_v10, %v8193_v16  ;;  %v6525_v26 = vmul.f32 %v17541_v35, %v5018_v4  ;;  %v3954_v29 = vpop.permute.xlu0 %3953 }
 0x47e   : > { %v5947_v47 = vadd.f32 %v5883_v39, %v17540_v7  ;;  %v17543_v43 = vunpack.c.l.bf16 %v17542_v50  ;;  %5682 = vst [vmem:[%s13318_s10 + $0x28] sm:$0xff] %v8354_v49  ;;  %8124 = vst [vmem:[%s13318_s10 + $0x128] sm:$0xff] %v8386_v57  ;;  %v8451_v5 = vpack.c.bf16 %v4954_v0, %v13637_v34  ;;  %v13705_v21 = vadd.f32 %v3788_v24, %v3560_v48  ;;  %v17545_v48 = vld [vmem:[#allocation328_spill] sm:$0xff]  ;;  %v4724_v0 = vld [vmem:[%s15749_s5 + $0x38] sm:$0xff] }
 0x47f   : > { %v7908_v37 = vclamps-f32 %v5306_v12, 1.0  ;;  %v8035_v27 = vclamps-f32 %v5946_v20, 1.0  ;;  %8284 = vst [vmem:[%s13318_s10 + $0x228] sm:$0xff] %v8418_v59  ;;  %v17544_v4 = vunpack.c.h.bf16 %v17542_v50  ;;  %v4041_v14 = vsel %vm4001_vm4, %v13622_v19, %v13564_v56  ;;  %v17546_v24 = vld [vmem:[#allocation329_spill] sm:$0xff]  ;;  %v17547_v12 = vld [vmem:[#allocation322_spill] sm:$0xff]  ;;  %v17550_v50 = vld [vmem:[#allocation323_spill] sm:$0xff] }
 0x480   : > { %v6588_v32 = vadd.f32 %v6524_v15, %v17543_v43  ;;  %v8036_v58 = vclamps-f32 %v5947_v47, 1.0  ;;  %7191 = vst [vmem:[%s13269_s12 + $0x30] sm:$0xff] %v8451_v5  ;;  %3981 = vrot.lane.b32.xlu0 %v13705_v21, %s9080_s30  ;;  %v4084_v34 = vsel %vm3871_vm3, %v4041_v14, 0.0  ;;  %v4042_v19 = vsel %vm4001_vm4, %v3954_v29, %v13628_v38  ;;  %v17549_v49 = vld [vmem:[#allocation289_spill] sm:$0xff]  ;;  %v17552_v5 = vld [vmem:[#allocation294_spill] sm:$0xff] }
 0x481   : > { %v8355_v16 = vpack.c.bf16 %v7908_v37, %v7907_v31  ;;  %v6589_v2 = vadd.f32 %v6525_v26, %v17544_v4  ;;  %v4412_v37 = vadd.f32 %v13653_v25, %v17545_v48  ;;  %v4010_v26 = vsel %vm4001_vm4, %v13628_v38, %v3954_v29  ;;  %v4725_v38 = vld [vmem:[%s15749_s5 + $0x40] sm:$0xff]  ;;  %v4217_v47 = vpop.permute.xlu0 %4216 }
 0x482   : > { %v8195_v43 = vclamps-f32 %v6588_v32, 1.0  ;;  %v8387_v39 = vpack.c.bf16 %v8036_v58, %v8035_v27  ;;  %v4414_v10 = vadd.f32 %v4010_v26, %v17546_v24  ;;  %v3055_v44 = vpack.c.bf16 %v12927_v54, %v12927_v54  ;;  %v17551_v29 = vld [vmem:[#allocation292_spill] sm:$0xff]  ;;  %v13770_v24 = vpop.permute.xlu1 %4154 }
 0x483   : > { %5683 = vst [vmem:[%s13318_s10 + $0x30] sm:$0xff] %v8355_v16  ;;  %v8196_v56 = vclamps-f32 %v6589_v2, 1.0  ;;  %v4086_v25 = vsel %vm3871_vm3, %v4042_v19, 0.0  ;;  %v4411_v31 = vadd.f32 %v4084_v34, %v17547_v12  ;;  %v4539_v15 = vmul.f32 3.0, %v17548_v28  ;;  %v17555_v28 = vld [vmem:[#allocation111_spill] sm:$0xff] }
 0x484   : > { %8125 = vst [vmem:[%s13318_s10 + $0x130] sm:$0xff] %v8387_v39  ;;  %v4540_v57 = vmul.f32 3.0, %v17549_v49  ;;  %v4763_v20 = vunpack.c.l.bf16 %v4724_v0  ;;  %v4764_v54 = vunpack.c.h.bf16 %v4724_v0  ;;  %v4272_v7 = vsel %vm4264_vm6, %v13591_v8, %v4215_v41  ;;  %3089 = vmatmul.mubr.bf16.vlgmr.msra.gmra.mrb[164].mxu1 %v3055_v44  ;;  %4244 = vrot.lane.b32.xlu0 %v13705_v21, %s9079_s21 }
 0x485   : > { %v8419_v62 = vpack.c.bf16 %v8196_v56, %v8195_v43  ;;  %v4304_v59 = vsel %vm4264_vm6, %v4215_v41, %v13591_v8  ;;  %v4475_v35 = vadd.f32 %v4411_v31, %v4272_v7  ;;  %v4413_v32 = vadd.f32 %v4086_v25, %v17550_v50 }
 0x486   : > { %v4541_v27 = vmul.f32 3.0, %v17551_v29  ;;  %v4348_v58 = vsel %vm4135_vm5, %v4304_v59, 0.0  ;;  %v4542_v16 = vmul.f32 3.0, %v17552_v5  ;;  %v4765_v4 = vunpack.c.l.bf16 %v4725_v38 }
 0x487   : > { %8285 = vst [vmem:[%s13318_s10 + $0x230] sm:$0xff] %v8419_v62  ;;  %v4766_v2 = vunpack.c.h.bf16 %v4725_v38  ;;  %v4476_v43 = vadd.f32 %v4412_v37, %v4348_v58  ;;  %v4603_v14 = vmul.f32 0.33333334, %v4475_v35  ;;  %v4273_v39 = vsel %vm4264_vm6, %v13675_v22, %v4217_v47  ;;  %v13790_v35 = vpop.permute.xlu0 %3893 }
 0x488   : > { %v4305_v41 = vsel %vm4264_vm6, %v4217_v47, %v13675_v22  ;;  %v4477_v34 = vadd.f32 %v4413_v32, %v4273_v39  ;;  %v3227_v48 = vrot.slane %v12744_v13, 7  ;;  %v3526_v26 = vrot.slane %v12793_v63, 1 }
 0x489   : > { %v4350_v8 = vsel %vm4135_vm5, %v4305_v41, 0.0  ;;  %v4604_v0 = vmul.f32 0.33333334, %v4476_v43  ;;  %v4667_v56 = vsub.f32 %v4539_v15, %v4603_v14  ;;  %v16200_v19 = vrot.slane %v12793_v63, 7  ;;  %v17557_v14 = vld [vmem:[#allocation109_spill] sm:$0xff] }
 0x48a   : > { %v4478_v37 = vadd.f32 %v4414_v10, %v4350_v8  ;;  %v4605_v44 = vmul.f32 0.33333334, %v4477_v34  ;;  %v17553_v25 = vrot.slane %v17506_v23, 7  ;;  %v17554_v12 = vrot.slane %v12744_v13, 1 }
 0x48b   : > { %v16199_v49 = vrot.slane %v17555_v28, 1  ;;  %v4668_v38 = vsub.f32 %v4540_v57, %v4604_v0  ;;  %v4827_v15 = vsub.f32 %v4763_v20, %v4667_v56  ;;  %v3260_v47 = vsel %vm3245_vm1, %v3227_v48, %v16200_v19 }
 0x48c   : > { %v3262_v22 = vsel %vm3245_vm1, %v17553_v25, %v3227_v48  ;;  %v3557_v31 = vsel %vm3542_vm2, %v17554_v12, %v3526_v26  ;;  %v4606_v10 = vmul.f32 0.33333334, %v4478_v37  ;;  %v4669_v7 = vsub.f32 %v4541_v27, %v4605_v44  ;;  %v13819_v12 = vpop.permute.xlu0 %4156 }
 0x48d   : > { %v3789_v62 = vadd.f32 %v3262_v22, %v12744_v13  ;;  %v3555_v59 = vsel %vm3542_vm2, %v3526_v26, %v16199_v49  ;;  %v3228_v50 = vrot.slane %v17514_v55, 7  ;;  %v4828_v57 = vsub.f32 %v4764_v54, %v4668_v38  ;;  %v17572_v49 = vld [vmem:[#allocation19_spill] sm:$0xff] }
 0x48e   : > { %v4891_v20 = vmax.f32 %v4827_v15, 0.0  ;;  %v4670_v32 = vsub.f32 %v4542_v16, %v4606_v10  ;;  %v4829_v27 = vsub.f32 %v4765_v4, %v4669_v7  ;;  %v3791_v58 = vadd.f32 %v3260_v47, %v12793_v63  ;;  %v13804_v16 = vpop.permute.xlu1 %3955  ;;  %v17561_v47 = vld [vmem:[#allocation86_spill] sm:$0xff] }
 0x48f   : > { %v13793_v29 = vadd.f32 %v3789_v62, %v3557_v31  ;;  %v17556_v5 = vrot.slane %v17512_v61, 7  ;;  %v3527_v39 = vrot.slane %v17557_v14, 1  ;;  %v4892_v41 = vmax.f32 %v4828_v57, 0.0  ;;  %v17560_v62 = vld [vmem:[#allocation207_spill] sm:$0xff] }
 0x490   : > { %v4955_v8 = vmin.f32 %v4891_v20, 1.0  ;;  %v4830_v34 = vsub.f32 %v4766_v2, %v4670_v32  ;;  %v4893_v4 = vmax.f32 %v4829_v27, 0.0  ;;  %v13806_v48 = vadd.f32 %v3791_v58, %v3555_v59  ;;  %v17562_v57 = vld [vmem:[#allocation299_spill] sm:$0xff] }
 0x491   : > { %v3263_v43 = vsel %vm3245_vm1, %v17556_v5, %v3228_v50  ;;  %3919 = vrot.lane.b32.xlu1 %v13793_v29, %s9080_s30  ;;  %v17559_v26 = vrot.slane %v17514_v55, 1  ;;  %v16198_v56 = vrot.slane %v17557_v14, 7  ;;  %v4956_v37 = vmin.f32 %v4892_v41, 1.0  ;;  %v17563_v5 = vld [vmem:[#allocation17_spill] sm:$0xff] }
 0x492   : > { %v3790_v54 = vadd.f32 %v3263_v43, %v17514_v55  ;;  %17558 = vst [vmem:[#allocation147_spill] sm:$0xff] %v13806_v48  ;;  %v5019_v44 = vmul.f32 0.95, %v4955_v8  ;;  %v4894_v2 = vmax.f32 %v4830_v34, 0.0  ;;  %v13815_v22 = vmin.f32 %v4893_v4, 1.0  ;;  %3921 = vrot.lane.b32.xlu0 %v13806_v48, %s9080_s30  ;;  %v17564_v41 = vld [vmem:[#allocation153_spill] sm:$0xff]  ;;  %v3958_v55 = vpop.permute.xlu0 %3957 }
 0x493   : > { %v3558_v0 = vsel %vm3542_vm2, %v17559_v26, %v3527_v39  ;;  %v3261_v31 = vsel %vm3245_vm1, %v3228_v50, %v16198_v56  ;;  %v16201_v38 = vrot.slane %v12828_v18, 1  ;;  %v13830_v15 = vsel %vm4001_vm4, %v13743_v40, %v13804_v16  ;;  %v17566_v4 = vld [vmem:[#allocation60_spill] sm:$0xff] }
 0x494   : > { %v13813_v25 = vadd.f32 %v3790_v54, %v3558_v0  ;;  %v5020_v10 = vmul.f32 0.95, %v4956_v37  ;;  %v5243_v7 = vmul.f32 %v17560_v62, %v5019_v44  ;;  %v5884_v59 = vmul.f32 %v17561_v47, %v5019_v44  ;;  %v17567_v0 = vld [vmem:[#allocation177_spill] sm:$0xff] }
 0x495   : > { %v6526_v20 = vmul.f32 %v17562_v57, %v5019_v44  ;;  %4182 = vrot.lane.b32.xlu1 %v13793_v29, %s9079_s21  ;;  %v8452_v50 = vpack.c.bf16 %v4956_v37, %v4955_v8  ;;  %v4958_v32 = vmin.f32 %v4894_v2, 1.0  ;;  %v5021_v27 = vmul.f32 0.95, %v13815_v22  ;;  %v17569_v47 = vld [vmem:[#allocation301_spill] sm:$0xff] }
 0x496   : > { %v3556_v58 = vsel %vm3542_vm2, %v3527_v39, %v16201_v38  ;;  %v5244_v43 = vmul.f32 %v17563_v5, %v5020_v10  ;;  %v17565_v34 = vunpack.c.l.bf16 %v17564_v41  ;;  %v5885_v26 = vmul.f32 %v17566_v4, %v5020_v10  ;;  %v17570_v37 = vld [vmem:[#allocation249_spill] sm:$0xff]  ;;  %4184 = vrot.lane.b32.xlu0 %v13806_v48, %s9079_s21 }
 0x497   : > { %v17568_v44 = vunpack.c.l.bf16 %v17567_v0  ;;  %v6527_v8 = vmul.f32 %v17569_v47, %v5020_v10  ;;  %v17571_v2 = vunpack.c.l.bf16 %v17570_v37  ;;  %7192 = vst [vmem:[%s13269_s12 + $0x38] sm:$0xff] %v8452_v50  ;;  %v5022_v56 = vmul.f32 0.95, %v4958_v32  ;;  %v17577_v47 = vld [vmem:[#allocation154_spill] sm:$0xff] }
 0x498   : > { %v5307_v54 = vadd.f32 %v5243_v7, %v17565_v34  ;;  %v5245_v19 = vmul.f32 %v17572_v49, %v5021_v27  ;;  %v17573_v39 = vunpack.c.h.bf16 %v17564_v41  ;;  %v17574_v34 = vunpack.c.h.bf16 %v17567_v0  ;;  %v17580_v0 = vld [vmem:[#allocation63_spill] sm:$0xff] }
 0x499   : > { %v5948_v62 = vadd.f32 %v5884_v59, %v17568_v44  ;;  %v6590_v57 = vadd.f32 %v6526_v20, %v17571_v2  ;;  %3983 = vrot.lane.b32.xlu1 %v13813_v25, %s9080_s30  ;;  %v17575_v10 = vunpack.c.h.bf16 %v17570_v37  ;;  %v17576_v44 = vld [vmem:[#allocation20_spill] sm:$0xff]  ;;  %v17578_v2 = vunpack.c.l.bf16 %v17577_v47 }
 0x49a   : > { %v5308_v7 = vadd.f32 %v5244_v43, %v17573_v39  ;;  %v7909_v5 = vclamps-f32 %v5307_v54, 1.0  ;;  %v5949_v4 = vadd.f32 %v5885_v26, %v17574_v34  ;;  %v5246_v49 = vmul.f32 %v17576_v44, %v5022_v56  ;;  %v17579_v54 = vld [vmem:[#allocation95_spill] sm:$0xff]  ;;  %v4219_v44 = vpop.permute.xlu1 %4218 }
 0x49b   : > { %v8037_v59 = vclamps-f32 %v5948_v62, 1.0  ;;  %v6591_v20 = vadd.f32 %v6527_v8, %v17575_v10  ;;  %v8197_v50 = vclamps-f32 %v6590_v57, 1.0  ;;  %v5309_v38 = vadd.f32 %v5245_v19, %v17578_v2  ;;  %v17582_v57 = vld [vmem:[#allocation303_spill] sm:$0xff] }
 0x49c   : > { %v7910_v41 = vclamps-f32 %v5308_v7, 1.0  ;;  %v8038_v43 = vclamps-f32 %v5949_v4, 1.0  ;;  %v5886_v39 = vmul.f32 %v17579_v54, %v5021_v27  ;;  %v5887_v26 = vmul.f32 %v17580_v0, %v5022_v56  ;;  %v17583_v2 = vld [vmem:[#allocation179_spill] sm:$0xff] }
 0x49d   : > { %v8198_v62 = vclamps-f32 %v6591_v20, 1.0  ;;  %v17581_v34 = vunpack.c.h.bf16 %v17577_v47  ;;  %v7911_v8 = vclamps-f32 %v5309_v38, 1.0  ;;  %v6528_v10 = vmul.f32 %v17582_v57, %v5021_v27  ;;  %4246 = vrot.lane.b32.xlu1 %v13813_v25, %s9079_s21  ;;  %v17586_v47 = vld [vmem:[#allocation305_spill] sm:$0xff] }
 0x49e   : > { %v8356_v13 = vpack.c.bf16 %v7910_v41, %v7909_v5  ;;  %v8388_v19 = vpack.c.bf16 %v8038_v43, %v8037_v59  ;;  %v17584_v7 = vunpack.c.l.bf16 %v17583_v2  ;;  %v17585_v54 = vunpack.c.h.bf16 %v17583_v2  ;;  %v17592_v2 = vld [vmem:[#allocation341_spill] sm:$0xff] }
 0x49f   : > { %v5310_v37 = vadd.f32 %v5246_v49, %v17581_v34  ;;  %v8420_v20 = vpack.c.bf16 %v8198_v62, %v8197_v50  ;;  %v6529_v38 = vmul.f32 %v17586_v47, %v5022_v56  ;;  %v17587_v49 = vld [vmem:[#allocation250_spill] sm:$0xff]  ;;  %v8453_v41 = vpack.c.bf16 %v4958_v32, %v13815_v22  ;;  %v4221_v56 = vpop.permute.xlu0 %4220  ;;  %v17595_v47 = vld [vmem:[#allocation335_spill] sm:$0xff] }
 0x4a0   : > { %v5950_v4 = vadd.f32 %v5886_v39, %v17584_v7  ;;  %v5951_v48 = vadd.f32 %v5887_v26, %v17585_v54  ;;  %v17588_v27 = vunpack.c.l.bf16 %v17587_v49  ;;  %5684 = vst [vmem:[%s13318_s10 + $0x38] sm:$0xff] %v8356_v13  ;;  %8126 = vst [vmem:[%s13318_s10 + $0x138] sm:$0xff] %v8388_v19  ;;  %v3792_v43 = vadd.f32 %v3261_v31, %v17557_v14  ;;  %v17590_v31 = vld [vmem:[#allocation340_spill] sm:$0xff] }
 0x4a1   : > { %v7912_v0 = vclamps-f32 %v5310_v37, 1.0  ;;  %8286 = vst [vmem:[%s13318_s10 + $0x238] sm:$0xff] %v8420_v20  ;;  %v17589_v50 = vunpack.c.h.bf16 %v17587_v49  ;;  %v4043_v13 = vsel %vm4001_vm4, %v13804_v16, %v13743_v40  ;;  %7193 = vst [vmem:[%s13269_s12 + $0x40] sm:$0xff] %v8453_v41  ;;  %v4416_v32 = vadd.f32 %v13830_v15, %v17590_v31  ;;  %v17594_v20 = vld [vmem:[#allocation298_spill] sm:$0xff] }
 0x4a2   : > { %v6592_v34 = vadd.f32 %v6528_v10, %v17588_v27  ;;  %v8039_v5 = vclamps-f32 %v5950_v4, 1.0  ;;  %v8040_v59 = vclamps-f32 %v5951_v48, 1.0  ;;  %v13892_v48 = vadd.f32 %v3792_v43, %v3556_v58  ;;  %v17591_v10 = vld [vmem:[#allocation334_spill] sm:$0xff]  ;;  %v13909_v58 = vpop.permute.xlu1 %3895  ;;  %v17593_v4 = vld [vmem:[#allocation296_spill] sm:$0xff] }
 0x4a3   : > { %v8357_v39 = vpack.c.bf16 %v7912_v0, %v7911_v8  ;;  %v6593_v26 = vadd.f32 %v6529_v38, %v17589_v50  ;;  %v4088_v22 = vsel %vm3871_vm3, %v4043_v13, 0.0  ;;  %v4726_v8 = vld [vmem:[%s15749_s5 + $0x48] sm:$0xff]  ;;  %v4012_v40 = vsel %vm4001_vm4, %v13790_v35, %v3958_v55  ;;  %v17597_v43 = vld [vmem:[#allocation302_spill] sm:$0xff] }
 0x4a4   : > { %v8199_v62 = vclamps-f32 %v6592_v34, 1.0  ;;  %v8389_v37 = vpack.c.bf16 %v8040_v59, %v8039_v5  ;;  %v4415_v19 = vadd.f32 %v4088_v22, %v17591_v10  ;;  %v4044_v16 = vsel %vm4001_vm4, %v3958_v55, %v13790_v35  ;;  %3985 = vrot.lane.b32.xlu0 %v13892_v48, %s9080_s30  ;;  %v4727_v55 = vld [vmem:[%s15749_s5 + $0x50] sm:$0xff]  ;;  %v17596_v59 = vld [vmem:[#allocation300_spill] sm:$0xff] }
 0x4a5   : > { %5685 = vst [vmem:[%s13318_s10 + $0x40] sm:$0xff] %v8357_v39  ;;  %v8200_v57 = vclamps-f32 %v6593_v26, 1.0  ;;  %v4090_v15 = vsel %vm3871_vm3, %v4044_v16, 0.0  ;;  %v4418_v7 = vadd.f32 %v4012_v40, %v17592_v2  ;;  %v4543_v54 = vmul.f32 3.0, %v17593_v4 }
 0x4a6   : > { %8127 = vst [vmem:[%s13318_s10 + $0x140] sm:$0xff] %v8389_v37  ;;  %v4544_v0 = vmul.f32 3.0, %v17594_v20  ;;  %v4417_v38 = vadd.f32 %v4090_v15, %v17595_v47  ;;  %v4767_v49 = vunpack.c.l.bf16 %v4726_v8  ;;  %v4768_v27 = vunpack.c.h.bf16 %v4726_v8  ;;  %v13934_v37 = vpop.permute.xlu0 %3897  ;;  %v13948_v16 = vpop.permute.xlu1 %4158 }
 0x4a7   : > { %v8421_v35 = vpack.c.bf16 %v8200_v57, %v8199_v62  ;;  %v4274_v34 = vsel %vm4264_vm6, %v13770_v24, %v4219_v44  ;;  %v4306_v5 = vsel %vm4264_vm6, %v4219_v44, %v13770_v24  ;;  %v4545_v41 = vmul.f32 3.0, %v17596_v59 }
 0x4a8   : > { %v4546_v39 = vmul.f32 3.0, %v17597_v43  ;;  %v4352_v50 = vsel %vm4135_vm5, %v4306_v5, 0.0  ;;  %v4479_v26 = vadd.f32 %v4415_v19, %v4274_v34  ;;  %v4769_v62 = vunpack.c.l.bf16 %v4727_v55  ;;  %4248 = vrot.lane.b32.xlu0 %v13892_v48, %s9079_s21  ;;  %v17598_v19 = vld [vmem:[#allocation119_spill] sm:$0xff] }
 0x4a9   : > { %8287 = vst [vmem:[%s13318_s10 + $0x240] sm:$0xff] %v8421_v35  ;;  %v4770_v13 = vunpack.c.h.bf16 %v4727_v55  ;;  %v4480_v22 = vadd.f32 %v4416_v32, %v4352_v50  ;;  %v4275_v24 = vsel %vm4264_vm6, %v13819_v12, %v4221_v56  ;;  %v4307_v44 = vsel %vm4264_vm6, %v4221_v56, %v13819_v12 }
 0x4aa   : > { %v3231_v31 = vrot.slane %v17555_v28, 7  ;;  %v4607_v8 = vmul.f32 0.33333334, %v4479_v26  ;;  %v4354_v57 = vsel %vm4135_vm5, %v4307_v44, 0.0  ;;  %v4481_v10 = vadd.f32 %v4417_v38, %v4275_v24  ;;  %v13968_v26 = vpop.permute.xlu0 %4160 }
 0x4ab   : > { %v3530_v40 = vrot.slane %v17598_v19, 1  ;;  %v4608_v32 = vmul.f32 0.33333334, %v4480_v22  ;;  %v4482_v15 = vadd.f32 %v4418_v7, %v4354_v57  ;;  %v17599_v2 = vrot.slane %v12793_v63, 7 }
 0x4ac   : > { %v16206_v12 = vrot.slane %v17598_v19, 7  ;;  %v4671_v56 = vsub.f32 %v4543_v54, %v4607_v8  ;;  %v4609_v20 = vmul.f32 0.33333334, %v4481_v10  ;;  %v17600_v55 = vrot.slane %v17555_v28, 1 }
 0x4ad   : > { %v3258_v4 = vsel %vm3245_vm1, %v17599_v2, %v3231_v31  ;;  %v4672_v38 = vsub.f32 %v4544_v0, %v4608_v32  ;;  %v4610_v34 = vmul.f32 0.33333334, %v4482_v15  ;;  %v16205_v5 = vrot.slane %v12880_v1, 1 }
 0x4ae   : > { %v3553_v35 = vsel %vm3542_vm2, %v17600_v55, %v3530_v40  ;;  %v3793_v47 = vadd.f32 %v3258_v4, %v17555_v28  ;;  %v3256_v7 = vsel %vm3245_vm1, %v3231_v31, %v16206_v12  ;;  %v4831_v59 = vsub.f32 %v4767_v49, %v4671_v56 }
 0x4af   : > { %v4673_v43 = vsub.f32 %v4545_v41, %v4609_v20  ;;  %v3795_v50 = vadd.f32 %v3256_v7, %v17598_v19  ;;  %v4832_v22 = vsub.f32 %v4768_v27, %v4672_v38  ;;  %v4674_v24 = vsub.f32 %v4546_v39, %v4610_v34 }
 0x4b0   : > { %v13965_v54 = vadd.f32 %v3793_v47, %v3553_v35  ;;  %v3551_v0 = vsel %vm3542_vm2, %v3530_v40, %v16205_v5  ;;  %v17602_v44 = vrot.slane %v12828_v18, 7  ;;  %v17603_v31 = vrot.slane %v17557_v14, 7  ;;  %v3960_v40 = vpop.permute.xlu1 %3959 }
 0x4b1   : > { %v4895_v41 = vmax.f32 %v4831_v59, 0.0  ;;  %v4833_v8 = vsub.f32 %v4769_v62, %v4673_v43  ;;  %v13982_v57 = vadd.f32 %v3795_v50, %v3551_v0  ;;  %v17605_v27 = vrot.slane %v12875_v30, 1 }
 0x4b2   : > { %17601 = vst [vmem:[#allocation165_spill] sm:$0xff] %v13965_v54  ;;  %v3259_v49 = vsel %vm3245_vm1, %v17603_v31, %v17602_v44  ;;  %3923 = vrot.lane.b32.xlu1 %v13965_v54, %s9080_s30  ;;  %v17606_v39 = vrot.slane %v12828_v18, 1  ;;  %v4896_v32 = vmax.f32 %v4832_v22, 0.0  ;;  %v4834_v15 = vsub.f32 %v4770_v13, %v4674_v24 }
 0x4b3   : > { %17604 = vst [vmem:[#allocation242_spill] sm:$0xff] %v13982_v57  ;;  %v3794_v2 = vadd.f32 %v3259_v49, %v12828_v18  ;;  %v17607_v4 = vrot.slane %v12875_v30, 7  ;;  %v17608_v62 = vmov %v17602_v44  ;;  %v4959_v20 = vmin.f32 %v4895_v41, 1.0  ;;  %3925 = vrot.lane.b32.xlu0 %v13982_v57, %s9080_s30  ;;  %v14020_v44 = vpop.permute.xlu0 %3961 }
 0x4b4   : > { %v3554_v10 = vsel %vm3542_vm2, %v17606_v39, %v17605_v27  ;;  %v4897_v55 = vmax.f32 %v4833_v8, 0.0  ;;  %v17609_v35 = vrot.slane %v12893_v6, 1  ;;  %v17610_v47 = vmov %v17605_v27  ;;  %v17611_v27 = vld [vmem:[#allocation208_spill] sm:$0xff] }
 0x4b5   : > { %v3257_v56 = vsel %vm3245_vm1, %v17608_v62, %v17607_v4  ;;  %v4960_v34 = vmin.f32 %v4896_v32, 1.0  ;;  %v4898_v7 = vmax.f32 %v4834_v15, 0.0  ;;  %v14006_v59 = vadd.f32 %v3794_v2, %v3554_v10  ;;  %v17612_v10 = vld [vmem:[#allocation64_spill] sm:$0xff]  ;;  %v17613_v15 = vld [vmem:[#allocation309_spill] sm:$0xff] }
 0x4b6   : > { %v3552_v13 = vsel %vm3542_vm2, %v17610_v47, %v17609_v35  ;;  %v3796_v38 = vadd.f32 %v3257_v56, %v12875_v30  ;;  %v4013_v43 = vsel %vm4001_vm4, %v13909_v58, %v3960_v40  ;;  %v5023_v50 = vmul.f32 0.95, %v4959_v20  ;;  %4186 = vrot.lane.b32.xlu1 %v13965_v54, %s9079_s21  ;;  %v17615_v62 = vld [vmem:[#allocation65_spill] sm:$0xff]  ;;  %v17617_v47 = vld [vmem:[#allocation155_spill] sm:$0xff] }
 0x4b7   : > { %v14011_v22 = vmin.f32 %v4897_v55, 1.0  ;;  %v4045_v0 = vsel %vm4001_vm4, %v3960_v40, %v13909_v58  ;;  %v5024_v31 = vmul.f32 0.95, %v4960_v34  ;;  %v8454_v49 = vpack.c.bf16 %v4960_v34, %v4959_v20  ;;  %4188 = vrot.lane.b32.xlu0 %v13982_v57, %s9079_s21  ;;  %v17614_v58 = vld [vmem:[#allocation209_spill] sm:$0xff]  ;;  %v17616_v20 = vld [vmem:[#allocation311_spill] sm:$0xff]  ;;  %v4223_v57 = vpop.permute.xlu1 %4222 }
 0x4b8   : > { %v14015_v24 = vadd.f32 %v3796_v38, %v3552_v13  ;;  %v4962_v41 = vmin.f32 %v4898_v7, 1.0  ;;  %v4092_v8 = vsel %vm3871_vm3, %v4045_v0, 0.0  ;;  %v5247_v39 = vmul.f32 %v17611_v27, %v5023_v50  ;;  %v17619_v34 = vld [vmem:[#allocation181_spill] sm:$0xff] }
 0x4b9   : > { %v5888_v32 = vmul.f32 %v17612_v10, %v5023_v50  ;;  %v6530_v2 = vmul.f32 %v17613_v15, %v5023_v50  ;;  %v5025_v4 = vmul.f32 0.95, %v14011_v22  ;;  %v5248_v40 = vmul.f32 %v17614_v58, %v5024_v31  ;;  %7194 = vst [vmem:[%s13269_s12 + $0x48] sm:$0xff] %v8454_v49  ;;  %v17621_v50 = vld [vmem:[#allocation251_spill] sm:$0xff] }
 0x4ba   : > { %v5889_v56 = vmul.f32 %v17615_v62, %v5024_v31  ;;  %v6531_v55 = vmul.f32 %v17616_v20, %v5024_v31  ;;  %v5026_v35 = vmul.f32 0.95, %v4962_v41  ;;  %v17618_v13 = vunpack.c.l.bf16 %v17617_v47  ;;  %v17623_v15 = vld [vmem:[#allocation23_spill] sm:$0xff]  ;;  %3987 = vrot.lane.b32.xlu1 %v14006_v59, %s9080_s30 }
 0x4bb   : > { %v17620_v7 = vunpack.c.l.bf16 %v17619_v34  ;;  %v17622_v27 = vunpack.c.l.bf16 %v17621_v50  ;;  %v5249_v5 = vmul.f32 %v17623_v15, %v5025_v4  ;;  %v17624_v58 = vunpack.c.h.bf16 %v17617_v47  ;;  %3989 = vrot.lane.b32.xlu0 %v14015_v24, %s9080_s30  ;;  %v4225_v47 = vpop.permute.xlu0 %4224 }
 0x4bc   : > { %v5311_v38 = vadd.f32 %v5247_v39, %v17618_v13  ;;  %v17625_v31 = vunpack.c.h.bf16 %v17619_v34  ;;  %v17626_v20 = vunpack.c.h.bf16 %v17621_v50  ;;  %v17627_v13 = vld [vmem:[#allocation210_spill] sm:$0xff] }
 0x4bd   : > { %v5952_v0 = vadd.f32 %v5888_v32, %v17620_v7  ;;  %v6594_v10 = vadd.f32 %v6530_v2, %v17622_v27  ;;  %v5312_v62 = vadd.f32 %v5248_v40, %v17624_v58  ;;  %v5250_v12 = vmul.f32 %v17627_v13, %v5026_v35  ;;  %v17628_v2 = vld [vmem:[#allocation156_spill] sm:$0xff] }
 0x4be   : > { %v5953_v49 = vadd.f32 %v5889_v56, %v17625_v31  ;;  %v6595_v39 = vadd.f32 %v6531_v55, %v17626_v20  ;;  %v7913_v32 = vclamps-f32 %v5311_v38, 1.0  ;;  %v17629_v27 = vunpack.c.l.bf16 %v17628_v2  ;;  %v17631_v38 = vld [vmem:[#allocation66_spill] sm:$0xff]  ;;  %4250 = vrot.lane.b32.xlu1 %v14006_v59, %s9079_s21 }
 0x4bf   : > { %v8041_v7 = vclamps-f32 %v5952_v0, 1.0  ;;  %v8201_v18 = vclamps-f32 %v6594_v10, 1.0  ;;  %v7914_v40 = vclamps-f32 %v5312_v62, 1.0  ;;  %v17630_v56 = vunpack.c.h.bf16 %v17628_v2  ;;  %v17632_v10 = vld [vmem:[#allocation108_spill] sm:$0xff]  ;;  %4252 = vrot.lane.b32.xlu0 %v14015_v24, %s9079_s21 }
 0x4c0   : > { %v5313_v15 = vadd.f32 %v5249_v5, %v17629_v27  ;;  %v8042_v58 = vclamps-f32 %v5953_v49, 1.0  ;;  %v8202_v34 = vclamps-f32 %v6595_v39, 1.0  ;;  %v5890_v0 = vmul.f32 %v17631_v38, %v5025_v4  ;;  %v17633_v5 = vld [vmem:[#allocation312_spill] sm:$0xff]  ;;  %v17634_v27 = vld [vmem:[#allocation183_spill] sm:$0xff] }
 0x4c1   : > { %v5314_v55 = vadd.f32 %v5250_v12, %v17630_v56  ;;  %v5891_v31 = vmul.f32 %v17632_v10, %v5026_v35  ;;  %v6532_v20 = vmul.f32 %v17633_v5, %v5025_v4  ;;  %v8358_v13 = vpack.c.bf16 %v7914_v40, %v7913_v32  ;;  %v17637_v56 = vld [vmem:[#allocation314_spill] sm:$0xff]  ;;  %v17638_v38 = vld [vmem:[#allocation252_spill] sm:$0xff]  ;;  %v14083_v5 = vpop.permute.xlu0 %3901 }
 0x4c2   : > { %v7915_v50 = vclamps-f32 %v5313_v15, 1.0  ;;  %v8390_v62 = vpack.c.bf16 %v8042_v58, %v8041_v7  ;;  %v8422_v49 = vpack.c.bf16 %v8202_v34, %v8201_v18  ;;  %v17635_v2 = vunpack.c.l.bf16 %v17634_v27  ;;  %v17640_v32 = vld [vmem:[#allocation346_spill] sm:$0xff] }
 0x4c3   : > { %v7916_v39 = vclamps-f32 %v5314_v55, 1.0  ;;  %v17636_v12 = vunpack.c.h.bf16 %v17634_v27  ;;  %v6533_v54 = vmul.f32 %v17637_v56, %v5026_v35  ;;  %v17639_v14 = vunpack.c.l.bf16 %v17638_v38  ;;  %5686 = vst [vmem:[%s13318_s10 + $0x48] sm:$0xff] %v8358_v13 }
 0x4c4   : > { %v5954_v28 = vadd.f32 %v5890_v0, %v17635_v2  ;;  %8128 = vst [vmem:[%s13318_s10 + $0x148] sm:$0xff] %v8390_v62  ;;  %8288 = vst [vmem:[%s13318_s10 + $0x248] sm:$0xff] %v8422_v49  ;;  %v8455_v4 = vpack.c.bf16 %v4962_v41, %v14011_v22  ;;  %v4419_v7 = vadd.f32 %v4092_v8, %v17640_v32  ;;  %v17641_v34 = vunpack.c.h.bf16 %v17638_v38  ;;  %v4728_v0 = vld [vmem:[%s15749_s5 + $0x58] sm:$0xff]  ;;  %v17643_v22 = vld [vmem:[#allocation306_spill] sm:$0xff] }
 0x4c5   : > { %v5955_v15 = vadd.f32 %v5891_v31, %v17636_v12  ;;  %v6596_v10 = vadd.f32 %v6532_v20, %v17639_v14  ;;  %v8359_v18 = vpack.c.bf16 %v7916_v39, %v7915_v50  ;;  %v4420_v40 = vadd.f32 %v4013_v43, %v12837_v53  ;;  %v14081_v31 = vpop.permute.xlu1 %3899  ;;  %v4729_v62 = vld [vmem:[%s15749_s5 + $0x60] sm:$0xff] }
 0x4c6   : > { %v8043_v58 = vclamps-f32 %v5954_v28, 1.0  ;;  %v6597_v14 = vadd.f32 %v6533_v54, %v17641_v34  ;;  %7195 = vst [vmem:[%s13269_s12 + $0x50] sm:$0xff] %v8455_v4  ;;  %v4014_v53 = vsel %vm4001_vm4, %v13934_v37, %v14020_v44  ;;  %v4046_v28 = vsel %vm4001_vm4, %v14020_v44, %v13934_v37  ;;  %v17642_v54 = vld [vmem:[#allocation304_spill] sm:$0xff] }
 0x4c7   : > { %v8044_v35 = vclamps-f32 %v5955_v15, 1.0  ;;  %v8203_v55 = vclamps-f32 %v6596_v10, 1.0  ;;  %5687 = vst [vmem:[%s13318_s10 + $0x50] sm:$0xff] %v8359_v18  ;;  %v4547_v43 = vmul.f32 3.0, %v17642_v54  ;;  %v4548_v41 = vmul.f32 3.0, %v17643_v22  ;;  %v17644_v49 = vld [vmem:[#allocation348_spill] sm:$0xff] }
 0x4c8   : > { %v8204_v50 = vclamps-f32 %v6597_v14, 1.0  ;;  %v4094_v20 = vsel %vm3871_vm3, %v4046_v28, 0.0  ;;  %v4422_v13 = vadd.f32 %v4014_v53, %v12853_v11  ;;  %v4771_v27 = vunpack.c.l.bf16 %v4728_v0  ;;  %v17645_v11 = vld [vmem:[#allocation310_spill] sm:$0xff] }
 0x4c9   : > { %v8391_v8 = vpack.c.bf16 %v8044_v35, %v8043_v58  ;;  %v4421_v39 = vadd.f32 %v4094_v20, %v17644_v49  ;;  %v4772_v37 = vunpack.c.h.bf16 %v4728_v0  ;;  %v4276_v44 = vsel %vm4264_vm6, %v13948_v16, %v4223_v57 }
 0x4ca   : > { %v8423_v2 = vpack.c.bf16 %v8204_v50, %v8203_v55  ;;  %v4308_v12 = vsel %vm4264_vm6, %v4223_v57, %v13948_v16  ;;  %v4483_v15 = vadd.f32 %v4419_v7, %v4276_v44  ;;  %v4549_v56 = vmul.f32 3.0, %v17645_v11  ;;  %v14122_v57 = vpop.permute.xlu1 %4162  ;;  %v14124_v7 = vpop.permute.xlu0 %4164 }
 0x4cb   : > { %8129 = vst [vmem:[%s13318_s10 + $0x150] sm:$0xff] %v8391_v8  ;;  %v4356_v38 = vsel %vm4135_vm5, %v4308_v12, 0.0  ;;  %v4550_v10 = vmul.f32 3.0, %v12320_v60  ;;  %v4773_v18 = vunpack.c.l.bf16 %v4729_v62  ;;  %v4774_v4 = vunpack.c.h.bf16 %v4729_v62 }
 0x4cc   : > { %8289 = vst [vmem:[%s13318_s10 + $0x250] sm:$0xff] %v8423_v2  ;;  %v4484_v32 = vadd.f32 %v4420_v40, %v4356_v38  ;;  %v4611_v58 = vmul.f32 0.33333334, %v4483_v15  ;;  %v4277_v35 = vsel %vm4264_vm6, %v13968_v26, %v4225_v47  ;;  %v4309_v16 = vsel %vm4264_vm6, %v4225_v47, %v13968_v26 }
 0x4cd   : > { %v4358_v60 = vsel %vm4135_vm5, %v4309_v16, 0.0  ;;  %v4485_v34 = vadd.f32 %v4421_v39, %v4277_v35  ;;  %v17646_v14 = vrot.slane %v12880_v1, 7  ;;  %v17647_v40 = vrot.slane %v17598_v19, 7 }
 0x4ce   : > { %v17648_v0 = vrot.slane %v12930_v36, 1  ;;  %v17649_v53 = vrot.slane %v12880_v1, 1  ;;  %v4612_v47 = vmul.f32 0.33333334, %v4484_v32  ;;  %v4675_v28 = vsub.f32 %v4547_v43, %v4611_v58 }
 0x4cf   : > { %v3254_v55 = vsel %vm3245_vm1, %v17647_v40, %v17646_v14  ;;  %v4486_v54 = vadd.f32 %v4422_v13, %v4358_v60  ;;  %v4613_v8 = vmul.f32 0.33333334, %v4485_v34  ;;  %v17650_v50 = vrot.slane %v12930_v36, 7 }
 0x4d0   : > { %v3549_v26 = vsel %vm3542_vm2, %v17649_v53, %v17648_v0  ;;  %v3797_v22 = vadd.f32 %v3254_v55, %v12880_v1  ;;  %v17651_v20 = vmov %v17646_v14  ;;  %v17652_v49 = vrot.slane %v12957_v33, 1  ;;  %v3966_v53 = vpop.permute.xlu0 %3965  ;;  %v17695_v1 = vld [vmem:[#allocation321_spill] sm:$0xff] }
 0x4d1   : > { %v3252_v62 = vsel %vm3245_vm1, %v17651_v20, %v17650_v50  ;;  %v17653_v39 = vmov %v17648_v0  ;;  %v17654_v43 = vrot.slane %v12893_v6, 7  ;;  %v17655_v13 = vrot.slane %v12875_v30, 7  ;;  %v3964_v0 = vpop.permute.xlu1 %3963 }
 0x4d2   : > { %v3547_v44 = vsel %vm3542_vm2, %v17653_v39, %v17652_v49  ;;  %v4676_v12 = vsub.f32 %v4548_v41, %v4612_v47  ;;  %v4835_v15 = vsub.f32 %v4771_v27, %v4675_v28  ;;  %v4614_v11 = vmul.f32 0.33333334, %v4486_v54 }
 0x4d3   : > { %v3255_v2 = vsel %vm3245_vm1, %v17655_v13, %v17654_v43  ;;  %v14159_v38 = vadd.f32 %v3797_v22, %v3549_v26  ;;  %v4677_v32 = vsub.f32 %v4549_v56, %v4613_v8  ;;  %v3799_v58 = vadd.f32 %v3252_v62, %v12930_v36 }
 0x4d4   : > { %v17657_v35 = vrot.slane %v12948_v42, 1  ;;  %v17658_v16 = vrot.slane %v12893_v6, 1  ;;  %v3798_v34 = vadd.f32 %v3255_v2, %v12893_v6  ;;  %v4836_v14 = vsub.f32 %v4772_v37, %v4676_v12  ;;  %v17663_v37 = vld [vmem:[#allocation137_spill] sm:$0xff] }
 0x4d5   : > { %17656 = vst [vmem:[#allocation200_spill] sm:$0xff] %v14159_v38  ;;  %v4899_v40 = vmax.f32 %v4835_v15, 0.0  ;;  %v4678_v55 = vsub.f32 %v4550_v10, %v4614_v11  ;;  %3927 = vrot.lane.b32.xlu1 %v14159_v38, %s9080_s30  ;;  %v17659_v41 = vrot.slane %v12948_v42, 7  ;;  %v17660_v27 = vmov %v17654_v43  ;;  %v17667_v11 = vld [vmem:[#allocation370_spill] sm:$0xff] }
 0x4d6   : > { %v3550_v60 = vsel %vm3542_vm2, %v17658_v16, %v17657_v35  ;;  %v4837_v26 = vsub.f32 %v4773_v18, %v4677_v32  ;;  %v14177_v47 = vadd.f32 %v3799_v58, %v3547_v44  ;;  %v17664_v54 = vrot.slane %v17663_v37, 1 }
 0x4d7   : > { %v3253_v56 = vsel %vm3245_vm1, %v17660_v27, %v17659_v41  ;;  %v14179_v28 = vadd.f32 %v3798_v34, %v3550_v60  ;;  %v17665_v10 = vmov %v17657_v35  ;;  %v4900_v8 = vmax.f32 %v4836_v14, 0.0  ;;  %v17668_v35 = vld [vmem:[#allocation25_spill] sm:$0xff]  ;;  %v17669_v60 = vld [vmem:[#allocation67_spill] sm:$0xff]  ;;  %v17670_v14 = vld [vmem:[#allocation318_spill] sm:$0xff] }
 0x4d8   : > { %17661 = vst [vmem:[#allocation201_spill] sm:$0xff] %v14177_v47  ;;  %v3548_v22 = vsel %vm3542_vm2, %v17665_v10, %v17664_v54  ;;  %v4963_v50 = vmin.f32 %v4899_v40, 1.0  ;;  %v4838_v20 = vsub.f32 %v4774_v4, %v4678_v55  ;;  %v3800_v62 = vadd.f32 %v3253_v56, %v12948_v42  ;;  %3929 = vrot.lane.b32.xlu0 %v14177_v47, %s9080_s30  ;;  %v17671_v56 = vld [vmem:[#allocation359_spill] sm:$0xff] }
 0x4d9   : > { %17662 = vst [vmem:[#allocation47_spill] sm:$0xff] %v14179_v28  ;;  %v4901_v49 = vmax.f32 %v4837_v26, 0.0  ;;  %v4015_v18 = vsel %vm4001_vm4, %v14081_v31, %v3964_v0  ;;  %v4047_v39 = vsel %vm4001_vm4, %v3964_v0, %v14081_v31  ;;  %v14199_v44 = vsel %vm4001_vm4, %v14083_v5, %v3966_v53  ;;  %4190 = vrot.lane.b32.xlu1 %v14159_v38, %s9079_s21  ;;  %v17672_v26 = vld [vmem:[#allocation26_spill] sm:$0xff] }
 0x4da   : > { %v4964_v4 = vmin.f32 %v4900_v8, 1.0  ;;  %v5027_v43 = vmul.f32 0.95, %v4963_v50  ;;  %v4902_v13 = vmax.f32 %v4838_v20, 0.0  ;;  %v14203_v2 = vadd.f32 %v3800_v62, %v3548_v22  ;;  %v17675_v22 = vld [vmem:[#allocation222_spill] sm:$0xff]  ;;  %v17676_v20 = vld [vmem:[#allocation185_spill] sm:$0xff] }
 0x4db   : > { %v14205_v12 = vmin.f32 %v4901_v49, 1.0  ;;  %v4096_v15 = vsel %vm3871_vm3, %v4047_v39, 0.0  ;;  %v14210_v31 = vadd.f32 %v4015_v18, %v17667_v11  ;;  %v4048_v32 = vsel %vm4001_vm4, %v3966_v53, %v14083_v5  ;;  %v17673_v53 = vld [vmem:[#allocation157_spill] sm:$0xff]  ;;  %v17679_v39 = vld [vmem:[#allocation254_spill] sm:$0xff] }
 0x4dc   : > { %17666 = vst [vmem:[#allocation50_spill] sm:$0xff] %v14203_v2  ;;  %v5028_v58 = vmul.f32 0.95, %v4964_v4  ;;  %v5251_v16 = vmul.f32 %v17668_v35, %v5027_v43  ;;  %v5892_v34 = vmul.f32 %v17669_v60, %v5027_v43  ;;  %v6534_v40 = vmul.f32 %v17670_v14, %v5027_v43  ;;  %4192 = vrot.lane.b32.xlu0 %v14177_v47, %s9079_s21 }
 0x4dd   : > { %v8456_v55 = vpack.c.bf16 %v4964_v4, %v4963_v50  ;;  %v4966_v41 = vmin.f32 %v4902_v13, 1.0  ;;  %v5029_v27 = vmul.f32 0.95, %v14205_v12  ;;  %v14222_v0 = vadd.f32 %v4096_v15, %v17671_v56  ;;  %3991 = vrot.lane.b32.xlu1 %v14179_v28, %s9080_s30  ;;  %v17678_v50 = vld [vmem:[#allocation319_spill] sm:$0xff]  ;;  %v17681_v15 = vld [vmem:[#allocation212_spill] sm:$0xff] }
 0x4de   : > { %v5252_v5 = vmul.f32 %v17672_v26, %v5028_v58  ;;  %v17674_v54 = vunpack.c.l.bf16 %v17673_v53  ;;  %v5893_v8 = vmul.f32 %v17675_v22, %v5028_v58  ;;  %v17677_v62 = vunpack.c.l.bf16 %v17676_v20  ;;  %v4227_v26 = vpop.permute.xlu1 %4226 }
 0x4df   : > { %v6535_v18 = vmul.f32 %v17678_v50, %v5028_v58  ;;  %v17680_v4 = vunpack.c.l.bf16 %v17679_v39  ;;  %7196 = vst [vmem:[%s13269_s12 + $0x58] sm:$0xff] %v8456_v55  ;;  %v5030_v13 = vmul.f32 0.95, %v4966_v41  ;;  %v5253_v11 = vmul.f32 %v17681_v15, %v5029_v27  ;;  %v17685_v50 = vld [vmem:[#allocation28_spill] sm:$0xff]  ;;  %v17686_v55 = vld [vmem:[#allocation158_spill] sm:$0xff] }
 0x4e0   : > { %v5315_v10 = vadd.f32 %v5251_v16, %v17674_v54  ;;  %v5956_v49 = vadd.f32 %v5892_v34, %v17677_v62  ;;  %v17682_v35 = vunpack.c.h.bf16 %v17673_v53  ;;  %v17683_v14 = vunpack.c.h.bf16 %v17676_v20  ;;  %v4229_v54 = vpop.permute.xlu0 %4228  ;;  %3993 = vrot.lane.b32.xlu0 %v14203_v2, %s9080_s30 }
 0x4e1   : > { %v6598_v43 = vadd.f32 %v6534_v40, %v17680_v4  ;;  %v17684_v22 = vunpack.c.h.bf16 %v17679_v39  ;;  %v5254_v40 = vmul.f32 %v17685_v50, %v5030_v13  ;;  %v17687_v4 = vunpack.c.l.bf16 %v17686_v55  ;;  %4254 = vrot.lane.b32.xlu1 %v14179_v28, %s9079_s21 }
 0x4e2   : > { %v5316_v16 = vadd.f32 %v5252_v5, %v17682_v35  ;;  %v7917_v60 = vclamps-f32 %v5315_v10, 1.0  ;;  %v5957_v56 = vadd.f32 %v5893_v8, %v17683_v14  ;;  %v8045_v34 = vclamps-f32 %v5956_v49, 1.0  ;;  %v17688_v10 = vld [vmem:[#allocation223_spill] sm:$0xff]  ;;  %v17689_v8 = vld [vmem:[#allocation120_spill] sm:$0xff] }
 0x4e3   : > { %v6599_v58 = vadd.f32 %v6535_v18, %v17684_v22  ;;  %v8205_v62 = vclamps-f32 %v6598_v43, 1.0  ;;  %v5317_v6 = vadd.f32 %v5253_v11, %v17687_v4  ;;  %v5894_v20 = vmul.f32 %v17688_v10, %v5029_v27  ;;  %v17691_v11 = vld [vmem:[#allocation320_spill] sm:$0xff] }
 0x4e4   : > { %v7918_v5 = vclamps-f32 %v5316_v16, 1.0  ;;  %v8046_v53 = vclamps-f32 %v5957_v56, 1.0  ;;  %v5895_v49 = vmul.f32 %v17689_v8, %v5030_v13  ;;  %v17690_v39 = vunpack.c.h.bf16 %v17686_v55  ;;  %v17692_v16 = vld [vmem:[#allocation187_spill] sm:$0xff]  ;;  %4256 = vrot.lane.b32.xlu0 %v14203_v2, %s9079_s21 }
 0x4e5   : > { %v8206_v18 = vclamps-f32 %v6599_v58, 1.0  ;;  %v7919_v15 = vclamps-f32 %v5317_v6, 1.0  ;;  %v6536_v35 = vmul.f32 %v17691_v11, %v5029_v27  ;;  %v17693_v56 = vunpack.c.l.bf16 %v17692_v16  ;;  %v17696_v58 = vld [vmem:[#allocation255_spill] sm:$0xff] }
 0x4e6   : > { %v5318_v43 = vadd.f32 %v5254_v40, %v17690_v39  ;;  %v8360_v14 = vpack.c.bf16 %v7918_v5, %v7917_v60  ;;  %v8392_v22 = vpack.c.bf16 %v8046_v53, %v8045_v34  ;;  %v17694_v4 = vunpack.c.h.bf16 %v17692_v16  ;;  %v17703_v16 = vld [vmem:[#allocation72_spill] sm:$0xff] }
 0x4e7   : > { %v5958_v50 = vadd.f32 %v5894_v20, %v17693_v56  ;;  %v8424_v8 = vpack.c.bf16 %v8206_v18, %v8205_v62  ;;  %v6537_v38 = vmul.f32 %v17695_v1, %v5030_v13  ;;  %v17697_v28 = vunpack.c.l.bf16 %v17696_v58  ;;  %v4730_v1 = vld [vmem:[%s15749_s5 + $0x68] sm:$0xff]  ;;  %v14272_v13 = vpop.permute.xlu1 %3903 }
 0x4e8   : > { %v5959_v10 = vadd.f32 %v5895_v49, %v17694_v4  ;;  %v7920_v47 = vclamps-f32 %v5318_v43, 1.0  ;;  %5688 = vst [vmem:[%s13318_s10 + $0x58] sm:$0xff] %v8360_v14  ;;  %8130 = vst [vmem:[%s13318_s10 + $0x158] sm:$0xff] %v8392_v22  ;;  %v8457_v60 = vpack.c.bf16 %v4966_v41, %v14205_v12  ;;  %v4098_v34 = vsel %vm3871_vm3, %v4048_v32, 0.0  ;;  %v17699_v12 = vld [vmem:[#allocation364_spill] sm:$0xff]  ;;  %v17700_v32 = vld [vmem:[#allocation371_spill] sm:$0xff] }
 0x4e9   : > { %v6600_v55 = vadd.f32 %v6536_v35, %v17697_v28  ;;  %v8047_v6 = vclamps-f32 %v5958_v50, 1.0  ;;  %v14274_v28 = vpop.permute.xlu0 %3905  ;;  %8290 = vst [vmem:[%s13318_s10 + $0x258] sm:$0xff] %v8424_v8  ;;  %v17698_v40 = vunpack.c.h.bf16 %v17696_v58  ;;  %v4425_v41 = vadd.f32 %v4098_v34, %v17699_v12  ;;  %v17701_v18 = vld [vmem:[#allocation313_spill] sm:$0xff]  ;;  %v17702_v43 = vld [vmem:[#allocation315_spill] sm:$0xff]  ;;  %v4731_v35 = vld [vmem:[%s15749_s5 + $0x70] sm:$0xff] }
 0x4ea   : > { %v8048_v27 = vclamps-f32 %v5959_v10, 1.0  ;;  %v8361_v62 = vpack.c.bf16 %v7920_v47, %v7919_v15  ;;  %7197 = vst [vmem:[%s13269_s12 + $0x60] sm:$0xff] %v8457_v60  ;;  %v4426_v49 = vadd.f32 %v14199_v44, %v17700_v32  ;;  %v4551_v39 = vmul.f32 3.0, %v17701_v18  ;;  %v17704_v50 = vld [vmem:[#allocation74_spill] sm:$0xff] }
 0x4eb   : > { %v6601_v5 = vadd.f32 %v6537_v38, %v17698_v40  ;;  %v8207_v53 = vclamps-f32 %v6600_v55, 1.0  ;;  %v4552_v11 = vmul.f32 3.0, %v17702_v43  ;;  %v4775_v15 = vunpack.c.l.bf16 %v4730_v1 }
 0x4ec   : > { %v8393_v20 = vpack.c.bf16 %v8048_v27, %v8047_v6  ;;  %5689 = vst [vmem:[%s13318_s10 + $0x60] sm:$0xff] %v8361_v62  ;;  %v4776_v38 = vunpack.c.h.bf16 %v4730_v1  ;;  %v4278_v14 = vsel %vm4264_vm6, %v14122_v57, %v4227_v26  ;;  %v4310_v44 = vsel %vm4264_vm6, %v4227_v26, %v14122_v57 }
 0x4ed   : > { %v8208_v47 = vclamps-f32 %v6601_v5, 1.0  ;;  %v4487_v22 = vadd.f32 %v14222_v0, %v4278_v14  ;;  %v4553_v56 = vmul.f32 3.0, %v17703_v16  ;;  %v4554_v4 = vmul.f32 3.0, %v17704_v50  ;;  %v14308_v0 = vpop.permute.xlu1 %4166  ;;  %v14310_v26 = vpop.permute.xlu0 %4168  ;;  %v17707_v5 = vld [vmem:[#allocation142_spill] sm:$0xff]  ;;  %v17712_v14 = vld [vmem:[#allocation144_spill] sm:$0xff] }
 0x4ee   : > { %8131 = vst [vmem:[%s13318_s10 + $0x160] sm:$0xff] %v8393_v20  ;;  %v4360_v8 = vsel %vm4135_vm5, %v4310_v44, 0.0  ;;  %v4777_v58 = vunpack.c.l.bf16 %v4731_v35  ;;  %v4778_v55 = vunpack.c.h.bf16 %v4731_v35  ;;  %v4279_v60 = vsel %vm4264_vm6, %v14124_v7, %v4229_v54 }
 0x4ef   : > { %v8425_v10 = vpack.c.bf16 %v8208_v47, %v8207_v53  ;;  %v4488_v6 = vadd.f32 %v14210_v31, %v4360_v8  ;;  %v4615_v27 = vmul.f32 0.33333334, %v4487_v22  ;;  %v4311_v57 = vsel %vm4264_vm6, %v4229_v54, %v14124_v7 }
 0x4f0   : > { %v4362_v34 = vsel %vm4135_vm5, %v4311_v57, 0.0  ;;  %v4489_v1 = vadd.f32 %v4425_v41, %v4279_v60  ;;  %v17705_v31 = vrot.slane %v12957_v33, 7  ;;  %v17706_v62 = vrot.slane %v12930_v36, 7  ;;  %v17866_v36 = vld [vmem:[#allocation339_spill] sm:$0xff] }
 0x4f1   : > { %8291 = vst [vmem:[%s13318_s10 + $0x260] sm:$0xff] %v8425_v10  ;;  %v17708_v53 = vrot.slane %v17707_v5, 1  ;;  %v17709_v7 = vrot.slane %v12957_v33, 1  ;;  %v4616_v12 = vmul.f32 0.33333334, %v4488_v6  ;;  %v4679_v20 = vsub.f32 %v4551_v39, %v4615_v27 }
 0x4f2   : > { %v3250_v40 = vsel %vm3245_vm1, %v17706_v62, %v17705_v31  ;;  %v4490_v32 = vadd.f32 %v4426_v49, %v4362_v34  ;;  %v4617_v41 = vmul.f32 0.33333334, %v4489_v1  ;;  %v17710_v43 = vrot.slane %v17707_v5, 7  ;;  %v17718_v34 = vld [vmem:[#allocation143_spill] sm:$0xff] }
 0x4f3   : > { %v3545_v54 = vsel %vm3542_vm2, %v17709_v7, %v17708_v53  ;;  %v3801_v18 = vadd.f32 %v3250_v40, %v12957_v33  ;;  %v17711_v35 = vmov %v17705_v31  ;;  %v17713_v44 = vrot.slane %v17712_v14, 1 }
 0x4f4   : > { %v3248_v47 = vsel %vm3245_vm1, %v17711_v35, %v17710_v43  ;;  %v17714_v22 = vmov %v17708_v53  ;;  %v17715_v39 = vrot.slane %v17663_v37, 7  ;;  %v17716_v49 = vrot.slane %v12948_v42, 7 }
 0x4f5   : > { %v3543_v16 = vsel %vm3542_vm2, %v17714_v22, %v17713_v44  ;;  %v4680_v10 = vsub.f32 %v4552_v11, %v4616_v12  ;;  %v4839_v8 = vsub.f32 %v4775_v15, %v4679_v20  ;;  %v4618_v6 = vmul.f32 0.33333334, %v4490_v32  ;;  %v3970_v12 = vpop.permute.xlu0 %3969 }
 0x4f6   : > { %v3251_v50 = vsel %vm3245_vm1, %v17716_v49, %v17715_v39  ;;  %v14346_v27 = vadd.f32 %v3801_v18, %v3545_v54  ;;  %v4681_v60 = vsub.f32 %v4553_v56, %v4617_v41  ;;  %v3803_v57 = vadd.f32 %v3248_v47, %v17707_v5  ;;  %v3968_v54 = vpop.permute.xlu1 %3967 }
 0x4f7   : > { %v17719_v1 = vrot.slane %v17718_v34, 1  ;;  %v17720_v31 = vrot.slane %v17663_v37, 1  ;;  %v3802_v40 = vadd.f32 %v3251_v50, %v17663_v37  ;;  %v4840_v53 = vsub.f32 %v4776_v38, %v4680_v10  ;;  %v17725_v38 = vld [vmem:[#allocation145_spill] sm:$0xff] }
 0x4f8   : > { %17717 = vst [vmem:[#allocation278_spill] sm:$0xff] %v14346_v27  ;;  %v4903_v7 = vmax.f32 %v4839_v8, 0.0  ;;  %v4682_v43 = vsub.f32 %v4554_v4, %v4618_v6  ;;  %3931 = vrot.lane.b32.xlu1 %v14346_v27, %s9080_s30  ;;  %v17721_v11 = vrot.slane %v17718_v34, 7  ;;  %v17722_v15 = vmov %v17715_v39 }
 0x4f9   : > { %v3546_v62 = vsel %vm3542_vm2, %v17720_v31, %v17719_v1  ;;  %v4841_v20 = vsub.f32 %v4777_v58, %v4681_v60  ;;  %v14364_v32 = vadd.f32 %v3803_v57, %v3543_v16  ;;  %v17726_v41 = vrot.slane %v17725_v38, 1 }
 0x4fa   : > { %v3249_v56 = vsel %vm3245_vm1, %v17722_v15, %v17721_v11  ;;  %v14366_v18 = vadd.f32 %v3802_v40, %v3546_v62  ;;  %v17727_v4 = vmov %v17719_v1  ;;  %v4904_v47 = vmax.f32 %v4840_v53, 0.0  ;;  %v17729_v62 = vld [vmem:[#allocation213_spill] sm:$0xff] }
 0x4fb   : > { %17723 = vst [vmem:[#allocation148_spill] sm:$0xff] %v14364_v32  ;;  %v3544_v35 = vsel %vm3542_vm2, %v17727_v4, %v17726_v41  ;;  %v4967_v44 = vmin.f32 %v4903_v7, 1.0  ;;  %v4842_v22 = vsub.f32 %v4778_v55, %v4682_v43  ;;  %v3804_v39 = vadd.f32 %v3249_v56, %v17718_v34  ;;  %3933 = vrot.lane.b32.xlu0 %v14364_v32, %s9080_s30  ;;  %v17730_v53 = vld [vmem:[#allocation69_spill] sm:$0xff]  ;;  %v17731_v43 = vld [vmem:[#allocation324_spill] sm:$0xff]  ;;  %v17733_v41 = vld [vmem:[#allocation215_spill] sm:$0xff] }
 0x4fc   : > { %17724 = vst [vmem:[#allocation280_spill] sm:$0xff] %v14366_v18  ;;  %v4905_v49 = vmax.f32 %v4841_v20, 0.0  ;;  %v4017_v58 = vsel %vm4001_vm4, %v14272_v13, %v3968_v54  ;;  %v4049_v16 = vsel %vm4001_vm4, %v3968_v54, %v14272_v13  ;;  %v14386_v50 = vsel %vm4001_vm4, %v14274_v28, %v3970_v12  ;;  %4194 = vrot.lane.b32.xlu1 %v14346_v27, %s9079_s21 }
 0x4fd   : > { %v4968_v55 = vmin.f32 %v4904_v47, 1.0  ;;  %v5031_v10 = vmul.f32 0.95, %v4967_v44  ;;  %v4906_v8 = vmax.f32 %v4842_v22, 0.0  ;;  %v14390_v6 = vadd.f32 %v3804_v39, %v3544_v35  ;;  %v17736_v47 = vld [vmem:[#allocation70_spill] sm:$0xff]  ;;  %v17737_v39 = vld [vmem:[#allocation189_spill] sm:$0xff] }
 0x4fe   : > { %v14392_v60 = vmin.f32 %v4905_v49, 1.0  ;;  %v4100_v57 = vsel %vm3871_vm3, %v4049_v16, 0.0  ;;  %v14397_v13 = vadd.f32 %v4017_v58, %v13115_v45  ;;  %v4050_v1 = vsel %vm4001_vm4, %v3970_v12, %v14274_v28  ;;  %v17732_v45 = vld [vmem:[#allocation248_spill] sm:$0xff]  ;;  %v17734_v12 = vld [vmem:[#allocation159_spill] sm:$0xff]  ;;  %v17739_v16 = vld [vmem:[#allocation325_spill] sm:$0xff] }
 0x4ff   : > { %17728 = vst [vmem:[#allocation167_spill] sm:$0xff] %v14390_v6  ;;  %v5032_v31 = vmul.f32 0.95, %v4968_v55  ;;  %v5255_v40 = vmul.f32 %v17729_v62, %v5031_v10  ;;  %v5896_v7 = vmul.f32 %v17730_v53, %v5031_v10  ;;  %v6538_v11 = vmul.f32 %v17731_v43, %v5031_v10  ;;  %4196 = vrot.lane.b32.xlu0 %v14364_v32, %s9079_s21  ;;  %v17740_v10 = vld [vmem:[#allocation256_spill] sm:$0xff] }
 0x500   : > { %v8458_v15 = vpack.c.bf16 %v4968_v55, %v4967_v44  ;;  %v4970_v56 = vmin.f32 %v4906_v8, 1.0  ;;  %v5033_v54 = vmul.f32 0.95, %v14392_v60  ;;  %v14409_v20 = vadd.f32 %v4100_v57, %v17732_v45  ;;  %3995 = vrot.lane.b32.xlu1 %v14366_v18, %s9080_s30  ;;  %v14419_v44 = vpop.permute.xlu1 %4230  ;;  %v17742_v53 = vld [vmem:[#allocation32_spill] sm:$0xff] }
 0x501   : > { %v5256_v28 = vmul.f32 %v17733_v41, %v5032_v31  ;;  %v17735_v4 = vunpack.c.l.bf16 %v17734_v12  ;;  %v5897_v22 = vmul.f32 %v17736_v47, %v5032_v31  ;;  %v17738_v49 = vunpack.c.l.bf16 %v17737_v39  ;;  %v17746_v32 = vld [vmem:[#allocation36_spill] sm:$0xff] }
 0x502   : > { %v6539_v55 = vmul.f32 %v17739_v16, %v5032_v31  ;;  %v17741_v8 = vunpack.c.l.bf16 %v17740_v10  ;;  %7198 = vst [vmem:[%s13269_s12 + $0x68] sm:$0xff] %v8458_v15  ;;  %v5034_v62 = vmul.f32 0.95, %v4970_v56  ;;  %v5257_v43 = vmul.f32 %v17742_v53, %v5033_v54  ;;  %v17747_v15 = vld [vmem:[#allocation160_spill] sm:$0xff] }
 0x503   : > { %v5319_v35 = vadd.f32 %v5255_v40, %v17735_v4  ;;  %v5960_v58 = vadd.f32 %v5896_v7, %v17738_v49  ;;  %v14426_v40 = vpop.permute.xlu0 %4232  ;;  %v17743_v45 = vunpack.c.h.bf16 %v17734_v12  ;;  %v17744_v4 = vunpack.c.h.bf16 %v17737_v39  ;;  %3997 = vrot.lane.b32.xlu0 %v14390_v6, %s9080_s30 }
 0x504   : > { %v6602_v57 = vadd.f32 %v6538_v11, %v17741_v8  ;;  %v17745_v37 = vunpack.c.h.bf16 %v17740_v10  ;;  %v5258_v11 = vmul.f32 %v17746_v32, %v5034_v62  ;;  %v17748_v8 = vunpack.c.l.bf16 %v17747_v15  ;;  %4258 = vrot.lane.b32.xlu1 %v14366_v18, %s9079_s21 }
 0x505   : > { %v5320_v41 = vadd.f32 %v5256_v28, %v17743_v45  ;;  %v7921_v7 = vclamps-f32 %v5319_v35, 1.0  ;;  %v5961_v47 = vadd.f32 %v5897_v22, %v17744_v4  ;;  %v8049_v49 = vclamps-f32 %v5960_v58, 1.0  ;;  %v17749_v28 = vld [vmem:[#allocation132_spill] sm:$0xff]  ;;  %v17750_v45 = vld [vmem:[#allocation211_spill] sm:$0xff] }
 0x506   : > { %v6603_v31 = vadd.f32 %v6539_v55, %v17745_v37  ;;  %v8209_v16 = vclamps-f32 %v6602_v57, 1.0  ;;  %v5321_v33 = vadd.f32 %v5257_v43, %v17748_v8  ;;  %v5898_v35 = vmul.f32 %v17749_v28, %v5033_v54  ;;  %v17752_v55 = vld [vmem:[#allocation326_spill] sm:$0xff] }
 0x507   : > { %v7922_v53 = vclamps-f32 %v5320_v41, 1.0  ;;  %v8050_v12 = vclamps-f32 %v5961_v47, 1.0  ;;  %v5899_v39 = vmul.f32 %v17750_v45, %v5034_v62  ;;  %v17751_v32 = vunpack.c.h.bf16 %v17747_v15  ;;  %v17753_v41 = vld [vmem:[#allocation191_spill] sm:$0xff]  ;;  %v14450_v45 = vpop.permute.xlu1 %3907  ;;  %v17757_v15 = vld [vmem:[#allocation257_spill] sm:$0xff] }
 0x508   : > { %v8210_v37 = vclamps-f32 %v6603_v31, 1.0  ;;  %v7923_v58 = vclamps-f32 %v5321_v33, 1.0  ;;  %v6540_v10 = vmul.f32 %v17752_v55, %v5033_v54  ;;  %v17754_v4 = vunpack.c.l.bf16 %v17753_v41  ;;  %v17756_v31 = vld [vmem:[#allocation327_spill] sm:$0xff]  ;;  %v14455_v54 = vpop.permute.xlu0 %3909 }
 0x509   : > { %v5322_v22 = vadd.f32 %v5258_v11, %v17751_v32  ;;  %v8362_v57 = vpack.c.bf16 %v7922_v53, %v7921_v7  ;;  %v8394_v43 = vpack.c.bf16 %v8050_v12, %v8049_v49  ;;  %v17755_v8 = vunpack.c.h.bf16 %v17753_v41 }
 0x50a   : > { %v5962_v47 = vadd.f32 %v5898_v35, %v17754_v4  ;;  %v8426_v18 = vpack.c.bf16 %v8210_v37, %v8209_v16  ;;  %v6541_v42 = vmul.f32 %v17756_v31, %v5034_v62  ;;  %v17758_v11 = vunpack.c.l.bf16 %v17757_v15  ;;  %v17760_v37 = vld [vmem:[#allocation253_spill] sm:$0xff]  ;;  %v4733_v4 = vld [vmem:[%s15749_s5 + $0x80] sm:$0xff] }
 0x50b   : > { %v5963_v28 = vadd.f32 %v5899_v39, %v17755_v8  ;;  %v7924_v27 = vclamps-f32 %v5322_v22, 1.0  ;;  %5690 = vst [vmem:[%s13318_s10 + $0x68] sm:$0xff] %v8362_v57  ;;  %8132 = vst [vmem:[%s13318_s10 + $0x168] sm:$0xff] %v8394_v43  ;;  %v8459_v53 = vpack.c.bf16 %v4970_v56, %v14392_v60  ;;  %v4102_v12 = vsel %vm3871_vm3, %v4050_v1, 0.0  ;;  %v4732_v22 = vld [vmem:[%s15749_s5 + $0x78] sm:$0xff] }
 0x50c   : > { %v6604_v33 = vadd.f32 %v6540_v10, %v17758_v11  ;;  %v8051_v7 = vclamps-f32 %v5962_v47, 1.0  ;;  %8292 = vst [vmem:[%s13318_s10 + $0x268] sm:$0xff] %v8426_v18  ;;  %v17759_v62 = vunpack.c.h.bf16 %v17757_v15  ;;  %v4429_v32 = vadd.f32 %v4102_v12, %v17760_v37  ;;  %v17761_v18 = vld [vmem:[#allocation34_spill] sm:$0xff]  ;;  %v17764_v10 = vld [vmem:[#allocation273_spill] sm:$0xff]  ;;  %v14497_v11 = vpop.permute.xlu1 %4170 }
 0x50d   : > { %v8052_v49 = vclamps-f32 %v5963_v28, 1.0  ;;  %v8363_v16 = vpack.c.bf16 %v7924_v27, %v7923_v58  ;;  %7199 = vst [vmem:[%s13269_s12 + $0x70] sm:$0xff] %v8459_v53  ;;  %v4430_v60 = vadd.f32 %v14386_v50, %v13117_v51  ;;  %v17762_v27 = vrot.slane %v17761_v18, 7  ;;  %v17767_v50 = vld [vmem:[#allocation76_spill] sm:$0xff]  ;;  %v17768_v47 = vld [vmem:[#allocation78_spill] sm:$0xff] }
 0x50e   : > { %v6605_v35 = vadd.f32 %v6541_v42, %v17759_v62  ;;  %v8211_v39 = vclamps-f32 %v6604_v33, 1.0  ;;  %v17763_v1 = vrot.slane %v17712_v14, 7  ;;  %v3376_v58 = vsub.s32 0, %v11738_v9 }
 0x50f   : > { %v8395_v55 = vpack.c.bf16 %v8052_v49, %v8051_v7  ;;  %5691 = vst [vmem:[%s13318_s10 + $0x70] sm:$0xff] %v8363_v16  ;;  %v17765_v57 = vrot.slane %v17764_v10, 1  ;;  %v17766_v43 = vrot.slane %v17761_v18, 1  ;;  %v4555_v41 = vmul.f32 3.0, %v17767_v50  ;;  %v14505_v16 = vpop.permute.xlu0 %4172 }
 0x510   : > { %v3308_v42 = vsel %vm3245_vm1, %v17763_v1, %v17762_v27  ;;  %v8212_v56 = vclamps-f32 %v6605_v35, 1.0  ;;  %v4556_v8 = vmul.f32 3.0, %v17768_v47  ;;  %v4779_v28 = vunpack.c.l.bf16 %v4732_v22  ;;  %v17770_v35 = vld [vmem:[#allocation135_spill] sm:$0xff] }
 0x511   : > { %v3603_v51 = vsel %vm3542_vm2, %v17766_v43, %v17765_v57  ;;  %8133 = vst [vmem:[%s13318_s10 + $0x170] sm:$0xff] %v8395_v55  ;;  %v4780_v31 = vunpack.c.h.bf16 %v4732_v22  ;;  %v4280_v15 = vsel %vm4264_vm6, %v14308_v0, %v14419_v44  ;;  %v17769_v7 = vmov 0.0   ;;  %v17771_v22 = vld [vmem:[#allocation214_spill] sm:$0xff] }
 0x512   : > { %v8427_v33 = vpack.c.bf16 %v8212_v56, %v8211_v39  ;;  %v3377_v49 = vrot.slane %v17769_v7, %v3376_v58  ;;  %v4312_v53 = vsel %vm4264_vm6, %v14419_v44, %v14308_v0  ;;  %v4491_v12 = vadd.f32 %v14409_v20, %v4280_v15 }
 0x513   : > { %v4364_v62 = vsel %vm4135_vm5, %v4312_v53, 0.0  ;;  %v4557_v37 = vmul.f32 3.0, %v17770_v35  ;;  %v4558_v55 = vmul.f32 3.0, %v17771_v22  ;;  %v4781_v27 = vunpack.c.l.bf16 %v4733_v4 }
 0x514   : > { %8293 = vst [vmem:[%s13318_s10 + $0x270] sm:$0xff] %v8427_v33  ;;  %v3382_v39 = vsel %vm3149_vm7, %v3377_v49, %v3308_v42  ;;  %v4492_v1 = vadd.f32 %v14397_v13, %v4364_v62  ;;  %v4619_v56 = vmul.f32 0.33333334, %v4491_v12  ;;  %v4782_v0 = vunpack.c.h.bf16 %v4733_v4 }
 0x515   : > { %v3743_v20 = vadd.f32 %v3382_v39, %v17761_v18  ;;  %v4281_v44 = vsel %vm4264_vm6, %v14310_v26, %v14426_v40  ;;  %v4313_v58 = vsel %vm4264_vm6, %v14426_v40, %v14310_v26  ;;  %v3145_v10 = vadd.s32 248, %v11738_v9  ;;  %v14535_v26 = vpop.permute.xlu1 %3971 }
 0x516   : > { %v4620_v57 = vmul.f32 0.33333334, %v4492_v1  ;;  %v4683_v42 = vsub.f32 %v4555_v41, %v4619_v56  ;;  %v4366_v13 = vsel %vm4135_vm5, %v4313_v58, 0.0  ;;  %v4493_v43 = vadd.f32 %v4429_v32, %v4281_v44 }
 0x517   : > { %v14527_v50 = vadd.f32 %v3743_v20, %v3603_v51  ;;  %v4494_v4 = vadd.f32 %v4430_v60, %v4366_v13  ;;  %v17773_v47 = vrot.slane %v17712_v14, 7  ;;  %v17774_v15 = vrot.slane %v17707_v5, 7  ;;  %v14543_v51 = vpop.permute.xlu0 %3973  ;;  %v17780_v13 = vld [vmem:[#allocation43_spill] sm:$0xff] }
 0x518   : > { %vm3477_vm8 = vcmp.eq.s32.totalorder %v3145_v10, 255  ;;  %v4684_v40 = vsub.f32 %v4556_v8, %v4620_v57  ;;  %v4843_v53 = vsub.f32 %v4779_v28, %v4683_v42  ;;  %v4621_v41 = vmul.f32 0.33333334, %v4493_v43  ;;  %v17777_v8 = vld [vmem:[#allocation35_spill] sm:$0xff] }
 0x519   : > { %17772 = vst [vmem:[#allocation243_spill] sm:$0xff] %v14527_v50  ;;  %v3246_v33 = vsel %vm3245_vm1, %v17774_v15, %v17773_v47  ;;  %v17775_v12 = vrot.slane %v17761_v18, 1  ;;  %v17776_v32 = vrot.slane %v17712_v14, 1  ;;  %3873 = vrot.lane.b32.xlu0 %v14527_v50, %s9080_s30  ;;  %v4622_v62 = vmul.f32 0.33333334, %v4494_v4 }
 0x51a   : > { %v3673_v35 = vsub.s32 1, %v11738_v9  ;;  %v3805_v22 = vadd.f32 %v3246_v33, %v17712_v14  ;;  %v17778_v28 = vrot.slane %v17777_v8, 7  ;;  %v17779_v39 = vrot.slane %v17725_v38, 7 }
 0x51b   : > { %v3605_v60 = vsel %vm3542_vm2, %v17776_v32, %v17775_v12  ;;  %v4844_v56 = vsub.f32 %v4780_v31, %v4684_v40  ;;  %v4907_v20 = vmax.f32 %v4843_v53, 0.0  ;;  %v4685_v44 = vsub.f32 %v4557_v37, %v4621_v41 }
 0x51c   : > { %v3309_v1 = vsel %vm3245_vm1, %v17779_v39, %v17778_v28  ;;  %v4686_v57 = vsub.f32 %v4558_v55, %v4622_v62  ;;  %v3674_v42 = vrot.slane %v17769_v7, %v3673_v35  ;;  %v17781_v43 = vrot.slane %v17780_v13, 1  ;;  %v14582_v62 = vpop.permute.xlu1 %4234  ;;  %v17790_v13 = vld [vmem:[#allocation77_spill] sm:$0xff] }
 0x51d   : > { %v3383_v58 = vsel %vm3149_vm7, %v3377_v49, %v3309_v1  ;;  %v17782_v4 = vrot.slane %v17777_v8, 1  ;;  %v4908_v33 = vmax.f32 %v4844_v56, 0.0  ;;  %v4971_v12 = vmin.f32 %v4907_v20, 1.0  ;;  %4136 = vrot.lane.b32.xlu0 %v14527_v50, %s9079_s21 }
 0x51e   : > { %v3744_v15 = vadd.f32 %v3383_v58, %v17777_v8  ;;  %v4845_v31 = vsub.f32 %v4781_v27, %v4685_v44  ;;  %v17783_v37 = vmov %v17779_v39  ;;  %v17784_v40 = vrot.slane %v17718_v34, 7  ;;  %v17789_v58 = vld [vmem:[#allocation216_spill] sm:$0xff] }
 0x51f   : > { %v3604_v47 = vsel %vm3542_vm2, %v17782_v4, %v17781_v43  ;;  %v4846_v7 = vsub.f32 %v4782_v0, %v4686_v57  ;;  %v3741_v55 = vsel %vm3477_vm8, %v3674_v42, %v3605_v60  ;;  %v17786_v41 = vmov %v17782_v4  ;;  %v14586_v60 = vpop.permute.xlu0 %4236  ;;  %v17791_v43 = vld [vmem:[#allocation330_spill] sm:$0xff] }
 0x520   : > { %v3247_v49 = vsel %vm3245_vm1, %v17784_v40, %v17783_v37  ;;  %v14574_v53 = vadd.f32 %v3744_v15, %v3604_v47  ;;  %v17787_v32 = vrot.slane %v17725_v38, 1  ;;  %v4972_v35 = vmin.f32 %v4908_v33, 1.0  ;;  %v17793_v33 = vld [vmem:[#allocation217_spill] sm:$0xff] }
 0x521   : > { %v5035_v28 = vmul.f32 0.95, %v4971_v12  ;;  %v4909_v39 = vmax.f32 %v4845_v31, 0.0  ;;  %v14584_v0 = vadd.f32 %v3805_v22, %v3741_v55  ;;  %v4910_v1 = vmax.f32 %v4846_v7, 0.0  ;;  %v17794_v37 = vld [vmem:[#allocation161_spill] sm:$0xff]  ;;  %v17796_v7 = vld [vmem:[#allocation79_spill] sm:$0xff] }
 0x522   : > { %17785 = vst [vmem:[#allocation290_spill] sm:$0xff] %v14574_v53  ;;  %v3606_v27 = vsel %vm3542_vm2, %v17787_v32, %v17786_v41  ;;  %v3806_v20 = vadd.f32 %v3247_v49, %v17725_v38  ;;  %v14594_v9 = vsel %vm4001_vm4, %v14450_v45, %v14535_v26  ;;  %v5036_v44 = vmul.f32 0.95, %v4972_v35  ;;  %3937 = vrot.lane.b32.xlu0 %v14574_v53, %s9080_s30  ;;  %v17797_v41 = vld [vmem:[#allocation194_spill] sm:$0xff] }
 0x523   : > { %17788 = vst [vmem:[#allocation277_spill] sm:$0xff] %v14584_v0  ;;  %v3742_v56 = vsel %vm3477_vm8, %v3674_v42, %v3606_v27  ;;  %v5259_v57 = vmul.f32 %v17789_v58, %v5035_v28  ;;  %v5900_v22 = vmul.f32 %v17790_v13, %v5035_v28  ;;  %v6542_v4 = vmul.f32 %v17791_v43, %v5035_v28  ;;  %v17799_v28 = vld [vmem:[#allocation331_spill] sm:$0xff] }
 0x524   : > { %3935 = vrot.lane.b32.xlu1 %v14584_v0, %s9080_s30  ;;  %v8460_v10 = vpack.c.bf16 %v4972_v35, %v4971_v12  ;;  %v4973_v42 = vmin.f32 %v4909_v39, 1.0  ;;  %v4974_v47 = vmin.f32 %v4910_v1, 1.0  ;;  %v14603_v15 = vadd.f32 %v3806_v20, %v3742_v56  ;;  %v17800_v12 = vld [vmem:[#allocation258_spill] sm:$0xff]  ;;  %v14615_v56 = vpop.permute.xlu1 %3911  ;;  %v2998_v20 = vpop.f32.mrb[160].mxu1 }
 0x525   : > { %v5260_v31 = vmul.f32 %v17793_v33, %v5036_v44  ;;  %v17795_v40 = vunpack.c.l.bf16 %v17794_v37  ;;  %v5901_v55 = vmul.f32 %v17796_v7, %v5036_v44  ;;  %v17798_v32 = vunpack.c.l.bf16 %v17797_v41  ;;  %v17806_v20 = vld [vmem:[#allocation30_spill] sm:$0xff] }
 0x526   : > { %17792 = vst [vmem:[#allocation202_spill] sm:$0xff] %v14603_v15  ;;  %v6543_v58 = vmul.f32 %v17799_v28, %v5036_v44  ;;  %v17801_v35 = vunpack.c.l.bf16 %v17800_v12  ;;  %7200 = vst [vmem:[%s13269_s12 + $0x78] sm:$0xff] %v8460_v10  ;;  %v5037_v1 = vmul.f32 0.95, %v4973_v42  ;;  %v5038_v13 = vmul.f32 0.95, %v4974_v47  ;;  %v14623_v44 = vpop.permute.xlu0 %3913  ;;  %4200 = vrot.lane.b32.xlu0 %v14574_v53, %s9079_s21 }
 0x527   : > { %v5323_v49 = vadd.f32 %v5259_v57, %v17795_v40  ;;  %v5964_v27 = vadd.f32 %v5900_v22, %v17798_v32  ;;  %v17802_v43 = vunpack.c.h.bf16 %v17794_v37  ;;  %v17803_v40 = vunpack.c.h.bf16 %v17797_v41  ;;  %v3000_v22 = vpop.f32.mrb[161].mxu1  ;;  %v17805_v28 = vld [vmem:[#allocation38_spill] sm:$0xff]  ;;  %v17807_v41 = vld [vmem:[#allocation136_spill] sm:$0xff] }
 0x528   : > { %v6606_v39 = vadd.f32 %v6542_v4, %v17801_v35  ;;  %4198 = vrot.lane.b32.xlu1 %v14584_v0, %s9079_s21  ;;  %v17804_v4 = vunpack.c.h.bf16 %v17800_v12  ;;  %v5261_v35 = vmul.f32 %v17805_v28, %v5037_v1  ;;  %v5262_v37 = vmul.f32 %v17806_v20, %v5038_v13  ;;  %v17809_v12 = vld [vmem:[#allocation162_spill] sm:$0xff]  ;;  %v17812_v20 = vld [vmem:[#allocation332_spill] sm:$0xff] }
 0x529   : > { %v5324_v33 = vadd.f32 %v5260_v31, %v17802_v43  ;;  %v7925_v57 = vclamps-f32 %v5323_v49, 1.0  ;;  %v5965_v7 = vadd.f32 %v5901_v55, %v17803_v40  ;;  %v8053_v38 = vclamps-f32 %v5964_v27, 1.0  ;;  %v3002_v31 = vpop.f32.mrb[162].mxu1  ;;  %v17808_v43 = vld [vmem:[#allocation224_spill] sm:$0xff] }
 0x52a   : > { %v6607_v10 = vadd.f32 %v6543_v58, %v17804_v4  ;;  %v8213_v32 = vclamps-f32 %v6606_v39, 1.0  ;;  %v5902_v27 = vmul.f32 %v17807_v41, %v5037_v1  ;;  %v5903_v40 = vmul.f32 %v17808_v43, %v5038_v13  ;;  %v3003_v14 = vpop.f32.mrb[163].mxu1  ;;  %4260 = vrot.lane.b32.xlu0 %v14390_v6, %s9079_s21 }
 0x52b   : > { %v7926_v49 = vclamps-f32 %v5324_v33, 1.0  ;;  %v8054_v55 = vclamps-f32 %v5965_v7, 1.0  ;;  %v17810_v58 = vunpack.c.l.bf16 %v17809_v12  ;;  %v17811_v4 = vunpack.c.h.bf16 %v17809_v12  ;;  %v17813_v33 = vld [vmem:[#allocation197_spill] sm:$0xff] }
 0x52c   : > { %v8214_v22 = vclamps-f32 %v6607_v10, 1.0  ;;  %v6544_v34 = vmul.f32 %v17812_v20, %v5037_v1  ;;  %v17814_v7 = vunpack.c.l.bf16 %v17813_v33  ;;  %v17815_v41 = vunpack.c.h.bf16 %v17813_v33  ;;  %3999 = vrot.lane.b32.xlu1 %v14603_v15, %s9080_s30  ;;  %v4734_v33 = vld [vmem:[%s15749_s5 + $0x88] sm:$0xff]  ;;  %s7223_s30 = scalar_lea.sflag [#allocation5], %s13190_s16 }
 0x52d   : > { %v5325_v39 = vadd.f32 %v5261_v35, %v17810_v58  ;;  %v5326_v28 = vadd.f32 %v5262_v37, %v17811_v4  ;;  %v8364_v5 = vpack.c.bf16 %v7926_v49, %v7925_v57  ;;  %v8396_v31 = vpack.c.bf16 %v8054_v55, %v8053_v38  ;;  %v17816_v58 = vld [vmem:[#allocation333_spill] sm:$0xff]  ;;  %v14647_v38 = vpop.permute.xlu1 %4174  ;;  %v17817_v37 = vld [vmem:[#allocation259_spill] sm:$0xff] }
 0x52e   : > { %v5966_v0 = vadd.f32 %v5902_v27, %v17814_v7  ;;  %v5967_v43 = vadd.f32 %v5903_v40, %v17815_v41  ;;  %v8428_v14 = vpack.c.bf16 %v8214_v22, %v8213_v32  ;;  %v6545_v12 = vmul.f32 %v17816_v58, %v5038_v13  ;;  %v14653_v32 = vpop.permute.xlu0 %4176  ;;  %v17819_v40 = vld [vmem:[#allocation272_spill] sm:$0xff]  ;;  %v17827_v58 = vld [vmem:[#allocation225_spill] sm:$0xff] }
 0x52f   : > { %v7927_v10 = vclamps-f32 %v5325_v39, 1.0  ;;  %v7928_v35 = vclamps-f32 %v5326_v28, 1.0  ;;  %5692 = vst [vmem:[%s13318_s10 + $0x78] sm:$0xff] %v8364_v5  ;;  %8134 = vst [vmem:[%s13318_s10 + $0x178] sm:$0xff] %v8396_v31  ;;  %v17818_v49 = vunpack.c.l.bf16 %v17817_v37  ;;  %v8461_v27 = vpack.c.bf16 %v4974_v47, %v4973_v42  ;;  %v17821_v13 = vld [vmem:[#allocation360_spill] sm:$0xff] }
 0x530   : > { %v8055_v1 = vclamps-f32 %v5966_v0, 1.0  ;;  %v8056_v57 = vclamps-f32 %v5967_v43, 1.0  ;;  %v17820_v22 = vunpack.c.l.bf16 %v17819_v40  ;;  %v17822_v39 = vclamps-f32 %v17821_v13, 1.0  ;;  %8294 = vst [vmem:[%s13318_s10 + $0x278] sm:$0xff] %v8428_v14  ;;  %4262 = vrot.lane.b32.xlu1 %v14603_v15, %s9079_s21  ;;  %v17825_v7 = vld [vmem:[#allocation372_spill] sm:$0xff]  ;;  %s9081_s21 = smov [#allocation4]  }
 0x531   : > { %v6608_v55 = vadd.f32 %v6544_v34, %v17818_v49  ;;  %v8365_v28 = vpack.c.bf16 %v7928_v35, %v7927_v10  ;;  %v17824_v5 = vunpack.c.h.bf16 %v17817_v37  ;;  %v4051_v34 = vsel %vm4001_vm4, %v14535_v26, %v14450_v45  ;;  %7201 = vst [vmem:[%s13269_s12 + $0x80] sm:$0xff] %v8461_v27  ;;  %v17826_v10 = vld [vmem:[#allocation373_spill] sm:$0xff]  ;;  %v17829_v37 = vld [vmem:[#allocation46_spill] sm:$0xff] }
 0x532   : > { %v14659_v4 = vsub.f32 %v17822_v39, %v17820_v22  ;;  %v8397_v42 = vpack.c.bf16 %v8056_v57, %v8055_v1  ;;  %v4104_v20 = vsel %vm3871_vm3, %v4051_v34, 0.0  ;;  %v4020_v31 = vsel %vm4001_vm4, %v14455_v54, %v14543_v51  ;;  %v17828_v1 = vld [vmem:[#allocation227_spill] sm:$0xff]  ;;  %v17830_v39 = vld [vmem:[#allocation229_spill] sm:$0xff] }
 0x533   : > { %v6609_v0 = vadd.f32 %v6545_v12, %v17824_v5  ;;  %v8215_v47 = vclamps-f32 %v6608_v55, 1.0  ;;  %5693 = vst [vmem:[%s13318_s10 + $0x80] sm:$0xff] %v8365_v28  ;;  %v4431_v26 = vadd.f32 %v4104_v20, %v13173_v17  ;;  %v4432_v41 = vadd.f32 %v14594_v9, %v17825_v7  ;;  %v4735_v17 = vld [vmem:[%s15749_s5 + $0x90] sm:$0xff]  ;;  %v3978_v5 = vpop.permute.xlu0 %3977  ;;  %v17831_v34 = vld [vmem:[#allocation231_spill] sm:$0xff] }
 0x534   : > { %17823 = vst [vmem:[#allocation52_spill] sm:$0xff] %v14659_v4  ;;  %v4052_v43 = vsel %vm4001_vm4, %v14543_v51, %v14455_v54  ;;  %8135 = vst [vmem:[%s13318_s10 + $0x180] sm:$0xff] %v8397_v42  ;;  %v4434_v35 = vadd.f32 %v4020_v31, %v17826_v10  ;;  %v4559_v12 = vmul.f32 3.0, %v17827_v58  ;;  %v4560_v57 = vmul.f32 3.0, %v17828_v1  ;;  %v3976_v51 = vpop.permute.xlu1 %3975  ;;  %v17832_v1 = vld [vmem:[#allocation276_spill] sm:$0xff] }
 0x535   : > { %v8216_v45 = vclamps-f32 %v6609_v0, 1.0  ;;  %v4106_v14 = vsel %vm3871_vm3, %v4052_v43, 0.0  ;;  %v4783_v55 = vunpack.c.l.bf16 %v4734_v33  ;;  %v4282_v54 = vsel %vm4264_vm6, %v14497_v11, %v14582_v62 }
 0x536   : > { %v4433_v49 = vadd.f32 %v4106_v14, %v17829_v37  ;;  %v4784_v27 = vunpack.c.h.bf16 %v4734_v33  ;;  %v4314_v22 = vsel %vm4264_vm6, %v14582_v62, %v14497_v11  ;;  %v4495_v13 = vadd.f32 %v4431_v26, %v4282_v54 }
 0x537   : > { %v8429_v9 = vpack.c.bf16 %v8216_v45, %v8215_v47  ;;  %v4561_v28 = vmul.f32 3.0, %v17830_v39  ;;  %v4368_v0 = vsel %vm4135_vm5, %v4314_v22, 0.0  ;;  %v4562_v42 = vmul.f32 3.0, %v17831_v34 }
 0x538   : > { %v4785_v47 = vunpack.c.l.bf16 %v4735_v17  ;;  %v4283_v20 = vsel %vm4264_vm6, %v14505_v16, %v14586_v60  ;;  %v4496_v31 = vadd.f32 %v4432_v41, %v4368_v0  ;;  %v4623_v33 = vmul.f32 0.33333334, %v4495_v13  ;;  %v17834_v0 = vld [vmem:[#allocation198_spill] sm:$0xff] }
 0x539   : > { %8295 = vst [vmem:[%s13318_s10 + $0x280] sm:$0xff] %v8429_v9  ;;  %v4315_v11 = vsel %vm4264_vm6, %v14586_v60, %v14505_v16  ;;  %v4497_v62 = vadd.f32 %v4433_v49, %v4283_v20  ;;  %v4021_v26 = vsel %vm4001_vm4, %v14615_v56, %v3976_v51  ;;  %v4053_v7 = vsel %vm4001_vm4, %v3976_v51, %v14615_v56  ;;  %v4239_v49 = vpop.permute.xlu1 %4238 }
 0x53a   : > { %v4370_v45 = vsel %vm4135_vm5, %v4315_v11, 0.0  ;;  %v4022_v41 = vsel %vm4001_vm4, %v14623_v44, %v3978_v5  ;;  %v4624_v43 = vmul.f32 0.33333334, %v4496_v31  ;;  %v4687_v14 = vsub.f32 %v4559_v12, %v4623_v33  ;;  %v14741_v12 = vpop.permute.xlu0 %4240  ;;  %v17836_v31 = vld [vmem:[#allocation33_spill] sm:$0xff]  ;;  %v17837_v11 = vld [vmem:[#allocation235_spill] sm:$0xff] }
 0x53b   : > { %v4498_v10 = vadd.f32 %v4434_v35, %v4370_v45  ;;  %v4625_v16 = vmul.f32 0.33333334, %v4497_v62  ;;  %v4786_v60 = vunpack.c.h.bf16 %v4735_v17  ;;  %v4108_v58 = vsel %vm3871_vm3, %v4053_v7, 0.0  ;;  %v14739_v35 = vld [vmem:[%s15749_s5 + $0x98] sm:$0xff]  ;;  %v17833_v17 = vld [vmem:[#allocation196_spill] sm:$0xff] }
 0x53c   : > { %v4436_v9 = vadd.f32 %v4021_v26, %v17832_v1  ;;  %v4054_v37 = vsel %vm4001_vm4, %v3978_v5, %v14623_v44  ;;  %v4688_v56 = vsub.f32 %v4560_v57, %v4624_v43  ;;  %v4847_v54 = vsub.f32 %v4783_v55, %v4687_v14  ;;  %v17835_v44 = vld [vmem:[#allocation233_spill] sm:$0xff] }
 0x53d   : > { %v4626_v51 = vmul.f32 0.33333334, %v4498_v10  ;;  %v4689_v22 = vsub.f32 %v4561_v28, %v4625_v16  ;;  %v4435_v13 = vadd.f32 %v4108_v58, %v17833_v17  ;;  %v4110_v39 = vsel %vm3871_vm3, %v4054_v37, 0.0  ;;  %v17838_v16 = vld [vmem:[#allocation237_spill] sm:$0xff]  ;;  %v14774_v1 = vpop.permute.xlu1 %3915 }
 0x53e   : > { %v14747_v34 = vadd.f32 %v4022_v41, %v17834_v0  ;;  %v14750_v57 = vmul.f32 3.0, %v17835_v44  ;;  %v4848_v55 = vsub.f32 %v4784_v27, %v4688_v56  ;;  %v4911_v28 = vmax.f32 %v4847_v54, 0.0  ;;  %v14765_v27 = vld [vmem:[%s15749_s5 + $0xa0] sm:$0xff]  ;;  %v17840_v0 = vld [vmem:[#allocation41_spill] sm:$0xff] }
 0x53f   : > { %v4690_v5 = vsub.f32 %v4562_v42, %v4626_v51  ;;  %v4849_v20 = vsub.f32 %v4785_v47, %v4689_v22  ;;  %v14753_v33 = vadd.f32 %v4110_v39, %v17836_v31  ;;  %v14756_v62 = vmul.f32 3.0, %v17837_v11  ;;  %v14778_v51 = vpop.permute.xlu0 %3917  ;;  %v17839_v39 = vld [vmem:[#allocation87_spill] sm:$0xff] }
 0x540   : > { %v4284_v26 = vsel %vm4264_vm6, %v14647_v38, %v4239_v49  ;;  %v4912_v7 = vmax.f32 %v4848_v55, 0.0  ;;  %v4975_v41 = vmin.f32 %v4911_v28, 1.0  ;;  %v4316_v47 = vsel %vm4264_vm6, %v4239_v49, %v14647_v38  ;;  %v17841_v55 = vld [vmem:[#allocation226_spill] sm:$0xff]  ;;  %v17847_v49 = vld [vmem:[#allocation199_spill] sm:$0xff] }
 0x541   : > { %v4850_v43 = vsub.f32 %v4786_v60, %v4690_v5  ;;  %v4913_v14 = vmax.f32 %v4849_v20, 0.0  ;;  %v4499_v10 = vadd.f32 %v4435_v13, %v4284_v26  ;;  %v14772_v58 = vmul.f32 3.0, %v17838_v16  ;;  %v17842_v5 = vld [vmem:[#allocation336_spill] sm:$0xff] }
 0x542   : > { %v4976_v37 = vmin.f32 %v4912_v7, 1.0  ;;  %v5039_v60 = vmul.f32 0.95, %v4975_v41  ;;  %v4372_v22 = vsel %vm4135_vm5, %v4316_v47, 0.0  ;;  %v14785_v38 = vmul.f32 3.0, %v17839_v39  ;;  %v17844_v47 = vld [vmem:[#allocation164_spill] sm:$0xff] }
 0x543   : > { %v4914_v56 = vmax.f32 %v4850_v43, 0.0  ;;  %v14776_v54 = vmin.f32 %v4913_v14, 1.0  ;;  %v14782_v17 = vmul.f32 0.33333334, %v4499_v10  ;;  %v4500_v7 = vadd.f32 %v4436_v9, %v4372_v22  ;;  %v17843_v43 = vld [vmem:[#allocation42_spill] sm:$0xff]  ;;  %v17846_v39 = vld [vmem:[#allocation228_spill] sm:$0xff]  ;;  %v14803_v9 = vpop.permute.xlu1 %4178 }
 0x544   : > { %v5040_v13 = vmul.f32 0.95, %v4976_v37  ;;  %v5263_v44 = vmul.f32 %v17840_v0, %v5039_v60  ;;  %v5904_v28 = vmul.f32 %v17841_v55, %v5039_v60  ;;  %v6546_v20 = vmul.f32 %v17842_v5, %v5039_v60  ;;  %v17849_v0 = vld [vmem:[#allocation337_spill] sm:$0xff]  ;;  %v17850_v55 = vld [vmem:[#allocation260_spill] sm:$0xff] }
 0x545   : > { %v8462_v31 = vpack.c.bf16 %v4976_v37, %v4975_v41  ;;  %v4978_v11 = vmin.f32 %v4914_v56, 1.0  ;;  %v5041_v26 = vmul.f32 0.95, %v14776_v54  ;;  %v17845_v10 = vunpack.c.l.bf16 %v17844_v47  ;;  %v17852_v37 = vld [vmem:[#allocation45_spill] sm:$0xff] }
 0x546   : > { %v5264_v14 = vmul.f32 %v17843_v43, %v5040_v13  ;;  %v5905_v42 = vmul.f32 %v17846_v39, %v5040_v13  ;;  %v17848_v45 = vunpack.c.l.bf16 %v17847_v49  ;;  %v6547_v4 = vmul.f32 %v17849_v0, %v5040_v13  ;;  %v17857_v0 = vld [vmem:[#allocation166_spill] sm:$0xff] }
 0x547   : > { %v5327_v16 = vadd.f32 %v5263_v44, %v17845_v10  ;;  %v17851_v8 = vunpack.c.l.bf16 %v17850_v55  ;;  %7202 = vst [vmem:[%s13269_s12 + $0x88] sm:$0xff] %v8462_v31  ;;  %v5042_v41 = vmul.f32 0.95, %v4978_v11  ;;  %v5265_v56 = vmul.f32 %v17852_v37, %v5041_v26 }
 0x548   : > { %v5968_v15 = vadd.f32 %v5904_v28, %v17848_v45  ;;  %v17853_v22 = vunpack.c.h.bf16 %v17844_v47  ;;  %v17854_v43 = vunpack.c.h.bf16 %v17847_v49  ;;  %v14809_v45 = vpop.permute.xlu0 %4180  ;;  %v17855_v13 = vunpack.c.h.bf16 %v17850_v55  ;;  %v17859_v47 = vld [vmem:[#allocation230_spill] sm:$0xff] }
 0x549   : > { %v6610_v60 = vadd.f32 %v6546_v20, %v17851_v8  ;;  %v7929_v44 = vclamps-f32 %v5327_v16, 1.0  ;;  %v17856_v20 = vld [vmem:[#allocation48_spill] sm:$0xff]  ;;  %v17858_v37 = vunpack.c.l.bf16 %v17857_v0  ;;  %v17861_v49 = vunpack.c.h.bf16 %v17857_v0 }
 0x54a   : > { %v5328_v5 = vadd.f32 %v5264_v14, %v17853_v22  ;;  %v5969_v10 = vadd.f32 %v5905_v42, %v17854_v43  ;;  %v8057_v39 = vclamps-f32 %v5968_v15, 1.0  ;;  %v6611_v28 = vadd.f32 %v6547_v4, %v17855_v13  ;;  %v17860_v16 = vld [vmem:[#allocation232_spill] sm:$0xff]  ;;  %v17862_v4 = vld [vmem:[#allocation338_spill] sm:$0xff] }
 0x54b   : > { %v8217_v8 = vclamps-f32 %v6610_v60, 1.0  ;;  %v5266_v31 = vmul.f32 %v17856_v20, %v5042_v41  ;;  %v5329_v53 = vadd.f32 %v5265_v56, %v17858_v37  ;;  %v5906_v14 = vmul.f32 %v17859_v47, %v5041_v26  ;;  %v17863_v20 = vld [vmem:[#allocation9_spill] sm:$0xff] }
 0x54c   : > { %v7930_v50 = vclamps-f32 %v5328_v5, 1.0  ;;  %v8058_v18 = vclamps-f32 %v5969_v10, 1.0  ;;  %v5907_v42 = vmul.f32 %v17860_v16, %v5042_v41  ;;  %v8218_v15 = vclamps-f32 %v6611_v28, 1.0  ;;  %v17867_v28 = vld [vmem:[#allocation261_spill] sm:$0xff] }
 0x54d   : > { %v5330_v22 = vadd.f32 %v5266_v31, %v17861_v49  ;;  %v7931_v55 = vclamps-f32 %v5329_v53, 1.0  ;;  %v6548_v60 = vmul.f32 %v17862_v4, %v5041_v26  ;;  %v17864_v56 = vunpack.c.l.bf16 %v17863_v20  ;;  %v3980_v53 = vpop.permute.xlu1 %3979 }
 0x54e   : > { %v8366_v43 = vpack.c.bf16 %v7930_v50, %v7929_v44  ;;  %v8398_v13 = vpack.c.bf16 %v8058_v18, %v8057_v39  ;;  %v17865_v10 = vunpack.c.h.bf16 %v17863_v20  ;;  %v8430_v47 = vpack.c.bf16 %v8218_v15, %v8217_v8  ;;  %v3982_v39 = vpop.permute.xlu0 %3981  ;;  %v17872_v20 = vld [vmem:[#allocation44_spill] sm:$0xff] }
 0x54f   : > { %v5970_v5 = vadd.f32 %v5906_v14, %v17864_v56  ;;  %v7932_v6 = vclamps-f32 %v5330_v22, 1.0  ;;  %v6549_v16 = vmul.f32 %v17866_v36, %v5042_v41  ;;  %v17868_v2 = vunpack.c.l.bf16 %v17867_v28 }
 0x550   : > { %v5971_v37 = vadd.f32 %v5907_v42, %v17865_v10  ;;  %5694 = vst [vmem:[%s13318_s10 + $0x88] sm:$0xff] %v8366_v43  ;;  %8136 = vst [vmem:[%s13318_s10 + $0x188] sm:$0xff] %v8398_v13  ;;  %v8463_v26 = vpack.c.bf16 %v4978_v11, %v14776_v54  ;;  %v4628_v44 = vmul.f32 0.33333334, %v4500_v7  ;;  %v17869_v0 = vunpack.c.h.bf16 %v17867_v28 }
 0x551   : > { %v6612_v31 = vadd.f32 %v6548_v60, %v17868_v2  ;;  %v8059_v50 = vclamps-f32 %v5970_v5, 1.0  ;;  %8296 = vst [vmem:[%s13318_s10 + $0x288] sm:$0xff] %v8430_v47  ;;  %v8367_v8 = vpack.c.bf16 %v7932_v6, %v7931_v55  ;;  %v4691_v2 = vsub.f32 %v14750_v57, %v14782_v17  ;;  %v14864_v43 = vpop.permute.xlu1 %4242 }
 0x552   : > { %v8060_v18 = vclamps-f32 %v5971_v37, 1.0  ;;  %v6613_v36 = vadd.f32 %v6549_v16, %v17869_v0  ;;  %7203 = vst [vmem:[%s13269_s12 + $0x90] sm:$0xff] %v8463_v26  ;;  %v4692_v42 = vsub.f32 %v14756_v62, %v4628_v44  ;;  %v4285_v54 = vsel %vm4264_vm6, %v14653_v32, %v14741_v12  ;;  %v14870_v5 = vpop.permute.xlu0 %4244  ;;  %v17874_v26 = vld [vmem:[#allocation49_spill] sm:$0xff] }
 0x553   : > { %v8219_v41 = vclamps-f32 %v6612_v31, 1.0  ;;  %v4317_v6 = vsel %vm4264_vm6, %v14741_v12, %v14653_v32  ;;  %5695 = vst [vmem:[%s13318_s10 + $0x90] sm:$0xff] %v8367_v8  ;;  %v17870_v7 = vunpack.c.l.bf16 %v14739_v35  ;;  %v4501_v62 = vadd.f32 %v14753_v33, %v4285_v54  ;;  %v17875_v0 = vld [vmem:[#allocation89_spill] sm:$0xff] }
 0x554   : > { %v8399_v14 = vpack.c.bf16 %v8060_v18, %v8059_v50  ;;  %v8220_v11 = vclamps-f32 %v6613_v36, 1.0  ;;  %v4374_v57 = vsel %vm4135_vm5, %v4317_v6, 0.0  ;;  %v17871_v17 = vunpack.c.h.bf16 %v14739_v35  ;;  %v17876_v36 = vld [vmem:[#allocation51_spill] sm:$0xff] }
 0x555   : > { %v4851_v15 = vsub.f32 %v17870_v7, %v4691_v2  ;;  %v4502_v22 = vadd.f32 %v14747_v34, %v4374_v57  ;;  %v4023_v32 = vsel %vm4001_vm4, %v14774_v1, %v3980_v53  ;;  %v4055_v12 = vsel %vm4001_vm4, %v3980_v53, %v14774_v1  ;;  %v17877_v2 = vld [vmem:[#allocation234_spill] sm:$0xff]  ;;  %v14900_v6 = vpop.permute.xlu1 %3919  ;;  %v17881_v57 = vld [vmem:[#allocation343_spill] sm:$0xff] }
 0x556   : > { %8137 = vst [vmem:[%s13318_s10 + $0x190] sm:$0xff] %v8399_v14  ;;  %v4852_v49 = vsub.f32 %v17871_v17, %v4692_v42  ;;  %v8431_v55 = vpack.c.bf16 %v8220_v11, %v8219_v41  ;;  %v4629_v60 = vmul.f32 0.33333334, %v4501_v62  ;;  %v4112_v33 = vsel %vm3871_vm3, %v4055_v12, 0.0  ;;  %v17878_v42 = vld [vmem:[#allocation342_spill] sm:$0xff] }
 0x557   : > { %v4915_v4 = vmax.f32 %v4851_v15, 0.0  ;;  %v4790_v13 = vunpack.c.h.bf16 %v14765_v27  ;;  %v4630_v34 = vmul.f32 0.33333334, %v4502_v22  ;;  %v14868_v56 = vadd.f32 %v4112_v33, %v17872_v20  ;;  %v17879_v11 = vld [vmem:[#allocation218_spill] sm:$0xff]  ;;  %v17880_v15 = vld [vmem:[#allocation236_spill] sm:$0xff] }
 0x558   : > { %v4916_v35 = vmax.f32 %v4852_v49, 0.0  ;;  %8297 = vst [vmem:[%s13318_s10 + $0x290] sm:$0xff] %v8431_v55  ;;  %v4693_v1 = vsub.f32 %v14772_v58, %v4629_v60  ;;  %v4024_v37 = vsel %vm4001_vm4, %v14778_v51, %v3982_v39  ;;  %v4056_v47 = vsel %vm4001_vm4, %v3982_v39, %v14778_v51  ;;  %v14906_v49 = vpop.permute.xlu0 %3921  ;;  %v17882_v22 = vld [vmem:[#allocation168_spill] sm:$0xff]  ;;  %v17884_v55 = vld [vmem:[#allocation203_spill] sm:$0xff]  ;;  %v17886_v33 = vld [vmem:[#allocation262_spill] sm:$0xff] }
 0x559   : > { %v4979_v10 = vmin.f32 %v4915_v4, 1.0  ;;  %v4694_v28 = vsub.f32 %v14785_v38, %v4630_v34  ;;  %v14882_v31 = vadd.f32 %v4023_v32, %v13639_v46  ;;  %v4114_v53 = vsel %vm3871_vm3, %v4056_v47, 0.0 }
 0x55a   : > { %v4980_v16 = vmin.f32 %v4916_v35, 1.0  ;;  %v17873_v58 = vunpack.c.l.bf16 %v14765_v27  ;;  %v14889_v44 = vadd.f32 %v4114_v53, %v17874_v26  ;;  %v14892_v8 = vadd.f32 %v4024_v37, %v13705_v21 }
 0x55b   : > { %v5043_v50 = vmul.f32 0.95, %v4979_v10  ;;  %v4854_v38 = vsub.f32 %v4790_v13, %v4694_v28  ;;  %v14895_v46 = vmul.f32 3.0, %v17875_v0  ;;  %v17883_v32 = vunpack.c.l.bf16 %v17882_v22  ;;  %v17891_v0 = vld [vmem:[#allocation53_spill] sm:$0xff] }
 0x55c   : > { %v4853_v18 = vsub.f32 %v17873_v58, %v4693_v1  ;;  %v5044_v51 = vmul.f32 0.95, %v4980_v16  ;;  %v8464_v39 = vpack.c.bf16 %v4980_v16, %v4979_v10  ;;  %v17885_v4 = vunpack.c.l.bf16 %v17884_v55 }
 0x55d   : > { %v5267_v41 = vmul.f32 %v17876_v36, %v5043_v50  ;;  %v5908_v14 = vmul.f32 %v17877_v2, %v5043_v50  ;;  %v6550_v27 = vmul.f32 %v17878_v42, %v5043_v50  ;;  %v4918_v17 = vmax.f32 %v4854_v38, 0.0 }
 0x55e   : > { %v4917_v54 = vmax.f32 %v4853_v18, 0.0  ;;  %v5268_v7 = vmul.f32 %v17879_v11, %v5044_v51  ;;  %v5909_v21 = vmul.f32 %v17880_v15, %v5044_v51  ;;  %v6551_v62 = vmul.f32 %v17881_v57, %v5044_v51  ;;  %7204 = vst [vmem:[%s13269_s12 + $0x98] sm:$0xff] %v8464_v39  ;;  %v14928_v11 = vpop.permute.xlu1 %4182  ;;  %v17894_v57 = vld [vmem:[#allocation54_spill] sm:$0xff] }
 0x55f   : > { %v5331_v12 = vadd.f32 %v5267_v41, %v17883_v32  ;;  %v5972_v60 = vadd.f32 %v5908_v14, %v17885_v4  ;;  %v17887_v35 = vunpack.c.l.bf16 %v17886_v33  ;;  %v17888_v20 = vunpack.c.h.bf16 %v17882_v22  ;;  %v17892_v41 = vld [vmem:[#allocation238_spill] sm:$0xff]  ;;  %v17893_v14 = vld [vmem:[#allocation344_spill] sm:$0xff] }
 0x560   : > { %v4981_v34 = vmin.f32 %v4917_v54, 1.0  ;;  %v17889_v1 = vunpack.c.h.bf16 %v17884_v55  ;;  %v17890_v47 = vunpack.c.h.bf16 %v17886_v33  ;;  %v4982_v28 = vmin.f32 %v4918_v17, 1.0  ;;  %v14926_v54 = vld [vmem:[%s15749_s5 + $0xa8] sm:$0xff]  ;;  %v14931_v17 = vpop.permute.xlu0 %4184  ;;  %v17895_v22 = vld [vmem:[#allocation170_spill] sm:$0xff]  ;;  %v17897_v55 = vld [vmem:[#allocation83_spill] sm:$0xff] }
 0x561   : > { %v6614_v13 = vadd.f32 %v6550_v27, %v17887_v35  ;;  %v5332_v10 = vadd.f32 %v5268_v7, %v17888_v20  ;;  %v7933_v53 = vclamps-f32 %v5331_v12, 1.0  ;;  %v8061_v50 = vclamps-f32 %v5972_v60, 1.0  ;;  %v17898_v60 = vld [vmem:[#allocation11_spill] sm:$0xff] }
 0x562   : > { %v5973_v37 = vadd.f32 %v5909_v21, %v17889_v1  ;;  %v6615_v16 = vadd.f32 %v6551_v62, %v17890_v47  ;;  %v5045_v18 = vmul.f32 0.95, %v4981_v34  ;;  %v5046_v38 = vmul.f32 0.95, %v4982_v28  ;;  %v17902_v1 = vld [vmem:[#allocation263_spill] sm:$0xff] }
 0x563   : > { %v8221_v58 = vclamps-f32 %v6614_v13, 1.0  ;;  %v7934_v26 = vclamps-f32 %v5332_v10, 1.0  ;;  %v8465_v27 = vpack.c.bf16 %v4982_v28, %v4981_v34  ;;  %v17896_v32 = vunpack.c.l.bf16 %v17895_v22  ;;  %v17900_v13 = vld [vmem:[#allocation345_spill] sm:$0xff] }
 0x564   : > { %v8062_v51 = vclamps-f32 %v5973_v37, 1.0  ;;  %v8222_v39 = vclamps-f32 %v6615_v16, 1.0  ;;  %v5269_v36 = vmul.f32 %v17891_v0, %v5045_v18  ;;  %v5910_v2 = vmul.f32 %v17892_v41, %v5045_v18  ;;  %v17904_v16 = vld [vmem:[#allocation239_spill] sm:$0xff] }
 0x565   : > { %v6552_v42 = vmul.f32 %v17893_v14, %v5045_v18  ;;  %v8368_v7 = vpack.c.bf16 %v7934_v26, %v7933_v53  ;;  %v5270_v62 = vmul.f32 %v17894_v57, %v5046_v38  ;;  %v5911_v4 = vmul.f32 %v17897_v55, %v5046_v38  ;;  %7205 = vst [vmem:[%s13269_s12 + $0xa0] sm:$0xff] %v8465_v27 }
 0x566   : > { %v8400_v15 = vpack.c.bf16 %v8062_v51, %v8061_v50  ;;  %v8432_v21 = vpack.c.bf16 %v8222_v39, %v8221_v58  ;;  %v5333_v12 = vadd.f32 %v5269_v36, %v17896_v32  ;;  %v17899_v33 = vunpack.c.l.bf16 %v17898_v60 }
 0x567   : > { %v6553_v34 = vmul.f32 %v17900_v13, %v5046_v38  ;;  %5696 = vst [vmem:[%s13318_s10 + $0x98] sm:$0xff] %v8368_v7  ;;  %v17901_v20 = vunpack.c.h.bf16 %v17895_v22  ;;  %v17903_v37 = vunpack.c.l.bf16 %v17902_v1  ;;  %v4568_v28 = vmul.f32 3.0, %v17904_v16  ;;  %v4739_v7 = vld [vmem:[%s15749_s5 + $0xb0] sm:$0xff] }
 0x568   : > { %v5974_v35 = vadd.f32 %v5910_v2, %v17899_v33  ;;  %8138 = vst [vmem:[%s13318_s10 + $0x198] sm:$0xff] %v8400_v15  ;;  %8298 = vst [vmem:[%s13318_s10 + $0x298] sm:$0xff] %v8432_v21  ;;  %v4791_v53 = vunpack.c.l.bf16 %v14926_v54  ;;  %v7935_v50 = vclamps-f32 %v5333_v12, 1.0  ;;  %v17905_v58 = vunpack.c.h.bf16 %v17898_v60  ;;  %v3984_v15 = vpop.permute.xlu1 %3983 }
 0x569   : > { %v5334_v10 = vadd.f32 %v5270_v62, %v17901_v20  ;;  %v6616_v47 = vadd.f32 %v6552_v42, %v17903_v37  ;;  %v17906_v51 = vunpack.c.h.bf16 %v17902_v1  ;;  %v4286_v36 = vsel %vm4264_vm6, %v14803_v9, %v14864_v43  ;;  %v3986_v62 = vpop.permute.xlu0 %3985 }
 0x56a   : > { %v5975_v18 = vadd.f32 %v5911_v4, %v17905_v58  ;;  %v8063_v26 = vclamps-f32 %v5974_v35, 1.0  ;;  %v4318_v41 = vsel %vm4264_vm6, %v14864_v43, %v14803_v9  ;;  %v4503_v27 = vadd.f32 %v14868_v56, %v4286_v36  ;;  %v15012_v58 = vld [vmem:[%s15749_s5 + $0xb8] sm:$0xff]  ;;  %v17909_v36 = vld [vmem:[#allocation101_spill] sm:$0xff] }
 0x56b   : > { %v6617_v39 = vadd.f32 %v6553_v34, %v17906_v51  ;;  %v7936_v38 = vclamps-f32 %v5334_v10, 1.0  ;;  %v8223_v0 = vclamps-f32 %v6616_v47, 1.0  ;;  %v4376_v42 = vsel %vm4135_vm5, %v4318_v41, 0.0 }
 0x56c   : > { %v8064_v2 = vclamps-f32 %v5975_v18, 1.0  ;;  %v4792_v57 = vunpack.c.h.bf16 %v14926_v54  ;;  %v4504_v9 = vadd.f32 %v14882_v31, %v4376_v42  ;;  %v4569_v43 = vmul.f32 3.0, %v17506_v23  ;;  %v4247_v10 = vpop.permute.xlu1 %4246 }
 0x56d   : > { %v8224_v14 = vclamps-f32 %v6617_v39, 1.0  ;;  %v8369_v21 = vpack.c.bf16 %v7936_v38, %v7935_v50  ;;  %v4631_v12 = vmul.f32 0.33333334, %v4503_v27  ;;  %v4570_v56 = vmul.f32 3.0, %v17512_v61 }
 0x56e   : > { %v8401_v22 = vpack.c.bf16 %v8064_v2, %v8063_v26  ;;  %v4632_v55 = vmul.f32 0.33333334, %v4504_v9  ;;  %v4793_v4 = vunpack.c.l.bf16 %v4739_v7  ;;  %v4287_v60 = vsel %vm4264_vm6, %v14809_v45, %v14870_v5  ;;  %v17907_v26 = vld [vmem:[#allocation147_spill] sm:$0xff] }
 0x56f   : > { %v8433_v32 = vpack.c.bf16 %v8224_v14, %v8223_v0  ;;  %5697 = vst [vmem:[%s13318_s10 + $0xa0] sm:$0xff] %v8369_v21  ;;  %v4319_v31 = vsel %vm4264_vm6, %v14870_v5, %v14809_v45  ;;  %v4695_v23 = vsub.f32 %v14895_v46, %v4631_v12  ;;  %v4505_v54 = vadd.f32 %v14889_v44, %v4287_v60  ;;  %v17908_v0 = vld [vmem:[#allocation100_spill] sm:$0xff]  ;;  %v17910_v12 = vld [vmem:[#allocation55_spill] sm:$0xff] }
 0x570   : > { %8139 = vst [vmem:[%s13318_s10 + $0x1a0] sm:$0xff] %v8401_v22  ;;  %v4378_v61 = vsel %vm4135_vm5, %v4319_v31, 0.0  ;;  %v4025_v33 = vsel %vm4001_vm4, %v14900_v6, %v3984_v15  ;;  %v4696_v35 = vsub.f32 %v4568_v28, %v4632_v55  ;;  %v4794_v13 = vunpack.c.h.bf16 %v4739_v7  ;;  %v17911_v55 = vld [vmem:[#allocation84_spill] sm:$0xff]  ;;  %v17912_v60 = vld [vmem:[#allocation347_spill] sm:$0xff] }
 0x571   : > { %8299 = vst [vmem:[%s13318_s10 + $0x2a0] sm:$0xff] %v8433_v32  ;;  %v4506_v34 = vadd.f32 %v14892_v8, %v4378_v61  ;;  %v4057_v45 = vsel %vm4001_vm4, %v3984_v15, %v14900_v6  ;;  %v4855_v5 = vsub.f32 %v4791_v53, %v4695_v23  ;;  %v4633_v20 = vmul.f32 0.33333334, %v4505_v54  ;;  %v15004_v6 = vpop.permute.xlu0 %4248  ;;  %v17913_v61 = vld [vmem:[#allocation221_spill] sm:$0xff]  ;;  %v17914_v54 = vld [vmem:[#allocation240_spill] sm:$0xff] }
 0x572   : > { %v4116_v46 = vsel %vm3871_vm3, %v4057_v45, 0.0  ;;  %v4026_v44 = vsel %vm4001_vm4, %v14906_v49, %v3986_v62  ;;  %v4856_v1 = vsub.f32 %v4792_v57, %v4696_v35  ;;  %v14999_v47 = vadd.f32 %v4025_v33, %v13813_v25  ;;  %v15033_v57 = vpop.permute.xlu1 %3923  ;;  %v17915_v35 = vld [vmem:[#allocation349_spill] sm:$0xff]  ;;  %v17916_v45 = vld [vmem:[#allocation172_spill] sm:$0xff] }
 0x573   : > { %v4634_v37 = vmul.f32 0.33333334, %v4506_v34  ;;  %v4058_v8 = vsel %vm4001_vm4, %v3986_v62, %v14906_v49  ;;  %v4919_v16 = vmax.f32 %v4855_v5, 0.0  ;;  %v4697_v28 = vsub.f32 %v4569_v43, %v4633_v20 }
 0x574   : > { %v4443_v53 = vadd.f32 %v4116_v46, %v13793_v29  ;;  %v4118_v50 = vsel %vm3871_vm3, %v4058_v8, 0.0  ;;  %v4920_v25 = vmax.f32 %v4856_v1, 0.0  ;;  %v15018_v49 = vadd.f32 %v4026_v44, %v13892_v48  ;;  %v17918_v46 = vld [vmem:[#allocation205_spill] sm:$0xff]  ;;  %v17920_v1 = vld [vmem:[#allocation264_spill] sm:$0xff] }
 0x575   : > { %v4698_v18 = vsub.f32 %v4570_v56, %v4634_v37  ;;  %v15015_v51 = vadd.f32 %v4118_v50, %v17907_v26  ;;  %v4983_v39 = vmin.f32 %v4919_v16, 1.0  ;;  %v4857_v38 = vsub.f32 %v4793_v4, %v4697_v28  ;;  %v15037_v32 = vpop.permute.xlu0 %3925 }
 0x576   : > { %v15021_v29 = vmul.f32 3.0, %v17908_v0  ;;  %v15024_v41 = vmul.f32 3.0, %v17909_v36  ;;  %v4984_v2 = vmin.f32 %v4920_v25, 1.0  ;;  %v4795_v42 = vunpack.c.l.bf16 %v15012_v58 }
 0x577   : > { %v4858_v14 = vsub.f32 %v4794_v13, %v4698_v18  ;;  %v4288_v27 = vsel %vm4264_vm6, %v14928_v11, %v4247_v10  ;;  %v5047_v7 = vmul.f32 0.95, %v4983_v39  ;;  %v4921_v15 = vmax.f32 %v4857_v38, 0.0  ;;  %v3090_v38 = vpop.f32.mrb[164].mxu1 }
 0x578   : > { %v4320_v48 = vsel %vm4264_vm6, %v4247_v10, %v14928_v11  ;;  %v4507_v21 = vadd.f32 %v4443_v53, %v4288_v27  ;;  %v5048_v9 = vmul.f32 0.95, %v4984_v2  ;;  %v8466_v43 = vpack.c.bf16 %v4984_v2, %v4983_v39 }
 0x579   : > { %v4922_v62 = vmax.f32 %v4858_v14, 0.0  ;;  %v4380_v22 = vsel %vm4135_vm5, %v4320_v48, 0.0  ;;  %v5271_v56 = vmul.f32 %v17910_v12, %v5047_v7  ;;  %v5912_v4 = vmul.f32 %v17911_v55, %v5047_v7  ;;  %v17925_v14 = vld [vmem:[#allocation57_spill] sm:$0xff] }
 0x57a   : > { %v6554_v31 = vmul.f32 %v17912_v60, %v5047_v7  ;;  %v4985_v23 = vmin.f32 %v4921_v15, 1.0  ;;  %v5272_v11 = vmul.f32 %v17913_v61, %v5048_v9  ;;  %v5913_v33 = vmul.f32 %v17914_v54, %v5048_v9  ;;  %7206 = vst [vmem:[%s13269_s12 + $0xa8] sm:$0xff] %v8466_v43  ;;  %v15059_v7 = vpop.permute.xlu1 %4186  ;;  %v3092_v15 = vpop.f32.mrb[165].mxu1  ;;  %v17929_v61 = vld [vmem:[#allocation90_spill] sm:$0xff]  ;;  %v17930_v54 = vld [vmem:[#allocation91_spill] sm:$0xff] }
 0x57b   : > { %v6555_v13 = vmul.f32 %v17915_v35, %v5048_v9  ;;  %v4986_v34 = vmin.f32 %v4922_v62, 1.0  ;;  %v17917_v5 = vunpack.c.l.bf16 %v17916_v45  ;;  %v17919_v44 = vunpack.c.l.bf16 %v17918_v46  ;;  %v17926_v62 = vld [vmem:[#allocation85_spill] sm:$0xff]  ;;  %v3094_v55 = vpop.f32.mrb[166].mxu1  ;;  %v17931_v35 = vld [vmem:[#allocation107_spill] sm:$0xff] }
 0x57c   : > { %v17921_v37 = vunpack.c.l.bf16 %v17920_v1  ;;  %v5049_v16 = vmul.f32 0.95, %v4985_v23  ;;  %v17922_v28 = vunpack.c.h.bf16 %v17916_v45  ;;  %v17923_v50 = vunpack.c.h.bf16 %v17918_v46  ;;  %v3095_v45 = vpop.f32.mrb[167].mxu1 }
 0x57d   : > { %v5335_v20 = vadd.f32 %v5271_v56, %v17917_v5  ;;  %v5976_v10 = vadd.f32 %v5912_v4, %v17919_v44  ;;  %v17924_v18 = vunpack.c.h.bf16 %v17920_v1  ;;  %v5050_v39 = vmul.f32 0.95, %v4986_v34  ;;  %v15062_v56 = vpop.permute.xlu0 %4188  ;;  %v17927_v4 = vld [vmem:[#allocation174_spill] sm:$0xff] }
 0x57e   : > { %v6618_v8 = vadd.f32 %v6554_v31, %v17921_v37  ;;  %v5336_v53 = vadd.f32 %v5272_v11, %v17922_v28  ;;  %v5977_v25 = vadd.f32 %v5913_v33, %v17923_v50  ;;  %v5273_v27 = vmul.f32 %v17925_v14, %v5049_v16  ;;  %v17933_v37 = vld [vmem:[#allocation13_spill] sm:$0xff] }
 0x57f   : > { %v6619_v26 = vadd.f32 %v6555_v13, %v17924_v18  ;;  %v7937_v0 = vclamps-f32 %v5335_v20, 1.0  ;;  %v8065_v36 = vclamps-f32 %v5976_v10, 1.0  ;;  %v5274_v12 = vmul.f32 %v17926_v62, %v5050_v39 }
 0x580   : > { %v8225_v2 = vclamps-f32 %v6618_v8, 1.0  ;;  %v7938_v48 = vclamps-f32 %v5336_v53, 1.0  ;;  %v8066_v9 = vclamps-f32 %v5977_v25, 1.0  ;;  %v17928_v60 = vunpack.c.l.bf16 %v17927_v4  ;;  %v17936_v25 = vld [vmem:[#allocation350_spill] sm:$0xff] }
 0x581   : > { %v8226_v43 = vclamps-f32 %v6619_v26, 1.0  ;;  %v5914_v11 = vmul.f32 %v17929_v61, %v5049_v16  ;;  %v5915_v33 = vmul.f32 %v17930_v54, %v5050_v39  ;;  %v6556_v13 = vmul.f32 %v17931_v35, %v5049_v16  ;;  %v17937_v26 = vld [vmem:[#allocation265_spill] sm:$0xff] }
 0x582   : > { %v5337_v31 = vadd.f32 %v5273_v27, %v17928_v60  ;;  %v8370_v5 = vpack.c.bf16 %v7938_v48, %v7937_v0  ;;  %v8402_v20 = vpack.c.bf16 %v8066_v9, %v8065_v36  ;;  %v17932_v44 = vunpack.c.h.bf16 %v17927_v4 }
 0x583   : > { %v8434_v46 = vpack.c.bf16 %v8226_v43, %v8225_v2  ;;  %v17934_v8 = vunpack.c.l.bf16 %v17933_v37  ;;  %v17935_v53 = vunpack.c.h.bf16 %v17933_v37  ;;  %v6557_v18 = vmul.f32 %v17936_v25, %v5050_v39  ;;  %v4741_v39 = vld [vmem:[%s15749_s5 + $0xc0] sm:$0xff] }
 0x584   : > { %v5338_v10 = vadd.f32 %v5274_v12, %v17932_v44  ;;  %v7939_v1 = vclamps-f32 %v5337_v31, 1.0  ;;  %5698 = vst [vmem:[%s13318_s10 + $0xa8] sm:$0xff] %v8370_v5  ;;  %8140 = vst [vmem:[%s13318_s10 + $0x1a8] sm:$0xff] %v8402_v20  ;;  %v17938_v38 = vunpack.c.l.bf16 %v17937_v26  ;;  %v8467_v36 = vpack.c.bf16 %v4986_v34, %v4985_v23  ;;  %v3988_v34 = vpop.permute.xlu1 %3987  ;;  %v17940_v31 = vld [vmem:[#allocation109_spill] sm:$0xff] }
 0x585   : > { %v5978_v28 = vadd.f32 %v5914_v11, %v17934_v8  ;;  %v5979_v50 = vadd.f32 %v5915_v33, %v17935_v53  ;;  %8300 = vst [vmem:[%s13318_s10 + $0x2a8] sm:$0xff] %v8434_v46  ;;  %v4508_v2 = vadd.f32 %v14999_v47, %v4380_v22  ;;  %v17939_v15 = vunpack.c.h.bf16 %v17937_v26  ;;  %v3990_v47 = vpop.permute.xlu0 %3989  ;;  %v17941_v46 = vld [vmem:[#allocation165_spill] sm:$0xff] }
 0x586   : > { %v7940_v16 = vclamps-f32 %v5338_v10, 1.0  ;;  %v6620_v0 = vadd.f32 %v6556_v13, %v17938_v38  ;;  %v4635_v9 = vmul.f32 0.33333334, %v4507_v21  ;;  %7207 = vst [vmem:[%s13269_s12 + $0xb0] sm:$0xff] %v8467_v36  ;;  %v4796_v12 = vunpack.c.h.bf16 %v15012_v58 }
 0x587   : > { %v8067_v14 = vclamps-f32 %v5978_v28, 1.0  ;;  %v8068_v27 = vclamps-f32 %v5979_v50, 1.0  ;;  %v6621_v48 = vadd.f32 %v6557_v18, %v17939_v15  ;;  %v4636_v23 = vmul.f32 0.33333334, %v4508_v2 }
 0x588   : > { %v8371_v43 = vpack.c.bf16 %v7940_v16, %v7939_v1  ;;  %v8227_v62 = vclamps-f32 %v6620_v0, 1.0  ;;  %v4699_v4 = vsub.f32 %v15021_v29, %v4635_v9  ;;  %v4573_v21 = vmul.f32 3.0, %v12793_v63  ;;  %v15124_v1 = vpop.permute.xlu1 %4250  ;;  %v17942_v0 = vld [vmem:[#allocation111_spill] sm:$0xff] }
 0x589   : > { %v8403_v22 = vpack.c.bf16 %v8068_v27, %v8067_v14  ;;  %v8228_v55 = vclamps-f32 %v6621_v48, 1.0  ;;  %v4700_v60 = vsub.f32 %v15024_v41, %v4636_v23  ;;  %v4574_v61 = vmul.f32 3.0, %v17940_v31  ;;  %v17945_v48 = vld [vmem:[#allocation59_spill] sm:$0xff]  ;;  %v17948_v23 = vld [vmem:[#allocation88_spill] sm:$0xff] }
 0x58a   : > { %5699 = vst [vmem:[%s13318_s10 + $0xb0] sm:$0xff] %v8371_v43  ;;  %v4797_v11 = vunpack.c.l.bf16 %v4741_v39  ;;  %v4289_v54 = vsel %vm4264_vm6, %v14931_v17, %v15004_v6  ;;  %v4859_v35 = vsub.f32 %v4795_v42, %v4699_v4  ;;  %v4321_v63 = vsel %vm4264_vm6, %v15004_v6, %v14931_v17  ;;  %v17947_v43 = vld [vmem:[#allocation351_spill] sm:$0xff] }
 0x58b   : > { %8141 = vst [vmem:[%s13318_s10 + $0x1b0] sm:$0xff] %v8403_v22  ;;  %v8435_v33 = vpack.c.bf16 %v8228_v55, %v8227_v62  ;;  %v4509_v29 = vadd.f32 %v15015_v51, %v4289_v54  ;;  %v4860_v41 = vsub.f32 %v4796_v12, %v4700_v60  ;;  %v4382_v13 = vsel %vm4135_vm5, %v4321_v63, 0.0  ;;  %v17950_v55 = vld [vmem:[#allocation352_spill] sm:$0xff] }
 0x58c   : > { %v4027_v45 = vsel %vm4001_vm4, %v15033_v57, %v3988_v34  ;;  %v4059_v58 = vsel %vm4001_vm4, %v3988_v34, %v15033_v57  ;;  %v4923_v42 = vmax.f32 %v4859_v35, 0.0  ;;  %v4510_v5 = vadd.f32 %v15018_v49, %v4382_v13  ;;  %v15126_v57 = vpop.permute.xlu0 %4252  ;;  %v15155_v60 = vpop.permute.xlu1 %3927 }
 0x58d   : > { %8301 = vst [vmem:[%s13318_s10 + $0x2b0] sm:$0xff] %v8435_v33  ;;  %v4637_v20 = vmul.f32 0.33333334, %v4509_v29  ;;  %v4120_v17 = vsel %vm3871_vm3, %v4059_v58, 0.0  ;;  %v4924_v6 = vmax.f32 %v4860_v41, 0.0  ;;  %v4798_v51 = vunpack.c.h.bf16 %v4741_v39  ;;  %v17946_v39 = vld [vmem:[#allocation92_spill] sm:$0xff] }
 0x58e   : > { %v15119_v44 = vadd.f32 %v4120_v17, %v17941_v46  ;;  %v4028_v10 = vsel %vm4001_vm4, %v15037_v32, %v3990_v47  ;;  %v4987_v37 = vmin.f32 %v4923_v42, 1.0  ;;  %v4638_v8 = vmul.f32 0.33333334, %v4510_v5  ;;  %v17953_v33 = vld [vmem:[#allocation16_spill] sm:$0xff]  ;;  %v17955_v29 = vld [vmem:[#allocation266_spill] sm:$0xff]  ;;  %v15174_v46 = vld [vmem:[%s15749_s5 + $0xc8] sm:$0xff] }
 0x58f   : > { %v4701_v49 = vsub.f32 %v4573_v21, %v4637_v20  ;;  %v4060_v28 = vsel %vm4001_vm4, %v3990_v47, %v15037_v32  ;;  %v4988_v53 = vmin.f32 %v4924_v6, 1.0  ;;  %v15132_v50 = vadd.f32 %v4027_v45, %v14006_v59  ;;  %v17943_v32 = vld [vmem:[#allocation242_spill] sm:$0xff]  ;;  %v17944_v59 = vld [vmem:[#allocation112_spill] sm:$0xff]  ;;  %v17949_v47 = vld [vmem:[#allocation93_spill] sm:$0xff] }
 0x590   : > { %v4122_v25 = vsel %vm3871_vm3, %v4060_v28, 0.0  ;;  %v15137_v18 = vadd.f32 %v4028_v10, %v14015_v24  ;;  %v5051_v16 = vmul.f32 0.95, %v4987_v37  ;;  %v4702_v26 = vsub.f32 %v4574_v61, %v4638_v8  ;;  %v15157_v31 = vpop.permute.xlu0 %3929  ;;  %v17951_v61 = vld [vmem:[#allocation176_spill] sm:$0xff] }
 0x591   : > { %v4861_v38 = vsub.f32 %v4797_v11, %v4701_v49  ;;  %v15140_v36 = vmul.f32 3.0, %v17942_v0  ;;  %v5052_v2 = vmul.f32 0.95, %v4988_v53  ;;  %v8468_v14 = vpack.c.bf16 %v4988_v53, %v4987_v37 }
 0x592   : > { %v15143_v27 = vadd.f32 %v4122_v25, %v17943_v32  ;;  %v15146_v15 = vmul.f32 3.0, %v17944_v59  ;;  %v5275_v9 = vmul.f32 %v17945_v48, %v5051_v16  ;;  %v5916_v24 = vmul.f32 %v17946_v39, %v5051_v16  ;;  %v17960_v48 = vld [vmem:[#allocation61_spill] sm:$0xff]  ;;  %v15182_v39 = vpop.permute.xlu1 %4190 }
 0x593   : > { %v6558_v62 = vmul.f32 %v17947_v43, %v5051_v16  ;;  %v4862_v12 = vsub.f32 %v4798_v51, %v4702_v26  ;;  %v5276_v34 = vmul.f32 %v17948_v23, %v5052_v2  ;;  %v5917_v22 = vmul.f32 %v17949_v47, %v5052_v2  ;;  %7208 = vst [vmem:[%s13269_s12 + $0xb8] sm:$0xff] %v8468_v14  ;;  %v17961_v43 = vld [vmem:[#allocation62_spill] sm:$0xff] }
 0x594   : > { %v6559_v4 = vmul.f32 %v17950_v55, %v5052_v2  ;;  %v4925_v21 = vmax.f32 %v4861_v38, 0.0  ;;  %v17952_v11 = vunpack.c.l.bf16 %v17951_v61  ;;  %v17954_v35 = vunpack.c.l.bf16 %v17953_v33 }
 0x595   : > { %v17956_v41 = vunpack.c.l.bf16 %v17955_v29  ;;  %v4926_v45 = vmax.f32 %v4862_v12, 0.0  ;;  %v17957_v58 = vunpack.c.h.bf16 %v17951_v61  ;;  %v17958_v5 = vunpack.c.h.bf16 %v17953_v33  ;;  %v17962_v12 = vld [vmem:[#allocation102_spill] sm:$0xff] }
 0x596   : > { %v5339_v54 = vadd.f32 %v5275_v9, %v17952_v11  ;;  %v5980_v63 = vadd.f32 %v5916_v24, %v17954_v35  ;;  %v17959_v17 = vunpack.c.h.bf16 %v17955_v29  ;;  %v4989_v51 = vmin.f32 %v4925_v21, 1.0  ;;  %v15184_v24 = vpop.permute.xlu0 %4192  ;;  %v17967_v11 = vld [vmem:[#allocation354_spill] sm:$0xff] }
 0x597   : > { %v6622_v13 = vadd.f32 %v6558_v62, %v17956_v41  ;;  %v5340_v42 = vadd.f32 %v5276_v34, %v17957_v58  ;;  %v5981_v20 = vadd.f32 %v5917_v22, %v17958_v5  ;;  %v4990_v49 = vmin.f32 %v4926_v45, 1.0  ;;  %v17963_v34 = vld [vmem:[#allocation104_spill] sm:$0xff]  ;;  %v17964_v22 = vld [vmem:[#allocation353_spill] sm:$0xff]  ;;  %v17969_v41 = vld [vmem:[#allocation18_spill] sm:$0xff] }
 0x598   : > { %v6623_v6 = vadd.f32 %v6559_v4, %v17959_v17  ;;  %v7941_v10 = vclamps-f32 %v5339_v54, 1.0  ;;  %v8069_v37 = vclamps-f32 %v5980_v63, 1.0  ;;  %v5053_v16 = vmul.f32 0.95, %v4989_v51  ;;  %v17965_v4 = vld [vmem:[#allocation178_spill] sm:$0xff]  ;;  %v17972_v5 = vld [vmem:[#allocation267_spill] sm:$0xff] }
 0x599   : > { %v8229_v8 = vclamps-f32 %v6622_v13, 1.0  ;;  %v7942_v28 = vclamps-f32 %v5340_v42, 1.0  ;;  %v8070_v53 = vclamps-f32 %v5981_v20, 1.0  ;;  %v5054_v26 = vmul.f32 0.95, %v4990_v49 }
 0x59a   : > { %v8230_v25 = vclamps-f32 %v6623_v6, 1.0  ;;  %v8469_v38 = vpack.c.bf16 %v4990_v49, %v4989_v51  ;;  %v4799_v0 = vunpack.c.l.bf16 %v15174_v46  ;;  %v4290_v2 = vsel %vm4264_vm6, %v15059_v7, %v15124_v1 }
 0x59b   : > { %v8372_v14 = vpack.c.bf16 %v7942_v28, %v7941_v10  ;;  %v8404_v32 = vpack.c.bf16 %v8070_v53, %v8069_v37  ;;  %v5277_v9 = vmul.f32 %v17960_v48, %v5053_v16  ;;  %v5278_v62 = vmul.f32 %v17961_v43, %v5054_v26  ;;  %v4743_v28 = vld [vmem:[%s15749_s5 + $0xd0] sm:$0xff] }
 0x59c   : > { %v8436_v59 = vpack.c.bf16 %v8230_v25, %v8229_v8  ;;  %v5918_v23 = vmul.f32 %v17962_v12, %v5053_v16  ;;  %v5919_v47 = vmul.f32 %v17963_v34, %v5054_v26  ;;  %v6560_v55 = vmul.f32 %v17964_v22, %v5053_v16  ;;  %7209 = vst [vmem:[%s13269_s12 + $0xc0] sm:$0xff] %v8469_v38  ;;  %v3992_v38 = vpop.permute.xlu1 %3991  ;;  %v17975_v22 = vld [vmem:[#allocation47_spill] sm:$0xff] }
 0x59d   : > { %5700 = vst [vmem:[%s13318_s10 + $0xb8] sm:$0xff] %v8372_v14  ;;  %8142 = vst [vmem:[%s13318_s10 + $0x1b8] sm:$0xff] %v8404_v32  ;;  %v17966_v21 = vunpack.c.l.bf16 %v17965_v4  ;;  %v6561_v54 = vmul.f32 %v17967_v11, %v5054_v26  ;;  %v4322_v33 = vsel %vm4264_vm6, %v15124_v1, %v15059_v7  ;;  %v4511_v35 = vadd.f32 %v15119_v44, %v4290_v2  ;;  %v3994_v2 = vpop.permute.xlu0 %3993  ;;  %v17976_v11 = vld [vmem:[#allocation200_spill] sm:$0xff] }
 0x59e   : > { %8302 = vst [vmem:[%s13318_s10 + $0x2b8] sm:$0xff] %v8436_v59  ;;  %v17968_v63 = vunpack.c.h.bf16 %v17965_v4  ;;  %v17970_v13 = vunpack.c.l.bf16 %v17969_v41  ;;  %v17971_v58 = vunpack.c.h.bf16 %v17969_v41  ;;  %v17973_v20 = vunpack.c.l.bf16 %v17972_v5 }
 0x59f   : > { %v5341_v61 = vadd.f32 %v5277_v9, %v17966_v21  ;;  %v17974_v51 = vunpack.c.h.bf16 %v17972_v5  ;;  %v4384_v7 = vsel %vm4135_vm5, %v4322_v33, 0.0  ;;  %v4639_v44 = vmul.f32 0.33333334, %v4511_v35  ;;  %v17977_v35 = vld [vmem:[#allocation121_spill] sm:$0xff] }
 0x5a0   : > { %v5342_v29 = vadd.f32 %v5278_v62, %v17968_v63  ;;  %v5982_v45 = vadd.f32 %v5918_v23, %v17970_v13  ;;  %v5983_v42 = vadd.f32 %v5919_v47, %v17971_v58  ;;  %v6624_v17 = vadd.f32 %v6560_v55, %v17973_v20  ;;  %v4255_v58 = vpop.permute.xlu1 %4254  ;;  %v17978_v5 = vld [vmem:[#allocation201_spill] sm:$0xff] }
 0x5a1   : > { %v7943_v6 = vclamps-f32 %v5341_v61, 1.0  ;;  %v6625_v10 = vadd.f32 %v6561_v54, %v17974_v51  ;;  %v4800_v25 = vunpack.c.h.bf16 %v15174_v46  ;;  %v4512_v16 = vadd.f32 %v15132_v50, %v4384_v7  ;;  %v15257_v61 = vpop.permute.xlu0 %4256 }
 0x5a2   : > { %v7944_v1 = vclamps-f32 %v5342_v29, 1.0  ;;  %v8071_v37 = vclamps-f32 %v5982_v45, 1.0  ;;  %v8072_v8 = vclamps-f32 %v5983_v42, 1.0  ;;  %v8231_v49 = vclamps-f32 %v6624_v17, 1.0  ;;  %v17979_v17 = vld [vmem:[#allocation123_spill] sm:$0xff] }
 0x5a3   : > { %v8232_v53 = vclamps-f32 %v6625_v10, 1.0  ;;  %v4703_v26 = vsub.f32 %v15140_v36, %v4639_v44  ;;  %v4577_v59 = vmul.f32 3.0, %v17598_v19  ;;  %v4578_v48 = vmul.f32 3.0, %v12875_v30  ;;  %v17980_v10 = vld [vmem:[#allocation96_spill] sm:$0xff]  ;;  %v17981_v44 = vld [vmem:[#allocation105_spill] sm:$0xff] }
 0x5a4   : > { %v8373_v14 = vpack.c.bf16 %v7944_v1, %v7943_v6  ;;  %v8405_v32 = vpack.c.bf16 %v8072_v8, %v8071_v37  ;;  %v4640_v43 = vmul.f32 0.33333334, %v4512_v16  ;;  %v4801_v12 = vunpack.c.l.bf16 %v4743_v28  ;;  %v17982_v37 = vld [vmem:[#allocation355_spill] sm:$0xff] }
 0x5a5   : > { %v8437_v9 = vpack.c.bf16 %v8232_v53, %v8231_v49  ;;  %v4863_v62 = vsub.f32 %v4799_v0, %v4703_v26  ;;  %v4291_v50 = vsel %vm4264_vm6, %v15062_v56, %v15126_v57  ;;  %v4323_v36 = vsel %vm4264_vm6, %v15126_v57, %v15062_v56  ;;  %v17983_v26 = vld [vmem:[#allocation180_spill] sm:$0xff] }
 0x5a6   : > { %5701 = vst [vmem:[%s13318_s10 + $0xc0] sm:$0xff] %v8373_v14  ;;  %8143 = vst [vmem:[%s13318_s10 + $0x1c0] sm:$0xff] %v8405_v32  ;;  %v4029_v30 = vsel %vm4001_vm4, %v15155_v60, %v3992_v38  ;;  %v4061_v19 = vsel %vm4001_vm4, %v3992_v38, %v15155_v60  ;;  %v4704_v46 = vsub.f32 %v15146_v15, %v4640_v43  ;;  %v4386_v23 = vsel %vm4135_vm5, %v4323_v36, 0.0  ;;  %v17985_v14 = vld [vmem:[#allocation21_spill] sm:$0xff] }
 0x5a7   : > { %8303 = vst [vmem:[%s13318_s10 + $0x2c0] sm:$0xff] %v8437_v9  ;;  %v4927_v0 = vmax.f32 %v4863_v62, 0.0  ;;  %v4513_v34 = vadd.f32 %v15143_v27, %v4291_v50  ;;  %v4802_v47 = vunpack.c.h.bf16 %v4743_v28  ;;  %v4514_v56 = vadd.f32 %v15137_v18, %v4386_v23  ;;  %v15255_v27 = vld [vmem:[%s15749_s5 + $0xd8] sm:$0xff]  ;;  %v15288_v62 = vpop.permute.xlu0 %3933  ;;  %v17990_v23 = vld [vmem:[#allocation106_spill] sm:$0xff] }
 0x5a8   : > { %v4124_v57 = vsel %vm3871_vm3, %v4061_v19, 0.0  ;;  %v4452_v55 = vadd.f32 %v4029_v30, %v17975_v22  ;;  %v4864_v4 = vsub.f32 %v4800_v25, %v4704_v46  ;;  %v15250_v15 = vsel %vm4001_vm4, %v15157_v31, %v3994_v2  ;;  %v17989_v19 = vld [vmem:[#allocation97_spill] sm:$0xff] }
 0x5a9   : > { %v4991_v21 = vmin.f32 %v4927_v0, 1.0  ;;  %v4641_v60 = vmul.f32 0.33333334, %v4513_v34  ;;  %v4642_v18 = vmul.f32 0.33333334, %v4514_v56  ;;  %v4451_v54 = vadd.f32 %v4124_v57, %v17976_v11  ;;  %v15295_v56 = vpop.permute.xlu1 %3931  ;;  %v17991_v57 = vld [vmem:[#allocation122_spill] sm:$0xff] }
 0x5aa   : > { %v4062_v33 = vsel %vm4001_vm4, %v3994_v2, %v15157_v31  ;;  %v15264_v63 = vmul.f32 3.0, %v17977_v35  ;;  %v4928_v29 = vmax.f32 %v4864_v4, 0.0  ;;  %v15272_v6 = vmul.f32 3.0, %v17979_v17 }
 0x5ab   : > { %v5055_v41 = vmul.f32 0.95, %v4991_v21  ;;  %v4705_v13 = vsub.f32 %v4577_v59, %v4641_v60  ;;  %v4126_v45 = vsel %vm3871_vm3, %v4062_v33, 0.0  ;;  %v4706_v42 = vsub.f32 %v4578_v48, %v4642_v18  ;;  %v17987_v48 = vld [vmem:[#allocation268_spill] sm:$0xff] }
 0x5ac   : > { %v15269_v20 = vadd.f32 %v4126_v45, %v17978_v5  ;;  %v4803_v51 = vunpack.c.l.bf16 %v15255_v27  ;;  %v4992_v31 = vmin.f32 %v4928_v29, 1.0  ;;  %v4804_v53 = vunpack.c.h.bf16 %v15255_v27 }
 0x5ad   : > { %v5279_v7 = vmul.f32 %v17980_v10, %v5055_v41  ;;  %v5920_v1 = vmul.f32 %v17981_v44, %v5055_v41  ;;  %v6562_v8 = vmul.f32 %v17982_v37, %v5055_v41  ;;  %v4865_v49 = vsub.f32 %v4801_v12, %v4705_v13 }
 0x5ae   : > { %v4866_v28 = vsub.f32 %v4802_v47, %v4706_v42  ;;  %v4292_v25 = vsel %vm4264_vm6, %v15182_v39, %v4255_v58  ;;  %v5056_v16 = vmul.f32 0.95, %v4992_v31  ;;  %v17984_v38 = vunpack.c.l.bf16 %v17983_v26 }
 0x5af   : > { %v17986_v32 = vunpack.c.l.bf16 %v17985_v14  ;;  %v17988_v9 = vunpack.c.l.bf16 %v17987_v48  ;;  %v8470_v12 = vpack.c.bf16 %v4992_v31, %v4991_v21  ;;  %v4929_v50 = vmax.f32 %v4865_v49, 0.0 }
 0x5b0   : > { %v5343_v2 = vadd.f32 %v5279_v7, %v17984_v38  ;;  %v4930_v36 = vmax.f32 %v4866_v28, 0.0  ;;  %v4324_v30 = vsel %vm4264_vm6, %v4255_v58, %v15182_v39  ;;  %v5280_v46 = vmul.f32 %v17989_v19, %v5056_v16  ;;  %v15307_v7 = vpop.permute.xlu0 %4196 }
 0x5b1   : > { %v5984_v59 = vadd.f32 %v5920_v1, %v17986_v32  ;;  %v6626_v43 = vadd.f32 %v6562_v8, %v17988_v9  ;;  %v5921_v34 = vmul.f32 %v17990_v23, %v5056_v16  ;;  %v6563_v22 = vmul.f32 %v17991_v57, %v5056_v16  ;;  %7210 = vst [vmem:[%s13269_s12 + $0xc8] sm:$0xff] %v8470_v12  ;;  %v17995_v1 = vld [vmem:[#allocation98_spill] sm:$0xff]  ;;  %v17996_v8 = vld [vmem:[#allocation103_spill] sm:$0xff] }
 0x5b2   : > { %v7945_v0 = vclamps-f32 %v5343_v2, 1.0  ;;  %v4993_v60 = vmin.f32 %v4929_v50, 1.0  ;;  %v4994_v21 = vmin.f32 %v4930_v36, 1.0  ;;  %v17992_v18 = vunpack.c.h.bf16 %v17983_v26  ;;  %v17998_v26 = vld [vmem:[#allocation115_spill] sm:$0xff]  ;;  %v17999_v2 = vld [vmem:[#allocation356_spill] sm:$0xff]  ;;  %v18003_v50 = vld [vmem:[#allocation22_spill] sm:$0xff] }
 0x5b3   : > { %v8073_v47 = vclamps-f32 %v5984_v59, 1.0  ;;  %v8233_v4 = vclamps-f32 %v6626_v43, 1.0  ;;  %v17993_v33 = vunpack.c.h.bf16 %v17985_v14  ;;  %v4388_v35 = vsel %vm4135_vm5, %v4324_v30, 0.0  ;;  %v15315_v14 = vpop.permute.xlu1 %4194  ;;  %v18000_v59 = vld [vmem:[#allocation182_spill] sm:$0xff] }
 0x5b4   : > { %v5344_v11 = vadd.f32 %v5280_v46, %v17992_v18  ;;  %v4515_v29 = vadd.f32 %v4451_v54, %v4292_v25  ;;  %v17994_v41 = vunpack.c.h.bf16 %v17987_v48  ;;  %v5057_v45 = vmul.f32 0.95, %v4993_v60  ;;  %v17997_v54 = vld [vmem:[#allocation113_spill] sm:$0xff] }
 0x5b5   : > { %v5985_v39 = vadd.f32 %v5921_v34, %v17993_v33  ;;  %v5058_v58 = vmul.f32 0.95, %v4994_v21  ;;  %v8471_v42 = vpack.c.bf16 %v4994_v21, %v4993_v60  ;;  %v4516_v31 = vadd.f32 %v4452_v55, %v4388_v35  ;;  %v18007_v34 = vld [vmem:[#allocation269_spill] sm:$0xff] }
 0x5b6   : > { %v6627_v13 = vadd.f32 %v6563_v22, %v17994_v41  ;;  %v7946_v5 = vclamps-f32 %v5344_v11, 1.0  ;;  %v4643_v10 = vmul.f32 0.33333334, %v4515_v29  ;;  %v5281_v37 = vmul.f32 %v17995_v1, %v5057_v45  ;;  %v3998_v41 = vpop.permute.xlu0 %3997  ;;  %v18014_v1 = vld [vmem:[#allocation130_spill] sm:$0xff] }
 0x5b7   : > { %v8074_v17 = vclamps-f32 %v5985_v39, 1.0  ;;  %v5282_v49 = vmul.f32 %v17996_v8, %v5058_v58  ;;  %v5922_v28 = vmul.f32 %v17997_v54, %v5057_v45  ;;  %7211 = vst [vmem:[%s13269_s12 + $0xd0] sm:$0xff] %v8471_v42  ;;  %v5923_v38 = vmul.f32 %v17998_v26, %v5058_v58  ;;  %v4745_v8 = vld [vmem:[%s15749_s5 + $0xe0] sm:$0xff] }
 0x5b8   : > { %v8234_v44 = vclamps-f32 %v6627_v13, 1.0  ;;  %v8374_v25 = vpack.c.bf16 %v7946_v5, %v7945_v0  ;;  %v6564_v55 = vmul.f32 %v17999_v2, %v5057_v45  ;;  %v18001_v48 = vunpack.c.l.bf16 %v18000_v59  ;;  %v18006_v0 = vld [vmem:[#allocation357_spill] sm:$0xff] }
 0x5b9   : > { %v8406_v16 = vpack.c.bf16 %v8074_v17, %v8073_v47  ;;  %v18002_v43 = vunpack.c.h.bf16 %v18000_v59  ;;  %v18004_v36 = vunpack.c.l.bf16 %v18003_v50  ;;  %v18005_v19 = vunpack.c.h.bf16 %v18003_v50  ;;  %v18011_v45 = vld [vmem:[#allocation361_spill] sm:$0xff]  ;;  %v18013_v17 = vld [vmem:[#allocation50_spill] sm:$0xff] }
 0x5ba   : > { %v8438_v32 = vpack.c.bf16 %v8234_v44, %v8233_v4  ;;  %v5345_v9 = vadd.f32 %v5281_v37, %v18001_v48  ;;  %5702 = vst [vmem:[%s13318_s10 + $0xc8] sm:$0xff] %v8374_v25  ;;  %v6565_v23 = vmul.f32 %v18006_v0, %v5058_v58  ;;  %v18008_v47 = vunpack.c.l.bf16 %v18007_v34  ;;  %v18016_v0 = vld [vmem:[#allocation110_spill] sm:$0xff] }
 0x5bb   : > { %v5346_v12 = vadd.f32 %v5282_v49, %v18002_v43  ;;  %v5986_v30 = vadd.f32 %v5922_v28, %v18004_v36  ;;  %8144 = vst [vmem:[%s13318_s10 + $0x1c8] sm:$0xff] %v8406_v16  ;;  %v5987_v46 = vadd.f32 %v5923_v38, %v18005_v19  ;;  %v4644_v22 = vmul.f32 0.33333334, %v4516_v31  ;;  %v3996_v49 = vpop.permute.xlu1 %3995  ;;  %v18015_v28 = vld [vmem:[#allocation131_spill] sm:$0xff] }
 0x5bc   : > { %v6628_v57 = vadd.f32 %v6564_v55, %v18008_v47  ;;  %8304 = vst [vmem:[%s13318_s10 + $0x2c8] sm:$0xff] %v8438_v32  ;;  %v7947_v4 = vclamps-f32 %v5345_v9, 1.0  ;;  %v4707_v18 = vsub.f32 %v15264_v63, %v4643_v10  ;;  %v18009_v33 = vunpack.c.h.bf16 %v18007_v34  ;;  %v18017_v34 = vld [vmem:[#allocation116_spill] sm:$0xff] }
 0x5bd   : > { %v7948_v60 = vclamps-f32 %v5346_v12, 1.0  ;;  %v8075_v21 = vclamps-f32 %v5986_v30, 1.0  ;;  %v8076_v11 = vclamps-f32 %v5987_v46, 1.0  ;;  %v4708_v29 = vsub.f32 %v15272_v6, %v4644_v22 }
 0x5be   : > { %v6629_v39 = vadd.f32 %v6565_v23, %v18009_v33  ;;  %v8235_v35 = vclamps-f32 %v6628_v57, 1.0  ;;  %v18010_v13 = vunpack.c.h.bf16 %v17819_v40  ;;  %v18012_v58 = vclamps-f32 %v18011_v45, 1.0  ;;  %v18018_v57 = vld [vmem:[#allocation358_spill] sm:$0xff] }
 0x5bf   : > { %v8375_v5 = vpack.c.bf16 %v7948_v60, %v7947_v4  ;;  %v4454_v63 = vadd.f32 %v15250_v15, %v18013_v17  ;;  %v4867_v31 = vsub.f32 %v4803_v51, %v4707_v18  ;;  %v8407_v10 = vpack.c.bf16 %v8076_v11, %v8075_v21  ;;  %v18019_v60 = vld [vmem:[#allocation114_spill] sm:$0xff] }
 0x5c0   : > { %v15339_v42 = vsub.f32 %v18012_v58, %v18010_v13  ;;  %v8236_v44 = vclamps-f32 %v6629_v39, 1.0  ;;  %v4868_v6 = vsub.f32 %v4804_v53, %v4708_v29  ;;  %v4581_v37 = vmul.f32 3.0, %v18014_v1  ;;  %v18020_v18 = vld [vmem:[#allocation118_spill] sm:$0xff]  ;;  %v18022_v29 = vld [vmem:[#allocation184_spill] sm:$0xff] }
 0x5c1   : > { %5703 = vst [vmem:[%s13318_s10 + $0xd0] sm:$0xff] %v8375_v5  ;;  %v4931_v54 = vmax.f32 %v4867_v31, 0.0  ;;  %v4582_v15 = vmul.f32 3.0, %v18015_v28  ;;  %v4293_v51 = vsel %vm4264_vm6, %v15184_v24, %v15257_v61  ;;  %v4325_v27 = vsel %vm4264_vm6, %v15257_v61, %v15184_v24  ;;  %8145 = vst [vmem:[%s13318_s10 + $0x1d0] sm:$0xff] %v8407_v10  ;;  %v15372_v61 = vpop.permute.xlu0 %3873  ;;  %v18021_v33 = vld [vmem:[#allocation362_spill] sm:$0xff] }
 0x5c2   : > { %v8439_v53 = vpack.c.bf16 %v8236_v44, %v8235_v35  ;;  %v4932_v25 = vmax.f32 %v4868_v6, 0.0  ;;  %v4390_v16 = vsel %vm4135_vm5, %v4325_v27, 0.0  ;;  %v4517_v26 = vadd.f32 %v15269_v20, %v4293_v51  ;;  %v18026_v5 = vld [vmem:[#allocation270_spill] sm:$0xff] }
 0x5c3   : > { %v4995_v38 = vmin.f32 %v4931_v54, 1.0  ;;  %v4805_v2 = vunpack.c.l.bf16 %v4745_v8  ;;  %v4518_v55 = vadd.f32 %v4454_v63, %v4390_v16  ;;  %v4063_v32 = vsel %vm4001_vm4, %v3996_v49, %v15295_v56 }
 0x5c4   : > { %8305 = vst [vmem:[%s13318_s10 + $0x2d0] sm:$0xff] %v8439_v53  ;;  %v4996_v59 = vmin.f32 %v4932_v25, 1.0  ;;  %v4806_v48 = vunpack.c.h.bf16 %v4745_v8  ;;  %v4645_v9 = vmul.f32 0.33333334, %v4517_v26  ;;  %v4031_v24 = vsel %vm4001_vm4, %v15295_v56, %v3996_v49  ;;  %v15382_v56 = vpop.permute.xlu1 %4258 }
 0x5c5   : > { %v5059_v43 = vmul.f32 0.95, %v4995_v38  ;;  %v4646_v20 = vmul.f32 0.33333334, %v4518_v55  ;;  %v4128_v12 = vsel %vm3871_vm3, %v4063_v32, 0.0  ;;  %v4032_v50 = vsel %vm4001_vm4, %v15288_v62, %v3998_v41  ;;  %v15403_v54 = vpop.permute.xlu0 %4136  ;;  %v18031_v55 = vld [vmem:[#allocation278_spill] sm:$0xff] }
 0x5c6   : > { %v5060_v36 = vmul.f32 0.95, %v4996_v59  ;;  %v8472_v30 = vpack.c.bf16 %v4996_v59, %v4995_v38  ;;  %v4709_v19 = vsub.f32 %v4581_v37, %v4645_v9  ;;  %v4064_v46 = vsel %vm4001_vm4, %v3998_v41, %v15288_v62  ;;  %v18024_v41 = vld [vmem:[#allocation24_spill] sm:$0xff] }
 0x5c7   : > { %v5283_v23 = vmul.f32 %v18016_v0, %v5059_v43  ;;  %v5924_v47 = vmul.f32 %v18017_v34, %v5059_v43  ;;  %v6566_v22 = vmul.f32 %v18018_v57, %v5059_v43  ;;  %v4710_v4 = vsub.f32 %v4582_v15, %v4646_v20  ;;  %v18032_v59 = vld [vmem:[#allocation280_spill] sm:$0xff] }
 0x5c8   : > { %v5284_v21 = vmul.f32 %v18019_v60, %v5060_v36  ;;  %v5925_v11 = vmul.f32 %v18020_v18, %v5060_v36  ;;  %v6567_v39 = vmul.f32 %v18021_v33, %v5060_v36  ;;  %7212 = vst [vmem:[%s13269_s12 + $0xd8] sm:$0xff] %v8472_v30  ;;  %v4869_v35 = vsub.f32 %v4805_v2, %v4709_v19  ;;  %v15405_v38 = vpop.permute.xlu1 %3935  ;;  %v18039_v33 = vld [vmem:[#allocation68_spill] sm:$0xff] }
 0x5c9   : > { %v18023_v13 = vunpack.c.l.bf16 %v18022_v29  ;;  %v18025_v45 = vunpack.c.l.bf16 %v18024_v41  ;;  %v18027_v17 = vunpack.c.l.bf16 %v18026_v5  ;;  %v4870_v31 = vsub.f32 %v4806_v48, %v4710_v4 }
 0x5ca   : > { %v18028_v10 = vunpack.c.h.bf16 %v18022_v29  ;;  %v18029_v6 = vunpack.c.h.bf16 %v18024_v41  ;;  %v18030_v37 = vunpack.c.h.bf16 %v18026_v5  ;;  %v4933_v49 = vmax.f32 %v4869_v35, 0.0  ;;  %v18040_v35 = vld [vmem:[#allocation127_spill] sm:$0xff]  ;;  %v18041_v29 = vld [vmem:[#allocation365_spill] sm:$0xff] }
 0x5cb   : > { %v5347_v62 = vadd.f32 %v5283_v23, %v18023_v13  ;;  %v5988_v58 = vadd.f32 %v5924_v47, %v18025_v45  ;;  %v6630_v63 = vadd.f32 %v6566_v22, %v18027_v17  ;;  %v4934_v27 = vmax.f32 %v4870_v31, 0.0  ;;  %v18033_v23 = vld [vmem:[#allocation167_spill] sm:$0xff]  ;;  %v18034_v47 = vld [vmem:[#allocation133_spill] sm:$0xff]  ;;  %v18036_v22 = vld [vmem:[#allocation126_spill] sm:$0xff] }
 0x5cc   : > { %v5348_v44 = vadd.f32 %v5284_v21, %v18028_v10  ;;  %v5989_v1 = vadd.f32 %v5925_v11, %v18029_v6  ;;  %v6631_v8 = vadd.f32 %v6567_v39, %v18030_v37  ;;  %v4997_v26 = vmin.f32 %v4933_v49, 1.0  ;;  %v18038_v21 = vld [vmem:[#allocation148_spill] sm:$0xff]  ;;  %v3938_v11 = vpop.permute.xlu0 %3937  ;;  %v18043_v45 = vld [vmem:[#allocation186_spill] sm:$0xff]  ;;  %v18045_v17 = vld [vmem:[#allocation27_spill] sm:$0xff]  ;;  %v15439_v37 = vpop.permute.xlu1 %4198 }
 0x5cd   : > { %v7949_v28 = vclamps-f32 %v5347_v62, 1.0  ;;  %v8077_v15 = vclamps-f32 %v5988_v58, 1.0  ;;  %v8237_v51 = vclamps-f32 %v6630_v63, 1.0  ;;  %v4998_v2 = vmin.f32 %v4934_v27, 1.0  ;;  %v18042_v62 = vld [vmem:[#allocation137_spill] sm:$0xff]  ;;  %v18047_v10 = vld [vmem:[#allocation271_spill] sm:$0xff] }
 0x5ce   : > { %v7950_v53 = vclamps-f32 %v5348_v44, 1.0  ;;  %v8078_v25 = vclamps-f32 %v5989_v1, 1.0  ;;  %v8238_v16 = vclamps-f32 %v6631_v8, 1.0  ;;  %v4455_v32 = vadd.f32 %v4128_v12, %v18031_v55  ;;  %v18035_v12 = vld [vmem:[#allocation117_spill] sm:$0xff] }
 0x5cf   : > { %v4456_v48 = vadd.f32 %v4031_v24, %v18032_v59  ;;  %v4130_v9 = vsel %vm3871_vm3, %v4064_v46, 0.0  ;;  %v5061_v30 = vmul.f32 0.95, %v4997_v26  ;;  %v5062_v19 = vmul.f32 0.95, %v4998_v2  ;;  %v18037_v46 = vld [vmem:[#allocation363_spill] sm:$0xff] }
 0x5d0   : > { %v8376_v43 = vpack.c.bf16 %v7950_v53, %v7949_v28  ;;  %v8408_v20 = vpack.c.bf16 %v8078_v25, %v8077_v15  ;;  %v8440_v36 = vpack.c.bf16 %v8238_v16, %v8237_v51  ;;  %v8473_v0 = vpack.c.bf16 %v4998_v2, %v4997_v26  ;;  %v4746_v53 = vld [vmem:[%s15749_s5 + $0xe8] sm:$0xff] }
 0x5d1   : > { %v15412_v34 = vadd.f32 %v4032_v50, %v18033_v23  ;;  %v4583_v57 = vmul.f32 3.0, %v18034_v47  ;;  %v5285_v24 = vmul.f32 %v18035_v12, %v5061_v30  ;;  %v5926_v4 = vmul.f32 %v18036_v22, %v5061_v30 }
 0x5d2   : > { %5704 = vst [vmem:[%s13318_s10 + $0xd8] sm:$0xff] %v8376_v43  ;;  %8146 = vst [vmem:[%s13318_s10 + $0x1d8] sm:$0xff] %v8408_v20  ;;  %v6568_v60 = vmul.f32 %v18037_v46, %v5061_v30  ;;  %v15422_v18 = vadd.f32 %v4130_v9, %v18038_v21  ;;  %v5286_v39 = vmul.f32 %v18039_v33, %v5062_v19  ;;  %v4584_v41 = vmul.f32 3.0, %v18042_v62  ;;  %v18053_v21 = vld [vmem:[#allocation243_spill] sm:$0xff]  ;;  %v18054_v33 = vld [vmem:[#allocation290_spill] sm:$0xff] }
 0x5d3   : > { %8306 = vst [vmem:[%s13318_s10 + $0x2d8] sm:$0xff] %v8440_v36  ;;  %v5927_v50 = vmul.f32 %v18040_v35, %v5062_v19  ;;  %v6569_v13 = vmul.f32 %v18041_v29, %v5062_v19  ;;  %7213 = vst [vmem:[%s13269_s12 + $0xe0] sm:$0xff] %v8473_v0  ;;  %v18044_v58 = vunpack.c.l.bf16 %v18043_v45  ;;  %v18046_v63 = vunpack.c.l.bf16 %v18045_v17  ;;  %v18055_v35 = vld [vmem:[#allocation35_spill] sm:$0xff] }
 0x5d4   : > { %v18048_v44 = vunpack.c.l.bf16 %v18047_v10  ;;  %v4294_v1 = vsel %vm4264_vm6, %v15315_v14, %v15382_v56  ;;  %v18049_v8 = vunpack.c.h.bf16 %v18043_v45  ;;  %v18050_v28 = vunpack.c.h.bf16 %v18045_v17 }
 0x5d5   : > { %v5349_v5 = vadd.f32 %v5285_v24, %v18044_v58  ;;  %v5990_v31 = vadd.f32 %v5926_v4, %v18046_v63  ;;  %v18051_v51 = vunpack.c.h.bf16 %v18047_v10  ;;  %v4326_v25 = vsel %vm4264_vm6, %v15382_v56, %v15315_v14  ;;  %v4201_v56 = vpop.permute.xlu0 %4200  ;;  %v18052_v4 = vld [vmem:[#allocation34_spill] sm:$0xff] }
 0x5d6   : > { %v6632_v6 = vadd.f32 %v6568_v60, %v18048_v44  ;;  %v5350_v49 = vadd.f32 %v5286_v39, %v18049_v8  ;;  %v5991_v15 = vadd.f32 %v5927_v50, %v18050_v28  ;;  %v4392_v55 = vsel %vm4135_vm5, %v4326_v25, 0.0  ;;  %v4000_v60 = vpop.permute.xlu1 %3999  ;;  %v15490_v44 = vld [vmem:[%s15749_s5 + $0xf0] sm:$0xff]  ;;  %v18058_v25 = vld [vmem:[#allocation143_spill] sm:$0xff] }
 0x5d7   : > { %v6633_v27 = vadd.f32 %v6569_v13, %v18051_v51  ;;  %v7951_v16 = vclamps-f32 %v5349_v5, 1.0  ;;  %v8079_v26 = vclamps-f32 %v5990_v31, 1.0  ;;  %v4519_v20 = vadd.f32 %v4455_v32, %v4294_v1  ;;  %v4717_v32 = vld [vmem:[%s15749_s5] sm:$0xff] }
 0x5d8   : > { %v8239_v2 = vclamps-f32 %v6632_v6, 1.0  ;;  %v7952_v59 = vclamps-f32 %v5350_v49, 1.0  ;;  %v8080_v9 = vclamps-f32 %v5991_v15, 1.0  ;;  %v4807_v36 = vunpack.c.l.bf16 %v4746_v53  ;;  %v18056_v49 = vld [vmem:[#allocation277_spill] sm:$0xff] }
 0x5d9   : > { %v8240_v43 = vclamps-f32 %v6633_v27, 1.0  ;;  %v4520_v30 = vadd.f32 %v4456_v48, %v4392_v55  ;;  %v4002_v19 = vsel %vm4001_vm4, %v15372_v61, %v3938_v11  ;;  %v4034_v14 = vsel %vm4001_vm4, %v3938_v11, %v15372_v61  ;;  %v18057_v27 = vld [vmem:[#allocation142_spill] sm:$0xff] }
 0x5da   : > { %v8377_v0 = vpack.c.bf16 %v7952_v59, %v7951_v16  ;;  %v8409_v23 = vpack.c.bf16 %v8080_v9, %v8079_v26  ;;  %v4647_v12 = vmul.f32 0.33333334, %v4519_v20  ;;  %v4808_v24 = vunpack.c.h.bf16 %v4746_v53 }
 0x5db   : > { %v8441_v47 = vpack.c.bf16 %v8240_v43, %v8239_v2  ;;  %v4648_v48 = vmul.f32 0.33333334, %v4520_v30  ;;  %v4070_v22 = vsel %vm3871_vm3, %v4034_v14, 0.0  ;;  %v4525_v46 = vmul.f32 3.0, %v18052_v4 }
 0x5dc   : > { %5705 = vst [vmem:[%s13318_s10 + $0xe0] sm:$0xff] %v8377_v0  ;;  %8147 = vst [vmem:[%s13318_s10 + $0x1e0] sm:$0xff] %v8409_v23  ;;  %v4711_v61 = vsub.f32 %v4583_v57, %v4647_v12  ;;  %v4397_v11 = vadd.f32 %v4070_v22, %v18053_v21  ;;  %v4398_v39 = vadd.f32 %v4002_v19, %v18054_v33  ;;  %v4526_v50 = vmul.f32 3.0, %v18055_v35  ;;  %v18059_v12 = vld [vmem:[#allocation124_spill] sm:$0xff] }
 0x5dd   : > { %8307 = vst [vmem:[%s13318_s10 + $0x2e0] sm:$0xff] %v8441_v47  ;;  %v4712_v29 = vsub.f32 %v4584_v41, %v4648_v48  ;;  %v4749_v13 = vunpack.c.l.bf16 %v4717_v32  ;;  %v4265_v62 = vsel %vm4264_vm6, %v15403_v54, %v4201_v56  ;;  %v4297_v45 = vsel %vm4264_vm6, %v4201_v56, %v15403_v54  ;;  %v4261_v54 = vpop.permute.xlu0 %4260  ;;  %v18061_v22 = vld [vmem:[#allocation52_spill] sm:$0xff] }
 0x5de   : > { %v4871_v58 = vsub.f32 %v4807_v36, %v4711_v61  ;;  %v4334_v57 = vsel %vm4135_vm5, %v4297_v45, 0.0  ;;  %v4461_v5 = vadd.f32 %v4397_v11, %v4265_v62  ;;  %v4065_v17 = vsel %vm4001_vm4, %v4000_v60, %v15405_v38  ;;  %v18063_v61 = vld [vmem:[#allocation129_spill] sm:$0xff]  ;;  %v18064_v33 = vld [vmem:[#allocation188_spill] sm:$0xff] }
 0x5df   : > { %v4872_v63 = vsub.f32 %v4808_v24, %v4712_v29  ;;  %v4750_v41 = vunpack.c.h.bf16 %v4717_v32  ;;  %v4462_v31 = vadd.f32 %v4398_v39, %v4334_v57  ;;  %v4132_v10 = vsel %vm3871_vm3, %v4065_v17, 0.0  ;;  %v18060_v24 = vld [vmem:[#allocation128_spill] sm:$0xff] }
 0x5e0   : > { %v4935_v6 = vmax.f32 %v4871_v58, 0.0  ;;  %v4589_v1 = vmul.f32 0.33333334, %v4461_v5  ;;  %v15495_v8 = vsel %vm4001_vm4, %v15405_v38, %v4000_v60  ;;  %v15498_v28 = vadd.f32 %v4132_v10, %v18056_v49 }
 0x5e1   : > { %v4936_v15 = vmax.f32 %v4872_v63, 0.0  ;;  %v4590_v51 = vmul.f32 0.33333334, %v4462_v31  ;;  %v15501_v53 = vmul.f32 3.0, %v18057_v27  ;;  %v15504_v16 = vmul.f32 3.0, %v18058_v25  ;;  %v18072_v27 = vld [vmem:[#allocation193_spill] sm:$0xff] }
 0x5e2   : > { %v4999_v26 = vmin.f32 %v4935_v6, 1.0  ;;  %v4653_v2 = vsub.f32 %v4525_v46, %v4589_v1  ;;  %v4809_v55 = vunpack.c.l.bf16 %v15490_v44  ;;  %v4295_v38 = vsel %vm4264_vm6, %v15307_v7, %v4261_v54  ;;  %v18062_v46 = vld [vmem:[#allocation125_spill] sm:$0xff] }
 0x5e3   : > { %v5000_v59 = vmin.f32 %v4936_v15, 1.0  ;;  %v4654_v9 = vsub.f32 %v4526_v50, %v4590_v51  ;;  %v4810_v43 = vunpack.c.h.bf16 %v15490_v44  ;;  %v4327_v20 = vsel %vm4264_vm6, %v4261_v54, %v15307_v7  ;;  %v18066_v50 = vld [vmem:[#allocation29_spill] sm:$0xff] }
 0x5e4   : > { %v5063_v36 = vmul.f32 0.95, %v4999_v26  ;;  %v4813_v30 = vsub.f32 %v4749_v13, %v4653_v2  ;;  %v4394_v19 = vsel %vm4135_vm5, %v4327_v20, 0.0  ;;  %v4521_v14 = vadd.f32 %v15422_v18, %v4295_v38  ;;  %v18074_v38 = vld [vmem:[#allocation274_spill] sm:$0xff] }
 0x5e5   : > { %v5064_v56 = vmul.f32 0.95, %v5000_v59  ;;  %v8474_v0 = vpack.c.bf16 %v5000_v59, %v4999_v26  ;;  %v4814_v23 = vsub.f32 %v4750_v41, %v4654_v9  ;;  %v4522_v47 = vadd.f32 %v15412_v34, %v4394_v19  ;;  %v18073_v26 = vld [vmem:[#allocation39_spill] sm:$0xff] }
 0x5e6   : > { %v5287_v32 = vmul.f32 %v18059_v12, %v5063_v36  ;;  %v5928_v48 = vmul.f32 %v18060_v24, %v5063_v36  ;;  %v6570_v4 = vmul.f32 %v18061_v22, %v5063_v36  ;;  %v4877_v7 = vmax.f32 %v4813_v30, 0.0  ;;  %v18075_v30 = vld [vmem:[#allocation195_spill] sm:$0xff]  ;;  %v18078_v12 = vld [vmem:[#allocation40_spill] sm:$0xff] }
 0x5e7   : > { %v5288_v60 = vmul.f32 %v18062_v46, %v5064_v56  ;;  %v5929_v21 = vmul.f32 %v18063_v61, %v5064_v56  ;;  %v6571_v11 = vmul.f32 %v15339_v42, %v5064_v56  ;;  %7214 = vst [vmem:[%s13269_s12 + $0xe8] sm:$0xff] %v8474_v0  ;;  %v4878_v18 = vmax.f32 %v4814_v23, 0.0  ;;  %v18076_v56 = vld [vmem:[#allocation146_spill] sm:$0xff]  ;;  %v18079_v24 = vld [vmem:[#allocation163_spill] sm:$0xff]  ;;  %v18083_v61 = vld [vmem:[#allocation241_spill] sm:$0xff] }
 0x5e8   : > { %v18065_v39 = vunpack.c.l.bf16 %v18064_v33  ;;  %v18067_v34 = vunpack.c.l.bf16 %v18066_v50  ;;  %v18068_v13 = vunpack.c.l.bf16 %v17819_v40  ;;  %v4941_v45 = vmin.f32 %v4877_v7, 1.0 }
 0x5e9   : > { %v18069_v58 = vunpack.c.h.bf16 %v18064_v33  ;;  %v18070_v5 = vunpack.c.h.bf16 %v18066_v50  ;;  %v18071_v42 = vunpack.c.h.bf16 %v17819_v40  ;;  %v4942_v41 = vmin.f32 %v4878_v18, 1.0 }
 0x5ea   : > { %v5351_v35 = vadd.f32 %v5287_v32, %v18065_v39  ;;  %v5992_v29 = vadd.f32 %v5928_v48, %v18067_v34  ;;  %v6634_v62 = vadd.f32 %v6570_v4, %v18068_v13  ;;  %v5005_v6 = vmul.f32 0.95, %v4941_v45  ;;  %v18081_v4 = vld [vmem:[#allocation275_spill] sm:$0xff] }
 0x5eb   : > { %v5352_v57 = vadd.f32 %v5288_v60, %v18069_v58  ;;  %v5993_v17 = vadd.f32 %v5929_v21, %v18070_v5  ;;  %v6635_v63 = vadd.f32 %v6571_v11, %v18071_v42  ;;  %v5006_v51 = vmul.f32 0.95, %v4942_v41  ;;  %v4263_v5 = vpop.permute.xlu1 %4262  ;;  %v18089_v42 = vld [vmem:[#allocation138_spill] sm:$0xff] }
 0x5ec   : > { %v7953_v31 = vclamps-f32 %v5351_v35, 1.0  ;;  %v8081_v10 = vclamps-f32 %v5992_v29, 1.0  ;;  %v8241_v54 = vclamps-f32 %v6634_v62, 1.0  ;;  %v5229_v25 = vmul.f32 %v18072_v27, %v5005_v6 }
 0x5ed   : > { %v7954_v1 = vclamps-f32 %v5352_v57, 1.0  ;;  %v8082_v49 = vclamps-f32 %v5993_v17, 1.0  ;;  %v8242_v15 = vclamps-f32 %v6635_v63, 1.0  ;;  %v5870_v2 = vmul.f32 %v18073_v26, %v5005_v6  ;;  %v18087_v17 = vld [vmem:[#allocation31_spill] sm:$0xff] }
 0x5ee   : > { %v6512_v40 = vmul.f32 %v18074_v38, %v5005_v6  ;;  %v8445_v59 = vpack.c.bf16 %v4942_v41, %v4941_v45  ;;  %v5230_v19 = vmul.f32 %v18075_v30, %v5006_v51  ;;  %v18077_v0 = vunpack.c.l.bf16 %v18076_v56 }
 0x5ef   : > { %v8378_v9 = vpack.c.bf16 %v7954_v1, %v7953_v31  ;;  %v8410_v20 = vpack.c.bf16 %v8082_v49, %v8081_v10  ;;  %v8442_v36 = vpack.c.bf16 %v8242_v15, %v8241_v54  ;;  %v5871_v32 = vmul.f32 %v18078_v12, %v5006_v51  ;;  %v18092_v31 = vld [vmem:[#allocation139_spill] sm:$0xff]  ;;  %v8181_v49 = vld [vmem:[%s10302_s22 + $0x2f0] sm:$0xff] }
 0x5f0   : > { %v5293_v23 = vadd.f32 %v5229_v25, %v18077_v0  ;;  %v18080_v48 = vunpack.c.l.bf16 %v18079_v24  ;;  %v6513_v7 = vmul.f32 %v18081_v4, %v5006_v51  ;;  %7185 = vst [vmem:[%s13269_s12] sm:$0xff] %v8445_v59  ;;  %v18082_v46 = vunpack.c.h.bf16 %v18076_v56  ;;  %v15571_v15 = vld [vmem:[%s10302_s22 + $0x2f8] sm:$0xff]  ;;  %v18094_v51 = vld [vmem:[#allocation202_spill] sm:$0xff]  ;;  %s8968_s22 = sshll.u32 %s9081_s21, 4  ;;  %s8969_s22 = int_to_ptr.vmem [resolvable:$false] %s8968_s22 }
 0x5f1   : > { %5706 = vst [vmem:[%s13318_s10 + $0xe8] sm:$0xff] %v8378_v9  ;;  %8148 = vst [vmem:[%s13318_s10 + $0x1e8] sm:$0xff] %v8410_v20  ;;  %v18084_v21 = vunpack.c.l.bf16 %v18083_v61  ;;  %v4649_v18 = vmul.f32 0.33333334, %v4521_v14  ;;  %v4650_v33 = vmul.f32 0.33333334, %v4522_v47  ;;  %v18085_v35 = vunpack.c.h.bf16 %v18079_v24  ;;  %p8971_p1 = scmp.lt.s32.totalorder %s15628_s19, %s8969_s22 }
 0x5f2   : > { %v5934_v22 = vadd.f32 %v5870_v2, %v18080_v48  ;;  %8308 = vst [vmem:[%s13318_s10 + $0x2e8] sm:$0xff] %v8442_v36  ;;  %v5294_v60 = vadd.f32 %v5230_v19, %v18082_v46  ;;  %v7895_v39 = vclamps-f32 %v5293_v23, 1.0  ;;  %v18086_v29 = vunpack.c.h.bf16 %v18083_v61  ;;  %v18095_v19 = vld [vmem:[#allocation144_spill] sm:$0xff]  ;;  %v18096_v23 = vld [vmem:[#allocation145_spill] sm:$0xff]  ;;  %v18099_v61 = vld [vmem:[#allocation367_spill] sm:$0xff]  ;;  %s8970_s23 = scalar_lea.vmem %s8969_s22, 8192 }
 0x5f3   : > { %v6576_v11 = vadd.f32 %v6512_v40, %v18084_v21  ;;  %v5935_v50 = vadd.f32 %v5871_v32, %v18085_v35  ;;  %v4713_v58 = vsub.f32 %v15501_v53, %v4649_v18  ;;  %v4714_v57 = vsub.f32 %v15504_v16, %v4650_v33  ;;  %p8972_p2 = scmp.lt.s32.totalorder %s8970_s23, %s8964_s17 }
 0x5f4   : > { %v8023_v34 = vclamps-f32 %v5934_v22, 1.0  ;;  %v6577_v13 = vadd.f32 %v6513_v7, %v18086_v29  ;;  %v7896_v62 = vclamps-f32 %v5294_v60, 1.0  ;;  %v18088_v14 = vunpack.c.l.bf16 %v18087_v17  ;;  %v18097_v7 = vld [vmem:[#allocation366_spill] sm:$0xff] }
 0x5f5   : > { %v8183_v45 = vclamps-f32 %v6576_v11, 1.0  ;;  %v18090_v47 = vclamps-f32 %v18089_v42, 1.0  ;;  %v18091_v41 = vunpack.c.h.bf16 %v18087_v17  ;;  %v18093_v10 = vclamps-f32 %v18092_v31, 1.0  ;;  %p8973_p3 = por %p8972_p2, %p8971_p1 }
 0x5f6   : > { %v8024_v6 = vclamps-f32 %v5935_v50, 1.0  ;;  %v8184_v1 = vclamps-f32 %v6577_v13, 1.0  ;;  %v8349_v53 = vpack.c.bf16 %v7896_v62, %v7895_v39  ;;  %v4460_v16 = vadd.f32 %v15495_v8, %v18094_v51  ;;  %v18101_v39 = vld [vmem:[#allocation71_spill] sm:$0xff]  ;;  %v18102_v50 = vld [vmem:[#allocation73_spill] sm:$0xff] }
 0x5f7   : > { %v5866_v63 = vsub.f32 %v18090_v47, %v18088_v14  ;;  %v5867_v54 = vsub.f32 %v18093_v10, %v18091_v41  ;;  %v4873_v27 = vsub.f32 %v4809_v55, %v4713_v58  ;;  %v4874_v25 = vsub.f32 %v4810_v43, %v4714_v57  ;;  %v4748_v55 = vld [vmem:[%s15749_s5 + $0xf8] sm:$0xff]  ;;  %p8974_p5 = pnand %p8973_p3, %p8967_p0 }
 0x5f8   : > { %v8381_v26 = vpack.c.bf16 %v8024_v6, %v8023_v34  ;;  %v8413_v2 = vpack.c.bf16 %v8184_v1, %v8183_v45  ;;  %v4296_v38 = vsel %vm4264_vm6, %v15439_v37, %v4263_v5  ;;  %v4328_v40 = vsel %vm4264_vm6, %v4263_v5, %v15439_v37  ;;  %5677 = vst [vmem:[%s13318_s10] sm:$0xff] %v8349_v53  ;;  %v18103_v5 = vld [vmem:[#allocation190_spill] sm:$0xff] }
 0x5f9   : > { %v4937_v8 = vmax.f32 %v4873_v27, 0.0  ;;  %v4938_v59 = vmax.f32 %v4874_v25, 0.0  ;;  %v4396_v44 = vsel %vm4135_vm5, %v4328_v40, 0.0  ;;  %v4523_v43 = vadd.f32 %v15498_v28, %v4296_v38 }
 0x5fa   : > { %v6444_v9 = vunpack.c.l.bf16 %v8181_v49  ;;  %v6445_v20 = vunpack.c.h.bf16 %v8181_v49  ;;  %v6446_v36 = vunpack.c.l.bf16 %v15571_v15  ;;  %8119 = vst [vmem:[%s13318_s10 + $0x100] sm:$0xff] %v8381_v26  ;;  %8279 = vst [vmem:[%s13318_s10 + $0x200] sm:$0xff] %v8413_v2  ;;  %v4524_v3 = vadd.f32 %v4460_v16, %v4396_v44 }
 0x5fb   : > { %v5001_v37 = vmin.f32 %v4937_v8, 1.0  ;;  %v5002_v30 = vmin.f32 %v4938_v59, 1.0  ;;  %v4587_v56 = vmul.f32 3.0, %v18095_v19  ;;  %v4651_v0 = vmul.f32 0.33333334, %v4523_v43  ;;  %v18108_v8 = vld [vmem:[#allocation37_spill] sm:$0xff] }
 0x5fc   : > { %v4588_v12 = vmul.f32 3.0, %v18096_v23  ;;  %v4811_v32 = vunpack.c.l.bf16 %v4748_v55  ;;  %v4812_v52 = vunpack.c.h.bf16 %v4748_v55  ;;  %v4652_v24 = vmul.f32 0.33333334, %v4524_v3  ;;  %v18110_v59 = vld [vmem:[#allocation140_spill] sm:$0xff] }
 0x5fd   : > { %v5065_v48 = vmul.f32 0.95, %v5001_v37  ;;  %v5066_v28 = vmul.f32 0.95, %v5002_v30  ;;  %v8475_v22 = vpack.c.bf16 %v5002_v30, %v5001_v37  ;;  %v4715_v4 = vsub.f32 %v4587_v56, %v4651_v0 }
 0x5fe   : > { %v18098_v46 = vclamps-f32 %v18097_v7, 1.0  ;;  %v18100_v21 = vclamps-f32 %v18099_v61, 1.0  ;;  %v6447_v18 = vunpack.c.h.bf16 %v15571_v15  ;;  %v4716_v33 = vsub.f32 %v4588_v12, %v4652_v24  ;;  %v18115_v12 = vld [vmem:[#allocation368_spill] sm:$0xff]  ;;  %v18117_v24 = vld [vmem:[#allocation369_spill] sm:$0xff]  ;;  %v18120_v7 = vld [vmem:[#allocation134_spill] sm:$0xff] }
 0x5ff   : > { %v5289_v35 = vmul.f32 %v18101_v39, %v5065_v48  ;;  %v5290_v34 = vmul.f32 %v18102_v50, %v5066_v28  ;;  %v5930_v29 = vmul.f32 %v5866_v63, %v5065_v48  ;;  %v5931_v13 = vmul.f32 %v5867_v54, %v5066_v28  ;;  %7215 = vst [vmem:[%s13269_s12 + $0xf0] sm:$0xff] %v8475_v22  ;;  %v18119_v22 = vld [vmem:[#allocation75_spill] sm:$0xff] }
 0x600   : > { %v6508_v60 = vsub.f32 %v18098_v46, %v6444_v9  ;;  %v6509_v11 = vsub.f32 %v18100_v21, %v6445_v20  ;;  %v4875_v58 = vsub.f32 %v4811_v32, %v4715_v4  ;;  %v4876_v57 = vsub.f32 %v4812_v52, %v4716_v33 }
 0x601   : > { %v18104_v14 = vunpack.c.l.bf16 %v18103_v5  ;;  %v18105_v47 = vunpack.c.h.bf16 %v18103_v5  ;;  %v18106_v31 = vunpack.c.l.bf16 %v18087_v17  ;;  %v18107_v6 = vunpack.c.h.bf16 %v18087_v17 }
 0x602   : > { %v6572_v62 = vmul.f32 %v6508_v60, %v5065_v48  ;;  %v6573_v45 = vmul.f32 %v6509_v11, %v5066_v28  ;;  %v4939_v49 = vmax.f32 %v4875_v58, 0.0  ;;  %v4940_v53 = vmax.f32 %v4876_v57, 0.0 }
 0x603   : > { %v5353_v42 = vadd.f32 %v5289_v35, %v18104_v14  ;;  %v5354_v41 = vadd.f32 %v5290_v34, %v18105_v47  ;;  %v5994_v10 = vadd.f32 %v5930_v29, %v18106_v31  ;;  %v5995_v63 = vadd.f32 %v5931_v13, %v18107_v6 }
 0x604   : > { %v6636_v54 = vadd.f32 %v6572_v62, %v6444_v9  ;;  %v6637_v1 = vadd.f32 %v6573_v45, %v6445_v20  ;;  %v5003_v38 = vmin.f32 %v4939_v49, 1.0  ;;  %v5004_v40 = vmin.f32 %v4940_v53, 1.0  ;;  %v18113_v9 = vld [vmem:[#allocation141_spill] sm:$0xff] }
 0x605   : > { %v7955_v51 = vclamps-f32 %v5353_v42, 1.0  ;;  %v7956_v16 = vclamps-f32 %v5354_v41, 1.0  ;;  %v8083_v27 = vclamps-f32 %v5994_v10, 1.0  ;;  %v8084_v25 = vclamps-f32 %v5995_v63, 1.0 }
 0x606   : > { %v8243_v26 = vclamps-f32 %v6636_v54, 1.0  ;;  %v8244_v2 = vclamps-f32 %v6637_v1, 1.0  ;;  %v18109_v17 = vunpack.c.l.bf16 %v18108_v8  ;;  %v18111_v55 = vclamps-f32 %v18110_v59, 1.0 }
 0x607   : > { %v18112_v43 = vunpack.c.h.bf16 %v18108_v8  ;;  %v18114_v20 = vclamps-f32 %v18113_v9, 1.0  ;;  %v8379_v37 = vpack.c.bf16 %v7956_v16, %v7955_v51  ;;  %v8411_v30 = vpack.c.bf16 %v8084_v25, %v8083_v27 }
 0x608   : > { %v5868_v44 = vsub.f32 %v18111_v55, %v18109_v17  ;;  %v8443_v19 = vpack.c.bf16 %v8244_v2, %v8243_v26  ;;  %v5067_v56 = vmul.f32 0.95, %v5003_v38  ;;  %v5068_v0 = vmul.f32 0.95, %v5004_v40 }
 0x609   : > { %v5869_v3 = vsub.f32 %v18114_v20, %v18112_v43  ;;  %v8476_v23 = vpack.c.bf16 %v5004_v40, %v5003_v38  ;;  %v18116_v32 = vclamps-f32 %v18115_v12, 1.0  ;;  %v18118_v48 = vclamps-f32 %v18117_v24, 1.0  ;;  %5707 = vst [vmem:[%s13318_s10 + $0xf0] sm:$0xff] %v8379_v37  ;;  %8149 = vst [vmem:[%s13318_s10 + $0x1f0] sm:$0xff] %v8411_v30 }
 0x60a   : > { %8309 = vst [vmem:[%s13318_s10 + $0x2f0] sm:$0xff] %v8443_v19  ;;  %v5291_v4 = vmul.f32 %v18119_v22, %v5067_v56  ;;  %v5292_v46 = vmul.f32 %v18120_v7, %v5068_v0  ;;  %v5932_v60 = vmul.f32 %v5868_v44, %v5067_v56 }
 0x60b   : > { %v6510_v52 = vsub.f32 %v18116_v32, %v6446_v36  ;;  %v6511_v28 = vsub.f32 %v18118_v48, %v6447_v18  ;;  %v5933_v61 = vmul.f32 %v5869_v3, %v5068_v0  ;;  %7216 = vst [vmem:[%s13269_s12 + $0xf8] sm:$0xff] %v8476_v23 }
 0x60d   : > { %v6574_v21 = vmul.f32 %v6510_v52, %v5067_v56  ;;  %v6575_v11 = vmul.f32 %v6511_v28, %v5068_v0 }
 0x60e   : > { %8977 = shalt.err (!%p8974_p5)
}
 0x60f   : > { %s8978_s12 = scalar_lea.hbm %s15626_s18, 4096  ;;  %s8982_s15 = scalar_lea.hbm %s15751_s7, 8192 }
 0x610   : > { %p8979_p6 = scmp.ne.s32.totalorder %s15626_s18, %s8978_s12  ;;  %p8983_p10 = scmp.lt.u32.totalorder %s15626_s18, %s15751_s7 }
 0x611   : > { %p8984_p11 = scmp.lt.u32.totalorder %s8982_s15, %s8978_s12  ;;  %p8986_p13 = scmp.lt.u32.totalorder %s8978_s12, %s15626_s18 }
 0x612   : > { %p8980_p7 = pnand %p8979_p6, %p9165_p4 }
 0x613   : > { %p8985_p12 = por %p8984_p11, %p8983_p10 }
 0x614   : > { %p8981_p9 = pneg %p8980_p7 }
 0x615   : > { %p8987_p0 = por %p8986_p13, %p8985_p12 }
 0x617   : > { %p8988_p1 = pnand %p8987_p0, %p8981_p9 }
 0x619   : > { %8991 = shalt.err (!%p8988_p1)
}
 0x61a   : > { %s9082_s17 = smov 128   ;;  %s9083_s23 = smov 8   ;;  %v18121_v33 = vld [vmem:[#allocation192_spill] sm:$0xff]  ;;  %v18124_v29 = vmov %v18109_v17  ;;  %v18125_v62 = vmov %v18112_v43  ;;  %v6638_v58 = vadd.f32 %v6574_v21, %v6446_v36  ;;  %v6639_v57 = vadd.f32 %v6575_v11, %v6447_v18 }
 0x61b   : > { %8786 = dma.vmem_to_hbm [thread:$0]  (%p9165_p4), %s15628_s19, 4096, %s15626_s18, %s7223_s30, %s9082_s17, %s9082_s17, %s9083_s23   ;;  %v18122_v39 = vunpack.c.l.bf16 %v18121_v33  ;;  %v18123_v50 = vunpack.c.h.bf16 %v18121_v33  ;;  %v5996_v13 = vadd.f32 %v5932_v60, %v18124_v29  ;;  %v5997_v45 = vadd.f32 %v5933_v61, %v18125_v62 }
 0x61c   : > { %s8784_s19 = smul.u32 12288, %s9066_s27  ;;  %s7239_s18 = sshll.u32 %s13318_s10, 4  ;;  %v8245_v41 = vclamps-f32 %v6638_v58, 1.0  ;;  %v8246_v31 = vclamps-f32 %v6639_v57, 1.0  ;;  %s15690_s18 = int_to_ptr.vmem [resolvable:$true] %s7239_s18 }
 0x61d   : > { %v5355_v35 = vadd.f32 %v5291_v4, %v18122_v39  ;;  %v5356_v34 = vadd.f32 %v5292_v46, %v18123_v50  ;;  %v8085_v42 = vclamps-f32 %v5996_v13, 1.0  ;;  %v8086_v47 = vclamps-f32 %v5997_v45, 1.0  ;;  %s7218_s27 = scalar_lea.sflag [#allocation3], %s13190_s16  ;;  %s8992_s20 = scalar_lea.vmem %s15690_s18, 12288 }
 0x61e   : > { %v8444_v63 = vpack.c.bf16 %v8246_v31, %v8245_v41  ;;  %s15688_s8 = scalar_lea.hbm %s15750_s6, %s8784_s19  ;;  %p8993_p2 = scmp.ne.s32.totalorder %s15690_s18, %s8992_s20 }
 0x61f   : > { %v7957_v5 = vclamps-f32 %v5355_v35, 1.0  ;;  %v7958_v14 = vclamps-f32 %v5356_v34, 1.0  ;;  %v8412_v6 = vpack.c.bf16 %v8086_v47, %v8085_v42  ;;  %s9084_s15 = smov [#allocation2]  }
 0x620   : > { %8310 = vst [vmem:[%s13318_s10 + $0x2f8] sm:$0xff] %v8444_v63  ;;  %p8994_p3 = pnand %p8993_p2, %p9165_p4  ;;  %s8996_s21 = sshll.u32 %s9084_s15, 4  ;;  %s8997_s21 = int_to_ptr.vmem [resolvable:$false] %s8996_s21 }
 0x621   : > { %v8380_v10 = vpack.c.bf16 %v7958_v14, %v7957_v5  ;;  %8150 = vst [vmem:[%s13318_s10 + $0x1f8] sm:$0xff] %v8412_v6  ;;  %s8998_s22 = scalar_lea.vmem %s8997_s21, 24576  ;;  %p8999_p6 = scmp.lt.s32.totalorder %s15690_s18, %s8997_s21 }
 0x622   : > { %p8995_p5 = pneg %p8994_p3  ;;  %p9000_p7 = scmp.lt.s32.totalorder %s8998_s22, %s8992_s20 }
 0x623   : > { %5708 = vst [vmem:[%s13318_s10 + $0xf8] sm:$0xff] %v8380_v10 }
 0x624   : > { %p9001_p9 = por %p9000_p7, %p8999_p6 }
 0x626   : > { %p9002_p10 = pnand %p9001_p9, %p8995_p5 }
 0x628   : > { %9005 = shalt.err (!%p9002_p10)
}
 0x629   : > { %s9006_s10 = scalar_lea.hbm %s15688_s8, 12288  ;;  %s9010_s12 = scalar_lea.hbm %s15750_s6, 24576 }
 0x62a   : > { %p9007_p11 = scmp.ne.s32.totalorder %s15688_s8, %s9006_s10  ;;  %p9011_p0 = scmp.lt.u32.totalorder %s15688_s8, %s15750_s6 }
 0x62b   : > { %p9012_p1 = scmp.lt.u32.totalorder %s9010_s12, %s9006_s10  ;;  %p9014_p3 = scmp.lt.u32.totalorder %s9006_s10, %s15688_s8 }
 0x62c   : > { %p9008_p12 = pnand %p9007_p11, %p9165_p4 }
 0x62d   : > { %p9013_p2 = por %p9012_p1, %p9011_p0 }
 0x62e   : > { %p9009_p13 = pneg %p9008_p12 }
 0x62f   : > { %p9015_p5 = por %p9014_p3, %p9013_p2 }
 0x631   : > { %p9016_p6 = pnand %p9015_p5, %p9009_p13 }
 0x633   : > { %9019 = shalt.err (!%p9016_p6)
}
 0x634   : > { %8785 = dma.vmem_to_hbm [thread:$0]  (%p9165_p4), %s15690_s18, 12288, %s15688_s8, %s7218_s27, %s9082_s17, %s9082_s17, %s9083_s23  }
 0x635 PF: > { %p8796_p7 = scmp.ge.s32.totalorder %s9074_s29, 2  ;;  %s7273_s20 = sand.u32 1, %s9054_s24  }
 0x636   : > { %s7274_s22 = scalar_lea.sflag [#allocation3], %s7273_s20 }
 0x637   : > { %p8790_p9 = pnand %p8796_p7, %p9172_p8 }
 0x639   : > { %9045 = dma.done.wait (!%p8790_p9), %s7274_s22, 12288  }
 0x63a   : > { %9047 = vsyncadd (!%p8790_p9), %s7274_s22, 4294955008  ;;  %s7283_s11 = scalar_lea.sflag [#allocation5], %s7273_s20 }
 0x63b   : > { %9049 = dma.done.wait (!%p8790_p9), %s7283_s11, 4096  }
 0x63c   : > { %9051 = vsyncadd (!%p8790_p9), %s7283_s11, 4294963200  ;;  %s24_s29 = sadd.s32 1, %s9074_s29   ;;  %s18126_s24 = smov %s9058_s25 }
 0x63d   : > { %p21_p10 = scmp.ge.s32.totalorder %s24_s29, 4   ;;  %s18127_s25 = smov %s9062_s26 }
 0x63e   : > { %s18128_s26 = smov %s9178_s14  ;;  %s18129_s27 = smov %s9070_s28 }
 0x63f   : > { %s18130_s28 = smov %s18132_s9  ;;  %23 = sbr.rel (!%p21_p10) target bundleno = 6 (0x6), region = 112 }
 0x646   :  { %7288 = vsyncpa [#allocation3], 1 }
 0x647   :  { %7290 = vsyncpa [#allocation3 + $0x1], 1 }
 0x648   :  { %7291 = vsyncpa [#allocation5], 1 }
 0x649   :  { %7293 = vsyncpa [#allocation5 + $0x1], 1 }

</bundles_post_ra>
